<compile_context>
chip_gen: v6e
topology: v6e:2x2x1
jax: 0.10.0
libtpu: 0.0.40
codegen_flags: <defaults>
</compile_context>

<pallas_src>
import functools

import jax
import jax.numpy as jnp
from jax.experimental import pallas as pl
from jax.experimental.pallas import tpu as pltpu


MXU_DTYPE = jnp.bfloat16   # MXU input dtype; accumulation stays float32
LANE = 128                 # TPU lane width


def _round_up(n, m):
    return ((n + m - 1) // m) * m


def _pad_lanes(a, n_pad):
    n = a.shape[-1]
    if n == n_pad:
        return a
    return jnp.pad(a, [(0, 0)] * (a.ndim - 1) + [(0, n_pad - n)])


def _conv_batch_tile(batch):
    """Images per conv grid step: divides batch exactly, keeps grid >= 2."""
    for tb in (4, 2):
        if batch % tb == 0 and batch // tb >= 2:
            return tb
    return 1


# ----------------------------------------------------------------------------
# Pallas kernel 1: per-batch-tile stride-1 conv + ReLU, weight resident in
# VMEM, im2col done in-kernel (contiguous slices + lane concat, never in HBM).
# ----------------------------------------------------------------------------
def _conv_kernel(x_ref, w_ref, b_ref, o_ref, *, kk, oh, ow, tb):
    # x_ref: (tb, Hs, Ws, C)   w_ref: (kk*kk*C, O)   b_ref: (1, O)
    # o_ref: (tb, OH, OW, O)
    w = w_ref[...]                                   # hoisted: one VMEM load
    bias = b_ref[...]
    for bi in range(tb):
        for h in range(oh):
            taps = []
            for a in range(kk):                      # tap order (a, b) matches
                for b in range(kk):                  # the packed weight rows
                    taps.append(x_ref[bi, h + a, b:b + ow, :])   # (OW, C)
            patch = jnp.concatenate(taps, axis=-1)   # (OW, kk*kk*C) in VMEM
            acc = jnp.dot(patch, w, preferred_element_type=jnp.float32)
            acc = jnp.maximum(acc + bias, 0.0)
            o_ref[bi, h] = acc.astype(o_ref.dtype)


def conv2d_relu_pallas(x, w_mat, b_row, *, kk, oh, ow):
    """Valid-padding stride-1 conv + ReLU: (B, Hs, Ws, C) -> (B, OH, OW, O)."""
    B, Hs, Ws, C = x.shape
    K, O = w_mat.shape
    assert K == kk * kk * C
    assert Hs >= oh + kk - 1 and Ws >= ow + kk - 1
    tb = _conv_batch_tile(B)
    kernel = functools.partial(_conv_kernel, kk=kk, oh=oh, ow=ow, tb=tb)
    flops = 2 * B * oh * ow * K * O
    bytes_accessed = (x.size * x.dtype.itemsize + w_mat.size * 2
                      + b_row.size * 4 + B * oh * ow * O * 2)
    return pl.pallas_call(
        kernel,
        out_shape=jax.ShapeDtypeStruct((B, oh, ow, O), MXU_DTYPE),
        grid=(B // tb,),
        in_specs=[
            pl.BlockSpec((tb, Hs, Ws, C), lambda i: (i, 0, 0, 0)),
            pl.BlockSpec((K, O), lambda i: (0, 0)),     # weight resident in VMEM
            pl.BlockSpec((1, O), lambda i: (0, 0)),     # bias resident in VMEM
        ],
        out_specs=pl.BlockSpec((tb, oh, ow, O), lambda i: (i, 0, 0, 0)),
        compiler_params=pltpu.CompilerParams(
            dimension_semantics=("parallel",)),
        cost_estimate=pl.CostEstimate(flops=flops, transcendentals=0,
                                      bytes_accessed=bytes_accessed),
    )(x, w_mat, b_row)


# ----------------------------------------------------------------------------
# Pallas kernel 2: fused MLP head  q = (relu(x @ w1 + b1)) @ w2 + b2
# ----------------------------------------------------------------------------
def _mlp_head_kernel(x_ref, w1_ref, b1_ref, w2_ref, b2_ref, o_ref):
    h = jnp.dot(x_ref[...], w1_ref[...], preferred_element_type=jnp.float32)
    h = jnp.maximum(h + b1_ref[...], 0.0)
    q = jnp.dot(h.astype(w2_ref.dtype), w2_ref[...],
                preferred_element_type=jnp.float32)
    o_ref[...] = (q + b2_ref[...]).astype(o_ref.dtype)


def _head_tile_m(batch):
    """Row tile <= 128 (small f32 hidden tile); >= 2 grid steps for B > 16."""
    if batch <= 16:
        return batch
    return min(128, _round_up(pl.cdiv(batch, 2), 8))


def mlp_head_pallas(x, w1, b1, w2, b2):
    """x: (B, K) bf16 -> (B, Npad) f32; both FC layers in one kernel."""
    M, K = x.shape
    _, H = w1.shape
    _, N = w2.shape
    assert H % LANE == 0 and N % LANE == 0
    tm = _head_tile_m(M)
    flops = 2 * M * (K * H + H * N)
    bytes_accessed = M * K * 2 + K * H * 2 + H * N * 2 + M * N * 4
    return pl.pallas_call(
        _mlp_head_kernel,
        out_shape=jax.ShapeDtypeStruct((M, N), jnp.float32),
        grid=(pl.cdiv(M, tm),),                        # ragged-safe tiling
        in_specs=[
            pl.BlockSpec((tm, K), lambda i: (i, 0)),   # streamed row tiles
            pl.BlockSpec((K, H), lambda i: (0, 0)),    # fc1 weight resident
            pl.BlockSpec((1, H), lambda i: (0, 0)),
            pl.BlockSpec((H, N), lambda i: (0, 0)),    # fc2 weight resident
            pl.BlockSpec((1, N), lambda i: (0, 0)),
        ],
        out_specs=pl.BlockSpec((tm, N), lambda i: (i, 0)),
        compiler_params=pltpu.CompilerParams(
            dimension_semantics=("parallel",),
            vmem_limit_bytes=32 * 1024 * 1024),
        cost_estimate=pl.CostEstimate(flops=flops, transcendentals=0,
                                      bytes_accessed=bytes_accessed),
    )(x, w1, b1, w2, b2)


# ----------------------------------------------------------------------------
# XLA-side space-to-depth relayout (pure re-indexing, ~1x activation bytes)
# ----------------------------------------------------------------------------
def _space_to_depth(x, s):
    """(B, H, W, C) -> (B, H//s, W//s, s*s*C), channel order (ph, pw, c)."""
    B, H, W, C = x.shape
    x = x.reshape(B, H // s, s, W // s, s, C)
    x = x.transpose(0, 1, 3, 2, 4, 5)
    return x.reshape(B, H // s, W // s, s * s * C)


# ----------------------------------------------------------------------------
# Parameters: PyTorch-layout init + one-time kernel-layout preparation
# ----------------------------------------------------------------------------
def init_params(key, num_actions):
    """PyTorch-layout parameters (nn.Conv2d / nn.Linear default uniform init)."""
    def uniform(k, shape, fan_in):
        bound = 1.0 / jnp.sqrt(float(fan_in))
        return jax.random.uniform(k, shape, jnp.float32, -bound, bound)

    ks = jax.random.split(key, 10)
    p = {}
    p["conv1_w"] = uniform(ks[0], (32, 4, 8, 8), 4 * 8 * 8)
    p["conv1_b"] = uniform(ks[1], (32,), 4 * 8 * 8)
    p["conv2_w"] = uniform(ks[2], (64, 32, 4, 4), 32 * 4 * 4)
    p["conv2_b"] = uniform(ks[3], (64,), 32 * 4 * 4)
    p["conv3_w"] = uniform(ks[4], (64, 64, 3, 3), 64 * 3 * 3)
    p["conv3_b"] = uniform(ks[5], (64,), 64 * 3 * 3)
    p["fc1_w"] = uniform(ks[6], (512, 64 * 7 * 7), 64 * 7 * 7)
    p["fc1_b"] = uniform(ks[7], (512,), 64 * 7 * 7)
    p["fc2_w"] = uniform(ks[8], (num_actions, 512), 512)
    p["fc2_b"] = uniform(ks[9], (num_actions,), 512)
    return p


def prepare_params(p):
    """Run once, outside jit: all weight re-layouts hoisted off the fwd path.

    * conv weights (O, C, KH, KW) are re-packed for the space-to-depth,
      stride-1 formulation: rows ordered (a, b, ph, pw, c) where the original
      tap is (kh, kw) = (s*a + ph, s*b + pw); shape (kk*kk*s*s*C, O) bf16.
    * fc1 columns permuted from NCHW flatten (c,h,w) to NHWC flatten (h,w,c).
    * fc2 transposed to (512, Npad) with num_actions zero-padded to 128
      (lane-dense q stores; padding sliced off outside the kernel).
    """
    kp = {}

    def conv_pack(w, s):
        o, c, khs, _ = w.shape
        kk = khs // s                                   # post-s2d kernel size
        w6 = w.reshape(o, c, kk, s, kk, s)              # (o, c, a, ph, b, pw)
        w6 = w6.transpose(2, 4, 3, 5, 1, 0)             # (a, b, ph, pw, c, o)
        return w6.reshape(kk * kk * s * s * c, o).astype(MXU_DTYPE)

    kp["conv1_w"] = conv_pack(p["conv1_w"], 4)                          # (256, 32)
    kp["conv1_b"] = p["conv1_b"].reshape(1, -1).astype(jnp.float32)
    kp["conv2_w"] = conv_pack(p["conv2_w"], 2)                          # (512, 64)
    kp["conv2_b"] = p["conv2_b"].reshape(1, -1).astype(jnp.float32)
    kp["conv3_w"] = conv_pack(p["conv3_w"], 1)                          # (576, 64)
    kp["conv3_b"] = p["conv3_b"].reshape(1, -1).astype(jnp.float32)

    w1 = p["fc1_w"].reshape(512, 64, 7, 7).transpose(0, 2, 3, 1)   # (512,7,7,64)
    kp["fc1_w"] = w1.reshape(512, 7 * 7 * 64).T.astype(MXU_DTYPE)  # (3136, 512)
    kp["fc1_b"] = p["fc1_b"].reshape(1, 512).astype(jnp.float32)

    na = p["fc2_w"].shape[0]
    nap = _round_up(na, LANE)
    kp["fc2_w"] = _pad_lanes(p["fc2_w"].T, nap).astype(MXU_DTYPE)       # (512, 128)
    kp["fc2_b"] = _pad_lanes(p["fc2_b"].reshape(1, na), nap).astype(jnp.float32)
    return kp


# ----------------------------------------------------------------------------
# Qnetwork forward (matches PyTorch: conv/relu x3 -> flatten -> fc1/relu -> fc2)
# ----------------------------------------------------------------------------
def qnetwork_forward(kp, x, *, num_actions):
    # x: (B, 4, 84, 84) NCHW float32 (PyTorch layout)
    x = x.astype(MXU_DTYPE)                        # cast before transpose
    x = jnp.transpose(x, (0, 2, 3, 1))             # -> NHWC (B, 84, 84, 4)
    x = _space_to_depth(x, 4)                      # (B, 21, 21, 64)
    out = conv2d_relu_pallas(x, kp["conv1_w"], kp["conv1_b"],
                             kk=2, oh=20, ow=20)   # (B, 20, 20, 32)
    out = _space_to_depth(out, 2)                  # (B, 10, 10, 128)
    out = conv2d_relu_pallas(out, kp["conv2_w"], kp["conv2_b"],
                             kk=2, oh=9, ow=9)     # (B, 9, 9, 64)
    out = conv2d_relu_pallas(out, kp["conv3_w"], kp["conv3_b"],
                             kk=3, oh=7, ow=7)     # (B, 7, 7, 64)
    B = out.shape[0]
    # NHWC flatten; fc1 columns were pre-permuted to match PyTorch's NCHW view.
    feat = out.reshape(B, 7 * 7 * 64)              # (B, 3136) bf16
    q = mlp_head_pallas(feat, kp["fc1_w"], kp["fc1_b"],
                        kp["fc2_w"], kp["fc2_b"])  # (B, 128) f32
    return q[:, :num_actions]


if __name__ == "__main__":
    num_actions = 6
    batch = 2

    key = jax.random.PRNGKey(0)
    k_params, k_x = jax.random.split(key)
    torch_layout_params = init_params(k_params, num_actions)
    kernel_params = prepare_params(torch_layout_params)   # once, outside jit

    # DQN Atari input: 4 stacked 84x84 frames (84x84 required so fc1 sees 64*7*7).
    x = jax.random.uniform(k_x, (batch, 4, 84, 84), jnp.float32)

    fwd = jax.jit(functools.partial(qnetwork_forward, num_actions=num_actions))
    q_values = fwd(kernel_params, x)
    jax.block_until_ready(q_values)

    assert q_values.shape == (batch, num_actions)
    print("KERNEL_OK")
</pallas_src>

<mosaic_0001>
module attributes {stable_mosaic.version = 11 : i64} {
  func.func @_conv_kernel(%arg0: i32, %arg1: memref<1x21x21x64xbf16, #tpu.memory_space<vmem>>, %arg2: memref<256x32xbf16, #tpu.memory_space<vmem>>, %arg3: memref<1x32xf32, #tpu.memory_space<vmem>>, %arg4: memref<1x20x20x32xbf16, #tpu.memory_space<vmem>>) attributes {dimension_semantics = [#tpu.dimension_semantics<parallel>], iteration_bounds = array<i64: 2>, scalar_prefetch = 0 : i64, scratch_operands = 0 : i64, tpu.core_type = #tpu.core_type<tc>, window_params = [{transform_indices = @transform_0, window_bounds = array<i64: 1, 21, 21, 64>}, {pipeline_mode = #tpu.pipeline_mode<synchronous>, transform_indices = @transform_1, window_bounds = array<i64: 256, 32>}, {pipeline_mode = #tpu.pipeline_mode<synchronous>, transform_indices = @transform_2, window_bounds = array<i64: 1, 32>}, {transform_indices = @transform_3, window_bounds = array<i64: 1, 20, 20, 32>}]} {
    %c0 = arith.constant 0 : index
    %c0_0 = arith.constant 0 : index
    %0 = vector.load %arg2[%c0, %c0_0] : memref<256x32xbf16, #tpu.memory_space<vmem>>, vector<256x32xbf16>
    %c0_1 = arith.constant 0 : index
    %c0_2 = arith.constant 0 : index
    %1 = vector.load %arg3[%c0_1, %c0_2] : memref<1x32xf32, #tpu.memory_space<vmem>>, vector<1x32xf32>
    %c0_3 = arith.constant 0 : index
    %c0_4 = arith.constant 0 : index
    %c0_5 = arith.constant 0 : index
    %c0_6 = arith.constant 0 : index
    %2 = vector.load %arg1[%c0_3, %c0_4, %c0_5, %c0_6] : memref<1x21x21x64xbf16, #tpu.memory_space<vmem>>, vector<1x1x20x64xbf16>
    %3 = vector.shape_cast %2 : vector<1x1x20x64xbf16> to vector<20x64xbf16>
    %c0_7 = arith.constant 0 : index
    %c0_8 = arith.constant 0 : index
    %c1 = arith.constant 1 : index
    %c0_9 = arith.constant 0 : index
    %4 = vector.load %arg1[%c0_7, %c0_8, %c1, %c0_9] : memref<1x21x21x64xbf16, #tpu.memory_space<vmem>>, vector<1x1x20x64xbf16>
    %5 = vector.shape_cast %4 : vector<1x1x20x64xbf16> to vector<20x64xbf16>
    %c0_10 = arith.constant 0 : index
    %c1_11 = arith.constant 1 : index
    %c0_12 = arith.constant 0 : index
    %c0_13 = arith.constant 0 : index
    %6 = vector.load %arg1[%c0_10, %c1_11, %c0_12, %c0_13] : memref<1x21x21x64xbf16, #tpu.memory_space<vmem>>, vector<1x1x20x64xbf16>
    %7 = vector.shape_cast %6 : vector<1x1x20x64xbf16> to vector<20x64xbf16>
    %c0_14 = arith.constant 0 : index
    %c1_15 = arith.constant 1 : index
    %c1_16 = arith.constant 1 : index
    %c0_17 = arith.constant 0 : index
    %8 = vector.load %arg1[%c0_14, %c1_15, %c1_16, %c0_17] : memref<1x21x21x64xbf16, #tpu.memory_space<vmem>>, vector<1x1x20x64xbf16>
    %9 = vector.shape_cast %8 : vector<1x1x20x64xbf16> to vector<20x64xbf16>
    %10 = tpu.concatenate %3, %5, %7, %9 in 1 : vector<20x64xbf16>, vector<20x64xbf16>, vector<20x64xbf16>, vector<20x64xbf16> -> vector<20x256xbf16>
    %cst = arith.constant dense<0.000000e+00> : vector<20x32xf32>
    %11 = tpu.matmul %10, %0, %cst {dimension_numbers = #tpu.dot_dimension_numbers<[1], [0], [0], [1], [0, 0, 1, 1], [], []>} : vector<20x256xbf16>, vector<256x32xbf16>, vector<20x32xf32> -> vector<20x32xf32>
    %12 = vector.broadcast %1 : vector<1x32xf32> to vector<20x32xf32>
    %13 = arith.addf %11, %12 : vector<20x32xf32>
    %cst_18 = arith.constant 0.000000e+00 : f32
    %14 = vector.broadcast %cst_18 : f32 to vector<20x32xf32>
    %15 = arith.maximumf %13, %14 : vector<20x32xf32>
    %16 = arith.truncf %15 : vector<20x32xf32> to vector<20x32xbf16>
    %c0_19 = arith.constant 0 : index
    %c0_20 = arith.constant 0 : index
    %c0_21 = arith.constant 0 : index
    %c0_22 = arith.constant 0 : index
    %17 = vector.load %arg4[%c0_19, %c0_20, %c0_21, %c0_22] : memref<1x20x20x32xbf16, #tpu.memory_space<vmem>>, vector<1x1x20x32xbf16>
    %18 = vector.shape_cast %17 : vector<1x1x20x32xbf16> to vector<20x32xbf16>
    %19 = vector.shape_cast %16 : vector<20x32xbf16> to vector<1x1x20x32xbf16>
    tpu.vector_store %arg4[%c0_19, %c0_20, %c0_21, %c0_22], %19 {strides = array<i32>} : memref<1x20x20x32xbf16, #tpu.memory_space<vmem>>, vector<1x1x20x32xbf16>,
    %c0_23 = arith.constant 0 : index
    %c1_24 = arith.constant 1 : index
    %c0_25 = arith.constant 0 : index
    %c0_26 = arith.constant 0 : index
    %20 = vector.load %arg1[%c0_23, %c1_24, %c0_25, %c0_26] : memref<1x21x21x64xbf16, #tpu.memory_space<vmem>>, vector<1x1x20x64xbf16>
    %21 = vector.shape_cast %20 : vector<1x1x20x64xbf16> to vector<20x64xbf16>
    %c0_27 = arith.constant 0 : index
    %c1_28 = arith.constant 1 : index
    %c1_29 = arith.constant 1 : index
    %c0_30 = arith.constant 0 : index
    %22 = vector.load %arg1[%c0_27, %c1_28, %c1_29, %c0_30] : memref<1x21x21x64xbf16, #tpu.memory_space<vmem>>, vector<1x1x20x64xbf16>
    %23 = vector.shape_cast %22 : vector<1x1x20x64xbf16> to vector<20x64xbf16>
    %c0_31 = arith.constant 0 : index
    %c2 = arith.constant 2 : index
    %c0_32 = arith.constant 0 : index
    %c0_33 = arith.constant 0 : index
    %24 = vector.load %arg1[%c0_31, %c2, %c0_32, %c0_33] : memref<1x21x21x64xbf16, #tpu.memory_space<vmem>>, vector<1x1x20x64xbf16>
    %25 = vector.shape_cast %24 : vector<1x1x20x64xbf16> to vector<20x64xbf16>
    %c0_34 = arith.constant 0 : index
    %c2_35 = arith.constant 2 : index
    %c1_36 = arith.constant 1 : index
    %c0_37 = arith.constant 0 : index
    %26 = vector.load %arg1[%c0_34, %c2_35, %c1_36, %c0_37] : memref<1x21x21x64xbf16, #tpu.memory_space<vmem>>, vector<1x1x20x64xbf16>
    %27 = vector.shape_cast %26 : vector<1x1x20x64xbf16> to vector<20x64xbf16>
    %28 = tpu.concatenate %21, %23, %25, %27 in 1 : vector<20x64xbf16>, vector<20x64xbf16>, vector<20x64xbf16>, vector<20x64xbf16> -> vector<20x256xbf16>
    %cst_38 = arith.constant dense<0.000000e+00> : vector<20x32xf32>
    %29 = tpu.matmul %28, %0, %cst_38 {dimension_numbers = #tpu.dot_dimension_numbers<[1], [0], [0], [1], [0, 0, 1, 1], [], []>} : vector<20x256xbf16>, vector<256x32xbf16>, vector<20x32xf32> -> vector<20x32xf32>
    %30 = vector.broadcast %1 : vector<1x32xf32> to vector<20x32xf32>
    %31 = arith.addf %29, %30 : vector<20x32xf32>
    %cst_39 = arith.constant 0.000000e+00 : f32
    %32 = vector.broadcast %cst_39 : f32 to vector<20x32xf32>
    %33 = arith.maximumf %31, %32 : vector<20x32xf32>
    %34 = arith.truncf %33 : vector<20x32xf32> to vector<20x32xbf16>
    %c0_40 = arith.constant 0 : index
    %c1_41 = arith.constant 1 : index
    %c0_42 = arith.constant 0 : index
    %c0_43 = arith.constant 0 : index
    %35 = vector.load %arg4[%c0_40, %c1_41, %c0_42, %c0_43] : memref<1x20x20x32xbf16, #tpu.memory_space<vmem>>, vector<1x1x20x32xbf16>
    %36 = vector.shape_cast %35 : vector<1x1x20x32xbf16> to vector<20x32xbf16>
    %37 = vector.shape_cast %34 : vector<20x32xbf16> to vector<1x1x20x32xbf16>
    tpu.vector_store %arg4[%c0_40, %c1_41, %c0_42, %c0_43], %37 {strides = array<i32>} : memref<1x20x20x32xbf16, #tpu.memory_space<vmem>>, vector<1x1x20x32xbf16>,
    %c0_44 = arith.constant 0 : index
    %c2_45 = arith.constant 2 : index
    %c0_46 = arith.constant 0 : index
    %c0_47 = arith.constant 0 : index
    %38 = vector.load %arg1[%c0_44, %c2_45, %c0_46, %c0_47] : memref<1x21x21x64xbf16, #tpu.memory_space<vmem>>, vector<1x1x20x64xbf16>
    %39 = vector.shape_cast %38 : vector<1x1x20x64xbf16> to vector<20x64xbf16>
    %c0_48 = arith.constant 0 : index
    %c2_49 = arith.constant 2 : index
    %c1_50 = arith.constant 1 : index
    %c0_51 = arith.constant 0 : index
    %40 = vector.load %arg1[%c0_48, %c2_49, %c1_50, %c0_51] : memref<1x21x21x64xbf16, #tpu.memory_space<vmem>>, vector<1x1x20x64xbf16>
    %41 = vector.shape_cast %40 : vector<1x1x20x64xbf16> to vector<20x64xbf16>
    %c0_52 = arith.constant 0 : index
    %c3 = arith.constant 3 : index
    %c0_53 = arith.constant 0 : index
    %c0_54 = arith.constant 0 : index
    %42 = vector.load %arg1[%c0_52, %c3, %c0_53, %c0_54] : memref<1x21x21x64xbf16, #tpu.memory_space<vmem>>, vector<1x1x20x64xbf16>
    %43 = vector.shape_cast %42 : vector<1x1x20x64xbf16> to vector<20x64xbf16>
    %c0_55 = arith.constant 0 : index
    %c3_56 = arith.constant 3 : index
    %c1_57 = arith.constant 1 : index
    %c0_58 = arith.constant 0 : index
    %44 = vector.load %arg1[%c0_55, %c3_56, %c1_57, %c0_58] : memref<1x21x21x64xbf16, #tpu.memory_space<vmem>>, vector<1x1x20x64xbf16>
    %45 = vector.shape_cast %44 : vector<1x1x20x64xbf16> to vector<20x64xbf16>
    %46 = tpu.concatenate %39, %41, %43, %45 in 1 : vector<20x64xbf16>, vector<20x64xbf16>, vector<20x64xbf16>, vector<20x64xbf16> -> vector<20x256xbf16>
    %cst_59 = arith.constant dense<0.000000e+00> : vector<20x32xf32>
    %47 = tpu.matmul %46, %0, %cst_59 {dimension_numbers = #tpu.dot_dimension_numbers<[1], [0], [0], [1], [0, 0, 1, 1], [], []>} : vector<20x256xbf16>, vector<256x32xbf16>, vector<20x32xf32> -> vector<20x32xf32>
    %48 = vector.broadcast %1 : vector<1x32xf32> to vector<20x32xf32>
    %49 = arith.addf %47, %48 : vector<20x32xf32>
    %cst_60 = arith.constant 0.000000e+00 : f32
    %50 = vector.broadcast %cst_60 : f32 to vector<20x32xf32>
    %51 = arith.maximumf %49, %50 : vector<20x32xf32>
    %52 = arith.truncf %51 : vector<20x32xf32> to vector<20x32xbf16>
    %c0_61 = arith.constant 0 : index
    %c2_62 = arith.constant 2 : index
    %c0_63 = arith.constant 0 : index
    %c0_64 = arith.constant 0 : index
    %53 = vector.load %arg4[%c0_61, %c2_62, %c0_63, %c0_64] : memref<1x20x20x32xbf16, #tpu.memory_space<vmem>>, vector<1x1x20x32xbf16>
    %54 = vector.shape_cast %53 : vector<1x1x20x32xbf16> to vector<20x32xbf16>
    %55 = vector.shape_cast %52 : vector<20x32xbf16> to vector<1x1x20x32xbf16>
    tpu.vector_store %arg4[%c0_61, %c2_62, %c0_63, %c0_64], %55 {strides = array<i32>} : memref<1x20x20x32xbf16, #tpu.memory_space<vmem>>, vector<1x1x20x32xbf16>,
    %c0_65 = arith.constant 0 : index
    %c3_66 = arith.constant 3 : index
    %c0_67 = arith.constant 0 : index
    %c0_68 = arith.constant 0 : index
    %56 = vector.load %arg1[%c0_65, %c3_66, %c0_67, %c0_68] : memref<1x21x21x64xbf16, #tpu.memory_space<vmem>>, vector<1x1x20x64xbf16>
    %57 = vector.shape_cast %56 : vector<1x1x20x64xbf16> to vector<20x64xbf16>
    %c0_69 = arith.constant 0 : index
    %c3_70 = arith.constant 3 : index
    %c1_71 = arith.constant 1 : index
    %c0_72 = arith.constant 0 : index
    %58 = vector.load %arg1[%c0_69, %c3_70, %c1_71, %c0_72] : memref<1x21x21x64xbf16, #tpu.memory_space<vmem>>, vector<1x1x20x64xbf16>
    %59 = vector.shape_cast %58 : vector<1x1x20x64xbf16> to vector<20x64xbf16>
    %c0_73 = arith.constant 0 : index
    %c4 = arith.constant 4 : index
    %c0_74 = arith.constant 0 : index
    %c0_75 = arith.constant 0 : index
    %60 = vector.load %arg1[%c0_73, %c4, %c0_74, %c0_75] : memref<1x21x21x64xbf16, #tpu.memory_space<vmem>>, vector<1x1x20x64xbf16>
    %61 = vector.shape_cast %60 : vector<1x1x20x64xbf16> to vector<20x64xbf16>
    %c0_76 = arith.constant 0 : index
    %c4_77 = arith.constant 4 : index
    %c1_78 = arith.constant 1 : index
    %c0_79 = arith.constant 0 : index
    %62 = vector.load %arg1[%c0_76, %c4_77, %c1_78, %c0_79] : memref<1x21x21x64xbf16, #tpu.memory_space<vmem>>, vector<1x1x20x64xbf16>
    %63 = vector.shape_cast %62 : vector<1x1x20x64xbf16> to vector<20x64xbf16>
    %64 = tpu.concatenate %57, %59, %61, %63 in 1 : vector<20x64xbf16>, vector<20x64xbf16>, vector<20x64xbf16>, vector<20x64xbf16> -> vector<20x256xbf16>
    %cst_80 = arith.constant dense<0.000000e+00> : vector<20x32xf32>
    %65 = tpu.matmul %64, %0, %cst_80 {dimension_numbers = #tpu.dot_dimension_numbers<[1], [0], [0], [1], [0, 0, 1, 1], [], []>} : vector<20x256xbf16>, vector<256x32xbf16>, vector<20x32xf32> -> vector<20x32xf32>
    %66 = vector.broadcast %1 : vector<1x32xf32> to vector<20x32xf32>
    %67 = arith.addf %65, %66 : vector<20x32xf32>
    %cst_81 = arith.constant 0.000000e+00 : f32
    %68 = vector.broadcast %cst_81 : f32 to vector<20x32xf32>
    %69 = arith.maximumf %67, %68 : vector<20x32xf32>
    %70 = arith.truncf %69 : vector<20x32xf32> to vector<20x32xbf16>
    %c0_82 = arith.constant 0 : index
    %c3_83 = arith.constant 3 : index
    %c0_84 = arith.constant 0 : index
    %c0_85 = arith.constant 0 : index
    %71 = vector.load %arg4[%c0_82, %c3_83, %c0_84, %c0_85] : memref<1x20x20x32xbf16, #tpu.memory_space<vmem>>, vector<1x1x20x32xbf16>
    %72 = vector.shape_cast %71 : vector<1x1x20x32xbf16> to vector<20x32xbf16>
    %73 = vector.shape_cast %70 : vector<20x32xbf16> to vector<1x1x20x32xbf16>
    tpu.vector_store %arg4[%c0_82, %c3_83, %c0_84, %c0_85], %73 {strides = array<i32>} : memref<1x20x20x32xbf16, #tpu.memory_space<vmem>>, vector<1x1x20x32xbf16>,
    %c0_86 = arith.constant 0 : index
    %c4_87 = arith.constant 4 : index
    %c0_88 = arith.constant 0 : index
    %c0_89 = arith.constant 0 : index
    %74 = vector.load %arg1[%c0_86, %c4_87, %c0_88, %c0_89] : memref<1x21x21x64xbf16, #tpu.memory_space<vmem>>, vector<1x1x20x64xbf16>
    %75 = vector.shape_cast %74 : vector<1x1x20x64xbf16> to vector<20x64xbf16>
    %c0_90 = arith.constant 0 : index
    %c4_91 = arith.constant 4 : index
    %c1_92 = arith.constant 1 : index
    %c0_93 = arith.constant 0 : index
    %76 = vector.load %arg1[%c0_90, %c4_91, %c1_92, %c0_93] : memref<1x21x21x64xbf16, #tpu.memory_space<vmem>>, vector<1x1x20x64xbf16>
    %77 = vector.shape_cast %76 : vector<1x1x20x64xbf16> to vector<20x64xbf16>
    %c0_94 = arith.constant 0 : index
    %c5 = arith.constant 5 : index
    %c0_95 = arith.constant 0 : index
    %c0_96 = arith.constant 0 : index
    %78 = vector.load %arg1[%c0_94, %c5, %c0_95, %c0_96] : memref<1x21x21x64xbf16, #tpu.memory_space<vmem>>, vector<1x1x20x64xbf16>
    %79 = vector.shape_cast %78 : vector<1x1x20x64xbf16> to vector<20x64xbf16>
    %c0_97 = arith.constant 0 : index
    %c5_98 = arith.constant 5 : index
    %c1_99 = arith.constant 1 : index
    %c0_100 = arith.constant 0 : index
    %80 = vector.load %arg1[%c0_97, %c5_98, %c1_99, %c0_100] : memref<1x21x21x64xbf16, #tpu.memory_space<vmem>>, vector<1x1x20x64xbf16>
    %81 = vector.shape_cast %80 : vector<1x1x20x64xbf16> to vector<20x64xbf16>
    %82 = tpu.concatenate %75, %77, %79, %81 in 1 : vector<20x64xbf16>, vector<20x64xbf16>, vector<20x64xbf16>, vector<20x64xbf16> -> vector<20x256xbf16>
    %cst_101 = arith.constant dense<0.000000e+00> : vector<20x32xf32>
    %83 = tpu.matmul %82, %0, %cst_101 {dimension_numbers = #tpu.dot_dimension_numbers<[1], [0], [0], [1], [0, 0, 1, 1], [], []>} : vector<20x256xbf16>, vector<256x32xbf16>, vector<20x32xf32> -> vector<20x32xf32>
    %84 = vector.broadcast %1 : vector<1x32xf32> to vector<20x32xf32>
    %85 = arith.addf %83, %84 : vector<20x32xf32>
    %cst_102 = arith.constant 0.000000e+00 : f32
    %86 = vector.broadcast %cst_102 : f32 to vector<20x32xf32>
    %87 = arith.maximumf %85, %86 : vector<20x32xf32>
    %88 = arith.truncf %87 : vector<20x32xf32> to vector<20x32xbf16>
    %c0_103 = arith.constant 0 : index
    %c4_104 = arith.constant 4 : index
    %c0_105 = arith.constant 0 : index
    %c0_106 = arith.constant 0 : index
    %89 = vector.load %arg4[%c0_103, %c4_104, %c0_105, %c0_106] : memref<1x20x20x32xbf16, #tpu.memory_space<vmem>>, vector<1x1x20x32xbf16>
    %90 = vector.shape_cast %89 : vector<1x1x20x32xbf16> to vector<20x32xbf16>
    %91 = vector.shape_cast %88 : vector<20x32xbf16> to vector<1x1x20x32xbf16>
    tpu.vector_store %arg4[%c0_103, %c4_104, %c0_105, %c0_106], %91 {strides = array<i32>} : memref<1x20x20x32xbf16, #tpu.memory_space<vmem>>, vector<1x1x20x32xbf16>,
    %c0_107 = arith.constant 0 : index
    %c5_108 = arith.constant 5 : index
    %c0_109 = arith.constant 0 : index
    %c0_110 = arith.constant 0 : index
    %92 = vector.load %arg1[%c0_107, %c5_108, %c0_109, %c0_110] : memref<1x21x21x64xbf16, #tpu.memory_space<vmem>>, vector<1x1x20x64xbf16>
    %93 = vector.shape_cast %92 : vector<1x1x20x64xbf16> to vector<20x64xbf16>
    %c0_111 = arith.constant 0 : index
    %c5_112 = arith.constant 5 : index
    %c1_113 = arith.constant 1 : index
    %c0_114 = arith.constant 0 : index
    %94 = vector.load %arg1[%c0_111, %c5_112, %c1_113, %c0_114] : memref<1x21x21x64xbf16, #tpu.memory_space<vmem>>, vector<1x1x20x64xbf16>
    %95 = vector.shape_cast %94 : vector<1x1x20x64xbf16> to vector<20x64xbf16>
    %c0_115 = arith.constant 0 : index
    %c6 = arith.constant 6 : index
    %c0_116 = arith.constant 0 : index
    %c0_117 = arith.constant 0 : index
    %96 = vector.load %arg1[%c0_115, %c6, %c0_116, %c0_117] : memref<1x21x21x64xbf16, #tpu.memory_space<vmem>>, vector<1x1x20x64xbf16>
    %97 = vector.shape_cast %96 : vector<1x1x20x64xbf16> to vector<20x64xbf16>
    %c0_118 = arith.constant 0 : index
    %c6_119 = arith.constant 6 : index
    %c1_120 = arith.constant 1 : index
    %c0_121 = arith.constant 0 : index
    %98 = vector.load %arg1[%c0_118, %c6_119, %c1_120, %c0_121] : memref<1x21x21x64xbf16, #tpu.memory_space<vmem>>, vector<1x1x20x64xbf16>
    %99 = vector.shape_cast %98 : vector<1x1x20x64xbf16> to vector<20x64xbf16>
    %100 = tpu.concatenate %93, %95, %97, %99 in 1 : vector<20x64xbf16>, vector<20x64xbf16>, vector<20x64xbf16>, vector<20x64xbf16> -> vector<20x256xbf16>
    %cst_122 = arith.constant dense<0.000000e+00> : vector<20x32xf32>
    %101 = tpu.matmul %100, %0, %cst_122 {dimension_numbers = #tpu.dot_dimension_numbers<[1], [0], [0], [1], [0, 0, 1, 1], [], []>} : vector<20x256xbf16>, vector<256x32xbf16>, vector<20x32xf32> -> vector<20x32xf32>
    %102 = vector.broadcast %1 : vector<1x32xf32> to vector<20x32xf32>
    %103 = arith.addf %101, %102 : vector<20x32xf32>
    %cst_123 = arith.constant 0.000000e+00 : f32
    %104 = vector.broadcast %cst_123 : f32 to vector<20x32xf32>
    %105 = arith.maximumf %103, %104 : vector<20x32xf32>
    %106 = arith.truncf %105 : vector<20x32xf32> to vector<20x32xbf16>
    %c0_124 = arith.constant 0 : index
    %c5_125 = arith.constant 5 : index
    %c0_126 = arith.constant 0 : index
    %c0_127 = arith.constant 0 : index
    %107 = vector.load %arg4[%c0_124, %c5_125, %c0_126, %c0_127] : memref<1x20x20x32xbf16, #tpu.memory_space<vmem>>, vector<1x1x20x32xbf16>
    %108 = vector.shape_cast %107 : vector<1x1x20x32xbf16> to vector<20x32xbf16>
    %109 = vector.shape_cast %106 : vector<20x32xbf16> to vector<1x1x20x32xbf16>
    tpu.vector_store %arg4[%c0_124, %c5_125, %c0_126, %c0_127], %109 {strides = array<i32>} : memref<1x20x20x32xbf16, #tpu.memory_space<vmem>>, vector<1x1x20x32xbf16>,
    %c0_128 = arith.constant 0 : index
    %c6_129 = arith.constant 6 : index
    %c0_130 = arith.constant 0 : index
    %c0_131 = arith.constant 0 : index
    %110 = vector.load %arg1[%c0_128, %c6_129, %c0_130, %c0_131] : memref<1x21x21x64xbf16, #tpu.memory_space<vmem>>, vector<1x1x20x64xbf16>
    %111 = vector.shape_cast %110 : vector<1x1x20x64xbf16> to vector<20x64xbf16>
    %c0_132 = arith.constant 0 : index
    %c6_133 = arith.constant 6 : index
    %c1_134 = arith.constant 1 : index
    %c0_135 = arith.constant 0 : index
    %112 = vector.load %arg1[%c0_132, %c6_133, %c1_134, %c0_135] : memref<1x21x21x64xbf16, #tpu.memory_space<vmem>>, vector<1x1x20x64xbf16>
    %113 = vector.shape_cast %112 : vector<1x1x20x64xbf16> to vector<20x64xbf16>
    %c0_136 = arith.constant 0 : index
    %c7 = arith.constant 7 : index
    %c0_137 = arith.constant 0 : index
    %c0_138 = arith.constant 0 : index
    %114 = vector.load %arg1[%c0_136, %c7, %c0_137, %c0_138] : memref<1x21x21x64xbf16, #tpu.memory_space<vmem>>, vector<1x1x20x64xbf16>
    %115 = vector.shape_cast %114 : vector<1x1x20x64xbf16> to vector<20x64xbf16>
    %c0_139 = arith.constant 0 : index
    %c7_140 = arith.constant 7 : index
    %c1_141 = arith.constant 1 : index
    %c0_142 = arith.constant 0 : index
    %116 = vector.load %arg1[%c0_139, %c7_140, %c1_141, %c0_142] : memref<1x21x21x64xbf16, #tpu.memory_space<vmem>>, vector<1x1x20x64xbf16>
    %117 = vector.shape_cast %116 : vector<1x1x20x64xbf16> to vector<20x64xbf16>
    %118 = tpu.concatenate %111, %113, %115, %117 in 1 : vector<20x64xbf16>, vector<20x64xbf16>, vector<20x64xbf16>, vector<20x64xbf16> -> vector<20x256xbf16>
    %cst_143 = arith.constant dense<0.000000e+00> : vector<20x32xf32>
    %119 = tpu.matmul %118, %0, %cst_143 {dimension_numbers = #tpu.dot_dimension_numbers<[1], [0], [0], [1], [0, 0, 1, 1], [], []>} : vector<20x256xbf16>, vector<256x32xbf16>, vector<20x32xf32> -> vector<20x32xf32>
    %120 = vector.broadcast %1 : vector<1x32xf32> to vector<20x32xf32>
    %121 = arith.addf %119, %120 : vector<20x32xf32>
    %cst_144 = arith.constant 0.000000e+00 : f32
    %122 = vector.broadcast %cst_144 : f32 to vector<20x32xf32>
    %123 = arith.maximumf %121, %122 : vector<20x32xf32>
    %124 = arith.truncf %123 : vector<20x32xf32> to vector<20x32xbf16>
    %c0_145 = arith.constant 0 : index
    %c6_146 = arith.constant 6 : index
    %c0_147 = arith.constant 0 : index
    %c0_148 = arith.constant 0 : index
    %125 = vector.load %arg4[%c0_145, %c6_146, %c0_147, %c0_148] : memref<1x20x20x32xbf16, #tpu.memory_space<vmem>>, vector<1x1x20x32xbf16>
    %126 = vector.shape_cast %125 : vector<1x1x20x32xbf16> to vector<20x32xbf16>
    %127 = vector.shape_cast %124 : vector<20x32xbf16> to vector<1x1x20x32xbf16>
    tpu.vector_store %arg4[%c0_145, %c6_146, %c0_147, %c0_148], %127 {strides = array<i32>} : memref<1x20x20x32xbf16, #tpu.memory_space<vmem>>, vector<1x1x20x32xbf16>,
    %c0_149 = arith.constant 0 : index
    %c7_150 = arith.constant 7 : index
    %c0_151 = arith.constant 0 : index
    %c0_152 = arith.constant 0 : index
    %128 = vector.load %arg1[%c0_149, %c7_150, %c0_151, %c0_152] : memref<1x21x21x64xbf16, #tpu.memory_space<vmem>>, vector<1x1x20x64xbf16>
    %129 = vector.shape_cast %128 : vector<1x1x20x64xbf16> to vector<20x64xbf16>
    %c0_153 = arith.constant 0 : index
    %c7_154 = arith.constant 7 : index
    %c1_155 = arith.constant 1 : index
    %c0_156 = arith.constant 0 : index
    %130 = vector.load %arg1[%c0_153, %c7_154, %c1_155, %c0_156] : memref<1x21x21x64xbf16, #tpu.memory_space<vmem>>, vector<1x1x20x64xbf16>
    %131 = vector.shape_cast %130 : vector<1x1x20x64xbf16> to vector<20x64xbf16>
    %c0_157 = arith.constant 0 : index
    %c8 = arith.constant 8 : index
    %c0_158 = arith.constant 0 : index
    %c0_159 = arith.constant 0 : index
    %132 = vector.load %arg1[%c0_157, %c8, %c0_158, %c0_159] : memref<1x21x21x64xbf16, #tpu.memory_space<vmem>>, vector<1x1x20x64xbf16>
    %133 = vector.shape_cast %132 : vector<1x1x20x64xbf16> to vector<20x64xbf16>
    %c0_160 = arith.constant 0 : index
    %c8_161 = arith.constant 8 : index
    %c1_162 = arith.constant 1 : index
    %c0_163 = arith.constant 0 : index
    %134 = vector.load %arg1[%c0_160, %c8_161, %c1_162, %c0_163] : memref<1x21x21x64xbf16, #tpu.memory_space<vmem>>, vector<1x1x20x64xbf16>
    %135 = vector.shape_cast %134 : vector<1x1x20x64xbf16> to vector<20x64xbf16>
    %136 = tpu.concatenate %129, %131, %133, %135 in 1 : vector<20x64xbf16>, vector<20x64xbf16>, vector<20x64xbf16>, vector<20x64xbf16> -> vector<20x256xbf16>
    %cst_164 = arith.constant dense<0.000000e+00> : vector<20x32xf32>
    %137 = tpu.matmul %136, %0, %cst_164 {dimension_numbers = #tpu.dot_dimension_numbers<[1], [0], [0], [1], [0, 0, 1, 1], [], []>} : vector<20x256xbf16>, vector<256x32xbf16>, vector<20x32xf32> -> vector<20x32xf32>
    %138 = vector.broadcast %1 : vector<1x32xf32> to vector<20x32xf32>
    %139 = arith.addf %137, %138 : vector<20x32xf32>
    %cst_165 = arith.constant 0.000000e+00 : f32
    %140 = vector.broadcast %cst_165 : f32 to vector<20x32xf32>
    %141 = arith.maximumf %139, %140 : vector<20x32xf32>
    %142 = arith.truncf %141 : vector<20x32xf32> to vector<20x32xbf16>
    %c0_166 = arith.constant 0 : index
    %c7_167 = arith.constant 7 : index
    %c0_168 = arith.constant 0 : index
    %c0_169 = arith.constant 0 : index
    %143 = vector.load %arg4[%c0_166, %c7_167, %c0_168, %c0_169] : memref<1x20x20x32xbf16, #tpu.memory_space<vmem>>, vector<1x1x20x32xbf16>
    %144 = vector.shape_cast %143 : vector<1x1x20x32xbf16> to vector<20x32xbf16>
    %145 = vector.shape_cast %142 : vector<20x32xbf16> to vector<1x1x20x32xbf16>
    tpu.vector_store %arg4[%c0_166, %c7_167, %c0_168, %c0_169], %145 {strides = array<i32>} : memref<1x20x20x32xbf16, #tpu.memory_space<vmem>>, vector<1x1x20x32xbf16>,
    %c0_170 = arith.constant 0 : index
    %c8_171 = arith.constant 8 : index
    %c0_172 = arith.constant 0 : index
    %c0_173 = arith.constant 0 : index
    %146 = vector.load %arg1[%c0_170, %c8_171, %c0_172, %c0_173] : memref<1x21x21x64xbf16, #tpu.memory_space<vmem>>, vector<1x1x20x64xbf16>
    %147 = vector.shape_cast %146 : vector<1x1x20x64xbf16> to vector<20x64xbf16>
    %c0_174 = arith.constant 0 : index
    %c8_175 = arith.constant 8 : index
    %c1_176 = arith.constant 1 : index
    %c0_177 = arith.constant 0 : index
    %148 = vector.load %arg1[%c0_174, %c8_175, %c1_176, %c0_177] : memref<1x21x21x64xbf16, #tpu.memory_space<vmem>>, vector<1x1x20x64xbf16>
    %149 = vector.shape_cast %148 : vector<1x1x20x64xbf16> to vector<20x64xbf16>
    %c0_178 = arith.constant 0 : index
    %c9 = arith.constant 9 : index
    %c0_179 = arith.constant 0 : index
    %c0_180 = arith.constant 0 : index
    %150 = vector.load %arg1[%c0_178, %c9, %c0_179, %c0_180] : memref<1x21x21x64xbf16, #tpu.memory_space<vmem>>, vector<1x1x20x64xbf16>
    %151 = vector.shape_cast %150 : vector<1x1x20x64xbf16> to vector<20x64xbf16>
    %c0_181 = arith.constant 0 : index
    %c9_182 = arith.constant 9 : index
    %c1_183 = arith.constant 1 : index
    %c0_184 = arith.constant 0 : index
    %152 = vector.load %arg1[%c0_181, %c9_182, %c1_183, %c0_184] : memref<1x21x21x64xbf16, #tpu.memory_space<vmem>>, vector<1x1x20x64xbf16>
    %153 = vector.shape_cast %152 : vector<1x1x20x64xbf16> to vector<20x64xbf16>
    %154 = tpu.concatenate %147, %149, %151, %153 in 1 : vector<20x64xbf16>, vector<20x64xbf16>, vector<20x64xbf16>, vector<20x64xbf16> -> vector<20x256xbf16>
    %cst_185 = arith.constant dense<0.000000e+00> : vector<20x32xf32>
    %155 = tpu.matmul %154, %0, %cst_185 {dimension_numbers = #tpu.dot_dimension_numbers<[1], [0], [0], [1], [0, 0, 1, 1], [], []>} : vector<20x256xbf16>, vector<256x32xbf16>, vector<20x32xf32> -> vector<20x32xf32>
    %156 = vector.broadcast %1 : vector<1x32xf32> to vector<20x32xf32>
    %157 = arith.addf %155, %156 : vector<20x32xf32>
    %cst_186 = arith.constant 0.000000e+00 : f32
    %158 = vector.broadcast %cst_186 : f32 to vector<20x32xf32>
    %159 = arith.maximumf %157, %158 : vector<20x32xf32>
    %160 = arith.truncf %159 : vector<20x32xf32> to vector<20x32xbf16>
    %c0_187 = arith.constant 0 : index
    %c8_188 = arith.constant 8 : index
    %c0_189 = arith.constant 0 : index
    %c0_190 = arith.constant 0 : index
    %161 = vector.load %arg4[%c0_187, %c8_188, %c0_189, %c0_190] : memref<1x20x20x32xbf16, #tpu.memory_space<vmem>>, vector<1x1x20x32xbf16>
    %162 = vector.shape_cast %161 : vector<1x1x20x32xbf16> to vector<20x32xbf16>
    %163 = vector.shape_cast %160 : vector<20x32xbf16> to vector<1x1x20x32xbf16>
    tpu.vector_store %arg4[%c0_187, %c8_188, %c0_189, %c0_190], %163 {strides = array<i32>} : memref<1x20x20x32xbf16, #tpu.memory_space<vmem>>, vector<1x1x20x32xbf16>,
    %c0_191 = arith.constant 0 : index
    %c9_192 = arith.constant 9 : index
    %c0_193 = arith.constant 0 : index
    %c0_194 = arith.constant 0 : index
    %164 = vector.load %arg1[%c0_191, %c9_192, %c0_193, %c0_194] : memref<1x21x21x64xbf16, #tpu.memory_space<vmem>>, vector<1x1x20x64xbf16>
    %165 = vector.shape_cast %164 : vector<1x1x20x64xbf16> to vector<20x64xbf16>
    %c0_195 = arith.constant 0 : index
    %c9_196 = arith.constant 9 : index
    %c1_197 = arith.constant 1 : index
    %c0_198 = arith.constant 0 : index
    %166 = vector.load %arg1[%c0_195, %c9_196, %c1_197, %c0_198] : memref<1x21x21x64xbf16, #tpu.memory_space<vmem>>, vector<1x1x20x64xbf16>
    %167 = vector.shape_cast %166 : vector<1x1x20x64xbf16> to vector<20x64xbf16>
    %c0_199 = arith.constant 0 : index
    %c10 = arith.constant 10 : index
    %c0_200 = arith.constant 0 : index
    %c0_201 = arith.constant 0 : index
    %168 = vector.load %arg1[%c0_199, %c10, %c0_200, %c0_201] : memref<1x21x21x64xbf16, #tpu.memory_space<vmem>>, vector<1x1x20x64xbf16>
    %169 = vector.shape_cast %168 : vector<1x1x20x64xbf16> to vector<20x64xbf16>
    %c0_202 = arith.constant 0 : index
    %c10_203 = arith.constant 10 : index
    %c1_204 = arith.constant 1 : index
    %c0_205 = arith.constant 0 : index
    %170 = vector.load %arg1[%c0_202, %c10_203, %c1_204, %c0_205] : memref<1x21x21x64xbf16, #tpu.memory_space<vmem>>, vector<1x1x20x64xbf16>
    %171 = vector.shape_cast %170 : vector<1x1x20x64xbf16> to vector<20x64xbf16>
    %172 = tpu.concatenate %165, %167, %169, %171 in 1 : vector<20x64xbf16>, vector<20x64xbf16>, vector<20x64xbf16>, vector<20x64xbf16> -> vector<20x256xbf16>
    %cst_206 = arith.constant dense<0.000000e+00> : vector<20x32xf32>
    %173 = tpu.matmul %172, %0, %cst_206 {dimension_numbers = #tpu.dot_dimension_numbers<[1], [0], [0], [1], [0, 0, 1, 1], [], []>} : vector<20x256xbf16>, vector<256x32xbf16>, vector<20x32xf32> -> vector<20x32xf32>
    %174 = vector.broadcast %1 : vector<1x32xf32> to vector<20x32xf32>
    %175 = arith.addf %173, %174 : vector<20x32xf32>
    %cst_207 = arith.constant 0.000000e+00 : f32
    %176 = vector.broadcast %cst_207 : f32 to vector<20x32xf32>
    %177 = arith.maximumf %175, %176 : vector<20x32xf32>
    %178 = arith.truncf %177 : vector<20x32xf32> to vector<20x32xbf16>
    %c0_208 = arith.constant 0 : index
    %c9_209 = arith.constant 9 : index
    %c0_210 = arith.constant 0 : index
    %c0_211 = arith.constant 0 : index
    %179 = vector.load %arg4[%c0_208, %c9_209, %c0_210, %c0_211] : memref<1x20x20x32xbf16, #tpu.memory_space<vmem>>, vector<1x1x20x32xbf16>
    %180 = vector.shape_cast %179 : vector<1x1x20x32xbf16> to vector<20x32xbf16>
    %181 = vector.shape_cast %178 : vector<20x32xbf16> to vector<1x1x20x32xbf16>
    tpu.vector_store %arg4[%c0_208, %c9_209, %c0_210, %c0_211], %181 {strides = array<i32>} : memref<1x20x20x32xbf16, #tpu.memory_space<vmem>>, vector<1x1x20x32xbf16>,
    %c0_212 = arith.constant 0 : index
    %c10_213 = arith.constant 10 : index
    %c0_214 = arith.constant 0 : index
    %c0_215 = arith.constant 0 : index
    %182 = vector.load %arg1[%c0_212, %c10_213, %c0_214, %c0_215] : memref<1x21x21x64xbf16, #tpu.memory_space<vmem>>, vector<1x1x20x64xbf16>
    %183 = vector.shape_cast %182 : vector<1x1x20x64xbf16> to vector<20x64xbf16>
    %c0_216 = arith.constant 0 : index
    %c10_217 = arith.constant 10 : index
    %c1_218 = arith.constant 1 : index
    %c0_219 = arith.constant 0 : index
    %184 = vector.load %arg1[%c0_216, %c10_217, %c1_218, %c0_219] : memref<1x21x21x64xbf16, #tpu.memory_space<vmem>>, vector<1x1x20x64xbf16>
    %185 = vector.shape_cast %184 : vector<1x1x20x64xbf16> to vector<20x64xbf16>
    %c0_220 = arith.constant 0 : index
    %c11 = arith.constant 11 : index
    %c0_221 = arith.constant 0 : index
    %c0_222 = arith.constant 0 : index
    %186 = vector.load %arg1[%c0_220, %c11, %c0_221, %c0_222] : memref<1x21x21x64xbf16, #tpu.memory_space<vmem>>, vector<1x1x20x64xbf16>
    %187 = vector.shape_cast %186 : vector<1x1x20x64xbf16> to vector<20x64xbf16>
    %c0_223 = arith.constant 0 : index
    %c11_224 = arith.constant 11 : index
    %c1_225 = arith.constant 1 : index
    %c0_226 = arith.constant 0 : index
    %188 = vector.load %arg1[%c0_223, %c11_224, %c1_225, %c0_226] : memref<1x21x21x64xbf16, #tpu.memory_space<vmem>>, vector<1x1x20x64xbf16>
    %189 = vector.shape_cast %188 : vector<1x1x20x64xbf16> to vector<20x64xbf16>
    %190 = tpu.concatenate %183, %185, %187, %189 in 1 : vector<20x64xbf16>, vector<20x64xbf16>, vector<20x64xbf16>, vector<20x64xbf16> -> vector<20x256xbf16>
    %cst_227 = arith.constant dense<0.000000e+00> : vector<20x32xf32>
    %191 = tpu.matmul %190, %0, %cst_227 {dimension_numbers = #tpu.dot_dimension_numbers<[1], [0], [0], [1], [0, 0, 1, 1], [], []>} : vector<20x256xbf16>, vector<256x32xbf16>, vector<20x32xf32> -> vector<20x32xf32>
    %192 = vector.broadcast %1 : vector<1x32xf32> to vector<20x32xf32>
    %193 = arith.addf %191, %192 : vector<20x32xf32>
    %cst_228 = arith.constant 0.000000e+00 : f32
    %194 = vector.broadcast %cst_228 : f32 to vector<20x32xf32>
    %195 = arith.maximumf %193, %194 : vector<20x32xf32>
    %196 = arith.truncf %195 : vector<20x32xf32> to vector<20x32xbf16>
    %c0_229 = arith.constant 0 : index
    %c10_230 = arith.constant 10 : index
    %c0_231 = arith.constant 0 : index
    %c0_232 = arith.constant 0 : index
    %197 = vector.load %arg4[%c0_229, %c10_230, %c0_231, %c0_232] : memref<1x20x20x32xbf16, #tpu.memory_space<vmem>>, vector<1x1x20x32xbf16>
    %198 = vector.shape_cast %197 : vector<1x1x20x32xbf16> to vector<20x32xbf16>
    %199 = vector.shape_cast %196 : vector<20x32xbf16> to vector<1x1x20x32xbf16>
    tpu.vector_store %arg4[%c0_229, %c10_230, %c0_231, %c0_232], %199 {strides = array<i32>} : memref<1x20x20x32xbf16, #tpu.memory_space<vmem>>, vector<1x1x20x32xbf16>,
    %c0_233 = arith.constant 0 : index
    %c11_234 = arith.constant 11 : index
    %c0_235 = arith.constant 0 : index
    %c0_236 = arith.constant 0 : index
    %200 = vector.load %arg1[%c0_233, %c11_234, %c0_235, %c0_236] : memref<1x21x21x64xbf16, #tpu.memory_space<vmem>>, vector<1x1x20x64xbf16>
    %201 = vector.shape_cast %200 : vector<1x1x20x64xbf16> to vector<20x64xbf16>
    %c0_237 = arith.constant 0 : index
    %c11_238 = arith.constant 11 : index
    %c1_239 = arith.constant 1 : index
    %c0_240 = arith.constant 0 : index
    %202 = vector.load %arg1[%c0_237, %c11_238, %c1_239, %c0_240] : memref<1x21x21x64xbf16, #tpu.memory_space<vmem>>, vector<1x1x20x64xbf16>
    %203 = vector.shape_cast %202 : vector<1x1x20x64xbf16> to vector<20x64xbf16>
    %c0_241 = arith.constant 0 : index
    %c12 = arith.constant 12 : index
    %c0_242 = arith.constant 0 : index
    %c0_243 = arith.constant 0 : index
    %204 = vector.load %arg1[%c0_241, %c12, %c0_242, %c0_243] : memref<1x21x21x64xbf16, #tpu.memory_space<vmem>>, vector<1x1x20x64xbf16>
    %205 = vector.shape_cast %204 : vector<1x1x20x64xbf16> to vector<20x64xbf16>
    %c0_244 = arith.constant 0 : index
    %c12_245 = arith.constant 12 : index
    %c1_246 = arith.constant 1 : index
    %c0_247 = arith.constant 0 : index
    %206 = vector.load %arg1[%c0_244, %c12_245, %c1_246, %c0_247] : memref<1x21x21x64xbf16, #tpu.memory_space<vmem>>, vector<1x1x20x64xbf16>
    %207 = vector.shape_cast %206 : vector<1x1x20x64xbf16> to vector<20x64xbf16>
    %208 = tpu.concatenate %201, %203, %205, %207 in 1 : vector<20x64xbf16>, vector<20x64xbf16>, vector<20x64xbf16>, vector<20x64xbf16> -> vector<20x256xbf16>
    %cst_248 = arith.constant dense<0.000000e+00> : vector<20x32xf32>
    %209 = tpu.matmul %208, %0, %cst_248 {dimension_numbers = #tpu.dot_dimension_numbers<[1], [0], [0], [1], [0, 0, 1, 1], [], []>} : vector<20x256xbf16>, vector<256x32xbf16>, vector<20x32xf32> -> vector<20x32xf32>
    %210 = vector.broadcast %1 : vector<1x32xf32> to vector<20x32xf32>
    %211 = arith.addf %209, %210 : vector<20x32xf32>
    %cst_249 = arith.constant 0.000000e+00 : f32
    %212 = vector.broadcast %cst_249 : f32 to vector<20x32xf32>
    %213 = arith.maximumf %211, %212 : vector<20x32xf32>
    %214 = arith.truncf %213 : vector<20x32xf32> to vector<20x32xbf16>
    %c0_250 = arith.constant 0 : index
    %c11_251 = arith.constant 11 : index
    %c0_252 = arith.constant 0 : index
    %c0_253 = arith.constant 0 : index
    %215 = vector.load %arg4[%c0_250, %c11_251, %c0_252, %c0_253] : memref<1x20x20x32xbf16, #tpu.memory_space<vmem>>, vector<1x1x20x32xbf16>
    %216 = vector.shape_cast %215 : vector<1x1x20x32xbf16> to vector<20x32xbf16>
    %217 = vector.shape_cast %214 : vector<20x32xbf16> to vector<1x1x20x32xbf16>
    tpu.vector_store %arg4[%c0_250, %c11_251, %c0_252, %c0_253], %217 {strides = array<i32>} : memref<1x20x20x32xbf16, #tpu.memory_space<vmem>>, vector<1x1x20x32xbf16>,
    %c0_254 = arith.constant 0 : index
    %c12_255 = arith.constant 12 : index
    %c0_256 = arith.constant 0 : index
    %c0_257 = arith.constant 0 : index
    %218 = vector.load %arg1[%c0_254, %c12_255, %c0_256, %c0_257] : memref<1x21x21x64xbf16, #tpu.memory_space<vmem>>, vector<1x1x20x64xbf16>
    %219 = vector.shape_cast %218 : vector<1x1x20x64xbf16> to vector<20x64xbf16>
    %c0_258 = arith.constant 0 : index
    %c12_259 = arith.constant 12 : index
    %c1_260 = arith.constant 1 : index
    %c0_261 = arith.constant 0 : index
    %220 = vector.load %arg1[%c0_258, %c12_259, %c1_260, %c0_261] : memref<1x21x21x64xbf16, #tpu.memory_space<vmem>>, vector<1x1x20x64xbf16>
    %221 = vector.shape_cast %220 : vector<1x1x20x64xbf16> to vector<20x64xbf16>
    %c0_262 = arith.constant 0 : index
    %c13 = arith.constant 13 : index
    %c0_263 = arith.constant 0 : index
    %c0_264 = arith.constant 0 : index
    %222 = vector.load %arg1[%c0_262, %c13, %c0_263, %c0_264] : memref<1x21x21x64xbf16, #tpu.memory_space<vmem>>, vector<1x1x20x64xbf16>
    %223 = vector.shape_cast %222 : vector<1x1x20x64xbf16> to vector<20x64xbf16>
    %c0_265 = arith.constant 0 : index
    %c13_266 = arith.constant 13 : index
    %c1_267 = arith.constant 1 : index
    %c0_268 = arith.constant 0 : index
    %224 = vector.load %arg1[%c0_265, %c13_266, %c1_267, %c0_268] : memref<1x21x21x64xbf16, #tpu.memory_space<vmem>>, vector<1x1x20x64xbf16>
    %225 = vector.shape_cast %224 : vector<1x1x20x64xbf16> to vector<20x64xbf16>
    %226 = tpu.concatenate %219, %221, %223, %225 in 1 : vector<20x64xbf16>, vector<20x64xbf16>, vector<20x64xbf16>, vector<20x64xbf16> -> vector<20x256xbf16>
    %cst_269 = arith.constant dense<0.000000e+00> : vector<20x32xf32>
    %227 = tpu.matmul %226, %0, %cst_269 {dimension_numbers = #tpu.dot_dimension_numbers<[1], [0], [0], [1], [0, 0, 1, 1], [], []>} : vector<20x256xbf16>, vector<256x32xbf16>, vector<20x32xf32> -> vector<20x32xf32>
    %228 = vector.broadcast %1 : vector<1x32xf32> to vector<20x32xf32>
    %229 = arith.addf %227, %228 : vector<20x32xf32>
    %cst_270 = arith.constant 0.000000e+00 : f32
    %230 = vector.broadcast %cst_270 : f32 to vector<20x32xf32>
    %231 = arith.maximumf %229, %230 : vector<20x32xf32>
    %232 = arith.truncf %231 : vector<20x32xf32> to vector<20x32xbf16>
    %c0_271 = arith.constant 0 : index
    %c12_272 = arith.constant 12 : index
    %c0_273 = arith.constant 0 : index
    %c0_274 = arith.constant 0 : index
    %233 = vector.load %arg4[%c0_271, %c12_272, %c0_273, %c0_274] : memref<1x20x20x32xbf16, #tpu.memory_space<vmem>>, vector<1x1x20x32xbf16>
    %234 = vector.shape_cast %233 : vector<1x1x20x32xbf16> to vector<20x32xbf16>
    %235 = vector.shape_cast %232 : vector<20x32xbf16> to vector<1x1x20x32xbf16>
    tpu.vector_store %arg4[%c0_271, %c12_272, %c0_273, %c0_274], %235 {strides = array<i32>} : memref<1x20x20x32xbf16, #tpu.memory_space<vmem>>, vector<1x1x20x32xbf16>,
    %c0_275 = arith.constant 0 : index
    %c13_276 = arith.constant 13 : index
    %c0_277 = arith.constant 0 : index
    %c0_278 = arith.constant 0 : index
    %236 = vector.load %arg1[%c0_275, %c13_276, %c0_277, %c0_278] : memref<1x21x21x64xbf16, #tpu.memory_space<vmem>>, vector<1x1x20x64xbf16>
    %237 = vector.shape_cast %236 : vector<1x1x20x64xbf16> to vector<20x64xbf16>
    %c0_279 = arith.constant 0 : index
    %c13_280 = arith.constant 13 : index
    %c1_281 = arith.constant 1 : index
    %c0_282 = arith.constant 0 : index
    %238 = vector.load %arg1[%c0_279, %c13_280, %c1_281, %c0_282] : memref<1x21x21x64xbf16, #tpu.memory_space<vmem>>, vector<1x1x20x64xbf16>
    %239 = vector.shape_cast %238 : vector<1x1x20x64xbf16> to vector<20x64xbf16>
    %c0_283 = arith.constant 0 : index
    %c14 = arith.constant 14 : index
    %c0_284 = arith.constant 0 : index
    %c0_285 = arith.constant 0 : index
    %240 = vector.load %arg1[%c0_283, %c14, %c0_284, %c0_285] : memref<1x21x21x64xbf16, #tpu.memory_space<vmem>>, vector<1x1x20x64xbf16>
    %241 = vector.shape_cast %240 : vector<1x1x20x64xbf16> to vector<20x64xbf16>
    %c0_286 = arith.constant 0 : index
    %c14_287 = arith.constant 14 : index
    %c1_288 = arith.constant 1 : index
    %c0_289 = arith.constant 0 : index
    %242 = vector.load %arg1[%c0_286, %c14_287, %c1_288, %c0_289] : memref<1x21x21x64xbf16, #tpu.memory_space<vmem>>, vector<1x1x20x64xbf16>
    %243 = vector.shape_cast %242 : vector<1x1x20x64xbf16> to vector<20x64xbf16>
    %244 = tpu.concatenate %237, %239, %241, %243 in 1 : vector<20x64xbf16>, vector<20x64xbf16>, vector<20x64xbf16>, vector<20x64xbf16> -> vector<20x256xbf16>
    %cst_290 = arith.constant dense<0.000000e+00> : vector<20x32xf32>
    %245 = tpu.matmul %244, %0, %cst_290 {dimension_numbers = #tpu.dot_dimension_numbers<[1], [0], [0], [1], [0, 0, 1, 1], [], []>} : vector<20x256xbf16>, vector<256x32xbf16>, vector<20x32xf32> -> vector<20x32xf32>
    %246 = vector.broadcast %1 : vector<1x32xf32> to vector<20x32xf32>
    %247 = arith.addf %245, %246 : vector<20x32xf32>
    %cst_291 = arith.constant 0.000000e+00 : f32
    %248 = vector.broadcast %cst_291 : f32 to vector<20x32xf32>
    %249 = arith.maximumf %247, %248 : vector<20x32xf32>
    %250 = arith.truncf %249 : vector<20x32xf32> to vector<20x32xbf16>
    %c0_292 = arith.constant 0 : index
    %c13_293 = arith.constant 13 : index
    %c0_294 = arith.constant 0 : index
    %c0_295 = arith.constant 0 : index
    %251 = vector.load %arg4[%c0_292, %c13_293, %c0_294, %c0_295] : memref<1x20x20x32xbf16, #tpu.memory_space<vmem>>, vector<1x1x20x32xbf16>
    %252 = vector.shape_cast %251 : vector<1x1x20x32xbf16> to vector<20x32xbf16>
    %253 = vector.shape_cast %250 : vector<20x32xbf16> to vector<1x1x20x32xbf16>
    tpu.vector_store %arg4[%c0_292, %c13_293, %c0_294, %c0_295], %253 {strides = array<i32>} : memref<1x20x20x32xbf16, #tpu.memory_space<vmem>>, vector<1x1x20x32xbf16>,
    %c0_296 = arith.constant 0 : index
    %c14_297 = arith.constant 14 : index
    %c0_298 = arith.constant 0 : index
    %c0_299 = arith.constant 0 : index
    %254 = vector.load %arg1[%c0_296, %c14_297, %c0_298, %c0_299] : memref<1x21x21x64xbf16, #tpu.memory_space<vmem>>, vector<1x1x20x64xbf16>
    %255 = vector.shape_cast %254 : vector<1x1x20x64xbf16> to vector<20x64xbf16>
    %c0_300 = arith.constant 0 : index
    %c14_301 = arith.constant 14 : index
    %c1_302 = arith.constant 1 : index
    %c0_303 = arith.constant 0 : index
    %256 = vector.load %arg1[%c0_300, %c14_301, %c1_302, %c0_303] : memref<1x21x21x64xbf16, #tpu.memory_space<vmem>>, vector<1x1x20x64xbf16>
    %257 = vector.shape_cast %256 : vector<1x1x20x64xbf16> to vector<20x64xbf16>
    %c0_304 = arith.constant 0 : index
    %c15 = arith.constant 15 : index
    %c0_305 = arith.constant 0 : index
    %c0_306 = arith.constant 0 : index
    %258 = vector.load %arg1[%c0_304, %c15, %c0_305, %c0_306] : memref<1x21x21x64xbf16, #tpu.memory_space<vmem>>, vector<1x1x20x64xbf16>
    %259 = vector.shape_cast %258 : vector<1x1x20x64xbf16> to vector<20x64xbf16>
    %c0_307 = arith.constant 0 : index
    %c15_308 = arith.constant 15 : index
    %c1_309 = arith.constant 1 : index
    %c0_310 = arith.constant 0 : index
    %260 = vector.load %arg1[%c0_307, %c15_308, %c1_309, %c0_310] : memref<1x21x21x64xbf16, #tpu.memory_space<vmem>>, vector<1x1x20x64xbf16>
    %261 = vector.shape_cast %260 : vector<1x1x20x64xbf16> to vector<20x64xbf16>
    %262 = tpu.concatenate %255, %257, %259, %261 in 1 : vector<20x64xbf16>, vector<20x64xbf16>, vector<20x64xbf16>, vector<20x64xbf16> -> vector<20x256xbf16>
    %cst_311 = arith.constant dense<0.000000e+00> : vector<20x32xf32>
    %263 = tpu.matmul %262, %0, %cst_311 {dimension_numbers = #tpu.dot_dimension_numbers<[1], [0], [0], [1], [0, 0, 1, 1], [], []>} : vector<20x256xbf16>, vector<256x32xbf16>, vector<20x32xf32> -> vector<20x32xf32>
    %264 = vector.broadcast %1 : vector<1x32xf32> to vector<20x32xf32>
    %265 = arith.addf %263, %264 : vector<20x32xf32>
    %cst_312 = arith.constant 0.000000e+00 : f32
    %266 = vector.broadcast %cst_312 : f32 to vector<20x32xf32>
    %267 = arith.maximumf %265, %266 : vector<20x32xf32>
    %268 = arith.truncf %267 : vector<20x32xf32> to vector<20x32xbf16>
    %c0_313 = arith.constant 0 : index
    %c14_314 = arith.constant 14 : index
    %c0_315 = arith.constant 0 : index
    %c0_316 = arith.constant 0 : index
    %269 = vector.load %arg4[%c0_313, %c14_314, %c0_315, %c0_316] : memref<1x20x20x32xbf16, #tpu.memory_space<vmem>>, vector<1x1x20x32xbf16>
    %270 = vector.shape_cast %269 : vector<1x1x20x32xbf16> to vector<20x32xbf16>
    %271 = vector.shape_cast %268 : vector<20x32xbf16> to vector<1x1x20x32xbf16>
    tpu.vector_store %arg4[%c0_313, %c14_314, %c0_315, %c0_316], %271 {strides = array<i32>} : memref<1x20x20x32xbf16, #tpu.memory_space<vmem>>, vector<1x1x20x32xbf16>,
    %c0_317 = arith.constant 0 : index
    %c15_318 = arith.constant 15 : index
    %c0_319 = arith.constant 0 : index
    %c0_320 = arith.constant 0 : index
    %272 = vector.load %arg1[%c0_317, %c15_318, %c0_319, %c0_320] : memref<1x21x21x64xbf16, #tpu.memory_space<vmem>>, vector<1x1x20x64xbf16>
    %273 = vector.shape_cast %272 : vector<1x1x20x64xbf16> to vector<20x64xbf16>
    %c0_321 = arith.constant 0 : index
    %c15_322 = arith.constant 15 : index
    %c1_323 = arith.constant 1 : index
    %c0_324 = arith.constant 0 : index
    %274 = vector.load %arg1[%c0_321, %c15_322, %c1_323, %c0_324] : memref<1x21x21x64xbf16, #tpu.memory_space<vmem>>, vector<1x1x20x64xbf16>
    %275 = vector.shape_cast %274 : vector<1x1x20x64xbf16> to vector<20x64xbf16>
    %c0_325 = arith.constant 0 : index
    %c16 = arith.constant 16 : index
    %c0_326 = arith.constant 0 : index
    %c0_327 = arith.constant 0 : index
    %276 = vector.load %arg1[%c0_325, %c16, %c0_326, %c0_327] : memref<1x21x21x64xbf16, #tpu.memory_space<vmem>>, vector<1x1x20x64xbf16>
    %277 = vector.shape_cast %276 : vector<1x1x20x64xbf16> to vector<20x64xbf16>
    %c0_328 = arith.constant 0 : index
    %c16_329 = arith.constant 16 : index
    %c1_330 = arith.constant 1 : index
    %c0_331 = arith.constant 0 : index
    %278 = vector.load %arg1[%c0_328, %c16_329, %c1_330, %c0_331] : memref<1x21x21x64xbf16, #tpu.memory_space<vmem>>, vector<1x1x20x64xbf16>
    %279 = vector.shape_cast %278 : vector<1x1x20x64xbf16> to vector<20x64xbf16>
    %280 = tpu.concatenate %273, %275, %277, %279 in 1 : vector<20x64xbf16>, vector<20x64xbf16>, vector<20x64xbf16>, vector<20x64xbf16> -> vector<20x256xbf16>
    %cst_332 = arith.constant dense<0.000000e+00> : vector<20x32xf32>
    %281 = tpu.matmul %280, %0, %cst_332 {dimension_numbers = #tpu.dot_dimension_numbers<[1], [0], [0], [1], [0, 0, 1, 1], [], []>} : vector<20x256xbf16>, vector<256x32xbf16>, vector<20x32xf32> -> vector<20x32xf32>
    %282 = vector.broadcast %1 : vector<1x32xf32> to vector<20x32xf32>
    %283 = arith.addf %281, %282 : vector<20x32xf32>
    %cst_333 = arith.constant 0.000000e+00 : f32
    %284 = vector.broadcast %cst_333 : f32 to vector<20x32xf32>
    %285 = arith.maximumf %283, %284 : vector<20x32xf32>
    %286 = arith.truncf %285 : vector<20x32xf32> to vector<20x32xbf16>
    %c0_334 = arith.constant 0 : index
    %c15_335 = arith.constant 15 : index
    %c0_336 = arith.constant 0 : index
    %c0_337 = arith.constant 0 : index
    %287 = vector.load %arg4[%c0_334, %c15_335, %c0_336, %c0_337] : memref<1x20x20x32xbf16, #tpu.memory_space<vmem>>, vector<1x1x20x32xbf16>
    %288 = vector.shape_cast %287 : vector<1x1x20x32xbf16> to vector<20x32xbf16>
    %289 = vector.shape_cast %286 : vector<20x32xbf16> to vector<1x1x20x32xbf16>
    tpu.vector_store %arg4[%c0_334, %c15_335, %c0_336, %c0_337], %289 {strides = array<i32>} : memref<1x20x20x32xbf16, #tpu.memory_space<vmem>>, vector<1x1x20x32xbf16>,
    %c0_338 = arith.constant 0 : index
    %c16_339 = arith.constant 16 : index
    %c0_340 = arith.constant 0 : index
    %c0_341 = arith.constant 0 : index
    %290 = vector.load %arg1[%c0_338, %c16_339, %c0_340, %c0_341] : memref<1x21x21x64xbf16, #tpu.memory_space<vmem>>, vector<1x1x20x64xbf16>
    %291 = vector.shape_cast %290 : vector<1x1x20x64xbf16> to vector<20x64xbf16>
    %c0_342 = arith.constant 0 : index
    %c16_343 = arith.constant 16 : index
    %c1_344 = arith.constant 1 : index
    %c0_345 = arith.constant 0 : index
    %292 = vector.load %arg1[%c0_342, %c16_343, %c1_344, %c0_345] : memref<1x21x21x64xbf16, #tpu.memory_space<vmem>>, vector<1x1x20x64xbf16>
    %293 = vector.shape_cast %292 : vector<1x1x20x64xbf16> to vector<20x64xbf16>
    %c0_346 = arith.constant 0 : index
    %c17 = arith.constant 17 : index
    %c0_347 = arith.constant 0 : index
    %c0_348 = arith.constant 0 : index
    %294 = vector.load %arg1[%c0_346, %c17, %c0_347, %c0_348] : memref<1x21x21x64xbf16, #tpu.memory_space<vmem>>, vector<1x1x20x64xbf16>
    %295 = vector.shape_cast %294 : vector<1x1x20x64xbf16> to vector<20x64xbf16>
    %c0_349 = arith.constant 0 : index
    %c17_350 = arith.constant 17 : index
    %c1_351 = arith.constant 1 : index
    %c0_352 = arith.constant 0 : index
    %296 = vector.load %arg1[%c0_349, %c17_350, %c1_351, %c0_352] : memref<1x21x21x64xbf16, #tpu.memory_space<vmem>>, vector<1x1x20x64xbf16>
    %297 = vector.shape_cast %296 : vector<1x1x20x64xbf16> to vector<20x64xbf16>
    %298 = tpu.concatenate %291, %293, %295, %297 in 1 : vector<20x64xbf16>, vector<20x64xbf16>, vector<20x64xbf16>, vector<20x64xbf16> -> vector<20x256xbf16>
    %cst_353 = arith.constant dense<0.000000e+00> : vector<20x32xf32>
    %299 = tpu.matmul %298, %0, %cst_353 {dimension_numbers = #tpu.dot_dimension_numbers<[1], [0], [0], [1], [0, 0, 1, 1], [], []>} : vector<20x256xbf16>, vector<256x32xbf16>, vector<20x32xf32> -> vector<20x32xf32>
    %300 = vector.broadcast %1 : vector<1x32xf32> to vector<20x32xf32>
    %301 = arith.addf %299, %300 : vector<20x32xf32>
    %cst_354 = arith.constant 0.000000e+00 : f32
    %302 = vector.broadcast %cst_354 : f32 to vector<20x32xf32>
    %303 = arith.maximumf %301, %302 : vector<20x32xf32>
    %304 = arith.truncf %303 : vector<20x32xf32> to vector<20x32xbf16>
    %c0_355 = arith.constant 0 : index
    %c16_356 = arith.constant 16 : index
    %c0_357 = arith.constant 0 : index
    %c0_358 = arith.constant 0 : index
    %305 = vector.load %arg4[%c0_355, %c16_356, %c0_357, %c0_358] : memref<1x20x20x32xbf16, #tpu.memory_space<vmem>>, vector<1x1x20x32xbf16>
    %306 = vector.shape_cast %305 : vector<1x1x20x32xbf16> to vector<20x32xbf16>
    %307 = vector.shape_cast %304 : vector<20x32xbf16> to vector<1x1x20x32xbf16>
    tpu.vector_store %arg4[%c0_355, %c16_356, %c0_357, %c0_358], %307 {strides = array<i32>} : memref<1x20x20x32xbf16, #tpu.memory_space<vmem>>, vector<1x1x20x32xbf16>,
    %c0_359 = arith.constant 0 : index
    %c17_360 = arith.constant 17 : index
    %c0_361 = arith.constant 0 : index
    %c0_362 = arith.constant 0 : index
    %308 = vector.load %arg1[%c0_359, %c17_360, %c0_361, %c0_362] : memref<1x21x21x64xbf16, #tpu.memory_space<vmem>>, vector<1x1x20x64xbf16>
    %309 = vector.shape_cast %308 : vector<1x1x20x64xbf16> to vector<20x64xbf16>
    %c0_363 = arith.constant 0 : index
    %c17_364 = arith.constant 17 : index
    %c1_365 = arith.constant 1 : index
    %c0_366 = arith.constant 0 : index
    %310 = vector.load %arg1[%c0_363, %c17_364, %c1_365, %c0_366] : memref<1x21x21x64xbf16, #tpu.memory_space<vmem>>, vector<1x1x20x64xbf16>
    %311 = vector.shape_cast %310 : vector<1x1x20x64xbf16> to vector<20x64xbf16>
    %c0_367 = arith.constant 0 : index
    %c18 = arith.constant 18 : index
    %c0_368 = arith.constant 0 : index
    %c0_369 = arith.constant 0 : index
    %312 = vector.load %arg1[%c0_367, %c18, %c0_368, %c0_369] : memref<1x21x21x64xbf16, #tpu.memory_space<vmem>>, vector<1x1x20x64xbf16>
    %313 = vector.shape_cast %312 : vector<1x1x20x64xbf16> to vector<20x64xbf16>
    %c0_370 = arith.constant 0 : index
    %c18_371 = arith.constant 18 : index
    %c1_372 = arith.constant 1 : index
    %c0_373 = arith.constant 0 : index
    %314 = vector.load %arg1[%c0_370, %c18_371, %c1_372, %c0_373] : memref<1x21x21x64xbf16, #tpu.memory_space<vmem>>, vector<1x1x20x64xbf16>
    %315 = vector.shape_cast %314 : vector<1x1x20x64xbf16> to vector<20x64xbf16>
    %316 = tpu.concatenate %309, %311, %313, %315 in 1 : vector<20x64xbf16>, vector<20x64xbf16>, vector<20x64xbf16>, vector<20x64xbf16> -> vector<20x256xbf16>
    %cst_374 = arith.constant dense<0.000000e+00> : vector<20x32xf32>
    %317 = tpu.matmul %316, %0, %cst_374 {dimension_numbers = #tpu.dot_dimension_numbers<[1], [0], [0], [1], [0, 0, 1, 1], [], []>} : vector<20x256xbf16>, vector<256x32xbf16>, vector<20x32xf32> -> vector<20x32xf32>
    %318 = vector.broadcast %1 : vector<1x32xf32> to vector<20x32xf32>
    %319 = arith.addf %317, %318 : vector<20x32xf32>
    %cst_375 = arith.constant 0.000000e+00 : f32
    %320 = vector.broadcast %cst_375 : f32 to vector<20x32xf32>
    %321 = arith.maximumf %319, %320 : vector<20x32xf32>
    %322 = arith.truncf %321 : vector<20x32xf32> to vector<20x32xbf16>
    %c0_376 = arith.constant 0 : index
    %c17_377 = arith.constant 17 : index
    %c0_378 = arith.constant 0 : index
    %c0_379 = arith.constant 0 : index
    %323 = vector.load %arg4[%c0_376, %c17_377, %c0_378, %c0_379] : memref<1x20x20x32xbf16, #tpu.memory_space<vmem>>, vector<1x1x20x32xbf16>
    %324 = vector.shape_cast %323 : vector<1x1x20x32xbf16> to vector<20x32xbf16>
    %325 = vector.shape_cast %322 : vector<20x32xbf16> to vector<1x1x20x32xbf16>
    tpu.vector_store %arg4[%c0_376, %c17_377, %c0_378, %c0_379], %325 {strides = array<i32>} : memref<1x20x20x32xbf16, #tpu.memory_space<vmem>>, vector<1x1x20x32xbf16>,
    %c0_380 = arith.constant 0 : index
    %c18_381 = arith.constant 18 : index
    %c0_382 = arith.constant 0 : index
    %c0_383 = arith.constant 0 : index
    %326 = vector.load %arg1[%c0_380, %c18_381, %c0_382, %c0_383] : memref<1x21x21x64xbf16, #tpu.memory_space<vmem>>, vector<1x1x20x64xbf16>
    %327 = vector.shape_cast %326 : vector<1x1x20x64xbf16> to vector<20x64xbf16>
    %c0_384 = arith.constant 0 : index
    %c18_385 = arith.constant 18 : index
    %c1_386 = arith.constant 1 : index
    %c0_387 = arith.constant 0 : index
    %328 = vector.load %arg1[%c0_384, %c18_385, %c1_386, %c0_387] : memref<1x21x21x64xbf16, #tpu.memory_space<vmem>>, vector<1x1x20x64xbf16>
    %329 = vector.shape_cast %328 : vector<1x1x20x64xbf16> to vector<20x64xbf16>
    %c0_388 = arith.constant 0 : index
    %c19 = arith.constant 19 : index
    %c0_389 = arith.constant 0 : index
    %c0_390 = arith.constant 0 : index
    %330 = vector.load %arg1[%c0_388, %c19, %c0_389, %c0_390] : memref<1x21x21x64xbf16, #tpu.memory_space<vmem>>, vector<1x1x20x64xbf16>
    %331 = vector.shape_cast %330 : vector<1x1x20x64xbf16> to vector<20x64xbf16>
    %c0_391 = arith.constant 0 : index
    %c19_392 = arith.constant 19 : index
    %c1_393 = arith.constant 1 : index
    %c0_394 = arith.constant 0 : index
    %332 = vector.load %arg1[%c0_391, %c19_392, %c1_393, %c0_394] : memref<1x21x21x64xbf16, #tpu.memory_space<vmem>>, vector<1x1x20x64xbf16>
    %333 = vector.shape_cast %332 : vector<1x1x20x64xbf16> to vector<20x64xbf16>
    %334 = tpu.concatenate %327, %329, %331, %333 in 1 : vector<20x64xbf16>, vector<20x64xbf16>, vector<20x64xbf16>, vector<20x64xbf16> -> vector<20x256xbf16>
    %cst_395 = arith.constant dense<0.000000e+00> : vector<20x32xf32>
    %335 = tpu.matmul %334, %0, %cst_395 {dimension_numbers = #tpu.dot_dimension_numbers<[1], [0], [0], [1], [0, 0, 1, 1], [], []>} : vector<20x256xbf16>, vector<256x32xbf16>, vector<20x32xf32> -> vector<20x32xf32>
    %336 = vector.broadcast %1 : vector<1x32xf32> to vector<20x32xf32>
    %337 = arith.addf %335, %336 : vector<20x32xf32>
    %cst_396 = arith.constant 0.000000e+00 : f32
    %338 = vector.broadcast %cst_396 : f32 to vector<20x32xf32>
    %339 = arith.maximumf %337, %338 : vector<20x32xf32>
    %340 = arith.truncf %339 : vector<20x32xf32> to vector<20x32xbf16>
    %c0_397 = arith.constant 0 : index
    %c18_398 = arith.constant 18 : index
    %c0_399 = arith.constant 0 : index
    %c0_400 = arith.constant 0 : index
    %341 = vector.load %arg4[%c0_397, %c18_398, %c0_399, %c0_400] : memref<1x20x20x32xbf16, #tpu.memory_space<vmem>>, vector<1x1x20x32xbf16>
    %342 = vector.shape_cast %341 : vector<1x1x20x32xbf16> to vector<20x32xbf16>
    %343 = vector.shape_cast %340 : vector<20x32xbf16> to vector<1x1x20x32xbf16>
    tpu.vector_store %arg4[%c0_397, %c18_398, %c0_399, %c0_400], %343 {strides = array<i32>} : memref<1x20x20x32xbf16, #tpu.memory_space<vmem>>, vector<1x1x20x32xbf16>,
    %c0_401 = arith.constant 0 : index
    %c19_402 = arith.constant 19 : index
    %c0_403 = arith.constant 0 : index
    %c0_404 = arith.constant 0 : index
    %344 = vector.load %arg1[%c0_401, %c19_402, %c0_403, %c0_404] : memref<1x21x21x64xbf16, #tpu.memory_space<vmem>>, vector<1x1x20x64xbf16>
    %345 = vector.shape_cast %344 : vector<1x1x20x64xbf16> to vector<20x64xbf16>
    %c0_405 = arith.constant 0 : index
    %c19_406 = arith.constant 19 : index
    %c1_407 = arith.constant 1 : index
    %c0_408 = arith.constant 0 : index
    %346 = vector.load %arg1[%c0_405, %c19_406, %c1_407, %c0_408] : memref<1x21x21x64xbf16, #tpu.memory_space<vmem>>, vector<1x1x20x64xbf16>
    %347 = vector.shape_cast %346 : vector<1x1x20x64xbf16> to vector<20x64xbf16>
    %c0_409 = arith.constant 0 : index
    %c20 = arith.constant 20 : index
    %c0_410 = arith.constant 0 : index
    %c0_411 = arith.constant 0 : index
    %348 = vector.load %arg1[%c0_409, %c20, %c0_410, %c0_411] : memref<1x21x21x64xbf16, #tpu.memory_space<vmem>>, vector<1x1x20x64xbf16>
    %349 = vector.shape_cast %348 : vector<1x1x20x64xbf16> to vector<20x64xbf16>
    %c0_412 = arith.constant 0 : index
    %c20_413 = arith.constant 20 : index
    %c1_414 = arith.constant 1 : index
    %c0_415 = arith.constant 0 : index
    %350 = vector.load %arg1[%c0_412, %c20_413, %c1_414, %c0_415] : memref<1x21x21x64xbf16, #tpu.memory_space<vmem>>, vector<1x1x20x64xbf16>
    %351 = vector.shape_cast %350 : vector<1x1x20x64xbf16> to vector<20x64xbf16>
    %352 = tpu.concatenate %345, %347, %349, %351 in 1 : vector<20x64xbf16>, vector<20x64xbf16>, vector<20x64xbf16>, vector<20x64xbf16> -> vector<20x256xbf16>
    %cst_416 = arith.constant dense<0.000000e+00> : vector<20x32xf32>
    %353 = tpu.matmul %352, %0, %cst_416 {dimension_numbers = #tpu.dot_dimension_numbers<[1], [0], [0], [1], [0, 0, 1, 1], [], []>} : vector<20x256xbf16>, vector<256x32xbf16>, vector<20x32xf32> -> vector<20x32xf32>
    %354 = vector.broadcast %1 : vector<1x32xf32> to vector<20x32xf32>
    %355 = arith.addf %353, %354 : vector<20x32xf32>
    %cst_417 = arith.constant 0.000000e+00 : f32
    %356 = vector.broadcast %cst_417 : f32 to vector<20x32xf32>
    %357 = arith.maximumf %355, %356 : vector<20x32xf32>
    %358 = arith.truncf %357 : vector<20x32xf32> to vector<20x32xbf16>
    %c0_418 = arith.constant 0 : index
    %c19_419 = arith.constant 19 : index
    %c0_420 = arith.constant 0 : index
    %c0_421 = arith.constant 0 : index
    %359 = vector.load %arg4[%c0_418, %c19_419, %c0_420, %c0_421] : memref<1x20x20x32xbf16, #tpu.memory_space<vmem>>, vector<1x1x20x32xbf16>
    %360 = vector.shape_cast %359 : vector<1x1x20x32xbf16> to vector<20x32xbf16>
    %361 = vector.shape_cast %358 : vector<20x32xbf16> to vector<1x1x20x32xbf16>
    tpu.vector_store %arg4[%c0_418, %c19_419, %c0_420, %c0_421], %361 {strides = array<i32>} : memref<1x20x20x32xbf16, #tpu.memory_space<vmem>>, vector<1x1x20x32xbf16>,
    return
  }
  func.func @transform_0(%arg0: i32) -> (i32, i32, i32, i32) {
    %c0_i32 = arith.constant 0 : i32
    %c0_i32_0 = arith.constant 0 : i32
    %c0_i32_1 = arith.constant 0 : i32
    %c0_i32_2 = arith.constant 0 : i32
    return %arg0, %c0_i32, %c0_i32_0, %c0_i32_1 : i32, i32, i32, i32
  }
  func.func @transform_1(%arg0: i32) -> (i32, i32) {
    %c0_i32 = arith.constant 0 : i32
    %c0_i32_0 = arith.constant 0 : i32
    %c0_i32_1 = arith.constant 0 : i32
    return %c0_i32, %c0_i32_0 : i32, i32
  }
  func.func @transform_2(%arg0: i32) -> (i32, i32) {
    %c0_i32 = arith.constant 0 : i32
    %c0_i32_0 = arith.constant 0 : i32
    %c0_i32_1 = arith.constant 0 : i32
    return %c0_i32, %c0_i32_0 : i32, i32
  }
  func.func @transform_3(%arg0: i32) -> (i32, i32, i32, i32) {
    %c0_i32 = arith.constant 0 : i32
    %c0_i32_0 = arith.constant 0 : i32
    %c0_i32_1 = arith.constant 0 : i32
    %c0_i32_2 = arith.constant 0 : i32
    return %arg0, %c0_i32, %c0_i32_0, %c0_i32_1 : i32, i32, i32, i32
  }
}

module attributes {stable_mosaic.version = 11 : i64} {
  func.func @_conv_kernel(%arg0: i32, %arg1: memref<1x10x10x128xbf16, #tpu.memory_space<vmem>>, %arg2: memref<512x64xbf16, #tpu.memory_space<vmem>>, %arg3: memref<1x64xf32, #tpu.memory_space<vmem>>, %arg4: memref<1x9x9x64xbf16, #tpu.memory_space<vmem>>) attributes {dimension_semantics = [#tpu.dimension_semantics<parallel>], iteration_bounds = array<i64: 2>, scalar_prefetch = 0 : i64, scratch_operands = 0 : i64, tpu.core_type = #tpu.core_type<tc>, window_params = [{transform_indices = @transform_0, window_bounds = array<i64: 1, 10, 10, 128>}, {pipeline_mode = #tpu.pipeline_mode<synchronous>, transform_indices = @transform_1, window_bounds = array<i64: 512, 64>}, {pipeline_mode = #tpu.pipeline_mode<synchronous>, transform_indices = @transform_2, window_bounds = array<i64: 1, 64>}, {transform_indices = @transform_3, window_bounds = array<i64: 1, 9, 9, 64>}]} {
    %c0 = arith.constant 0 : index
    %c0_0 = arith.constant 0 : index
    %0 = vector.load %arg2[%c0, %c0_0] : memref<512x64xbf16, #tpu.memory_space<vmem>>, vector<512x64xbf16>
    %c0_1 = arith.constant 0 : index
    %c0_2 = arith.constant 0 : index
    %1 = vector.load %arg3[%c0_1, %c0_2] : memref<1x64xf32, #tpu.memory_space<vmem>>, vector<1x64xf32>
    %c0_3 = arith.constant 0 : index
    %c0_4 = arith.constant 0 : index
    %c0_5 = arith.constant 0 : index
    %c0_6 = arith.constant 0 : index
    %2 = vector.load %arg1[%c0_3, %c0_4, %c0_5, %c0_6] : memref<1x10x10x128xbf16, #tpu.memory_space<vmem>>, vector<1x1x9x128xbf16>
    %3 = vector.shape_cast %2 : vector<1x1x9x128xbf16> to vector<9x128xbf16>
    %c0_7 = arith.constant 0 : index
    %c0_8 = arith.constant 0 : index
    %c1 = arith.constant 1 : index
    %c0_9 = arith.constant 0 : index
    %4 = vector.load %arg1[%c0_7, %c0_8, %c1, %c0_9] : memref<1x10x10x128xbf16, #tpu.memory_space<vmem>>, vector<1x1x9x128xbf16>
    %5 = vector.shape_cast %4 : vector<1x1x9x128xbf16> to vector<9x128xbf16>
    %c0_10 = arith.constant 0 : index
    %c1_11 = arith.constant 1 : index
    %c0_12 = arith.constant 0 : index
    %c0_13 = arith.constant 0 : index
    %6 = vector.load %arg1[%c0_10, %c1_11, %c0_12, %c0_13] : memref<1x10x10x128xbf16, #tpu.memory_space<vmem>>, vector<1x1x9x128xbf16>
    %7 = vector.shape_cast %6 : vector<1x1x9x128xbf16> to vector<9x128xbf16>
    %c0_14 = arith.constant 0 : index
    %c1_15 = arith.constant 1 : index
    %c1_16 = arith.constant 1 : index
    %c0_17 = arith.constant 0 : index
    %8 = vector.load %arg1[%c0_14, %c1_15, %c1_16, %c0_17] : memref<1x10x10x128xbf16, #tpu.memory_space<vmem>>, vector<1x1x9x128xbf16>
    %9 = vector.shape_cast %8 : vector<1x1x9x128xbf16> to vector<9x128xbf16>
    %10 = tpu.concatenate %3, %5, %7, %9 in 1 : vector<9x128xbf16>, vector<9x128xbf16>, vector<9x128xbf16>, vector<9x128xbf16> -> vector<9x512xbf16>
    %cst = arith.constant dense<0.000000e+00> : vector<9x64xf32>
    %11 = tpu.matmul %10, %0, %cst {dimension_numbers = #tpu.dot_dimension_numbers<[1], [0], [0], [1], [0, 0, 1, 1], [], []>} : vector<9x512xbf16>, vector<512x64xbf16>, vector<9x64xf32> -> vector<9x64xf32>
    %12 = vector.broadcast %1 : vector<1x64xf32> to vector<9x64xf32>
    %13 = arith.addf %11, %12 : vector<9x64xf32>
    %cst_18 = arith.constant 0.000000e+00 : f32
    %14 = vector.broadcast %cst_18 : f32 to vector<9x64xf32>
    %15 = arith.maximumf %13, %14 : vector<9x64xf32>
    %16 = arith.truncf %15 : vector<9x64xf32> to vector<9x64xbf16>
    %c0_19 = arith.constant 0 : index
    %c0_20 = arith.constant 0 : index
    %c0_21 = arith.constant 0 : index
    %c0_22 = arith.constant 0 : index
    %17 = vector.load %arg4[%c0_19, %c0_20, %c0_21, %c0_22] : memref<1x9x9x64xbf16, #tpu.memory_space<vmem>>, vector<1x1x9x64xbf16>
    %18 = vector.shape_cast %17 : vector<1x1x9x64xbf16> to vector<9x64xbf16>
    %19 = vector.shape_cast %16 : vector<9x64xbf16> to vector<1x1x9x64xbf16>
    tpu.vector_store %arg4[%c0_19, %c0_20, %c0_21, %c0_22], %19 {strides = array<i32>} : memref<1x9x9x64xbf16, #tpu.memory_space<vmem>>, vector<1x1x9x64xbf16>,
    %c0_23 = arith.constant 0 : index
    %c1_24 = arith.constant 1 : index
    %c0_25 = arith.constant 0 : index
    %c0_26 = arith.constant 0 : index
    %20 = vector.load %arg1[%c0_23, %c1_24, %c0_25, %c0_26] : memref<1x10x10x128xbf16, #tpu.memory_space<vmem>>, vector<1x1x9x128xbf16>
    %21 = vector.shape_cast %20 : vector<1x1x9x128xbf16> to vector<9x128xbf16>
    %c0_27 = arith.constant 0 : index
    %c1_28 = arith.constant 1 : index
    %c1_29 = arith.constant 1 : index
    %c0_30 = arith.constant 0 : index
    %22 = vector.load %arg1[%c0_27, %c1_28, %c1_29, %c0_30] : memref<1x10x10x128xbf16, #tpu.memory_space<vmem>>, vector<1x1x9x128xbf16>
    %23 = vector.shape_cast %22 : vector<1x1x9x128xbf16> to vector<9x128xbf16>
    %c0_31 = arith.constant 0 : index
    %c2 = arith.constant 2 : index
    %c0_32 = arith.constant 0 : index
    %c0_33 = arith.constant 0 : index
    %24 = vector.load %arg1[%c0_31, %c2, %c0_32, %c0_33] : memref<1x10x10x128xbf16, #tpu.memory_space<vmem>>, vector<1x1x9x128xbf16>
    %25 = vector.shape_cast %24 : vector<1x1x9x128xbf16> to vector<9x128xbf16>
    %c0_34 = arith.constant 0 : index
    %c2_35 = arith.constant 2 : index
    %c1_36 = arith.constant 1 : index
    %c0_37 = arith.constant 0 : index
    %26 = vector.load %arg1[%c0_34, %c2_35, %c1_36, %c0_37] : memref<1x10x10x128xbf16, #tpu.memory_space<vmem>>, vector<1x1x9x128xbf16>
    %27 = vector.shape_cast %26 : vector<1x1x9x128xbf16> to vector<9x128xbf16>
    %28 = tpu.concatenate %21, %23, %25, %27 in 1 : vector<9x128xbf16>, vector<9x128xbf16>, vector<9x128xbf16>, vector<9x128xbf16> -> vector<9x512xbf16>
    %cst_38 = arith.constant dense<0.000000e+00> : vector<9x64xf32>
    %29 = tpu.matmul %28, %0, %cst_38 {dimension_numbers = #tpu.dot_dimension_numbers<[1], [0], [0], [1], [0, 0, 1, 1], [], []>} : vector<9x512xbf16>, vector<512x64xbf16>, vector<9x64xf32> -> vector<9x64xf32>
    %30 = vector.broadcast %1 : vector<1x64xf32> to vector<9x64xf32>
    %31 = arith.addf %29, %30 : vector<9x64xf32>
    %cst_39 = arith.constant 0.000000e+00 : f32
    %32 = vector.broadcast %cst_39 : f32 to vector<9x64xf32>
    %33 = arith.maximumf %31, %32 : vector<9x64xf32>
    %34 = arith.truncf %33 : vector<9x64xf32> to vector<9x64xbf16>
    %c0_40 = arith.constant 0 : index
    %c1_41 = arith.constant 1 : index
    %c0_42 = arith.constant 0 : index
    %c0_43 = arith.constant 0 : index
    %35 = vector.load %arg4[%c0_40, %c1_41, %c0_42, %c0_43] : memref<1x9x9x64xbf16, #tpu.memory_space<vmem>>, vector<1x1x9x64xbf16>
    %36 = vector.shape_cast %35 : vector<1x1x9x64xbf16> to vector<9x64xbf16>
    %37 = vector.shape_cast %34 : vector<9x64xbf16> to vector<1x1x9x64xbf16>
    tpu.vector_store %arg4[%c0_40, %c1_41, %c0_42, %c0_43], %37 {strides = array<i32>} : memref<1x9x9x64xbf16, #tpu.memory_space<vmem>>, vector<1x1x9x64xbf16>,
    %c0_44 = arith.constant 0 : index
    %c2_45 = arith.constant 2 : index
    %c0_46 = arith.constant 0 : index
    %c0_47 = arith.constant 0 : index
    %38 = vector.load %arg1[%c0_44, %c2_45, %c0_46, %c0_47] : memref<1x10x10x128xbf16, #tpu.memory_space<vmem>>, vector<1x1x9x128xbf16>
    %39 = vector.shape_cast %38 : vector<1x1x9x128xbf16> to vector<9x128xbf16>
    %c0_48 = arith.constant 0 : index
    %c2_49 = arith.constant 2 : index
    %c1_50 = arith.constant 1 : index
    %c0_51 = arith.constant 0 : index
    %40 = vector.load %arg1[%c0_48, %c2_49, %c1_50, %c0_51] : memref<1x10x10x128xbf16, #tpu.memory_space<vmem>>, vector<1x1x9x128xbf16>
    %41 = vector.shape_cast %40 : vector<1x1x9x128xbf16> to vector<9x128xbf16>
    %c0_52 = arith.constant 0 : index
    %c3 = arith.constant 3 : index
    %c0_53 = arith.constant 0 : index
    %c0_54 = arith.constant 0 : index
    %42 = vector.load %arg1[%c0_52, %c3, %c0_53, %c0_54] : memref<1x10x10x128xbf16, #tpu.memory_space<vmem>>, vector<1x1x9x128xbf16>
    %43 = vector.shape_cast %42 : vector<1x1x9x128xbf16> to vector<9x128xbf16>
    %c0_55 = arith.constant 0 : index
    %c3_56 = arith.constant 3 : index
    %c1_57 = arith.constant 1 : index
    %c0_58 = arith.constant 0 : index
    %44 = vector.load %arg1[%c0_55, %c3_56, %c1_57, %c0_58] : memref<1x10x10x128xbf16, #tpu.memory_space<vmem>>, vector<1x1x9x128xbf16>
    %45 = vector.shape_cast %44 : vector<1x1x9x128xbf16> to vector<9x128xbf16>
    %46 = tpu.concatenate %39, %41, %43, %45 in 1 : vector<9x128xbf16>, vector<9x128xbf16>, vector<9x128xbf16>, vector<9x128xbf16> -> vector<9x512xbf16>
    %cst_59 = arith.constant dense<0.000000e+00> : vector<9x64xf32>
    %47 = tpu.matmul %46, %0, %cst_59 {dimension_numbers = #tpu.dot_dimension_numbers<[1], [0], [0], [1], [0, 0, 1, 1], [], []>} : vector<9x512xbf16>, vector<512x64xbf16>, vector<9x64xf32> -> vector<9x64xf32>
    %48 = vector.broadcast %1 : vector<1x64xf32> to vector<9x64xf32>
    %49 = arith.addf %47, %48 : vector<9x64xf32>
    %cst_60 = arith.constant 0.000000e+00 : f32
    %50 = vector.broadcast %cst_60 : f32 to vector<9x64xf32>
    %51 = arith.maximumf %49, %50 : vector<9x64xf32>
    %52 = arith.truncf %51 : vector<9x64xf32> to vector<9x64xbf16>
    %c0_61 = arith.constant 0 : index
    %c2_62 = arith.constant 2 : index
    %c0_63 = arith.constant 0 : index
    %c0_64 = arith.constant 0 : index
    %53 = vector.load %arg4[%c0_61, %c2_62, %c0_63, %c0_64] : memref<1x9x9x64xbf16, #tpu.memory_space<vmem>>, vector<1x1x9x64xbf16>
    %54 = vector.shape_cast %53 : vector<1x1x9x64xbf16> to vector<9x64xbf16>
    %55 = vector.shape_cast %52 : vector<9x64xbf16> to vector<1x1x9x64xbf16>
    tpu.vector_store %arg4[%c0_61, %c2_62, %c0_63, %c0_64], %55 {strides = array<i32>} : memref<1x9x9x64xbf16, #tpu.memory_space<vmem>>, vector<1x1x9x64xbf16>,
    %c0_65 = arith.constant 0 : index
    %c3_66 = arith.constant 3 : index
    %c0_67 = arith.constant 0 : index
    %c0_68 = arith.constant 0 : index
    %56 = vector.load %arg1[%c0_65, %c3_66, %c0_67, %c0_68] : memref<1x10x10x128xbf16, #tpu.memory_space<vmem>>, vector<1x1x9x128xbf16>
    %57 = vector.shape_cast %56 : vector<1x1x9x128xbf16> to vector<9x128xbf16>
    %c0_69 = arith.constant 0 : index
    %c3_70 = arith.constant 3 : index
    %c1_71 = arith.constant 1 : index
    %c0_72 = arith.constant 0 : index
    %58 = vector.load %arg1[%c0_69, %c3_70, %c1_71, %c0_72] : memref<1x10x10x128xbf16, #tpu.memory_space<vmem>>, vector<1x1x9x128xbf16>
    %59 = vector.shape_cast %58 : vector<1x1x9x128xbf16> to vector<9x128xbf16>
    %c0_73 = arith.constant 0 : index
    %c4 = arith.constant 4 : index
    %c0_74 = arith.constant 0 : index
    %c0_75 = arith.constant 0 : index
    %60 = vector.load %arg1[%c0_73, %c4, %c0_74, %c0_75] : memref<1x10x10x128xbf16, #tpu.memory_space<vmem>>, vector<1x1x9x128xbf16>
    %61 = vector.shape_cast %60 : vector<1x1x9x128xbf16> to vector<9x128xbf16>
    %c0_76 = arith.constant 0 : index
    %c4_77 = arith.constant 4 : index
    %c1_78 = arith.constant 1 : index
    %c0_79 = arith.constant 0 : index
    %62 = vector.load %arg1[%c0_76, %c4_77, %c1_78, %c0_79] : memref<1x10x10x128xbf16, #tpu.memory_space<vmem>>, vector<1x1x9x128xbf16>
    %63 = vector.shape_cast %62 : vector<1x1x9x128xbf16> to vector<9x128xbf16>
    %64 = tpu.concatenate %57, %59, %61, %63 in 1 : vector<9x128xbf16>, vector<9x128xbf16>, vector<9x128xbf16>, vector<9x128xbf16> -> vector<9x512xbf16>
    %cst_80 = arith.constant dense<0.000000e+00> : vector<9x64xf32>
    %65 = tpu.matmul %64, %0, %cst_80 {dimension_numbers = #tpu.dot_dimension_numbers<[1], [0], [0], [1], [0, 0, 1, 1], [], []>} : vector<9x512xbf16>, vector<512x64xbf16>, vector<9x64xf32> -> vector<9x64xf32>
    %66 = vector.broadcast %1 : vector<1x64xf32> to vector<9x64xf32>
    %67 = arith.addf %65, %66 : vector<9x64xf32>
    %cst_81 = arith.constant 0.000000e+00 : f32
    %68 = vector.broadcast %cst_81 : f32 to vector<9x64xf32>
    %69 = arith.maximumf %67, %68 : vector<9x64xf32>
    %70 = arith.truncf %69 : vector<9x64xf32> to vector<9x64xbf16>
    %c0_82 = arith.constant 0 : index
    %c3_83 = arith.constant 3 : index
    %c0_84 = arith.constant 0 : index
    %c0_85 = arith.constant 0 : index
    %71 = vector.load %arg4[%c0_82, %c3_83, %c0_84, %c0_85] : memref<1x9x9x64xbf16, #tpu.memory_space<vmem>>, vector<1x1x9x64xbf16>
    %72 = vector.shape_cast %71 : vector<1x1x9x64xbf16> to vector<9x64xbf16>
    %73 = vector.shape_cast %70 : vector<9x64xbf16> to vector<1x1x9x64xbf16>
    tpu.vector_store %arg4[%c0_82, %c3_83, %c0_84, %c0_85], %73 {strides = array<i32>} : memref<1x9x9x64xbf16, #tpu.memory_space<vmem>>, vector<1x1x9x64xbf16>,
    %c0_86 = arith.constant 0 : index
    %c4_87 = arith.constant 4 : index
    %c0_88 = arith.constant 0 : index
    %c0_89 = arith.constant 0 : index
    %74 = vector.load %arg1[%c0_86, %c4_87, %c0_88, %c0_89] : memref<1x10x10x128xbf16, #tpu.memory_space<vmem>>, vector<1x1x9x128xbf16>
    %75 = vector.shape_cast %74 : vector<1x1x9x128xbf16> to vector<9x128xbf16>
    %c0_90 = arith.constant 0 : index
    %c4_91 = arith.constant 4 : index
    %c1_92 = arith.constant 1 : index
    %c0_93 = arith.constant 0 : index
    %76 = vector.load %arg1[%c0_90, %c4_91, %c1_92, %c0_93] : memref<1x10x10x128xbf16, #tpu.memory_space<vmem>>, vector<1x1x9x128xbf16>
    %77 = vector.shape_cast %76 : vector<1x1x9x128xbf16> to vector<9x128xbf16>
    %c0_94 = arith.constant 0 : index
    %c5 = arith.constant 5 : index
    %c0_95 = arith.constant 0 : index
    %c0_96 = arith.constant 0 : index
    %78 = vector.load %arg1[%c0_94, %c5, %c0_95, %c0_96] : memref<1x10x10x128xbf16, #tpu.memory_space<vmem>>, vector<1x1x9x128xbf16>
    %79 = vector.shape_cast %78 : vector<1x1x9x128xbf16> to vector<9x128xbf16>
    %c0_97 = arith.constant 0 : index
    %c5_98 = arith.constant 5 : index
    %c1_99 = arith.constant 1 : index
    %c0_100 = arith.constant 0 : index
    %80 = vector.load %arg1[%c0_97, %c5_98, %c1_99, %c0_100] : memref<1x10x10x128xbf16, #tpu.memory_space<vmem>>, vector<1x1x9x128xbf16>
    %81 = vector.shape_cast %80 : vector<1x1x9x128xbf16> to vector<9x128xbf16>
    %82 = tpu.concatenate %75, %77, %79, %81 in 1 : vector<9x128xbf16>, vector<9x128xbf16>, vector<9x128xbf16>, vector<9x128xbf16> -> vector<9x512xbf16>
    %cst_101 = arith.constant dense<0.000000e+00> : vector<9x64xf32>
    %83 = tpu.matmul %82, %0, %cst_101 {dimension_numbers = #tpu.dot_dimension_numbers<[1], [0], [0], [1], [0, 0, 1, 1], [], []>} : vector<9x512xbf16>, vector<512x64xbf16>, vector<9x64xf32> -> vector<9x64xf32>
    %84 = vector.broadcast %1 : vector<1x64xf32> to vector<9x64xf32>
    %85 = arith.addf %83, %84 : vector<9x64xf32>
    %cst_102 = arith.constant 0.000000e+00 : f32
    %86 = vector.broadcast %cst_102 : f32 to vector<9x64xf32>
    %87 = arith.maximumf %85, %86 : vector<9x64xf32>
    %88 = arith.truncf %87 : vector<9x64xf32> to vector<9x64xbf16>
    %c0_103 = arith.constant 0 : index
    %c4_104 = arith.constant 4 : index
    %c0_105 = arith.constant 0 : index
    %c0_106 = arith.constant 0 : index
    %89 = vector.load %arg4[%c0_103, %c4_104, %c0_105, %c0_106] : memref<1x9x9x64xbf16, #tpu.memory_space<vmem>>, vector<1x1x9x64xbf16>
    %90 = vector.shape_cast %89 : vector<1x1x9x64xbf16> to vector<9x64xbf16>
    %91 = vector.shape_cast %88 : vector<9x64xbf16> to vector<1x1x9x64xbf16>
    tpu.vector_store %arg4[%c0_103, %c4_104, %c0_105, %c0_106], %91 {strides = array<i32>} : memref<1x9x9x64xbf16, #tpu.memory_space<vmem>>, vector<1x1x9x64xbf16>,
    %c0_107 = arith.constant 0 : index
    %c5_108 = arith.constant 5 : index
    %c0_109 = arith.constant 0 : index
    %c0_110 = arith.constant 0 : index
    %92 = vector.load %arg1[%c0_107, %c5_108, %c0_109, %c0_110] : memref<1x10x10x128xbf16, #tpu.memory_space<vmem>>, vector<1x1x9x128xbf16>
    %93 = vector.shape_cast %92 : vector<1x1x9x128xbf16> to vector<9x128xbf16>
    %c0_111 = arith.constant 0 : index
    %c5_112 = arith.constant 5 : index
    %c1_113 = arith.constant 1 : index
    %c0_114 = arith.constant 0 : index
    %94 = vector.load %arg1[%c0_111, %c5_112, %c1_113, %c0_114] : memref<1x10x10x128xbf16, #tpu.memory_space<vmem>>, vector<1x1x9x128xbf16>
    %95 = vector.shape_cast %94 : vector<1x1x9x128xbf16> to vector<9x128xbf16>
    %c0_115 = arith.constant 0 : index
    %c6 = arith.constant 6 : index
    %c0_116 = arith.constant 0 : index
    %c0_117 = arith.constant 0 : index
    %96 = vector.load %arg1[%c0_115, %c6, %c0_116, %c0_117] : memref<1x10x10x128xbf16, #tpu.memory_space<vmem>>, vector<1x1x9x128xbf16>
    %97 = vector.shape_cast %96 : vector<1x1x9x128xbf16> to vector<9x128xbf16>
    %c0_118 = arith.constant 0 : index
    %c6_119 = arith.constant 6 : index
    %c1_120 = arith.constant 1 : index
    %c0_121 = arith.constant 0 : index
    %98 = vector.load %arg1[%c0_118, %c6_119, %c1_120, %c0_121] : memref<1x10x10x128xbf16, #tpu.memory_space<vmem>>, vector<1x1x9x128xbf16>
    %99 = vector.shape_cast %98 : vector<1x1x9x128xbf16> to vector<9x128xbf16>
    %100 = tpu.concatenate %93, %95, %97, %99 in 1 : vector<9x128xbf16>, vector<9x128xbf16>, vector<9x128xbf16>, vector<9x128xbf16> -> vector<9x512xbf16>
    %cst_122 = arith.constant dense<0.000000e+00> : vector<9x64xf32>
    %101 = tpu.matmul %100, %0, %cst_122 {dimension_numbers = #tpu.dot_dimension_numbers<[1], [0], [0], [1], [0, 0, 1, 1], [], []>} : vector<9x512xbf16>, vector<512x64xbf16>, vector<9x64xf32> -> vector<9x64xf32>
    %102 = vector.broadcast %1 : vector<1x64xf32> to vector<9x64xf32>
    %103 = arith.addf %101, %102 : vector<9x64xf32>
    %cst_123 = arith.constant 0.000000e+00 : f32
    %104 = vector.broadcast %cst_123 : f32 to vector<9x64xf32>
    %105 = arith.maximumf %103, %104 : vector<9x64xf32>
    %106 = arith.truncf %105 : vector<9x64xf32> to vector<9x64xbf16>
    %c0_124 = arith.constant 0 : index
    %c5_125 = arith.constant 5 : index
    %c0_126 = arith.constant 0 : index
    %c0_127 = arith.constant 0 : index
    %107 = vector.load %arg4[%c0_124, %c5_125, %c0_126, %c0_127] : memref<1x9x9x64xbf16, #tpu.memory_space<vmem>>, vector<1x1x9x64xbf16>
    %108 = vector.shape_cast %107 : vector<1x1x9x64xbf16> to vector<9x64xbf16>
    %109 = vector.shape_cast %106 : vector<9x64xbf16> to vector<1x1x9x64xbf16>
    tpu.vector_store %arg4[%c0_124, %c5_125, %c0_126, %c0_127], %109 {strides = array<i32>} : memref<1x9x9x64xbf16, #tpu.memory_space<vmem>>, vector<1x1x9x64xbf16>,
    %c0_128 = arith.constant 0 : index
    %c6_129 = arith.constant 6 : index
    %c0_130 = arith.constant 0 : index
    %c0_131 = arith.constant 0 : index
    %110 = vector.load %arg1[%c0_128, %c6_129, %c0_130, %c0_131] : memref<1x10x10x128xbf16, #tpu.memory_space<vmem>>, vector<1x1x9x128xbf16>
    %111 = vector.shape_cast %110 : vector<1x1x9x128xbf16> to vector<9x128xbf16>
    %c0_132 = arith.constant 0 : index
    %c6_133 = arith.constant 6 : index
    %c1_134 = arith.constant 1 : index
    %c0_135 = arith.constant 0 : index
    %112 = vector.load %arg1[%c0_132, %c6_133, %c1_134, %c0_135] : memref<1x10x10x128xbf16, #tpu.memory_space<vmem>>, vector<1x1x9x128xbf16>
    %113 = vector.shape_cast %112 : vector<1x1x9x128xbf16> to vector<9x128xbf16>
    %c0_136 = arith.constant 0 : index
    %c7 = arith.constant 7 : index
    %c0_137 = arith.constant 0 : index
    %c0_138 = arith.constant 0 : index
    %114 = vector.load %arg1[%c0_136, %c7, %c0_137, %c0_138] : memref<1x10x10x128xbf16, #tpu.memory_space<vmem>>, vector<1x1x9x128xbf16>
    %115 = vector.shape_cast %114 : vector<1x1x9x128xbf16> to vector<9x128xbf16>
    %c0_139 = arith.constant 0 : index
    %c7_140 = arith.constant 7 : index
    %c1_141 = arith.constant 1 : index
    %c0_142 = arith.constant 0 : index
    %116 = vector.load %arg1[%c0_139, %c7_140, %c1_141, %c0_142] : memref<1x10x10x128xbf16, #tpu.memory_space<vmem>>, vector<1x1x9x128xbf16>
    %117 = vector.shape_cast %116 : vector<1x1x9x128xbf16> to vector<9x128xbf16>
    %118 = tpu.concatenate %111, %113, %115, %117 in 1 : vector<9x128xbf16>, vector<9x128xbf16>, vector<9x128xbf16>, vector<9x128xbf16> -> vector<9x512xbf16>
    %cst_143 = arith.constant dense<0.000000e+00> : vector<9x64xf32>
    %119 = tpu.matmul %118, %0, %cst_143 {dimension_numbers = #tpu.dot_dimension_numbers<[1], [0], [0], [1], [0, 0, 1, 1], [], []>} : vector<9x512xbf16>, vector<512x64xbf16>, vector<9x64xf32> -> vector<9x64xf32>
    %120 = vector.broadcast %1 : vector<1x64xf32> to vector<9x64xf32>
    %121 = arith.addf %119, %120 : vector<9x64xf32>
    %cst_144 = arith.constant 0.000000e+00 : f32
    %122 = vector.broadcast %cst_144 : f32 to vector<9x64xf32>
    %123 = arith.maximumf %121, %122 : vector<9x64xf32>
    %124 = arith.truncf %123 : vector<9x64xf32> to vector<9x64xbf16>
    %c0_145 = arith.constant 0 : index
    %c6_146 = arith.constant 6 : index
    %c0_147 = arith.constant 0 : index
    %c0_148 = arith.constant 0 : index
    %125 = vector.load %arg4[%c0_145, %c6_146, %c0_147, %c0_148] : memref<1x9x9x64xbf16, #tpu.memory_space<vmem>>, vector<1x1x9x64xbf16>
    %126 = vector.shape_cast %125 : vector<1x1x9x64xbf16> to vector<9x64xbf16>
    %127 = vector.shape_cast %124 : vector<9x64xbf16> to vector<1x1x9x64xbf16>
    tpu.vector_store %arg4[%c0_145, %c6_146, %c0_147, %c0_148], %127 {strides = array<i32>} : memref<1x9x9x64xbf16, #tpu.memory_space<vmem>>, vector<1x1x9x64xbf16>,
    %c0_149 = arith.constant 0 : index
    %c7_150 = arith.constant 7 : index
    %c0_151 = arith.constant 0 : index
    %c0_152 = arith.constant 0 : index
    %128 = vector.load %arg1[%c0_149, %c7_150, %c0_151, %c0_152] : memref<1x10x10x128xbf16, #tpu.memory_space<vmem>>, vector<1x1x9x128xbf16>
    %129 = vector.shape_cast %128 : vector<1x1x9x128xbf16> to vector<9x128xbf16>
    %c0_153 = arith.constant 0 : index
    %c7_154 = arith.constant 7 : index
    %c1_155 = arith.constant 1 : index
    %c0_156 = arith.constant 0 : index
    %130 = vector.load %arg1[%c0_153, %c7_154, %c1_155, %c0_156] : memref<1x10x10x128xbf16, #tpu.memory_space<vmem>>, vector<1x1x9x128xbf16>
    %131 = vector.shape_cast %130 : vector<1x1x9x128xbf16> to vector<9x128xbf16>
    %c0_157 = arith.constant 0 : index
    %c8 = arith.constant 8 : index
    %c0_158 = arith.constant 0 : index
    %c0_159 = arith.constant 0 : index
    %132 = vector.load %arg1[%c0_157, %c8, %c0_158, %c0_159] : memref<1x10x10x128xbf16, #tpu.memory_space<vmem>>, vector<1x1x9x128xbf16>
    %133 = vector.shape_cast %132 : vector<1x1x9x128xbf16> to vector<9x128xbf16>
    %c0_160 = arith.constant 0 : index
    %c8_161 = arith.constant 8 : index
    %c1_162 = arith.constant 1 : index
    %c0_163 = arith.constant 0 : index
    %134 = vector.load %arg1[%c0_160, %c8_161, %c1_162, %c0_163] : memref<1x10x10x128xbf16, #tpu.memory_space<vmem>>, vector<1x1x9x128xbf16>
    %135 = vector.shape_cast %134 : vector<1x1x9x128xbf16> to vector<9x128xbf16>
    %136 = tpu.concatenate %129, %131, %133, %135 in 1 : vector<9x128xbf16>, vector<9x128xbf16>, vector<9x128xbf16>, vector<9x128xbf16> -> vector<9x512xbf16>
    %cst_164 = arith.constant dense<0.000000e+00> : vector<9x64xf32>
    %137 = tpu.matmul %136, %0, %cst_164 {dimension_numbers = #tpu.dot_dimension_numbers<[1], [0], [0], [1], [0, 0, 1, 1], [], []>} : vector<9x512xbf16>, vector<512x64xbf16>, vector<9x64xf32> -> vector<9x64xf32>
    %138 = vector.broadcast %1 : vector<1x64xf32> to vector<9x64xf32>
    %139 = arith.addf %137, %138 : vector<9x64xf32>
    %cst_165 = arith.constant 0.000000e+00 : f32
    %140 = vector.broadcast %cst_165 : f32 to vector<9x64xf32>
    %141 = arith.maximumf %139, %140 : vector<9x64xf32>
    %142 = arith.truncf %141 : vector<9x64xf32> to vector<9x64xbf16>
    %c0_166 = arith.constant 0 : index
    %c7_167 = arith.constant 7 : index
    %c0_168 = arith.constant 0 : index
    %c0_169 = arith.constant 0 : index
    %143 = vector.load %arg4[%c0_166, %c7_167, %c0_168, %c0_169] : memref<1x9x9x64xbf16, #tpu.memory_space<vmem>>, vector<1x1x9x64xbf16>
    %144 = vector.shape_cast %143 : vector<1x1x9x64xbf16> to vector<9x64xbf16>
    %145 = vector.shape_cast %142 : vector<9x64xbf16> to vector<1x1x9x64xbf16>
    tpu.vector_store %arg4[%c0_166, %c7_167, %c0_168, %c0_169], %145 {strides = array<i32>} : memref<1x9x9x64xbf16, #tpu.memory_space<vmem>>, vector<1x1x9x64xbf16>,
    %c0_170 = arith.constant 0 : index
    %c8_171 = arith.constant 8 : index
    %c0_172 = arith.constant 0 : index
    %c0_173 = arith.constant 0 : index
    %146 = vector.load %arg1[%c0_170, %c8_171, %c0_172, %c0_173] : memref<1x10x10x128xbf16, #tpu.memory_space<vmem>>, vector<1x1x9x128xbf16>
    %147 = vector.shape_cast %146 : vector<1x1x9x128xbf16> to vector<9x128xbf16>
    %c0_174 = arith.constant 0 : index
    %c8_175 = arith.constant 8 : index
    %c1_176 = arith.constant 1 : index
    %c0_177 = arith.constant 0 : index
    %148 = vector.load %arg1[%c0_174, %c8_175, %c1_176, %c0_177] : memref<1x10x10x128xbf16, #tpu.memory_space<vmem>>, vector<1x1x9x128xbf16>
    %149 = vector.shape_cast %148 : vector<1x1x9x128xbf16> to vector<9x128xbf16>
    %c0_178 = arith.constant 0 : index
    %c9 = arith.constant 9 : index
    %c0_179 = arith.constant 0 : index
    %c0_180 = arith.constant 0 : index
    %150 = vector.load %arg1[%c0_178, %c9, %c0_179, %c0_180] : memref<1x10x10x128xbf16, #tpu.memory_space<vmem>>, vector<1x1x9x128xbf16>
    %151 = vector.shape_cast %150 : vector<1x1x9x128xbf16> to vector<9x128xbf16>
    %c0_181 = arith.constant 0 : index
    %c9_182 = arith.constant 9 : index
    %c1_183 = arith.constant 1 : index
    %c0_184 = arith.constant 0 : index
    %152 = vector.load %arg1[%c0_181, %c9_182, %c1_183, %c0_184] : memref<1x10x10x128xbf16, #tpu.memory_space<vmem>>, vector<1x1x9x128xbf16>
    %153 = vector.shape_cast %152 : vector<1x1x9x128xbf16> to vector<9x128xbf16>
    %154 = tpu.concatenate %147, %149, %151, %153 in 1 : vector<9x128xbf16>, vector<9x128xbf16>, vector<9x128xbf16>, vector<9x128xbf16> -> vector<9x512xbf16>
    %cst_185 = arith.constant dense<0.000000e+00> : vector<9x64xf32>
    %155 = tpu.matmul %154, %0, %cst_185 {dimension_numbers = #tpu.dot_dimension_numbers<[1], [0], [0], [1], [0, 0, 1, 1], [], []>} : vector<9x512xbf16>, vector<512x64xbf16>, vector<9x64xf32> -> vector<9x64xf32>
    %156 = vector.broadcast %1 : vector<1x64xf32> to vector<9x64xf32>
    %157 = arith.addf %155, %156 : vector<9x64xf32>
    %cst_186 = arith.constant 0.000000e+00 : f32
    %158 = vector.broadcast %cst_186 : f32 to vector<9x64xf32>
    %159 = arith.maximumf %157, %158 : vector<9x64xf32>
    %160 = arith.truncf %159 : vector<9x64xf32> to vector<9x64xbf16>
    %c0_187 = arith.constant 0 : index
    %c8_188 = arith.constant 8 : index
    %c0_189 = arith.constant 0 : index
    %c0_190 = arith.constant 0 : index
    %161 = vector.load %arg4[%c0_187, %c8_188, %c0_189, %c0_190] : memref<1x9x9x64xbf16, #tpu.memory_space<vmem>>, vector<1x1x9x64xbf16>
    %162 = vector.shape_cast %161 : vector<1x1x9x64xbf16> to vector<9x64xbf16>
    %163 = vector.shape_cast %160 : vector<9x64xbf16> to vector<1x1x9x64xbf16>
    tpu.vector_store %arg4[%c0_187, %c8_188, %c0_189, %c0_190], %163 {strides = array<i32>} : memref<1x9x9x64xbf16, #tpu.memory_space<vmem>>, vector<1x1x9x64xbf16>,
    return
  }
  func.func @transform_0(%arg0: i32) -> (i32, i32, i32, i32) {
    %c0_i32 = arith.constant 0 : i32
    %c0_i32_0 = arith.constant 0 : i32
    %c0_i32_1 = arith.constant 0 : i32
    %c0_i32_2 = arith.constant 0 : i32
    return %arg0, %c0_i32, %c0_i32_0, %c0_i32_1 : i32, i32, i32, i32
  }
  func.func @transform_1(%arg0: i32) -> (i32, i32) {
    %c0_i32 = arith.constant 0 : i32
    %c0_i32_0 = arith.constant 0 : i32
    %c0_i32_1 = arith.constant 0 : i32
    return %c0_i32, %c0_i32_0 : i32, i32
  }
  func.func @transform_2(%arg0: i32) -> (i32, i32) {
    %c0_i32 = arith.constant 0 : i32
    %c0_i32_0 = arith.constant 0 : i32
    %c0_i32_1 = arith.constant 0 : i32
    return %c0_i32, %c0_i32_0 : i32, i32
  }
  func.func @transform_3(%arg0: i32) -> (i32, i32, i32, i32) {
    %c0_i32 = arith.constant 0 : i32
    %c0_i32_0 = arith.constant 0 : i32
    %c0_i32_1 = arith.constant 0 : i32
    %c0_i32_2 = arith.constant 0 : i32
    return %arg0, %c0_i32, %c0_i32_0, %c0_i32_1 : i32, i32, i32, i32
  }
}

module attributes {stable_mosaic.version = 11 : i64} {
  func.func @_conv_kernel(%arg0: i32, %arg1: memref<1x9x9x64xbf16, #tpu.memory_space<vmem>>, %arg2: memref<576x64xbf16, #tpu.memory_space<vmem>>, %arg3: memref<1x64xf32, #tpu.memory_space<vmem>>, %arg4: memref<1x7x7x64xbf16, #tpu.memory_space<vmem>>) attributes {dimension_semantics = [#tpu.dimension_semantics<parallel>], iteration_bounds = array<i64: 2>, scalar_prefetch = 0 : i64, scratch_operands = 0 : i64, tpu.core_type = #tpu.core_type<tc>, window_params = [{transform_indices = @transform_0, window_bounds = array<i64: 1, 9, 9, 64>}, {pipeline_mode = #tpu.pipeline_mode<synchronous>, transform_indices = @transform_1, window_bounds = array<i64: 576, 64>}, {pipeline_mode = #tpu.pipeline_mode<synchronous>, transform_indices = @transform_2, window_bounds = array<i64: 1, 64>}, {transform_indices = @transform_3, window_bounds = array<i64: 1, 7, 7, 64>}]} {
    %c0 = arith.constant 0 : index
    %c0_0 = arith.constant 0 : index
    %0 = vector.load %arg2[%c0, %c0_0] : memref<576x64xbf16, #tpu.memory_space<vmem>>, vector<576x64xbf16>
    %c0_1 = arith.constant 0 : index
    %c0_2 = arith.constant 0 : index
    %1 = vector.load %arg3[%c0_1, %c0_2] : memref<1x64xf32, #tpu.memory_space<vmem>>, vector<1x64xf32>
    %c0_3 = arith.constant 0 : index
    %c0_4 = arith.constant 0 : index
    %c0_5 = arith.constant 0 : index
    %c0_6 = arith.constant 0 : index
    %2 = vector.load %arg1[%c0_3, %c0_4, %c0_5, %c0_6] : memref<1x9x9x64xbf16, #tpu.memory_space<vmem>>, vector<1x1x7x64xbf16>
    %3 = vector.shape_cast %2 : vector<1x1x7x64xbf16> to vector<7x64xbf16>
    %c0_7 = arith.constant 0 : index
    %c0_8 = arith.constant 0 : index
    %c1 = arith.constant 1 : index
    %c0_9 = arith.constant 0 : index
    %4 = vector.load %arg1[%c0_7, %c0_8, %c1, %c0_9] : memref<1x9x9x64xbf16, #tpu.memory_space<vmem>>, vector<1x1x7x64xbf16>
    %5 = vector.shape_cast %4 : vector<1x1x7x64xbf16> to vector<7x64xbf16>
    %c0_10 = arith.constant 0 : index
    %c0_11 = arith.constant 0 : index
    %c2 = arith.constant 2 : index
    %c0_12 = arith.constant 0 : index
    %6 = vector.load %arg1[%c0_10, %c0_11, %c2, %c0_12] : memref<1x9x9x64xbf16, #tpu.memory_space<vmem>>, vector<1x1x7x64xbf16>
    %7 = vector.shape_cast %6 : vector<1x1x7x64xbf16> to vector<7x64xbf16>
    %c0_13 = arith.constant 0 : index
    %c1_14 = arith.constant 1 : index
    %c0_15 = arith.constant 0 : index
    %c0_16 = arith.constant 0 : index
    %8 = vector.load %arg1[%c0_13, %c1_14, %c0_15, %c0_16] : memref<1x9x9x64xbf16, #tpu.memory_space<vmem>>, vector<1x1x7x64xbf16>
    %9 = vector.shape_cast %8 : vector<1x1x7x64xbf16> to vector<7x64xbf16>
    %c0_17 = arith.constant 0 : index
    %c1_18 = arith.constant 1 : index
    %c1_19 = arith.constant 1 : index
    %c0_20 = arith.constant 0 : index
    %10 = vector.load %arg1[%c0_17, %c1_18, %c1_19, %c0_20] : memref<1x9x9x64xbf16, #tpu.memory_space<vmem>>, vector<1x1x7x64xbf16>
    %11 = vector.shape_cast %10 : vector<1x1x7x64xbf16> to vector<7x64xbf16>
    %c0_21 = arith.constant 0 : index
    %c1_22 = arith.constant 1 : index
    %c2_23 = arith.constant 2 : index
    %c0_24 = arith.constant 0 : index
    %12 = vector.load %arg1[%c0_21, %c1_22, %c2_23, %c0_24] : memref<1x9x9x64xbf16, #tpu.memory_space<vmem>>, vector<1x1x7x64xbf16>
    %13 = vector.shape_cast %12 : vector<1x1x7x64xbf16> to vector<7x64xbf16>
    %c0_25 = arith.constant 0 : index
    %c2_26 = arith.constant 2 : index
    %c0_27 = arith.constant 0 : index
    %c0_28 = arith.constant 0 : index
    %14 = vector.load %arg1[%c0_25, %c2_26, %c0_27, %c0_28] : memref<1x9x9x64xbf16, #tpu.memory_space<vmem>>, vector<1x1x7x64xbf16>
    %15 = vector.shape_cast %14 : vector<1x1x7x64xbf16> to vector<7x64xbf16>
    %c0_29 = arith.constant 0 : index
    %c2_30 = arith.constant 2 : index
    %c1_31 = arith.constant 1 : index
    %c0_32 = arith.constant 0 : index
    %16 = vector.load %arg1[%c0_29, %c2_30, %c1_31, %c0_32] : memref<1x9x9x64xbf16, #tpu.memory_space<vmem>>, vector<1x1x7x64xbf16>
    %17 = vector.shape_cast %16 : vector<1x1x7x64xbf16> to vector<7x64xbf16>
    %c0_33 = arith.constant 0 : index
    %c2_34 = arith.constant 2 : index
    %c2_35 = arith.constant 2 : index
    %c0_36 = arith.constant 0 : index
    %18 = vector.load %arg1[%c0_33, %c2_34, %c2_35, %c0_36] : memref<1x9x9x64xbf16, #tpu.memory_space<vmem>>, vector<1x1x7x64xbf16>
    %19 = vector.shape_cast %18 : vector<1x1x7x64xbf16> to vector<7x64xbf16>
    %20 = tpu.concatenate %3, %5, %7, %9, %11, %13, %15, %17, %19 in 1 : vector<7x64xbf16>, vector<7x64xbf16>, vector<7x64xbf16>, vector<7x64xbf16>, vector<7x64xbf16>, vector<7x64xbf16>, vector<7x64xbf16>, vector<7x64xbf16>, vector<7x64xbf16> -> vector<7x576xbf16>
    %cst = arith.constant dense<0.000000e+00> : vector<7x64xf32>
    %21 = tpu.matmul %20, %0, %cst {dimension_numbers = #tpu.dot_dimension_numbers<[1], [0], [0], [1], [0, 0, 1, 1], [], []>} : vector<7x576xbf16>, vector<576x64xbf16>, vector<7x64xf32> -> vector<7x64xf32>
    %22 = vector.broadcast %1 : vector<1x64xf32> to vector<7x64xf32>
    %23 = arith.addf %21, %22 : vector<7x64xf32>
    %cst_37 = arith.constant 0.000000e+00 : f32
    %24 = vector.broadcast %cst_37 : f32 to vector<7x64xf32>
    %25 = arith.maximumf %23, %24 : vector<7x64xf32>
    %26 = arith.truncf %25 : vector<7x64xf32> to vector<7x64xbf16>
    %c0_38 = arith.constant 0 : index
    %c0_39 = arith.constant 0 : index
    %c0_40 = arith.constant 0 : index
    %c0_41 = arith.constant 0 : index
    %27 = vector.load %arg4[%c0_38, %c0_39, %c0_40, %c0_41] : memref<1x7x7x64xbf16, #tpu.memory_space<vmem>>, vector<1x1x7x64xbf16>
    %28 = vector.shape_cast %27 : vector<1x1x7x64xbf16> to vector<7x64xbf16>
    %29 = vector.shape_cast %26 : vector<7x64xbf16> to vector<1x1x7x64xbf16>
    tpu.vector_store %arg4[%c0_38, %c0_39, %c0_40, %c0_41], %29 {strides = array<i32>} : memref<1x7x7x64xbf16, #tpu.memory_space<vmem>>, vector<1x1x7x64xbf16>,
    %c0_42 = arith.constant 0 : index
    %c1_43 = arith.constant 1 : index
    %c0_44 = arith.constant 0 : index
    %c0_45 = arith.constant 0 : index
    %30 = vector.load %arg1[%c0_42, %c1_43, %c0_44, %c0_45] : memref<1x9x9x64xbf16, #tpu.memory_space<vmem>>, vector<1x1x7x64xbf16>
    %31 = vector.shape_cast %30 : vector<1x1x7x64xbf16> to vector<7x64xbf16>
    %c0_46 = arith.constant 0 : index
    %c1_47 = arith.constant 1 : index
    %c1_48 = arith.constant 1 : index
    %c0_49 = arith.constant 0 : index
    %32 = vector.load %arg1[%c0_46, %c1_47, %c1_48, %c0_49] : memref<1x9x9x64xbf16, #tpu.memory_space<vmem>>, vector<1x1x7x64xbf16>
    %33 = vector.shape_cast %32 : vector<1x1x7x64xbf16> to vector<7x64xbf16>
    %c0_50 = arith.constant 0 : index
    %c1_51 = arith.constant 1 : index
    %c2_52 = arith.constant 2 : index
    %c0_53 = arith.constant 0 : index
    %34 = vector.load %arg1[%c0_50, %c1_51, %c2_52, %c0_53] : memref<1x9x9x64xbf16, #tpu.memory_space<vmem>>, vector<1x1x7x64xbf16>
    %35 = vector.shape_cast %34 : vector<1x1x7x64xbf16> to vector<7x64xbf16>
    %c0_54 = arith.constant 0 : index
    %c2_55 = arith.constant 2 : index
    %c0_56 = arith.constant 0 : index
    %c0_57 = arith.constant 0 : index
    %36 = vector.load %arg1[%c0_54, %c2_55, %c0_56, %c0_57] : memref<1x9x9x64xbf16, #tpu.memory_space<vmem>>, vector<1x1x7x64xbf16>
    %37 = vector.shape_cast %36 : vector<1x1x7x64xbf16> to vector<7x64xbf16>
    %c0_58 = arith.constant 0 : index
    %c2_59 = arith.constant 2 : index
    %c1_60 = arith.constant 1 : index
    %c0_61 = arith.constant 0 : index
    %38 = vector.load %arg1[%c0_58, %c2_59, %c1_60, %c0_61] : memref<1x9x9x64xbf16, #tpu.memory_space<vmem>>, vector<1x1x7x64xbf16>
    %39 = vector.shape_cast %38 : vector<1x1x7x64xbf16> to vector<7x64xbf16>
    %c0_62 = arith.constant 0 : index
    %c2_63 = arith.constant 2 : index
    %c2_64 = arith.constant 2 : index
    %c0_65 = arith.constant 0 : index
    %40 = vector.load %arg1[%c0_62, %c2_63, %c2_64, %c0_65] : memref<1x9x9x64xbf16, #tpu.memory_space<vmem>>, vector<1x1x7x64xbf16>
    %41 = vector.shape_cast %40 : vector<1x1x7x64xbf16> to vector<7x64xbf16>
    %c0_66 = arith.constant 0 : index
    %c3 = arith.constant 3 : index
    %c0_67 = arith.constant 0 : index
    %c0_68 = arith.constant 0 : index
    %42 = vector.load %arg1[%c0_66, %c3, %c0_67, %c0_68] : memref<1x9x9x64xbf16, #tpu.memory_space<vmem>>, vector<1x1x7x64xbf16>
    %43 = vector.shape_cast %42 : vector<1x1x7x64xbf16> to vector<7x64xbf16>
    %c0_69 = arith.constant 0 : index
    %c3_70 = arith.constant 3 : index
    %c1_71 = arith.constant 1 : index
    %c0_72 = arith.constant 0 : index
    %44 = vector.load %arg1[%c0_69, %c3_70, %c1_71, %c0_72] : memref<1x9x9x64xbf16, #tpu.memory_space<vmem>>, vector<1x1x7x64xbf16>
    %45 = vector.shape_cast %44 : vector<1x1x7x64xbf16> to vector<7x64xbf16>
    %c0_73 = arith.constant 0 : index
    %c3_74 = arith.constant 3 : index
    %c2_75 = arith.constant 2 : index
    %c0_76 = arith.constant 0 : index
    %46 = vector.load %arg1[%c0_73, %c3_74, %c2_75, %c0_76] : memref<1x9x9x64xbf16, #tpu.memory_space<vmem>>, vector<1x1x7x64xbf16>
    %47 = vector.shape_cast %46 : vector<1x1x7x64xbf16> to vector<7x64xbf16>
    %48 = tpu.concatenate %31, %33, %35, %37, %39, %41, %43, %45, %47 in 1 : vector<7x64xbf16>, vector<7x64xbf16>, vector<7x64xbf16>, vector<7x64xbf16>, vector<7x64xbf16>, vector<7x64xbf16>, vector<7x64xbf16>, vector<7x64xbf16>, vector<7x64xbf16> -> vector<7x576xbf16>
    %cst_77 = arith.constant dense<0.000000e+00> : vector<7x64xf32>
    %49 = tpu.matmul %48, %0, %cst_77 {dimension_numbers = #tpu.dot_dimension_numbers<[1], [0], [0], [1], [0, 0, 1, 1], [], []>} : vector<7x576xbf16>, vector<576x64xbf16>, vector<7x64xf32> -> vector<7x64xf32>
    %50 = vector.broadcast %1 : vector<1x64xf32> to vector<7x64xf32>
    %51 = arith.addf %49, %50 : vector<7x64xf32>
    %cst_78 = arith.constant 0.000000e+00 : f32
    %52 = vector.broadcast %cst_78 : f32 to vector<7x64xf32>
    %53 = arith.maximumf %51, %52 : vector<7x64xf32>
    %54 = arith.truncf %53 : vector<7x64xf32> to vector<7x64xbf16>
    %c0_79 = arith.constant 0 : index
    %c1_80 = arith.constant 1 : index
    %c0_81 = arith.constant 0 : index
    %c0_82 = arith.constant 0 : index
    %55 = vector.load %arg4[%c0_79, %c1_80, %c0_81, %c0_82] : memref<1x7x7x64xbf16, #tpu.memory_space<vmem>>, vector<1x1x7x64xbf16>
    %56 = vector.shape_cast %55 : vector<1x1x7x64xbf16> to vector<7x64xbf16>
    %57 = vector.shape_cast %54 : vector<7x64xbf16> to vector<1x1x7x64xbf16>
    tpu.vector_store %arg4[%c0_79, %c1_80, %c0_81, %c0_82], %57 {strides = array<i32>} : memref<1x7x7x64xbf16, #tpu.memory_space<vmem>>, vector<1x1x7x64xbf16>,
    %c0_83 = arith.constant 0 : index
    %c2_84 = arith.constant 2 : index
    %c0_85 = arith.constant 0 : index
    %c0_86 = arith.constant 0 : index
    %58 = vector.load %arg1[%c0_83, %c2_84, %c0_85, %c0_86] : memref<1x9x9x64xbf16, #tpu.memory_space<vmem>>, vector<1x1x7x64xbf16>
    %59 = vector.shape_cast %58 : vector<1x1x7x64xbf16> to vector<7x64xbf16>
    %c0_87 = arith.constant 0 : index
    %c2_88 = arith.constant 2 : index
    %c1_89 = arith.constant 1 : index
    %c0_90 = arith.constant 0 : index
    %60 = vector.load %arg1[%c0_87, %c2_88, %c1_89, %c0_90] : memref<1x9x9x64xbf16, #tpu.memory_space<vmem>>, vector<1x1x7x64xbf16>
    %61 = vector.shape_cast %60 : vector<1x1x7x64xbf16> to vector<7x64xbf16>
    %c0_91 = arith.constant 0 : index
    %c2_92 = arith.constant 2 : index
    %c2_93 = arith.constant 2 : index
    %c0_94 = arith.constant 0 : index
    %62 = vector.load %arg1[%c0_91, %c2_92, %c2_93, %c0_94] : memref<1x9x9x64xbf16, #tpu.memory_space<vmem>>, vector<1x1x7x64xbf16>
    %63 = vector.shape_cast %62 : vector<1x1x7x64xbf16> to vector<7x64xbf16>
    %c0_95 = arith.constant 0 : index
    %c3_96 = arith.constant 3 : index
    %c0_97 = arith.constant 0 : index
    %c0_98 = arith.constant 0 : index
    %64 = vector.load %arg1[%c0_95, %c3_96, %c0_97, %c0_98] : memref<1x9x9x64xbf16, #tpu.memory_space<vmem>>, vector<1x1x7x64xbf16>
    %65 = vector.shape_cast %64 : vector<1x1x7x64xbf16> to vector<7x64xbf16>
    %c0_99 = arith.constant 0 : index
    %c3_100 = arith.constant 3 : index
    %c1_101 = arith.constant 1 : index
    %c0_102 = arith.constant 0 : index
    %66 = vector.load %arg1[%c0_99, %c3_100, %c1_101, %c0_102] : memref<1x9x9x64xbf16, #tpu.memory_space<vmem>>, vector<1x1x7x64xbf16>
    %67 = vector.shape_cast %66 : vector<1x1x7x64xbf16> to vector<7x64xbf16>
    %c0_103 = arith.constant 0 : index
    %c3_104 = arith.constant 3 : index
    %c2_105 = arith.constant 2 : index
    %c0_106 = arith.constant 0 : index
    %68 = vector.load %arg1[%c0_103, %c3_104, %c2_105, %c0_106] : memref<1x9x9x64xbf16, #tpu.memory_space<vmem>>, vector<1x1x7x64xbf16>
    %69 = vector.shape_cast %68 : vector<1x1x7x64xbf16> to vector<7x64xbf16>
    %c0_107 = arith.constant 0 : index
    %c4 = arith.constant 4 : index
    %c0_108 = arith.constant 0 : index
    %c0_109 = arith.constant 0 : index
    %70 = vector.load %arg1[%c0_107, %c4, %c0_108, %c0_109] : memref<1x9x9x64xbf16, #tpu.memory_space<vmem>>, vector<1x1x7x64xbf16>
    %71 = vector.shape_cast %70 : vector<1x1x7x64xbf16> to vector<7x64xbf16>
    %c0_110 = arith.constant 0 : index
    %c4_111 = arith.constant 4 : index
    %c1_112 = arith.constant 1 : index
    %c0_113 = arith.constant 0 : index
    %72 = vector.load %arg1[%c0_110, %c4_111, %c1_112, %c0_113] : memref<1x9x9x64xbf16, #tpu.memory_space<vmem>>, vector<1x1x7x64xbf16>
    %73 = vector.shape_cast %72 : vector<1x1x7x64xbf16> to vector<7x64xbf16>
    %c0_114 = arith.constant 0 : index
    %c4_115 = arith.constant 4 : index
    %c2_116 = arith.constant 2 : index
    %c0_117 = arith.constant 0 : index
    %74 = vector.load %arg1[%c0_114, %c4_115, %c2_116, %c0_117] : memref<1x9x9x64xbf16, #tpu.memory_space<vmem>>, vector<1x1x7x64xbf16>
    %75 = vector.shape_cast %74 : vector<1x1x7x64xbf16> to vector<7x64xbf16>
    %76 = tpu.concatenate %59, %61, %63, %65, %67, %69, %71, %73, %75 in 1 : vector<7x64xbf16>, vector<7x64xbf16>, vector<7x64xbf16>, vector<7x64xbf16>, vector<7x64xbf16>, vector<7x64xbf16>, vector<7x64xbf16>, vector<7x64xbf16>, vector<7x64xbf16> -> vector<7x576xbf16>
    %cst_118 = arith.constant dense<0.000000e+00> : vector<7x64xf32>
    %77 = tpu.matmul %76, %0, %cst_118 {dimension_numbers = #tpu.dot_dimension_numbers<[1], [0], [0], [1], [0, 0, 1, 1], [], []>} : vector<7x576xbf16>, vector<576x64xbf16>, vector<7x64xf32> -> vector<7x64xf32>
    %78 = vector.broadcast %1 : vector<1x64xf32> to vector<7x64xf32>
    %79 = arith.addf %77, %78 : vector<7x64xf32>
    %cst_119 = arith.constant 0.000000e+00 : f32
    %80 = vector.broadcast %cst_119 : f32 to vector<7x64xf32>
    %81 = arith.maximumf %79, %80 : vector<7x64xf32>
    %82 = arith.truncf %81 : vector<7x64xf32> to vector<7x64xbf16>
    %c0_120 = arith.constant 0 : index
    %c2_121 = arith.constant 2 : index
    %c0_122 = arith.constant 0 : index
    %c0_123 = arith.constant 0 : index
    %83 = vector.load %arg4[%c0_120, %c2_121, %c0_122, %c0_123] : memref<1x7x7x64xbf16, #tpu.memory_space<vmem>>, vector<1x1x7x64xbf16>
    %84 = vector.shape_cast %83 : vector<1x1x7x64xbf16> to vector<7x64xbf16>
    %85 = vector.shape_cast %82 : vector<7x64xbf16> to vector<1x1x7x64xbf16>
    tpu.vector_store %arg4[%c0_120, %c2_121, %c0_122, %c0_123], %85 {strides = array<i32>} : memref<1x7x7x64xbf16, #tpu.memory_space<vmem>>, vector<1x1x7x64xbf16>,
    %c0_124 = arith.constant 0 : index
    %c3_125 = arith.constant 3 : index
    %c0_126 = arith.constant 0 : index
    %c0_127 = arith.constant 0 : index
    %86 = vector.load %arg1[%c0_124, %c3_125, %c0_126, %c0_127] : memref<1x9x9x64xbf16, #tpu.memory_space<vmem>>, vector<1x1x7x64xbf16>
    %87 = vector.shape_cast %86 : vector<1x1x7x64xbf16> to vector<7x64xbf16>
    %c0_128 = arith.constant 0 : index
    %c3_129 = arith.constant 3 : index
    %c1_130 = arith.constant 1 : index
    %c0_131 = arith.constant 0 : index
    %88 = vector.load %arg1[%c0_128, %c3_129, %c1_130, %c0_131] : memref<1x9x9x64xbf16, #tpu.memory_space<vmem>>, vector<1x1x7x64xbf16>
    %89 = vector.shape_cast %88 : vector<1x1x7x64xbf16> to vector<7x64xbf16>
    %c0_132 = arith.constant 0 : index
    %c3_133 = arith.constant 3 : index
    %c2_134 = arith.constant 2 : index
    %c0_135 = arith.constant 0 : index
    %90 = vector.load %arg1[%c0_132, %c3_133, %c2_134, %c0_135] : memref<1x9x9x64xbf16, #tpu.memory_space<vmem>>, vector<1x1x7x64xbf16>
    %91 = vector.shape_cast %90 : vector<1x1x7x64xbf16> to vector<7x64xbf16>
    %c0_136 = arith.constant 0 : index
    %c4_137 = arith.constant 4 : index
    %c0_138 = arith.constant 0 : index
    %c0_139 = arith.constant 0 : index
    %92 = vector.load %arg1[%c0_136, %c4_137, %c0_138, %c0_139] : memref<1x9x9x64xbf16, #tpu.memory_space<vmem>>, vector<1x1x7x64xbf16>
    %93 = vector.shape_cast %92 : vector<1x1x7x64xbf16> to vector<7x64xbf16>
    %c0_140 = arith.constant 0 : index
    %c4_141 = arith.constant 4 : index
    %c1_142 = arith.constant 1 : index
    %c0_143 = arith.constant 0 : index
    %94 = vector.load %arg1[%c0_140, %c4_141, %c1_142, %c0_143] : memref<1x9x9x64xbf16, #tpu.memory_space<vmem>>, vector<1x1x7x64xbf16>
    %95 = vector.shape_cast %94 : vector<1x1x7x64xbf16> to vector<7x64xbf16>
    %c0_144 = arith.constant 0 : index
    %c4_145 = arith.constant 4 : index
    %c2_146 = arith.constant 2 : index
    %c0_147 = arith.constant 0 : index
    %96 = vector.load %arg1[%c0_144, %c4_145, %c2_146, %c0_147] : memref<1x9x9x64xbf16, #tpu.memory_space<vmem>>, vector<1x1x7x64xbf16>
    %97 = vector.shape_cast %96 : vector<1x1x7x64xbf16> to vector<7x64xbf16>
    %c0_148 = arith.constant 0 : index
    %c5 = arith.constant 5 : index
    %c0_149 = arith.constant 0 : index
    %c0_150 = arith.constant 0 : index
    %98 = vector.load %arg1[%c0_148, %c5, %c0_149, %c0_150] : memref<1x9x9x64xbf16, #tpu.memory_space<vmem>>, vector<1x1x7x64xbf16>
    %99 = vector.shape_cast %98 : vector<1x1x7x64xbf16> to vector<7x64xbf16>
    %c0_151 = arith.constant 0 : index
    %c5_152 = arith.constant 5 : index
    %c1_153 = arith.constant 1 : index
    %c0_154 = arith.constant 0 : index
    %100 = vector.load %arg1[%c0_151, %c5_152, %c1_153, %c0_154] : memref<1x9x9x64xbf16, #tpu.memory_space<vmem>>, vector<1x1x7x64xbf16>
    %101 = vector.shape_cast %100 : vector<1x1x7x64xbf16> to vector<7x64xbf16>
    %c0_155 = arith.constant 0 : index
    %c5_156 = arith.constant 5 : index
    %c2_157 = arith.constant 2 : index
    %c0_158 = arith.constant 0 : index
    %102 = vector.load %arg1[%c0_155, %c5_156, %c2_157, %c0_158] : memref<1x9x9x64xbf16, #tpu.memory_space<vmem>>, vector<1x1x7x64xbf16>
    %103 = vector.shape_cast %102 : vector<1x1x7x64xbf16> to vector<7x64xbf16>
    %104 = tpu.concatenate %87, %89, %91, %93, %95, %97, %99, %101, %103 in 1 : vector<7x64xbf16>, vector<7x64xbf16>, vector<7x64xbf16>, vector<7x64xbf16>, vector<7x64xbf16>, vector<7x64xbf16>, vector<7x64xbf16>, vector<7x64xbf16>, vector<7x64xbf16> -> vector<7x576xbf16>
    %cst_159 = arith.constant dense<0.000000e+00> : vector<7x64xf32>
    %105 = tpu.matmul %104, %0, %cst_159 {dimension_numbers = #tpu.dot_dimension_numbers<[1], [0], [0], [1], [0, 0, 1, 1], [], []>} : vector<7x576xbf16>, vector<576x64xbf16>, vector<7x64xf32> -> vector<7x64xf32>
    %106 = vector.broadcast %1 : vector<1x64xf32> to vector<7x64xf32>
    %107 = arith.addf %105, %106 : vector<7x64xf32>
    %cst_160 = arith.constant 0.000000e+00 : f32
    %108 = vector.broadcast %cst_160 : f32 to vector<7x64xf32>
    %109 = arith.maximumf %107, %108 : vector<7x64xf32>
    %110 = arith.truncf %109 : vector<7x64xf32> to vector<7x64xbf16>
    %c0_161 = arith.constant 0 : index
    %c3_162 = arith.constant 3 : index
    %c0_163 = arith.constant 0 : index
    %c0_164 = arith.constant 0 : index
    %111 = vector.load %arg4[%c0_161, %c3_162, %c0_163, %c0_164] : memref<1x7x7x64xbf16, #tpu.memory_space<vmem>>, vector<1x1x7x64xbf16>
    %112 = vector.shape_cast %111 : vector<1x1x7x64xbf16> to vector<7x64xbf16>
    %113 = vector.shape_cast %110 : vector<7x64xbf16> to vector<1x1x7x64xbf16>
    tpu.vector_store %arg4[%c0_161, %c3_162, %c0_163, %c0_164], %113 {strides = array<i32>} : memref<1x7x7x64xbf16, #tpu.memory_space<vmem>>, vector<1x1x7x64xbf16>,
    %c0_165 = arith.constant 0 : index
    %c4_166 = arith.constant 4 : index
    %c0_167 = arith.constant 0 : index
    %c0_168 = arith.constant 0 : index
    %114 = vector.load %arg1[%c0_165, %c4_166, %c0_167, %c0_168] : memref<1x9x9x64xbf16, #tpu.memory_space<vmem>>, vector<1x1x7x64xbf16>
    %115 = vector.shape_cast %114 : vector<1x1x7x64xbf16> to vector<7x64xbf16>
    %c0_169 = arith.constant 0 : index
    %c4_170 = arith.constant 4 : index
    %c1_171 = arith.constant 1 : index
    %c0_172 = arith.constant 0 : index
    %116 = vector.load %arg1[%c0_169, %c4_170, %c1_171, %c0_172] : memref<1x9x9x64xbf16, #tpu.memory_space<vmem>>, vector<1x1x7x64xbf16>
    %117 = vector.shape_cast %116 : vector<1x1x7x64xbf16> to vector<7x64xbf16>
    %c0_173 = arith.constant 0 : index
    %c4_174 = arith.constant 4 : index
    %c2_175 = arith.constant 2 : index
    %c0_176 = arith.constant 0 : index
    %118 = vector.load %arg1[%c0_173, %c4_174, %c2_175, %c0_176] : memref<1x9x9x64xbf16, #tpu.memory_space<vmem>>, vector<1x1x7x64xbf16>
    %119 = vector.shape_cast %118 : vector<1x1x7x64xbf16> to vector<7x64xbf16>
    %c0_177 = arith.constant 0 : index
    %c5_178 = arith.constant 5 : index
    %c0_179 = arith.constant 0 : index
    %c0_180 = arith.constant 0 : index
    %120 = vector.load %arg1[%c0_177, %c5_178, %c0_179, %c0_180] : memref<1x9x9x64xbf16, #tpu.memory_space<vmem>>, vector<1x1x7x64xbf16>
    %121 = vector.shape_cast %120 : vector<1x1x7x64xbf16> to vector<7x64xbf16>
    %c0_181 = arith.constant 0 : index
    %c5_182 = arith.constant 5 : index
    %c1_183 = arith.constant 1 : index
    %c0_184 = arith.constant 0 : index
    %122 = vector.load %arg1[%c0_181, %c5_182, %c1_183, %c0_184] : memref<1x9x9x64xbf16, #tpu.memory_space<vmem>>, vector<1x1x7x64xbf16>
    %123 = vector.shape_cast %122 : vector<1x1x7x64xbf16> to vector<7x64xbf16>
    %c0_185 = arith.constant 0 : index
    %c5_186 = arith.constant 5 : index
    %c2_187 = arith.constant 2 : index
    %c0_188 = arith.constant 0 : index
    %124 = vector.load %arg1[%c0_185, %c5_186, %c2_187, %c0_188] : memref<1x9x9x64xbf16, #tpu.memory_space<vmem>>, vector<1x1x7x64xbf16>
    %125 = vector.shape_cast %124 : vector<1x1x7x64xbf16> to vector<7x64xbf16>
    %c0_189 = arith.constant 0 : index
    %c6 = arith.constant 6 : index
    %c0_190 = arith.constant 0 : index
    %c0_191 = arith.constant 0 : index
    %126 = vector.load %arg1[%c0_189, %c6, %c0_190, %c0_191] : memref<1x9x9x64xbf16, #tpu.memory_space<vmem>>, vector<1x1x7x64xbf16>
    %127 = vector.shape_cast %126 : vector<1x1x7x64xbf16> to vector<7x64xbf16>
    %c0_192 = arith.constant 0 : index
    %c6_193 = arith.constant 6 : index
    %c1_194 = arith.constant 1 : index
    %c0_195 = arith.constant 0 : index
    %128 = vector.load %arg1[%c0_192, %c6_193, %c1_194, %c0_195] : memref<1x9x9x64xbf16, #tpu.memory_space<vmem>>, vector<1x1x7x64xbf16>
    %129 = vector.shape_cast %128 : vector<1x1x7x64xbf16> to vector<7x64xbf16>
    %c0_196 = arith.constant 0 : index
    %c6_197 = arith.constant 6 : index
    %c2_198 = arith.constant 2 : index
    %c0_199 = arith.constant 0 : index
    %130 = vector.load %arg1[%c0_196, %c6_197, %c2_198, %c0_199] : memref<1x9x9x64xbf16, #tpu.memory_space<vmem>>, vector<1x1x7x64xbf16>
    %131 = vector.shape_cast %130 : vector<1x1x7x64xbf16> to vector<7x64xbf16>
    %132 = tpu.concatenate %115, %117, %119, %121, %123, %125, %127, %129, %131 in 1 : vector<7x64xbf16>, vector<7x64xbf16>, vector<7x64xbf16>, vector<7x64xbf16>, vector<7x64xbf16>, vector<7x64xbf16>, vector<7x64xbf16>, vector<7x64xbf16>, vector<7x64xbf16> -> vector<7x576xbf16>
    %cst_200 = arith.constant dense<0.000000e+00> : vector<7x64xf32>
    %133 = tpu.matmul %132, %0, %cst_200 {dimension_numbers = #tpu.dot_dimension_numbers<[1], [0], [0], [1], [0, 0, 1, 1], [], []>} : vector<7x576xbf16>, vector<576x64xbf16>, vector<7x64xf32> -> vector<7x64xf32>
    %134 = vector.broadcast %1 : vector<1x64xf32> to vector<7x64xf32>
    %135 = arith.addf %133, %134 : vector<7x64xf32>
    %cst_201 = arith.constant 0.000000e+00 : f32
    %136 = vector.broadcast %cst_201 : f32 to vector<7x64xf32>
    %137 = arith.maximumf %135, %136 : vector<7x64xf32>
    %138 = arith.truncf %137 : vector<7x64xf32> to vector<7x64xbf16>
    %c0_202 = arith.constant 0 : index
    %c4_203 = arith.constant 4 : index
    %c0_204 = arith.constant 0 : index
    %c0_205 = arith.constant 0 : index
    %139 = vector.load %arg4[%c0_202, %c4_203, %c0_204, %c0_205] : memref<1x7x7x64xbf16, #tpu.memory_space<vmem>>, vector<1x1x7x64xbf16>
    %140 = vector.shape_cast %139 : vector<1x1x7x64xbf16> to vector<7x64xbf16>
    %141 = vector.shape_cast %138 : vector<7x64xbf16> to vector<1x1x7x64xbf16>
    tpu.vector_store %arg4[%c0_202, %c4_203, %c0_204, %c0_205], %141 {strides = array<i32>} : memref<1x7x7x64xbf16, #tpu.memory_space<vmem>>, vector<1x1x7x64xbf16>,
    %c0_206 = arith.constant 0 : index
    %c5_207 = arith.constant 5 : index
    %c0_208 = arith.constant 0 : index
    %c0_209 = arith.constant 0 : index
    %142 = vector.load %arg1[%c0_206, %c5_207, %c0_208, %c0_209] : memref<1x9x9x64xbf16, #tpu.memory_space<vmem>>, vector<1x1x7x64xbf16>
    %143 = vector.shape_cast %142 : vector<1x1x7x64xbf16> to vector<7x64xbf16>
    %c0_210 = arith.constant 0 : index
    %c5_211 = arith.constant 5 : index
    %c1_212 = arith.constant 1 : index
    %c0_213 = arith.constant 0 : index
    %144 = vector.load %arg1[%c0_210, %c5_211, %c1_212, %c0_213] : memref<1x9x9x64xbf16, #tpu.memory_space<vmem>>, vector<1x1x7x64xbf16>
    %145 = vector.shape_cast %144 : vector<1x1x7x64xbf16> to vector<7x64xbf16>
    %c0_214 = arith.constant 0 : index
    %c5_215 = arith.constant 5 : index
    %c2_216 = arith.constant 2 : index
    %c0_217 = arith.constant 0 : index
    %146 = vector.load %arg1[%c0_214, %c5_215, %c2_216, %c0_217] : memref<1x9x9x64xbf16, #tpu.memory_space<vmem>>, vector<1x1x7x64xbf16>
    %147 = vector.shape_cast %146 : vector<1x1x7x64xbf16> to vector<7x64xbf16>
    %c0_218 = arith.constant 0 : index
    %c6_219 = arith.constant 6 : index
    %c0_220 = arith.constant 0 : index
    %c0_221 = arith.constant 0 : index
    %148 = vector.load %arg1[%c0_218, %c6_219, %c0_220, %c0_221] : memref<1x9x9x64xbf16, #tpu.memory_space<vmem>>, vector<1x1x7x64xbf16>
    %149 = vector.shape_cast %148 : vector<1x1x7x64xbf16> to vector<7x64xbf16>
    %c0_222 = arith.constant 0 : index
    %c6_223 = arith.constant 6 : index
    %c1_224 = arith.constant 1 : index
    %c0_225 = arith.constant 0 : index
    %150 = vector.load %arg1[%c0_222, %c6_223, %c1_224, %c0_225] : memref<1x9x9x64xbf16, #tpu.memory_space<vmem>>, vector<1x1x7x64xbf16>
    %151 = vector.shape_cast %150 : vector<1x1x7x64xbf16> to vector<7x64xbf16>
    %c0_226 = arith.constant 0 : index
    %c6_227 = arith.constant 6 : index
    %c2_228 = arith.constant 2 : index
    %c0_229 = arith.constant 0 : index
    %152 = vector.load %arg1[%c0_226, %c6_227, %c2_228, %c0_229] : memref<1x9x9x64xbf16, #tpu.memory_space<vmem>>, vector<1x1x7x64xbf16>
    %153 = vector.shape_cast %152 : vector<1x1x7x64xbf16> to vector<7x64xbf16>
    %c0_230 = arith.constant 0 : index
    %c7 = arith.constant 7 : index
    %c0_231 = arith.constant 0 : index
    %c0_232 = arith.constant 0 : index
    %154 = vector.load %arg1[%c0_230, %c7, %c0_231, %c0_232] : memref<1x9x9x64xbf16, #tpu.memory_space<vmem>>, vector<1x1x7x64xbf16>
    %155 = vector.shape_cast %154 : vector<1x1x7x64xbf16> to vector<7x64xbf16>
    %c0_233 = arith.constant 0 : index
    %c7_234 = arith.constant 7 : index
    %c1_235 = arith.constant 1 : index
    %c0_236 = arith.constant 0 : index
    %156 = vector.load %arg1[%c0_233, %c7_234, %c1_235, %c0_236] : memref<1x9x9x64xbf16, #tpu.memory_space<vmem>>, vector<1x1x7x64xbf16>
    %157 = vector.shape_cast %156 : vector<1x1x7x64xbf16> to vector<7x64xbf16>
    %c0_237 = arith.constant 0 : index
    %c7_238 = arith.constant 7 : index
    %c2_239 = arith.constant 2 : index
    %c0_240 = arith.constant 0 : index
    %158 = vector.load %arg1[%c0_237, %c7_238, %c2_239, %c0_240] : memref<1x9x9x64xbf16, #tpu.memory_space<vmem>>, vector<1x1x7x64xbf16>
    %159 = vector.shape_cast %158 : vector<1x1x7x64xbf16> to vector<7x64xbf16>
    %160 = tpu.concatenate %143, %145, %147, %149, %151, %153, %155, %157, %159 in 1 : vector<7x64xbf16>, vector<7x64xbf16>, vector<7x64xbf16>, vector<7x64xbf16>, vector<7x64xbf16>, vector<7x64xbf16>, vector<7x64xbf16>, vector<7x64xbf16>, vector<7x64xbf16> -> vector<7x576xbf16>
    %cst_241 = arith.constant dense<0.000000e+00> : vector<7x64xf32>
    %161 = tpu.matmul %160, %0, %cst_241 {dimension_numbers = #tpu.dot_dimension_numbers<[1], [0], [0], [1], [0, 0, 1, 1], [], []>} : vector<7x576xbf16>, vector<576x64xbf16>, vector<7x64xf32> -> vector<7x64xf32>
    %162 = vector.broadcast %1 : vector<1x64xf32> to vector<7x64xf32>
    %163 = arith.addf %161, %162 : vector<7x64xf32>
    %cst_242 = arith.constant 0.000000e+00 : f32
    %164 = vector.broadcast %cst_242 : f32 to vector<7x64xf32>
    %165 = arith.maximumf %163, %164 : vector<7x64xf32>
    %166 = arith.truncf %165 : vector<7x64xf32> to vector<7x64xbf16>
    %c0_243 = arith.constant 0 : index
    %c5_244 = arith.constant 5 : index
    %c0_245 = arith.constant 0 : index
    %c0_246 = arith.constant 0 : index
    %167 = vector.load %arg4[%c0_243, %c5_244, %c0_245, %c0_246] : memref<1x7x7x64xbf16, #tpu.memory_space<vmem>>, vector<1x1x7x64xbf16>
    %168 = vector.shape_cast %167 : vector<1x1x7x64xbf16> to vector<7x64xbf16>
    %169 = vector.shape_cast %166 : vector<7x64xbf16> to vector<1x1x7x64xbf16>
    tpu.vector_store %arg4[%c0_243, %c5_244, %c0_245, %c0_246], %169 {strides = array<i32>} : memref<1x7x7x64xbf16, #tpu.memory_space<vmem>>, vector<1x1x7x64xbf16>,
    %c0_247 = arith.constant 0 : index
    %c6_248 = arith.constant 6 : index
    %c0_249 = arith.constant 0 : index
    %c0_250 = arith.constant 0 : index
    %170 = vector.load %arg1[%c0_247, %c6_248, %c0_249, %c0_250] : memref<1x9x9x64xbf16, #tpu.memory_space<vmem>>, vector<1x1x7x64xbf16>
    %171 = vector.shape_cast %170 : vector<1x1x7x64xbf16> to vector<7x64xbf16>
    %c0_251 = arith.constant 0 : index
    %c6_252 = arith.constant 6 : index
    %c1_253 = arith.constant 1 : index
    %c0_254 = arith.constant 0 : index
    %172 = vector.load %arg1[%c0_251, %c6_252, %c1_253, %c0_254] : memref<1x9x9x64xbf16, #tpu.memory_space<vmem>>, vector<1x1x7x64xbf16>
    %173 = vector.shape_cast %172 : vector<1x1x7x64xbf16> to vector<7x64xbf16>
    %c0_255 = arith.constant 0 : index
    %c6_256 = arith.constant 6 : index
    %c2_257 = arith.constant 2 : index
    %c0_258 = arith.constant 0 : index
    %174 = vector.load %arg1[%c0_255, %c6_256, %c2_257, %c0_258] : memref<1x9x9x64xbf16, #tpu.memory_space<vmem>>, vector<1x1x7x64xbf16>
    %175 = vector.shape_cast %174 : vector<1x1x7x64xbf16> to vector<7x64xbf16>
    %c0_259 = arith.constant 0 : index
    %c7_260 = arith.constant 7 : index
    %c0_261 = arith.constant 0 : index
    %c0_262 = arith.constant 0 : index
    %176 = vector.load %arg1[%c0_259, %c7_260, %c0_261, %c0_262] : memref<1x9x9x64xbf16, #tpu.memory_space<vmem>>, vector<1x1x7x64xbf16>
    %177 = vector.shape_cast %176 : vector<1x1x7x64xbf16> to vector<7x64xbf16>
    %c0_263 = arith.constant 0 : index
    %c7_264 = arith.constant 7 : index
    %c1_265 = arith.constant 1 : index
    %c0_266 = arith.constant 0 : index
    %178 = vector.load %arg1[%c0_263, %c7_264, %c1_265, %c0_266] : memref<1x9x9x64xbf16, #tpu.memory_space<vmem>>, vector<1x1x7x64xbf16>
    %179 = vector.shape_cast %178 : vector<1x1x7x64xbf16> to vector<7x64xbf16>
    %c0_267 = arith.constant 0 : index
    %c7_268 = arith.constant 7 : index
    %c2_269 = arith.constant 2 : index
    %c0_270 = arith.constant 0 : index
    %180 = vector.load %arg1[%c0_267, %c7_268, %c2_269, %c0_270] : memref<1x9x9x64xbf16, #tpu.memory_space<vmem>>, vector<1x1x7x64xbf16>
    %181 = vector.shape_cast %180 : vector<1x1x7x64xbf16> to vector<7x64xbf16>
    %c0_271 = arith.constant 0 : index
    %c8 = arith.constant 8 : index
    %c0_272 = arith.constant 0 : index
    %c0_273 = arith.constant 0 : index
    %182 = vector.load %arg1[%c0_271, %c8, %c0_272, %c0_273] : memref<1x9x9x64xbf16, #tpu.memory_space<vmem>>, vector<1x1x7x64xbf16>
    %183 = vector.shape_cast %182 : vector<1x1x7x64xbf16> to vector<7x64xbf16>
    %c0_274 = arith.constant 0 : index
    %c8_275 = arith.constant 8 : index
    %c1_276 = arith.constant 1 : index
    %c0_277 = arith.constant 0 : index
    %184 = vector.load %arg1[%c0_274, %c8_275, %c1_276, %c0_277] : memref<1x9x9x64xbf16, #tpu.memory_space<vmem>>, vector<1x1x7x64xbf16>
    %185 = vector.shape_cast %184 : vector<1x1x7x64xbf16> to vector<7x64xbf16>
    %c0_278 = arith.constant 0 : index
    %c8_279 = arith.constant 8 : index
    %c2_280 = arith.constant 2 : index
    %c0_281 = arith.constant 0 : index
    %186 = vector.load %arg1[%c0_278, %c8_279, %c2_280, %c0_281] : memref<1x9x9x64xbf16, #tpu.memory_space<vmem>>, vector<1x1x7x64xbf16>
    %187 = vector.shape_cast %186 : vector<1x1x7x64xbf16> to vector<7x64xbf16>
    %188 = tpu.concatenate %171, %173, %175, %177, %179, %181, %183, %185, %187 in 1 : vector<7x64xbf16>, vector<7x64xbf16>, vector<7x64xbf16>, vector<7x64xbf16>, vector<7x64xbf16>, vector<7x64xbf16>, vector<7x64xbf16>, vector<7x64xbf16>, vector<7x64xbf16> -> vector<7x576xbf16>
    %cst_282 = arith.constant dense<0.000000e+00> : vector<7x64xf32>
    %189 = tpu.matmul %188, %0, %cst_282 {dimension_numbers = #tpu.dot_dimension_numbers<[1], [0], [0], [1], [0, 0, 1, 1], [], []>} : vector<7x576xbf16>, vector<576x64xbf16>, vector<7x64xf32> -> vector<7x64xf32>
    %190 = vector.broadcast %1 : vector<1x64xf32> to vector<7x64xf32>
    %191 = arith.addf %189, %190 : vector<7x64xf32>
    %cst_283 = arith.constant 0.000000e+00 : f32
    %192 = vector.broadcast %cst_283 : f32 to vector<7x64xf32>
    %193 = arith.maximumf %191, %192 : vector<7x64xf32>
    %194 = arith.truncf %193 : vector<7x64xf32> to vector<7x64xbf16>
    %c0_284 = arith.constant 0 : index
    %c6_285 = arith.constant 6 : index
    %c0_286 = arith.constant 0 : index
    %c0_287 = arith.constant 0 : index
    %195 = vector.load %arg4[%c0_284, %c6_285, %c0_286, %c0_287] : memref<1x7x7x64xbf16, #tpu.memory_space<vmem>>, vector<1x1x7x64xbf16>
    %196 = vector.shape_cast %195 : vector<1x1x7x64xbf16> to vector<7x64xbf16>
    %197 = vector.shape_cast %194 : vector<7x64xbf16> to vector<1x1x7x64xbf16>
    tpu.vector_store %arg4[%c0_284, %c6_285, %c0_286, %c0_287], %197 {strides = array<i32>} : memref<1x7x7x64xbf16, #tpu.memory_space<vmem>>, vector<1x1x7x64xbf16>,
    return
  }
  func.func @transform_0(%arg0: i32) -> (i32, i32, i32, i32) {
    %c0_i32 = arith.constant 0 : i32
    %c0_i32_0 = arith.constant 0 : i32
    %c0_i32_1 = arith.constant 0 : i32
    %c0_i32_2 = arith.constant 0 : i32
    return %arg0, %c0_i32, %c0_i32_0, %c0_i32_1 : i32, i32, i32, i32
  }
  func.func @transform_1(%arg0: i32) -> (i32, i32) {
    %c0_i32 = arith.constant 0 : i32
    %c0_i32_0 = arith.constant 0 : i32
    %c0_i32_1 = arith.constant 0 : i32
    return %c0_i32, %c0_i32_0 : i32, i32
  }
  func.func @transform_2(%arg0: i32) -> (i32, i32) {
    %c0_i32 = arith.constant 0 : i32
    %c0_i32_0 = arith.constant 0 : i32
    %c0_i32_1 = arith.constant 0 : i32
    return %c0_i32, %c0_i32_0 : i32, i32
  }
  func.func @transform_3(%arg0: i32) -> (i32, i32, i32, i32) {
    %c0_i32 = arith.constant 0 : i32
    %c0_i32_0 = arith.constant 0 : i32
    %c0_i32_1 = arith.constant 0 : i32
    %c0_i32_2 = arith.constant 0 : i32
    return %arg0, %c0_i32, %c0_i32_0, %c0_i32_1 : i32, i32, i32, i32
  }
}

module attributes {stable_mosaic.version = 11 : i64} {
  func.func @_mlp_head_kernel(%arg0: i32, %arg1: memref<2x3136xbf16, #tpu.memory_space<vmem>>, %arg2: memref<3136x512xbf16, #tpu.memory_space<vmem>>, %arg3: memref<1x512xf32, #tpu.memory_space<vmem>>, %arg4: memref<512x128xbf16, #tpu.memory_space<vmem>>, %arg5: memref<1x128xf32, #tpu.memory_space<vmem>>, %arg6: memref<2x128xf32, #tpu.memory_space<vmem>>) attributes {dimension_semantics = [#tpu.dimension_semantics<parallel>], iteration_bounds = array<i64: 1>, scalar_prefetch = 0 : i64, scratch_operands = 0 : i64, tpu.core_type = #tpu.core_type<tc>, window_params = [{transform_indices = @transform_0, window_bounds = array<i64: 2, 3136>}, {pipeline_mode = #tpu.pipeline_mode<synchronous>, transform_indices = @transform_1, window_bounds = array<i64: 3136, 512>}, {pipeline_mode = #tpu.pipeline_mode<synchronous>, transform_indices = @transform_2, window_bounds = array<i64: 1, 512>}, {pipeline_mode = #tpu.pipeline_mode<synchronous>, transform_indices = @transform_3, window_bounds = array<i64: 512, 128>}, {pipeline_mode = #tpu.pipeline_mode<synchronous>, transform_indices = @transform_4, window_bounds = array<i64: 1, 128>}, {transform_indices = @transform_5, window_bounds = array<i64: 2, 128>}]} {
    %c0 = arith.constant 0 : index
    %c0_0 = arith.constant 0 : index
    %0 = vector.load %arg1[%c0, %c0_0] : memref<2x3136xbf16, #tpu.memory_space<vmem>>, vector<2x3136xbf16>
    %c0_1 = arith.constant 0 : index
    %c0_2 = arith.constant 0 : index
    %1 = vector.load %arg2[%c0_1, %c0_2] : memref<3136x512xbf16, #tpu.memory_space<vmem>>, vector<3136x512xbf16>
    %cst = arith.constant dense<0.000000e+00> : vector<2x512xf32>
    %2 = tpu.matmul %0, %1, %cst {dimension_numbers = #tpu.dot_dimension_numbers<[1], [0], [0], [1], [0, 0, 1, 1], [], []>} : vector<2x3136xbf16>, vector<3136x512xbf16>, vector<2x512xf32> -> vector<2x512xf32>
    %c0_3 = arith.constant 0 : index
    %c0_4 = arith.constant 0 : index
    %3 = vector.load %arg3[%c0_3, %c0_4] : memref<1x512xf32, #tpu.memory_space<vmem>>, vector<1x512xf32>
    %4 = vector.broadcast %3 : vector<1x512xf32> to vector<2x512xf32>
    %5 = arith.addf %2, %4 : vector<2x512xf32>
    %cst_5 = arith.constant 0.000000e+00 : f32
    %6 = vector.broadcast %cst_5 : f32 to vector<2x512xf32>
    %7 = arith.maximumf %5, %6 : vector<2x512xf32>
    %8 = arith.truncf %7 : vector<2x512xf32> to vector<2x512xbf16>
    %c0_6 = arith.constant 0 : index
    %c0_7 = arith.constant 0 : index
    %9 = vector.load %arg4[%c0_6, %c0_7] : memref<512x128xbf16, #tpu.memory_space<vmem>>, vector<512x128xbf16>
    %cst_8 = arith.constant dense<0.000000e+00> : vector<2x128xf32>
    %10 = tpu.matmul %8, %9, %cst_8 {dimension_numbers = #tpu.dot_dimension_numbers<[1], [0], [0], [1], [0, 0, 1, 1], [], []>} : vector<2x512xbf16>, vector<512x128xbf16>, vector<2x128xf32> -> vector<2x128xf32>
    %c0_9 = arith.constant 0 : index
    %c0_10 = arith.constant 0 : index
    %11 = vector.load %arg5[%c0_9, %c0_10] : memref<1x128xf32, #tpu.memory_space<vmem>>, vector<1x128xf32>
    %12 = vector.broadcast %11 : vector<1x128xf32> to vector<2x128xf32>
    %13 = arith.addf %10, %12 : vector<2x128xf32>
    %c0_11 = arith.constant 0 : index
    %c0_12 = arith.constant 0 : index
    %14 = vector.load %arg6[%c0_11, %c0_12] : memref<2x128xf32, #tpu.memory_space<vmem>>, vector<2x128xf32>
    tpu.vector_store %arg6[%c0_11, %c0_12], %13 {strides = array<i32>} : memref<2x128xf32, #tpu.memory_space<vmem>>, vector<2x128xf32>,
    return
  }
  func.func @transform_0(%arg0: i32) -> (i32, i32) {
    %c0_i32 = arith.constant 0 : i32
    %c0_i32_0 = arith.constant 0 : i32
    return %arg0, %c0_i32 : i32, i32
  }
  func.func @transform_1(%arg0: i32) -> (i32, i32) {
    %c0_i32 = arith.constant 0 : i32
    %c0_i32_0 = arith.constant 0 : i32
    %c0_i32_1 = arith.constant 0 : i32
    return %c0_i32, %c0_i32_0 : i32, i32
  }
  func.func @transform_2(%arg0: i32) -> (i32, i32) {
    %c0_i32 = arith.constant 0 : i32
    %c0_i32_0 = arith.constant 0 : i32
    %c0_i32_1 = arith.constant 0 : i32
    return %c0_i32, %c0_i32_0 : i32, i32
  }
  func.func @transform_3(%arg0: i32) -> (i32, i32) {
    %c0_i32 = arith.constant 0 : i32
    %c0_i32_0 = arith.constant 0 : i32
    %c0_i32_1 = arith.constant 0 : i32
    return %c0_i32, %c0_i32_0 : i32, i32
  }
  func.func @transform_4(%arg0: i32) -> (i32, i32) {
    %c0_i32 = arith.constant 0 : i32
    %c0_i32_0 = arith.constant 0 : i32
    %c0_i32_1 = arith.constant 0 : i32
    return %c0_i32, %c0_i32_0 : i32, i32
  }
  func.func @transform_5(%arg0: i32) -> (i32, i32) {
    %c0_i32 = arith.constant 0 : i32
    %c0_i32_0 = arith.constant 0 : i32
    return %arg0, %c0_i32 : i32, i32
  }
}

</mosaic_0001>

<bundles_post_ra>
// kernel: qnetwork_forward.4
= control target key start
LH: loop header
LB: loop body
LE: loop exit
PB: predicated region body
PF: predicated region fallthrough
CT: control target
= control target key end

     0   :  { %s4673_s12 = smov 0   ;;  %s5896_s0 = inlined_call_operand.vmem [shape: bf16[2,21,21,64], index: 0, kind: input, shape index: {}]   ;;  %s5897_s1 = inlined_call_operand.vmem [shape: bf16[256,32], index: 1, kind: input, shape index: {}]   ;;  %s5898_s2 = inlined_call_operand.vmem [shape: f32[1,32], index: 2, kind: input, shape index: {}]   ;;  %s5899_s3 = inlined_call_operand.vmem [shape: bf16[2,20,20,32], index: 3, kind: output, shape index: {}]  }
   0x1 LB: > { %s3385_s13 = sadd.s32 4294967295, %s4650_s12   ;;  %p3389_p0 = scmp.ge.s32.totalorder %s4650_s12, 1  ;;  %s4650_s12 = sphi %s4673_s12, %s13_s12  }
   0x2   : > { %p137_p1 = scmp.lt.s32.totalorder %s4650_s12, 3 }
   0x4   : > { %p138_p2 = pnand %p3389_p0, %p137_p1 }
   0x5   : > { %p161_p3 = scmp.lt.s32.totalorder (!%p138_p2), %s3385_s13, 1  ;;  %s4652_s30 = smov (!%p138_p2), 64  }
   0x6   : > { %141 = sbr.rel (%p138_p2) target bundleno = 645 (0x285), region = 32 }
   0xb   : > { %v4684_v0 = vld [vmem:[%s5897_s1 + $0x78] sm:$0xff]   ;;  %s5901_s13 = smov (!%p161_p3, %s3385_s13), 1  ;;  %v4461_v2 = vld [vmem:[%s5897_s1 + $0x70] sm:$0xff]   ;;  %vm225_vm0 = vsmask.f32 7424  ;;  %v4463_v4 = vld [vmem:[%s5897_s1 + $0x68] sm:$0xff]  }
   0xc   : > { %v4460_v1 = vld [vmem:[%s5897_s1 + $0x38] sm:$0xff]   ;;  %3864 = vmatprep.subr.bf16.mxu0 %v4684_v0  ;;  %3892 = vmatprep.subr.bf16.mxu1 %v4684_v0  ;;  %s4424_s20 = smul.u32 252, %s5901_s13  ;;  %v4462_v3 = vld [vmem:[%s5897_s1 + $0x30] sm:$0xff]   ;;  %v4466_v5 = vld [vmem:[%s5897_s1 + $0x28] sm:$0xff]   ;;  %vm275_vm1 = vcmask 523264   ;;  %vm456_vm2 = vcmask 257024  }
   0xd   : > { %3865 = vmatpush3.bf16.msra.mxu0 %v4460_v1  ;;  %3893 = vmatpush3.bf16.msra.mxu1 %v4460_v1  ;;  %s4425_s11 = smul.u32 240, %s5901_s13  ;;  %vm459_vm3 = vcmask 254976  }
   0xe   : > { %3866 = vmatprep.subr.bf16.mxu0 %v4461_v2  ;;  %3894 = vmatprep.subr.bf16.mxu1 %v4461_v2  ;;  %s4706_s27 = scalar_lea.vmem %s5896_s0, %s4424_s20 }
   0xf   : > { %v4435_v6 = vld [vmem:[%s4706_s27 + $0xc] sm:$0xff]   ;;  %v4436_v7 = vld [vmem:[%s4706_s27 + $0x14] ss:$0 sps:$4 sm:$0x77]   ;;  %v4437_v8 = vld [vmem:[%s4706_s27] sm:$0xff]   ;;  %s5524_s15 = scalar_lea.vmem %s5899_s3, %s4425_s11 }
  0x10   : > { %v257_v9 = vshrl.u32 %v4435_v6, 16  ;;  %v259_v10 = vshll.u32 %v4435_v6, 16  ;;  %v264_v11 = vshll.u32 %v4436_v7, 16  ;;  %v4438_v12 = vld [vmem:[%s4706_s27 + $0x8] ss:$0 sps:$4 sm:$0x77]  }
  0x11   : > { %3867 = vmatpush3.bf16.msra.mxu0 %v4462_v3  ;;  %3895 = vmatpush3.bf16.msra.mxu1 %v4462_v3  ;;  %v227_v13 = vshrl.u32 %v4437_v8, 16  ;;  %v229_v14 = vshll.u32 %v4437_v8, 16  ;;  %v234_v17 = vshll.u32 %v4438_v12, 16  ;;  %v4439_v18 = vld [vmem:[%s4706_s27 + $0x18] sm:$0xff]   ;;  %v4441_v25 = vld [vmem:[%s4706_s27 + $0xc] sm:$0xff]   ;;  %v268_v36 = vshrl.u32 %v4436_v7, 16 }
  0x12   : > { %3868 = vmatprep.subr.bf16.mxu0 %v4463_v4  ;;  %3896 = vmatprep.subr.bf16.mxu1 %v4463_v4  ;;  %v261_v15 = vrot.slane %v259_v10, 1  ;;  %v266_v16 = vrot.slane %v264_v11, 1  ;;  %v4440_v20 = vld [vmem:[%s4706_s27 + $0x20] ss:$0 sps:$4 sm:$0x77]   ;;  %v512_v23 = vshrl.u32 %v4439_v18, 16 }
  0x13   : > { %v231_v19 = vrot.slane %v229_v14, 1  ;;  %v236_v22 = vrot.slane %v234_v17, 1  ;;  %v514_v24 = vshll.u32 %v4439_v18, 16  ;;  %v519_v27 = vshll.u32 %v4440_v20, 16  ;;  %v4443_v37 = vld [vmem:[%s4706_s27 + $0x24] sm:$0xff]   ;;  %v4445_v41 = vld [vmem:[%s4706_s27 + $0x18] sm:$0xff]  }
  0x14   : > { %v262_v21 = vor.u32 %v261_v15, %v257_v9  ;;  %v4442_v28 = vld [vmem:[%s4706_s27 + $0x14] ss:$0 sps:$4 sm:$0x77]   ;;  %v482_v31 = vshrl.u32 %v4441_v25, 16  ;;  %v484_v32 = vshll.u32 %v4441_v25, 16  ;;  %v523_v40 = vshrl.u32 %v4440_v20, 16 }
  0x15   : > { %3869 = vmatpush3.bf16.msra.mxu0 %v4466_v5  ;;  %3897 = vmatpush3.bf16.msra.mxu1 %v4466_v5  ;;  %v232_v26 = vor.u32 %v231_v19, %v227_v13  ;;  %v516_v30 = vrot.slane %v514_v24, 1  ;;  %v521_v34 = vrot.slane %v519_v27, 1  ;;  %v489_v35 = vshll.u32 %v4442_v28, 16  ;;  %v4726_v44 = vld [vmem:[%s4706_s27 + $0x2c] ss:$0 sps:$4 sm:$0x77]  }
  0x16   : > { %v267_v29 = vsel %vm225_vm0, %v262_v21, %v266_v16  ;;  %v486_v39 = vrot.slane %v484_v32, 1  ;;  %v238_v43 = vshrl.u32 %v4438_v12, 16  ;;  %v4447_v45 = vld [vmem:[%s4706_s27 + $0x30] sm:$0xff]   ;;  %v270_v48 = vor.u32 %v268_v36, %v266_v16  ;;  %v4733_v52 = vld [vmem:[%s4706_s27 + $0x20] ss:$0 sps:$4 sm:$0x77]  }
  0x17   : > { %271 = vrot.lane.b32.xlu0 %v267_v29, %s4652_s30  ;;  %v237_v33 = vsel %vm225_vm0, %v232_v26, %v236_v22  ;;  %v517_v38 = vor.u32 %v516_v30, %v512_v23  ;;  %v491_v42 = vrot.slane %v489_v35, 1  ;;  %v493_v49 = vshrl.u32 %v4442_v28, 16  ;;  %v4448_v62 = vld [vmem:[%s4706_s27 + $0x38] ss:$0 sps:$4 sm:$0x77]   ;;  %v4449_v6 = vld [vmem:[%s4706_s27 + $0x24] sm:$0xff]  }
  0x18   : > { %241 = vrot.lane.b32.xlu1 %v237_v33, %s4652_s30  ;;  %v487_v47 = vor.u32 %v486_v39, %v482_v31  ;;  %v665_v50 = vshll.u32 %v4443_v37, 16  ;;  %v670_v51 = vshll.u32 %v4726_v44, 16  ;;  %v525_v54 = vor.u32 %v523_v40, %v521_v34  ;;  %v4450_v7 = vld [vmem:[%s4706_s27 + $0x2c] ss:$0 sps:$4 sm:$0x77]   ;;  %v4451_v15 = vld [vmem:[%s4706_s27 + $0x3c] sm:$0xff]  }
  0x19   : > { %v522_v46 = vsel %vm225_vm0, %v517_v38, %v521_v34  ;;  %v663_v55 = vshrl.u32 %v4443_v37, 16  ;;  %v635_v56 = vshll.u32 %v4445_v41, 16  ;;  %v633_v58 = vshrl.u32 %v4445_v41, 16  ;;  %v4453_v19 = vld [vmem:[%s4706_s27 + $0x30] sm:$0xff]   ;;  %v4455_v29 = vld [vmem:[%s4706_s27 + $0x48] sm:$0xff]   ;;  %v4457_v33 = vld [vmem:[%s4706_s27 + $0x3c] sm:$0xff]  }
  0x1a   : > { %v492_v53 = vsel %vm225_vm0, %v487_v47, %v491_v42  ;;  %v667_v57 = vrot.slane %v665_v50, 1  ;;  %v814_v59 = vshrl.u32 %v4447_v45, 16  ;;  %v816_v60 = vshll.u32 %v4447_v45, 16  ;;  %v4750_v23 = vld [vmem:[%s4706_s27 + $0x44] ss:$0 sps:$4 sm:$0x77]  }
  0x1b   : > { %526 = vrot.lane.b32.xlu0 %v522_v46, %s4652_s30  ;;  %v672_v61 = vrot.slane %v670_v51, 1  ;;  %v240_v63 = vor.u32 %v238_v43, %v236_v22  ;;  %v640_v1 = vshll.u32 %v4733_v52, 16  ;;  %v637_v4 = vrot.slane %v635_v56, 1  ;;  %v4757_v30 = vld [vmem:[%s4706_s27 + $0x50] ss:$0 sps:$4 sm:$0x77]  }
  0x1c   : > { %496 = vrot.lane.b32.xlu1 %v492_v53, %s4652_s30  ;;  %v818_v2 = vrot.slane %v816_v60, 1  ;;  %v668_v3 = vor.u32 %v667_v57, %v663_v55  ;;  %v821_v5 = vshll.u32 %v4448_v62, 16  ;;  %v495_v8 = vor.u32 %v493_v49, %v491_v42  ;;  %v4765_v36 = vld [vmem:[%s4706_s27 + $0x38] ss:$0 sps:$4 sm:$0x77]   ;;  %v4467_v45 = vld [vmem:[%s5897_s1 + $0x60] sm:$0xff]  }
  0x1d   : > { %v784_v11 = vshrl.u32 %v4449_v6, 16  ;;  %v786_v12 = vshll.u32 %v4449_v6, 16  ;;  %v642_v13 = vrot.slane %v640_v1, 1  ;;  %v791_v14 = vshll.u32 %v4450_v7, 16  ;;  %3870 = vmatprep.subr.bf16.mxu0 %v4467_v45  ;;  %3898 = vmatprep.subr.bf16.mxu1 %v4467_v45 }
  0x1e   : > { %v819_v9 = vor.u32 %v818_v2, %v814_v59  ;;  %v823_v10 = vrot.slane %v821_v5, 1  ;;  %v673_v16 = vsel %vm225_vm0, %v668_v3, %v672_v61  ;;  %v638_v17 = vor.u32 %v637_v4, %v633_v58  ;;  %v4783_v58 = vld [vmem:[%s4706_s27 + $0x5c] ss:$0 sps:$4 sm:$0x77]  }
  0x1f   : > { %273 = vrot.lane.b32.xlu0 %v270_v48, %s4652_s30  ;;  %v788_v18 = vrot.slane %v786_v12, 1  ;;  %v793_v22 = vrot.slane %v791_v14, 1  ;;  %v674_v24 = vshrl.u32 %v4726_v44, 16  ;;  %v825_v25 = vshrl.u32 %v4448_v62, 16  ;;  %v4807_v14 = vld [vmem:[%s5897_s1 + $0x58] sm:$0xff]  }
  0x20   : > { %528 = vrot.lane.b32.xlu1 %v525_v54, %s4652_s30  ;;  %v824_v20 = vsel %vm225_vm0, %v819_v9, %v823_v10  ;;  %v643_v26 = vsel %vm225_vm0, %v638_v17, %v642_v13  ;;  %v967_v27 = vshll.u32 %v4451_v15, 16  ;;  %v937_v28 = vshll.u32 %v4453_v19, 16  ;;  %v4774_v48 = vld [vmem:[%s4706_s27 + $0x44] ss:$0 sps:$4 sm:$0x77]  }
  0x21   : > { %v789_v21 = vor.u32 %v788_v18, %v784_v11  ;;  %v1118_v32 = vshll.u32 %v4455_v29, 16  ;;  %v676_v34 = vor.u32 %v674_v24, %v672_v61  ;;  %v644_v35 = vshrl.u32 %v4733_v52, 16  ;;  %v4779_v52 = vld [vmem:[%s4706_s27 + $0x54] sm:$0xff]   ;;  %v4814_v18 = vld [vmem:[%s4706_s27 + $0x68] ss:$0 sps:$4 sm:$0x77]  }
  0x22   : > { %v795_v37 = vshrl.u32 %v4450_v7, 16  ;;  %v965_v38 = vshrl.u32 %v4451_v15, 16  ;;  %v969_v39 = vrot.slane %v967_v27, 1  ;;  %v972_v40 = vshll.u32 %v4750_v23, 16 }
  0x23   : > { %243 = vrot.lane.b32.xlu0 %v240_v63, %s4652_s30  ;;  %v794_v31 = vsel %vm225_vm0, %v789_v21, %v793_v22  ;;  %v827_v41 = vor.u32 %v825_v25, %v823_v10  ;;  %v935_v42 = vshrl.u32 %v4453_v19, 16  ;;  %v939_v43 = vrot.slane %v937_v28, 1  ;;  %v4470_v10 = vld [vmem:[%s4706_s27 + $0x60] sm:$0xff]   ;;  %v4820_v19 = vld [vmem:[%s5897_s1 + $0x18] sm:$0xff]   ;;  %v4835_v25 = vld [vmem:[%s5897_s1 + $0x50] sm:$0xff]  }
  0x24   : > { %498 = vrot.lane.b32.xlu1 %v495_v8, %s4652_s30  ;;  %v1116_v44 = vshrl.u32 %v4455_v29, 16  ;;  %v1120_v46 = vrot.slane %v1118_v32, 1  ;;  %v1123_v47 = vshll.u32 %v4757_v30, 16  ;;  %v1088_v49 = vshll.u32 %v4457_v33, 16  ;;  %v4797_v8 = vld [vmem:[%s5897_s1 + $0x20] sm:$0xff]   ;;  %v4845_v29 = vld [vmem:[%s5897_s1 + $0x10] sm:$0xff]  }
  0x25   : > { %v646_v50 = vor.u32 %v644_v35, %v642_v13  ;;  %v942_v51 = vshll.u32 %v4765_v36, 16  ;;  %v970_v53 = vor.u32 %v969_v39, %v965_v38  ;;  %v974_v54 = vrot.slane %v972_v40, 1  ;;  %3871 = vmatpush3.bf16.msra.mxu0 %v4797_v8  ;;  %3899 = vmatpush3.bf16.msra.mxu1 %v4797_v8  ;;  %v4827_v21 = vld [vmem:[%s4706_s27 + $0x50] ss:$0 sps:$4 sm:$0x77]  }
  0x26   : > { %v797_v55 = vor.u32 %v795_v37, %v793_v22  ;;  %v940_v56 = vor.u32 %v939_v43, %v935_v42  ;;  %v1086_v57 = vshrl.u32 %v4457_v33, 16  ;;  %v1121_v59 = vor.u32 %v1120_v46, %v1116_v44  ;;  %3872 = vmatprep.subr.bf16.mxu0 %v4807_v14  ;;  %3900 = vmatprep.subr.bf16.mxu1 %v4807_v14  ;;  %v4474_v22 = vld [vmem:[%s4706_s27 + $0x54] sm:$0xff]   ;;  %v4840_v28 = vld [vmem:[%s4706_s27 + $0x5c] ss:$0 sps:$4 sm:$0x77]  }
  0x27   : > { %677 = vrot.lane.b32.xlu0 %v673_v16, %s4652_s30  ;;  %v1125_v60 = vrot.slane %v1123_v47, 1  ;;  %v1090_v61 = vrot.slane %v1088_v49, 1  ;;  %v1093_v62 = vshll.u32 %v4774_v48, 16  ;;  %v944_v63 = vrot.slane %v942_v51, 1  ;;  %v4468_v16 = vld [vmem:[%s4706_s27 + $0x48] sm:$0xff]  }
  0x28   : > { %828 = vrot.lane.b32.xlu1 %v824_v20, %s4652_s30  ;;  %v976_v1 = vshrl.u32 %v4750_v23, 16  ;;  %v1127_v2 = vshrl.u32 %v4757_v30, 16  ;;  %v1269_v3 = vshll.u32 %v4779_v52, 16  ;;  %v975_v4 = vsel %vm225_vm0, %v970_v53, %v974_v54  ;;  %v4483_v53 = vld [vmem:[%s4706_s27 + $0x6c] sm:$0xff]  }
  0x29   : > { %v946_v5 = vshrl.u32 %v4765_v36, 16  ;;  %v1097_v6 = vshrl.u32 %v4774_v48, 16  ;;  %v1267_v7 = vshrl.u32 %v4779_v52, 16  ;;  %v1274_v9 = vshll.u32 %v4783_v58, 16  ;;  %3873 = vmatpush3.bf16.msra.mxu0 %v4820_v19  ;;  %3901 = vmatpush3.bf16.msra.mxu1 %v4820_v19  ;;  %v4860_v36 = vld [vmem:[%s5897_s1 + $0x8] sm:$0xff]   ;;  %v4877_v48 = vld [vmem:[%s5897_s1] sm:$0xff]  }
  0x2a   : > { %v1126_v11 = vsel %vm225_vm0, %v1121_v59, %v1125_v60  ;;  %v1091_v12 = vor.u32 %v1090_v61, %v1086_v57  ;;  %v1095_v13 = vrot.slane %v1093_v62, 1  ;;  %v1271_v15 = vrot.slane %v1269_v3, 1  ;;  %3874 = vmatprep.subr.bf16.mxu0 %v4835_v25  ;;  %3902 = vmatprep.subr.bf16.mxu1 %v4835_v25  ;;  %v4893_v59 = vld [vmem:[%s4706_s27 + $0x74] ss:$0 sps:$4 sm:$0x77]  }
  0x2b   : > { %647 = vrot.lane.b32.xlu0 %v643_v26, %s4652_s30  ;;  %v945_v17 = vsel %vm225_vm0, %v940_v56, %v944_v63  ;;  %v4824_v20 = vrot.slane %v1274_v9, 1  ;;  %v1420_v24 = vshll.u32 %v4470_v10, 16  ;;  %v978_v26 = vor.u32 %v976_v1, %v974_v54  ;;  %v4487_v54 = vld [vmem:[%s4706_s27 + $0x78] sm:$0xff]   ;;  %v4485_v1 = vld [vmem:[%s4706_s27 + $0x60] sm:$0xff]  }
  0x2c   : > { %798 = vrot.lane.b32.xlu1 %v794_v31, %s4652_s30  ;;  %v1096_v23 = vsel %vm225_vm0, %v1091_v12, %v1095_v13  ;;  %v1239_v27 = vshll.u32 %v4468_v16, 16  ;;  %v1418_v30 = vshrl.u32 %v4470_v10, 16  ;;  %v4851_v31 = vld [vmem:[%s5897_s1 + $0x48] sm:$0xff]   ;;  %v1129_v32 = vor.u32 %v1127_v2, %v1125_v60  ;;  %v4903_v2 = vld [vmem:[%s4706_s27 + $0x80] ss:$0 sps:$4 sm:$0x77]  }
  0x2d   : > { %v1425_v33 = vshll.u32 %v4814_v18, 16  ;;  %v1422_v35 = vrot.slane %v1420_v24, 1  ;;  %3875 = vmatpush3.bf16.msra.mxu0 %v4845_v29  ;;  %3903 = vmatpush3.bf16.msra.mxu1 %v4845_v29  ;;  %v948_v37 = vor.u32 %v946_v5, %v944_v63  ;;  %v1237_v38 = vshrl.u32 %v4468_v16, 16  ;;  %v4914_v9 = vld [vmem:[%s4706_s27 + $0x68] ss:$0 sps:$4 sm:$0x77]  }
  0x2e   : > { %v1241_v39 = vrot.slane %v1239_v27, 1  ;;  %v1244_v40 = vshll.u32 %v4827_v21, 16  ;;  %3876 = vmatprep.subr.bf16.mxu0 %v4851_v31  ;;  %v1099_v42 = vor.u32 %v1097_v6, %v1095_v13  ;;  %v1272_v43 = vor.u32 %v1271_v15, %v1267_v7  ;;  %3904 = vmatprep.subr.bf16.mxu1 %v4851_v31 }
  0x2f   : > { %679 = vrot.lane.b32.xlu0 %v676_v34, %s4652_s30  ;;  %v1390_v34 = vshll.u32 %v4474_v22, 16  ;;  %v1427_v44 = vrot.slane %v1425_v33, 1  ;;  %v1388_v45 = vshrl.u32 %v4474_v22, 16  ;;  %v1395_v47 = vshll.u32 %v4840_v28, 16 }
  0x30   : > { %830 = vrot.lane.b32.xlu1 %v827_v41, %s4652_s30  ;;  %v4869_v41 = vld [vmem:[%s5897_s1 + $0x40] sm:$0xff]   ;;  %v1423_v49 = vor.u32 %v1422_v35, %v1418_v30  ;;  %v1242_v51 = vor.u32 %v1241_v39, %v1237_v38  ;;  %v1246_v52 = vrot.slane %v1244_v40, 1  ;;  %v1278_v60 = vshrl.u32 %v4783_v58, 16  ;;  %v4499_v38 = vld [vmem:[%s4706_s27 + $0x90] sm:$0xff]  }
  0x31   : > { %v1392_v46 = vrot.slane %v1390_v34, 1  ;;  %3877 = vmatpush3.bf16.msra.mxu0 %v4860_v36  ;;  %3905 = vmatpush3.bf16.msra.mxu1 %v4860_v36  ;;  %v1397_v57 = vrot.slane %v1395_v47, 1  ;;  %v1429_v62 = vshrl.u32 %v4814_v18, 16  ;;  %v1571_v63 = vshll.u32 %v4483_v53, 16 }
  0x32   : > { %3878 = vmatprep.subr.bf16.mxu0 %v4869_v41  ;;  %3906 = vmatprep.subr.bf16.mxu1 %v4869_v41  ;;  %v1247_v61 = vsel %vm225_vm0, %v1242_v51, %v1246_v52  ;;  %v1722_v3 = vshll.u32 %v4487_v54, 16  ;;  %v1248_v5 = vshrl.u32 %v4827_v21, 16  ;;  %v1399_v6 = vshrl.u32 %v4840_v28, 16  ;;  %v4919_v18 = vld [vmem:[%s4706_s27 + $0x74] ss:$0 sps:$4 sm:$0x77]  }
  0x33   : > { %649 = vrot.lane.b32.xlu0 %v646_v50, %s4652_s30  ;;  %v1277_v50 = vsel %vm225_vm0, %v1272_v43, %v4824_v20  ;;  %v1393_v56 = vor.u32 %v1392_v46, %v1388_v45  ;;  %v1280_v7 = vor.u32 %v1278_v60, %v4824_v20  ;;  %v1569_v10 = vshrl.u32 %v4483_v53, 16  ;;  %v4933_v47 = vld [vmem:[%s4706_s27 + $0x8c] ss:$0 sps:$4 sm:$0x77]  }
  0x34   : > { %800 = vrot.lane.b32.xlu1 %v797_v55, %s4652_s30  ;;  %v1428_v55 = vsel %vm225_vm0, %v1423_v49, %v1427_v44  ;;  %v1541_v12 = vshll.u32 %v4485_v1, 16  ;;  %v1720_v13 = vshrl.u32 %v4487_v54, 16  ;;  %v1431_v15 = vor.u32 %v1429_v62, %v1427_v44  ;;  %v4939_v53 = vld [vmem:[%s4706_s27 + $0x98] ss:$0 sps:$4 sm:$0x77]   ;;  %v4501_v54 = vld [vmem:[%s4706_s27 + $0x84] sm:$0xff]  }
  0x35   : > { %3879 = vmatpush3.bf16.msra.mxu0 %v4877_v48  ;;  %3907 = vmatpush3.bf16.msra.mxu1 %v4877_v48  ;;  %v1398_v58 = vsel %vm225_vm0, %v1393_v56, %v1397_v57  ;;  %v1724_v16 = vrot.slane %v1722_v3, 1  ;;  %v1250_v20 = vor.u32 %v1248_v5, %v1246_v52  ;;  %v1546_v27 = vshll.u32 %v4914_v9, 16 }
  0x36   : > { %3920 = vmatprep.subr.bf16.mxu0 %v4684_v0  ;;  %3948 = vmatprep.subr.bf16.mxu1 %v4684_v0  ;;  %v1576_v0 = vshll.u32 %v4893_v59, 16  ;;  %v1401_v28 = vor.u32 %v1399_v6, %v1397_v57  ;;  %v1697_v35 = vshll.u32 %v4919_v18, 16  ;;  %v1580_v43 = vshrl.u32 %v4893_v59, 16 }
  0x37   : > { %979 = vrot.lane.b32.xlu0 %v975_v4, %s4652_s30  ;;  %v4489_v4 = vld [vmem:[%s4706_s27 + $0x6c] sm:$0xff]   ;;  %v1725_v33 = vor.u32 %v1724_v16, %v1720_v13  ;;  %v2024_v51 = vshll.u32 %v4499_v38, 16  ;;  %v1550_v56 = vshrl.u32 %v4914_v9, 16  ;;  %v1701_v57 = vshrl.u32 %v4919_v18, 16 }
  0x38   : > { %1130 = vrot.lane.b32.xlu1 %v1126_v11, %s4652_s30  ;;  %v1573_v11 = vrot.slane %v1571_v63, 1  ;;  %v1692_v21 = vshll.u32 %v4489_v4, 16  ;;  %v1578_v22 = vrot.slane %v1576_v0, 1  ;;  %v1699_v46 = vrot.slane %v1697_v35, 1  ;;  %v4507_v0 = vld [vmem:[%s4706_s27 + $0x9c] sm:$0xff]  }
  0x39   : > { %v1878_v62 = vshll.u32 %v4933_v47, 16  ;;  %v4949_v63 = vld [vmem:[%s4706_s27 + $0x80] ss:$0 sps:$4 sm:$0x77]   ;;  %v1994_v5 = vshll.u32 %v4501_v54, 16  ;;  %v1992_v16 = vshrl.u32 %v4501_v54, 16 }
  0x3a   : > { %v1574_v24 = vor.u32 %v1573_v11, %v1569_v10  ;;  %v1694_v34 = vrot.slane %v1692_v21, 1 }
  0x3b   : > { %949 = vrot.lane.b32.xlu0 %v945_v17, %s4652_s30  ;;  %v1727_v17 = vshll.u32 %v4903_v2, 16  ;;  %v1880_v10 = vrot.slane %v1878_v62, 1 }
  0x3c   : > { %1100 = vrot.lane.b32.xlu1 %v1096_v23, %s4652_s30  ;;  %v1539_v23 = vshrl.u32 %v4485_v1, 16  ;;  %v1579_v39 = vsel %vm225_vm0, %v1574_v24, %v1578_v22  ;;  %v2175_v24 = vshll.u32 %v4507_v0, 16 }
  0x3d   : > { %v1729_v30 = vrot.slane %v1727_v17, 1  ;;  %v1703_v17 = vor.u32 %v1701_v57, %v1699_v46 }
  0x3f   : > { %981 = vrot.lane.b32.xlu0 %v978_v26, %s4652_s30  ;;  %v1543_v26 = vrot.slane %v1541_v12, 1  ;;  %v1730_v44 = vsel %vm225_vm0, %v1725_v33, %v1729_v30  ;;  %v4509_v33 = vld [vmem:[%s4706_s27 + $0x90] sm:$0xff]  }
  0x40   : > { %1132 = vrot.lane.b32.xlu1 %v1129_v32, %s4652_s30  ;;  %v1690_v32 = vshrl.u32 %v4489_v4, 16  ;;  %v2022_v4 = vshrl.u32 %v4499_v38, 16  ;;  %v4511_v38 = vld [vmem:[%s4706_s27 + $0xa8] sm:$0xff]  }
  0x41   : > { %v1544_v40 = vor.u32 %v1543_v26, %v1539_v23  ;;  %v4963_v23 = vld [vmem:[%s4706_s27 + $0xa4] ss:$0 sps:$4 sm:$0x77]   ;;  %v1882_v26 = vshrl.u32 %v4933_v47, 16  ;;  %v2145_v47 = vshll.u32 %v4509_v33, 16 }
  0x42   : > { %v1695_v45 = vor.u32 %v1694_v34, %v1690_v32  ;;  %v2033_v32 = vshrl.u32 %v4939_v53, 16 }
  0x43   : > { %951 = vrot.lane.b32.xlu0 %v948_v37, %s4652_s30  ;;  %v4495_v37 = vld [vmem:[%s4706_s27 + $0x84] sm:$0xff]  }
  0x44   : > { %1102 = vrot.lane.b32.xlu1 %v1099_v42, %s4652_s30  ;;  %v1548_v42 = vrot.slane %v1546_v27, 1  ;;  %v1873_v49 = vshll.u32 %v4495_v37, 16  ;;  %v1871_v59 = vshrl.u32 %v4495_v37, 16  ;;  %v1700_v60 = vsel %vm225_vm0, %v1695_v45, %v1699_v46  ;;  %v4978_v45 = vld [vmem:[%s4706_s27 + $0x98] ss:$0 sps:$4 sm:$0x77]  }
  0x45   : > { %v1852_v37 = vshrl.u32 %v4949_v63, 16  ;;  %v2150_v57 = vshll.u32 %v4978_v45, 16 }
  0x46   : > { %v1549_v52 = vsel %vm225_vm0, %v1544_v40, %v1548_v42  ;;  %v1875_v1 = vrot.slane %v1873_v49, 1  ;;  %v1552_v9 = vor.u32 %v1550_v56, %v1548_v42  ;;  %v2173_v42 = vshrl.u32 %v4507_v0, 16  ;;  %v4982_v49 = vld [vmem:[%s4706_s27 + $0xb0] ss:$0 sps:$4 sm:$0x77]   ;;  %v4523_v0 = vld [vmem:[%s4706_s27 + $0xc0] sm:$0xff]  }
  0x47   : > { %1281 = vrot.lane.b32.xlu0 %v1277_v50, %s4652_s30  ;;  %v4497_v50 = vld [vmem:[%s4706_s27 + $0x78] sm:$0xff]   ;;  %v2147_v56 = vrot.slane %v2145_v47, 1 }
  0x48   : > { %1432 = vrot.lane.b32.xlu1 %v1428_v55, %s4652_s30  ;;  %v1731_v55 = vshrl.u32 %v4903_v2, 16  ;;  %v1843_v3 = vshll.u32 %v4497_v50, 16  ;;  %v2026_v2 = vrot.slane %v2024_v51, 1  ;;  %v1841_v11 = vshrl.u32 %v4497_v50, 16 }
  0x49   : > { %v1876_v13 = vor.u32 %v1875_v1, %v1871_v59  ;;  %v2143_v50 = vshrl.u32 %v4509_v33, 16  ;;  %v2326_v51 = vshll.u32 %v4511_v38, 16  ;;  %v2324_v59 = vshrl.u32 %v4511_v38, 16 }
  0x4a   : > { %v1733_v6 = vor.u32 %v1731_v55, %v1729_v30  ;;  %v1845_v12 = vrot.slane %v1843_v3, 1  ;;  %v2027_v18 = vor.u32 %v2026_v2, %v2022_v4  ;;  %v1884_v55 = vor.u32 %v1882_v26, %v1880_v10  ;;  %v4519_v3 = vld [vmem:[%s4706_s27 + $0xb4] sm:$0xff]  }
  0x4b   : > { %1251 = vrot.lane.b32.xlu0 %v1247_v61, %s4652_s30  ;;  %v1582_v61 = vor.u32 %v1580_v43, %v1578_v22  ;;  %v1881_v27 = vsel %vm225_vm0, %v1876_v13, %v1880_v10  ;;  %v2177_v43 = vrot.slane %v2175_v24, 1  ;;  %v2328_v62 = vrot.slane %v2326_v51, 1  ;;  %v5000_v13 = vld [vmem:[%s4706_s27 + $0xbc] ss:$0 sps:$4 sm:$0x77]  }
  0x4c   : > { %1402 = vrot.lane.b32.xlu1 %v1398_v58, %s4652_s30  ;;  %v2029_v58 = vshll.u32 %v4939_v53, 16  ;;  %v4987_v53 = vld [vmem:[%s4706_s27 + $0xa4] ss:$0 sps:$4 sm:$0x77]   ;;  %v2184_v24 = vshrl.u32 %v4963_v23, 16  ;;  %v2335_v26 = vshrl.u32 %v4982_v49, 16 }
  0x4d   : > { %v2301_v1 = vshll.u32 %v4987_v53, 16  ;;  %v2178_v2 = vor.u32 %v2177_v43, %v2173_v42  ;;  %v2329_v10 = vor.u32 %v2328_v62, %v2324_v59  ;;  %v2475_v33 = vshrl.u32 %v4519_v3, 16 }
  0x4e   : > { %v2031_v21 = vrot.slane %v2029_v58, 1  ;;  %v2626_v42 = vshrl.u32 %v4523_v0, 16 }
  0x4f   : > { %1283 = vrot.lane.b32.xlu0 %v1280_v7, %s4652_s30  ;;  %v4955_v7 = vld [vmem:[%s4706_s27 + $0x8c] ss:$0 sps:$4 sm:$0x77]  }
  0x50   : > { %1434 = vrot.lane.b32.xlu1 %v1431_v15, %s4652_s30  ;;  %v1848_v15 = vshll.u32 %v4949_v63, 16  ;;  %v1999_v22 = vshll.u32 %v4955_v7, 16  ;;  %v2032_v34 = vsel %vm225_vm0, %v2027_v18, %v2031_v21  ;;  %v2003_v40 = vshrl.u32 %v4955_v7, 16  ;;  %v5005_v18 = vld [vmem:[%s4706_s27 + $0xb0] ss:$0 sps:$4 sm:$0x77]  }
  0x52   : > { %v1850_v30 = vrot.slane %v1848_v15, 1  ;;  %v2477_v15 = vshll.u32 %v4519_v3, 16 }
  0x53   : > { %1253 = vrot.lane.b32.xlu0 %v1250_v20, %s4652_s30  ;;  %v1996_v20 = vrot.slane %v1994_v5, 1  ;;  %v2152_v5 = vrot.slane %v2150_v57, 1 }
  0x54   : > { %1404 = vrot.lane.b32.xlu1 %v1401_v28, %s4652_s30  ;;  %v1846_v28 = vor.u32 %v1845_v12, %v1841_v11  ;;  %v1854_v4 = vor.u32 %v1852_v37, %v1850_v30  ;;  %v2303_v12 = vrot.slane %v2301_v1, 1  ;;  %v5019_v37 = vld [vmem:[%s4706_s27 + $0xbc] ss:$0 sps:$4 sm:$0x77]  }
  0x55   : > { %v1997_v35 = vor.u32 %v1996_v20, %v1992_v16  ;;  %v2148_v16 = vor.u32 %v2147_v56, %v2143_v50  ;;  %v5009_v20 = vld [vmem:[%s4706_s27 + $0xc8] ss:$0 sps:$4 sm:$0x77]   ;;  %v2603_v47 = vshll.u32 %v5019_v37, 16 }
  0x56   : > { %v1851_v46 = vsel %vm225_vm0, %v1846_v28, %v1850_v30  ;;  %v2305_v28 = vshrl.u32 %v4987_v53, 16 }
  0x57   : > { %1583 = vrot.lane.b32.xlu0 %v1579_v39, %s4652_s30  ;;  %v2001_v39 = vrot.slane %v1999_v22, 1  ;;  %v2628_v22 = vshll.u32 %v4523_v0, 16  ;;  %v2153_v38 = vsel %vm225_vm0, %v2148_v16, %v2152_v5  ;;  %v5033_v62 = vrot.slane %v2603_v47, 1  ;;  %v4571_v0 = vld [vmem:[%s4706_s27 + $0xc] sm:$0xff]  }
  0x58   : > { %1734 = vrot.lane.b32.xlu1 %v1730_v44, %s4652_s30  ;;  %v2180_v44 = vshll.u32 %v4963_v23, 16  ;;  %v2482_v23 = vshll.u32 %v5000_v13, 16  ;;  %v2456_v16 = vshrl.u32 %v5005_v18, 16  ;;  %v5091_v47 = vld [vmem:[%s5897_s1 + $0x68] sm:$0xff]  }
  0x59   : > { %v2002_v54 = vsel %vm225_vm0, %v1997_v35, %v2001_v39  ;;  %v4525_v35 = vld [vmem:[%s4706_s27 + $0xb4] sm:$0xff]   ;;  %v2630_v43 = vrot.slane %v2628_v22, 1 }
  0x5a   : > { %v2182_v58 = vrot.slane %v2180_v44, 1  ;;  %v2633_v44 = vshll.u32 %v5009_v20, 16 }
  0x5b   : > { %1553 = vrot.lane.b32.xlu0 %v1549_v52, %s4652_s30  ;;  %v4513_v52 = vld [vmem:[%s4706_s27 + $0x9c] sm:$0xff]  }
  0x5c   : > { %1704 = vrot.lane.b32.xlu1 %v1700_v60, %s4652_s30  ;;  %v2331_v60 = vshll.u32 %v4982_v49, 16  ;;  %v2296_v63 = vshll.u32 %v4513_v52, 16  ;;  %v2294_v7 = vshrl.u32 %v4513_v52, 16  ;;  %v2186_v49 = vor.u32 %v2184_v24, %v2182_v58  ;;  %v4491_v24 = vld [vmem:[%s4706_s27 + $0x14] ss:$0 sps:$4 sm:$0x33]  }
  0x5d   : > { %v2307_v52 = vor.u32 %v2305_v28, %v2303_v12  ;;  %v2635_v59 = vrot.slane %v2633_v44, 1  ;;  %v4535_v44 = vld [vmem:[%s4706_s27 + $0xd8] sm:$0xff]  }
  0x5e   : > { %v2298_v11 = vrot.slane %v2296_v63, 1  ;;  %v2631_v63 = vor.u32 %v2630_v43, %v2626_v42  ;;  %v4533_v43 = vld [vmem:[%s4706_s27 + $0xc0] sm:$0xff]  }
  0x5f   : > { %1585 = vrot.lane.b32.xlu0 %v1582_v61, %s4652_s30  ;;  %v2035_v61 = vor.u32 %v2033_v32, %v2031_v21  ;;  %v2183_v21 = vsel %vm225_vm0, %v2178_v2, %v2182_v58 }
  0x60   : > { %1736 = vrot.lane.b32.xlu1 %v1733_v6, %s4652_s30  ;;  %v2333_v6 = vrot.slane %v2331_v60, 1  ;;  %v2299_v32 = vor.u32 %v2298_v11, %v2294_v7  ;;  %v2596_v60 = vshrl.u32 %v4525_v35, 16  ;;  %v4572_v11 = vld [vmem:[%s4706_s27] sm:$0xff]  }
  0x62   : > { %v2334_v30 = vsel %vm225_vm0, %v2329_v10, %v2333_v6  ;;  %v2337_v50 = vor.u32 %v2335_v26, %v2333_v6  ;;  %v4574_v26 = vld [vmem:[%s4706_s27 + $0x18] sm:$0xff]  }
  0x63   : > { %1555 = vrot.lane.b32.xlu0 %v1552_v9, %s4652_s30  ;;  %v2005_v9 = vor.u32 %v2003_v40, %v2001_v39  ;;  %v2452_v40 = vshll.u32 %v5005_v18, 16  ;;  %v5066_v18 = vld [vmem:[%s5897_s1 + $0x70] sm:$0xff]  }
  0x64   : > { %1706 = vrot.lane.b32.xlu1 %v1703_v17, %s4652_s30  ;;  %v4521_v17 = vld [vmem:[%s4706_s27 + $0xa8] sm:$0xff]  }
  0x65   : > { %v2447_v39 = vshll.u32 %v4521_v17, 16  ;;  %v2454_v57 = vrot.slane %v2452_v40, 1 }
  0x67   : > { %1885 = vrot.lane.b32.xlu0 %v1881_v27, %s4652_s30  ;;  %v2154_v27 = vshrl.u32 %v4978_v45, 16  ;;  %v2304_v45 = vsel %vm225_vm0, %v2299_v32, %v2303_v12  ;;  %v2449_v56 = vrot.slane %v2447_v39, 1  ;;  %v4492_v32 = vld [vmem:[%s4706_s27 + $0x20] ss:$0 sps:$4 sm:$0x33]  }
  0x68   : > { %2036 = vrot.lane.b32.xlu1 %v2032_v34, %s4652_s30  ;;  %v2479_v34 = vrot.slane %v2477_v15, 1  ;;  %v2637_v15 = vshrl.u32 %v5009_v20, 16 }
  0x69   : > { %v2156_v51 = vor.u32 %v2154_v27, %v2152_v5  ;;  %v2486_v5 = vshrl.u32 %v5000_v13, 16  ;;  %v5070_v27 = vld [vmem:[%s4706_s27 + $0xd4] ss:$0 sps:$4 sm:$0x77]  }
  0x6a   : > { %v2480_v53 = vor.u32 %v2479_v34, %v2475_v33  ;;  %v2639_v33 = vor.u32 %v2637_v15, %v2635_v59  ;;  %v2458_v34 = vor.u32 %v2456_v16, %v2454_v57  ;;  %v2784_v42 = vshll.u32 %v5070_v27, 16 }
  0x6b   : > { %1855 = vrot.lane.b32.xlu0 %v1851_v46, %s4652_s30  ;;  %v2598_v46 = vshll.u32 %v4525_v35, 16  ;;  %v2607_v35 = vshrl.u32 %v5019_v37, 16 }
  0x6c   : > { %2006 = vrot.lane.b32.xlu1 %v2002_v54, %s4652_s30  ;;  %v2484_v54 = vrot.slane %v2482_v23, 1 }
  0x6e   : > { %v2485_v1 = vsel %vm225_vm0, %v2480_v53, %v2484_v54  ;;  %v2488_v13 = vor.u32 %v2486_v5, %v2484_v54  ;;  %v2749_v53 = vshll.u32 %v4533_v43, 16 }
  0x6f   : > { %1887 = vrot.lane.b32.xlu0 %v1884_v55, %s4652_s30  ;;  %v2445_v55 = vshrl.u32 %v4521_v17, 16  ;;  %v4531_v17 = vld [vmem:[%s4706_s27 + $0xcc] sm:$0xff]  }
  0x70   : > { %2038 = vrot.lane.b32.xlu1 %v2035_v61, %s4652_s30  ;;  %v2600_v61 = vrot.slane %v2598_v46, 1  ;;  %v2779_v28 = vshll.u32 %v4531_v17, 16  ;;  %v2777_v39 = vshrl.u32 %v4531_v17, 16  ;;  %v4493_v46 = vld [vmem:[%s4706_s27 + $0x8] ss:$0 sps:$4 sm:$0x33]  }
  0x71   : > { %v2450_v3 = vor.u32 %v2449_v56, %v2445_v55  ;;  %v2609_v55 = vor.u32 %v2607_v35, %v5033_v62  ;;  %v5103_v56 = vld [vmem:[%s4706_s27 + $0xe0] ss:$0 sps:$4 sm:$0x77]  }
  0x72   : > { %v2601_v2 = vor.u32 %v2600_v61, %v2596_v60  ;;  %v2781_v40 = vrot.slane %v2779_v28, 1  ;;  %v4494_v60 = vld [vmem:[%s4706_s27 + $0x14] ss:$0 sps:$4 sm:$0x33]  }
  0x73   : > { %1857 = vrot.lane.b32.xlu0 %v1854_v4, %s4652_s30  ;;  %v2636_v4 = vsel %vm225_vm0, %v2631_v63, %v2635_v59  ;;  %v2455_v58 = vsel %vm225_vm0, %v2450_v3, %v2454_v57  ;;  %v2930_v57 = vshll.u32 %v4535_v44, 16  ;;  %v2747_v63 = vshrl.u32 %v4533_v43, 16  ;;  %v4537_v3 = vld [vmem:[%s4706_s27 + $0xcc] sm:$0xff]  }
  0x74   : > { %2008 = vrot.lane.b32.xlu1 %v2005_v9, %s4652_s30  ;;  %v2606_v10 = vsel %vm225_vm0, %v2601_v2, %v5033_v62  ;;  %v5115_v62 = vld [vmem:[%s5897_s1 + $0x28] sm:$0xff]  }
  0x75   : > { %v2932_v5 = vrot.slane %v2930_v57, 1  ;;  %v4505_v57 = vld [vmem:[%s4706_s27 + $0x20] ss:$0 sps:$4 sm:$0x33]  }
  0x77   : > { %2187 = vrot.lane.b32.xlu0 %v2183_v21, %s4652_s30  ;;  %v5056_v21 = vld [vmem:[%s5897_s1 + $0x38] sm:$0xff]  }
  0x78   : > { %2338 = vrot.lane.b32.xlu1 %v2334_v30, %s4652_s30 }
  0x7b   : > { %2157 = vrot.lane.b32.xlu0 %v2153_v38, %s4652_s30  ;;  %v4576_v38 = vld [vmem:[%s4706_s27 + $0xc] sm:$0xff]  }
  0x7c   : > { %2308 = vrot.lane.b32.xlu1 %v2304_v45, %s4652_s30  ;;  %v5083_v45 = vld [vmem:[%s5897_s1 + $0x30] sm:$0xff]  }
  0x7f   : > { %2189 = vrot.lane.b32.xlu0 %v2186_v49, %s4652_s30 }
  0x80   : > { %2340 = vrot.lane.b32.xlu1 %v2337_v50, %s4652_s30  ;;  %v2782_v50 = vor.u32 %v2781_v40, %v2777_v39  ;;  %v5156_v39 = vld [vmem:[%s5897_s1 + $0x20] sm:$0xff]   ;;  %v5163_v40 = vld [vmem:[%s5897_s1 + $0x58] sm:$0xff]  }
  0x83   : > { %2159 = vrot.lane.b32.xlu0 %v2156_v51, %s4652_s30  ;;  %v5095_v51 = vrot.slane %v2784_v42, 1 }
  0x84   : > { %2310 = vrot.lane.b32.xlu1 %v2307_v52, %s4652_s30  ;;  %v5098_v52 = vld [vmem:[%s4706_s27 + $0xc8] ss:$0 sps:$4 sm:$0x77]  }
  0x85   : > { %v2787_v61 = vsel %vm225_vm0, %v2782_v50, %v5095_v51  ;;  %v2754_v2 = vshll.u32 %v5098_v52, 16 }
  0x87   : > { %2489 = vrot.lane.b32.xlu0 %v2485_v1, %s4652_s30  ;;  %v2751_v1 = vrot.slane %v2749_v53, 1 }
  0x88   : > { %2640 = vrot.lane.b32.xlu1 %v2636_v4, %s4652_s30 }
  0x89   : > { %v272_v6 = vpop.permute.xlu0 %271 }
  0x8a   : > { %v242_v7 = vpop.permute.xlu1 %241  ;;  %v284_v9 = vsel %vm275_vm1, %v4571_v0, %v272_v6  ;;  %v2935_v6 = vshll.u32 %v5103_v56, 16 }
  0x8b   : > { %424 = vmatprep.mubr.bf16.mxu0 %v284_v9  ;;  %v277_v12 = vsel %vm275_vm1, %v4572_v11, %v242_v7  ;;  %2459 = vrot.lane.b32.xlu0 %v2455_v58, %s4652_s30  ;;  %v2928_v58 = vshrl.u32 %v4535_v44, 16  ;;  %v5124_v7 = vld [vmem:[%s5897_s1 + $0x60] sm:$0xff]   ;;  %v2752_v9 = vor.u32 %v2751_v1, %v2747_v63  ;;  %v2900_v11 = vshll.u32 %v4537_v3, 16  ;;  %v4503_v44 = vld [vmem:[%s4706_s27 + $0x2c] ss:$0 sps:$4 sm:$0x33]  }
  0x8c   : > { %425 = vmatmul.mubr.bf16.vlgmr.msra.gmra.mxu0 %v277_v12  ;;  %2610 = vrot.lane.b32.xlu1 %v2606_v10, %s4652_s30  ;;  %v5129_v10 = vld [vmem:[%s4706_s27 + $0xd4] ss:$0 sps:$4 sm:$0x77]   ;;  %v2937_v16 = vrot.slane %v2935_v6, 1 }
  0x8d   : > { %3921 = vmatpush3.bf16.msra.mxu0 %v5056_v21  ;;  %v527_v22 = vpop.permute.xlu0 %526  ;;  %v2933_v15 = vor.u32 %v2932_v5, %v2928_v58  ;;  %v4547_v58 = vld [vmem:[%s4706_s27 + $0xf0] sm:$0xff]  }
  0x8e   : > { %v538_v20 = vsel %vm275_vm1, %v4574_v26, %v527_v22  ;;  %3922 = vmatprep.subr.bf16.mxu0 %v5066_v18  ;;  %v497_v30 = vpop.permute.xlu1 %496  ;;  %v2898_v22 = vshrl.u32 %v4537_v3, 16  ;;  %v2905_v26 = vshll.u32 %v5129_v10, 16 }
  0x8f   : > { %576 = vmatprep.mubr.bf16.mxu1 %v538_v20  ;;  %2491 = vrot.lane.b32.xlu0 %v2488_v13, %s4652_s30  ;;  %v531_v23 = vsel %vm275_vm1, %v4576_v38, %v497_v30  ;;  %v5132_v13 = vrot.slane %v2754_v2, 1  ;;  %v2938_v30 = vsel %vm225_vm0, %v2933_v15, %v2937_v16  ;;  %v4545_v2 = vld [vmem:[%s4706_s27 + $0xd8] sm:$0xff]   ;;  %v4546_v15 = vld [vmem:[%s4706_s27 + $0xe0] ss:$0 sps:$4 sm:$0x77]  }
  0x90   : > { %577 = vmatmul.mubr.bf16.vlgmr.msra.gmra.mxu1 %v531_v23  ;;  %2642 = vrot.lane.b32.xlu1 %v2639_v33, %s4652_s30  ;;  %v2907_v35 = vrot.slane %v2905_v26, 1  ;;  %v3049_v26 = vshrl.u32 %v4545_v2, 16 }
  0x91   : > { %3923 = vmatpush3.bf16.msra.mxu0 %v5083_v45  ;;  %v274_v37 = vpop.permute.xlu0 %273  ;;  %3949 = vmatpush3.bf16.msra.mxu1 %v5056_v21  ;;  %v2757_v28 = vsel %vm225_vm0, %v2752_v9, %v5132_v13 }
  0x92   : > { %3924 = vmatprep.subr.bf16.mxu0 %v5091_v47  ;;  %v288_v49 = vsel %vm275_vm1, %v4491_v24, %v274_v37  ;;  %3950 = vmatprep.subr.bf16.mxu1 %v5066_v18  ;;  %v529_v54 = vpop.permute.xlu1 %528  ;;  %v2902_v24 = vrot.slane %v2900_v11, 1 }
  0x93   : > { %432 = vmatprep.mubr.bf16.mxu0 %v288_v49  ;;  %v542_v59 = vsel %vm275_vm1, %v4492_v32, %v529_v54  ;;  %2461 = vrot.lane.b32.xlu0 %v2458_v34, %s4652_s30  ;;  %v4581_v32 = vld [vmem:[%s4706_s27 + $0x24] sm:$0xff]   ;;  %v2939_v49 = vshrl.u32 %v5103_v56, 16 }
  0x94   : > { %584 = vmatprep.mubr.bf16.mxu1 %v542_v59  ;;  %2612 = vrot.lane.b32.xlu1 %v2609_v55, %s4652_s30  ;;  %v2903_v34 = vor.u32 %v2902_v24, %v2898_v22  ;;  %v4504_v55 = vld [vmem:[%s4706_s27 + $0x38] ss:$0 sps:$4 sm:$0x33]   ;;  %v4543_v56 = vld [vmem:[%s4706_s27 + $0xe4] sm:$0xff]   ;;  %v3232_v22 = vshll.u32 %v4547_v58, 16 }
  0x95   : > { %3925 = vmatpush3.bf16.msra.mxu0 %v5115_v62  ;;  %v244_v4 = vpop.permute.xlu0 %243  ;;  %3951 = vmatpush3.bf16.msra.mxu1 %v5083_v45  ;;  %v3081_v63 = vshll.u32 %v4543_v56, 16  ;;  %v3079_v3 = vshrl.u32 %v4543_v56, 16  ;;  %v3060_v56 = vshrl.u32 %v4546_v15, 16 }
  0x96   : > { %3926 = vmatprep.subr.bf16.mxu0 %v5124_v7  ;;  %v281_v0 = vsel %vm275_vm1, %v4493_v46, %v244_v4  ;;  %3952 = vmatprep.subr.bf16.mxu1 %v5091_v47  ;;  %v499_v12 = vpop.permute.xlu1 %498  ;;  %v2788_v46 = vshrl.u32 %v5070_v27, 16 }
  0x97   : > { %433 = vmatmul.mubr.bf16.gmra.mxu0 %v281_v0  ;;  %v535_v17 = vsel %vm275_vm1, %v4494_v60, %v499_v12  ;;  %2791 = vrot.lane.b32.xlu0 %v2787_v61, %s4652_s30  ;;  %v4587_v60 = vld [vmem:[%s4706_s27 + $0x24] sm:$0xff]   ;;  %v5205_v61 = vld [vmem:[%s4706_s27 + $0xec] ss:$0 sps:$4 sm:$0x77]  }
  0x98   : > { %585 = vmatmul.mubr.bf16.gmra.mxu1 %v535_v17  ;;  %2942 = vrot.lane.b32.xlu1 %v2938_v30, %s4652_s30  ;;  %v2790_v50 = vor.u32 %v2788_v46, %v5095_v51  ;;  %v2909_v51 = vshrl.u32 %v5129_v10, 16  ;;  %v3086_v4 = vshll.u32 %v5205_v61, 16  ;;  %v4506_v0 = vld [vmem:[%s4706_s27 + $0x2c] ss:$0 sps:$4 sm:$0x33]   ;;  %v4588_v10 = vld [vmem:[%s4706_s27 + $0x3c] sm:$0xff]  }
  0x99   : > { %3927 = vmatpush3.bf16.msra.mxu0 %v4797_v8  ;;  %v678_v20 = vpop.permute.xlu0 %677  ;;  %3953 = vmatpush3.bf16.msra.mxu1 %v5115_v62  ;;  %v4582_v8 = vld [vmem:[%s4706_s27 + $0x30] sm:$0xff]   ;;  %v4548_v17 = vld [vmem:[%s4706_s27 + $0xf8] ss:$0 sps:$4 sm:$0x77]  }
  0x9a   : > { %3928 = vmatprep.subr.bf16.mxu0 %v4807_v14  ;;  %v689_v33 = vsel %vm275_vm1, %v4581_v32, %v678_v20  ;;  %3954 = vmatprep.subr.bf16.mxu1 %v5124_v7  ;;  %v829_v38 = vpop.permute.xlu1 %828  ;;  %v2908_v14 = vsel %vm225_vm0, %v2903_v34, %v2907_v35  ;;  %v2911_v59 = vor.u32 %v2909_v51, %v2907_v35  ;;  %v3056_v32 = vshll.u32 %v4546_v15, 16  ;;  %v5247_v51 = vld [vmem:[%s5897_s1 + $0x18] sm:$0xff]  }
  0x9b   : > { %727 = vmatprep.mubr.bf16.mxu0 %v689_v33  ;;  %v840_v23 = vsel %vm275_vm1, %v4582_v8, %v829_v38  ;;  %2761 = vrot.lane.b32.xlu0 %v2757_v28, %s4652_s30  ;;  %v4549_v28 = vld [vmem:[%s4706_s27 + $0xe4] sm:$0xff]   ;;  %v3230_v33 = vshrl.u32 %v4547_v58, 16  ;;  %v3234_v34 = vrot.slane %v3232_v22, 1  ;;  %v3237_v35 = vshll.u32 %v4548_v17, 16 }
  0x9c   : > { %878 = vmatprep.mubr.bf16.mxu1 %v840_v23  ;;  %2912 = vrot.lane.b32.xlu1 %v2908_v14, %s4652_s30  ;;  %v4550_v23 = vld [vmem:[%s4706_s27 + $0xec] ss:$0 sps:$4 sm:$0x77]   ;;  %v3202_v14 = vshll.u32 %v4549_v28, 16 }
  0x9d   : > { %3929 = vmatpush3.bf16.msra.mxu0 %v4820_v19  ;;  %3955 = vmatpush3.bf16.msra.mxu1 %v5156_v39  ;;  %v648_v42 = vpop.permute.xlu0 %647  ;;  %v4515_v58 = vld [vmem:[%s4706_s27 + $0x44] ss:$0 sps:$4 sm:$0x33]   ;;  %v4517_v15 = vld [vmem:[%s4706_s27 + $0x38] ss:$0 sps:$4 sm:$0x33]  }
  0x9e   : > { %3930 = vmatprep.subr.bf16.mxu0 %v4835_v25  ;;  %3956 = vmatprep.subr.bf16.mxu1 %v5163_v40  ;;  %v799_v37 = vpop.permute.xlu1 %798 }
  0x9f   : > { %2793 = vrot.lane.b32.xlu0 %v2790_v50, %s4652_s30 }
  0xa1   : > { %3931 = vmatpush3.bf16.msra.mxu0 %v4845_v29  ;;  %3957 = vmatpush3.bf16.msra.mxu1 %v4820_v19  ;;  %v680_v43 = vpop.permute.xlu0 %679  ;;  %v4585_v19 = vld [vmem:[%s4706_s27 + $0x18] sm:$0xff]  }
  0xa2   : > { %3932 = vmatprep.subr.bf16.mxu0 %v4851_v31  ;;  %3958 = vmatprep.subr.bf16.mxu1 %v4835_v25  ;;  %v682_v25 = vsel %vm275_vm1, %v4585_v19, %v648_v42  ;;  %v693_v27 = vsel %vm275_vm1, %v4503_v44, %v680_v43  ;;  %v831_v53 = vpop.permute.xlu1 %830  ;;  %v3058_v42 = vrot.slane %v3056_v32, 1  ;;  %v3235_v43 = vor.u32 %v3234_v34, %v3230_v33 }
  0xa3   : > { %v844_v1 = vsel %vm275_vm1, %v4504_v55, %v831_v53  ;;  %v3239_v44 = vrot.slane %v3237_v35, 1  ;;  %v3204_v19 = vrot.slane %v3202_v14, 1  ;;  %v4600_v35 = vld [vmem:[%s4706_s27 + $0x60] sm:$0xff]   ;;  %v4527_v14 = vld [vmem:[%s4706_s27 + $0x5c] ss:$0 sps:$4 sm:$0x33]  }
  0xa5   : > { %3933 = vmatpush3.bf16.msra.mxu0 %v4860_v36  ;;  %3959 = vmatpush3.bf16.msra.mxu1 %v4845_v29  ;;  %v2941_v29 = vor.u32 %v2939_v49, %v2937_v16  ;;  %v650_v54 = vpop.permute.xlu0 %649  ;;  %v3051_v16 = vshll.u32 %v4545_v2, 16  ;;  %v3200_v49 = vshrl.u32 %v4549_v28, 16  ;;  %v5287_v2 = vld [vmem:[%s5897_s1 + $0x40] sm:$0xff]  }
  0xa6   : > { %3934 = vmatprep.subr.bf16.mxu0 %v4869_v41  ;;  %3960 = vmatprep.subr.bf16.mxu1 %v4851_v31  ;;  %v5186_v31 = vld [vmem:[%s5897_s1 + $0x78] sm:$0xff]   ;;  %v801_v5 = vpop.permute.xlu1 %800  ;;  %v686_v6 = vsel %vm275_vm1, %v4505_v57, %v650_v54  ;;  %v3241_v57 = vshrl.u32 %v4548_v17, 16  ;;  %v4518_v28 = vld [vmem:[%s4706_s27 + $0x44] ss:$0 sps:$4 sm:$0x33]  }
  0xa7   : > { %2944 = vrot.lane.b32.xlu1 %v2941_v29, %s4652_s30  ;;  %v3053_v20 = vrot.slane %v3051_v16, 1  ;;  %v837_v38 = vsel %vm275_vm1, %v4506_v0, %v801_v5  ;;  %v3240_v29 = vsel %vm225_vm0, %v3235_v43, %v3239_v44  ;;  %v3205_v53 = vor.u32 %v3204_v19, %v3200_v49  ;;  %v4597_v0 = vld [vmem:[%s4706_s27 + $0x30] sm:$0xff]   ;;  %v4598_v16 = vld [vmem:[%s4706_s27 + $0x3c] sm:$0xff]   ;;  %v4601_v43 = vld [vmem:[%s4706_s27 + $0x48] sm:$0xff]  }
  0xa8   : > { %v4528_v19 = vld [vmem:[%s4706_s27 + $0x68] ss:$0 sps:$4 sm:$0x33]  }
  0xa9   : > { %3935 = vmatpush3.bf16.msra.mxu0 %v4877_v48  ;;  %3961 = vmatpush3.bf16.msra.mxu1 %v4860_v36  ;;  %v2758_v36 = vshrl.u32 %v5098_v52, 16  ;;  %v833_v52 = vsel %vm275_vm1, %v4587_v60, %v799_v37  ;;  %v980_v9 = vpop.permute.xlu0 %979  ;;  %v3054_v8 = vor.u32 %v3053_v20, %v3049_v26  ;;  %v4589_v37 = vld [vmem:[%s4706_s27 + $0x48] sm:$0xff]   ;;  %v3243_v60 = vor.u32 %v3241_v57, %v3239_v44 }
  0xaa   : > { %3976 = vmatprep.subr.bf16.mxu0 %v5186_v31  ;;  %3962 = vmatprep.subr.bf16.mxu1 %v4869_v41  ;;  %v991_v11 = vsel %vm275_vm1, %v4588_v10, %v980_v9  ;;  %v1131_v30 = vpop.permute.xlu1 %1130 }
  0xab   : > { %v2760_v41 = vor.u32 %v2758_v36, %v5132_v13  ;;  %2914 = vrot.lane.b32.xlu1 %v2911_v59, %s4652_s30  ;;  %v3088_v13 = vrot.slane %v3086_v4, 1  ;;  %v1142_v46 = vsel %vm275_vm1, %v4589_v37, %v1131_v30  ;;  %v3059_v50 = vsel %vm225_vm0, %v3054_v8, %v3058_v42  ;;  %v4599_v30 = vld [vmem:[%s4706_s27 + $0x54] sm:$0xff]  }
  0xac   : > { %728 = vmatmul.mubr.bf16.vlgmr.msra.gmra.mxu0 %v682_v25  ;;  %v3207_v25 = vshll.u32 %v4550_v23, 16  ;;  %v3062_v59 = vor.u32 %v3060_v56, %v3058_v42  ;;  %v4603_v56 = vld [vmem:[%s4706_s27 + $0x6c] sm:$0xff]  }
  0xad   : > { %3977 = vmatpush3.bf16.msra.mxu0 %v5056_v21  ;;  %735 = vmatprep.mubr.bf16.mxu0 %v693_v27  ;;  %v3090_v27 = vshrl.u32 %v5205_v61, 16  ;;  %v950_v61 = vpop.permute.xlu0 %949 }
  0xae   : > { %3963 = vmatpush3.bf16.msra.mxu1 %v4877_v48  ;;  %3978 = vmatprep.subr.bf16.mxu0 %v5066_v18  ;;  %v3083_v48 = vrot.slane %v3081_v63, 1  ;;  %v3209_v54 = vrot.slane %v3207_v25, 1  ;;  %v5271_v63 = vld [vmem:[%s5897_s1 + $0x48] sm:$0xff]   ;;  %v1101_v5 = vpop.permute.xlu1 %1100  ;;  %v984_v9 = vsel %vm275_vm1, %v4597_v0, %v950_v61  ;;  %v4529_v25 = vld [vmem:[%s4706_s27 + $0x50] ss:$0 sps:$4 sm:$0x33]  }
  0xaf   : > { %4004 = vmatprep.subr.bf16.mxu1 %v5186_v31  ;;  %2763 = vrot.lane.b32.xlu0 %v2760_v41, %s4652_s30  ;;  %v3092_v36 = vor.u32 %v3090_v27, %v3088_v13  ;;  %v5255_v41 = vld [vmem:[%s5897_s1 + $0x50] sm:$0xff]   ;;  %v1135_v17 = vsel %vm275_vm1, %v4598_v16, %v1101_v5  ;;  %v4604_v61 = vld [vmem:[%s4706_s27 + $0x78] sm:$0xff]   ;;  %v4605_v0 = vld [vmem:[%s4706_s27 + $0x60] sm:$0xff]  }
  0xb0   : > { %v3084_v12 = vor.u32 %v3083_v48, %v3079_v3  ;;  %3244 = vrot.lane.b32.xlu1 %v3240_v29, %s4652_s30  ;;  %v3210_v55 = vsel %vm225_vm0, %v3205_v53, %v3209_v54  ;;  %v5280_v48 = vld [vmem:[%s5897_s1 + $0x8] sm:$0xff]  }
  0xb1   : > { %879 = vmatmul.mubr.bf16.vlgmr.msra.gmra.mxu1 %v833_v52  ;;  %3979 = vmatpush3.bf16.msra.mxu0 %v5083_v45  ;;  %v5264_v52 = vld [vmem:[%s5897_s1 + $0x10] sm:$0xff]   ;;  %v982_v4 = vpop.permute.xlu0 %981 }
  0xb2   : > { %4005 = vmatpush3.bf16.msra.mxu1 %v5056_v21  ;;  %3980 = vmatprep.subr.bf16.mxu0 %v5091_v47  ;;  %v3089_v24 = vsel %vm225_vm0, %v3084_v12, %v3088_v13  ;;  %v995_v10 = vsel %vm275_vm1, %v4515_v58, %v982_v4  ;;  %v4516_v13 = vld [vmem:[%s4706_s27 + $0x50] ss:$0 sps:$4 sm:$0x33]   ;;  %v4539_v58 = vld [vmem:[%s4706_s27 + $0x74] ss:$0 sps:$4 sm:$0x33]  }
  0xb3   : > { %4006 = vmatprep.subr.bf16.mxu1 %v5066_v18  ;;  %886 = vmatprep.mubr.bf16.mxu1 %v844_v1  ;;  %v3211_v1 = vshrl.u32 %v4550_v23, 16  ;;  %v4606_v16 = vld [vmem:[%s4706_s27 + $0x6c] sm:$0xff]  }
  0xb4   : > { %736 = vmatmul.mubr.bf16.gmra.mxu0 %v686_v6  ;;  %3093 = vrot.lane.b32.xlu0 %v3089_v24, %s4652_s30  ;;  %v5296_v6 = vld [vmem:[%s5897_s1] sm:$0xff]  }
  0xb5   : > { %3981 = vmatpush3.bf16.msra.mxu0 %v5115_v62  ;;  %1029 = vmatprep.mubr.bf16.mxu0 %v991_v11  ;;  %v3213_v3 = vor.u32 %v3211_v1, %v3209_v54  ;;  %v1133_v11 = vpop.permute.xlu1 %1132  ;;  %v952_v12 = vpop.permute.xlu0 %951 }
  0xb6   : > { %4007 = vmatpush3.bf16.msra.mxu1 %v5083_v45  ;;  %3982 = vmatprep.subr.bf16.mxu0 %v5124_v7  ;;  %v1146_v22 = vsel %vm275_vm1, %v4516_v13, %v1133_v11  ;;  %v988_v26 = vsel %vm275_vm1, %v4517_v15, %v952_v12  ;;  %v4540_v13 = vld [vmem:[%s4706_s27 + $0x80] ss:$0 sps:$4 sm:$0x33]   ;;  %v4541_v15 = vld [vmem:[%s4706_s27 + $0x68] ss:$0 sps:$4 sm:$0x33]  }
  0xb7   : > { %4008 = vmatprep.subr.bf16.mxu1 %v5091_v47  ;;  %3214 = vrot.lane.b32.xlu1 %v3210_v55, %s4652_s30  ;;  %v4530_v55 = vld [vmem:[%s4706_s27 + $0x5c] ss:$0 sps:$4 sm:$0x33]  }
  0xb8   : > { %3063 = vrot.lane.b32.xlu0 %v3059_v50, %s4652_s30  ;;  %v4602_v50 = vld [vmem:[%s4706_s27 + $0x54] sm:$0xff]  }
  0xb9   : > { %3983 = vmatpush3.bf16.msra.mxu0 %v5156_v39  ;;  %887 = vmatmul.mubr.bf16.gmra.mxu1 %v837_v38  ;;  %v1103_v24 = vpop.permute.xlu1 %1102  ;;  %v1282_v20 = vpop.permute.xlu0 %1281 }
  0xba   : > { %4009 = vmatpush3.bf16.msra.mxu1 %v5115_v62  ;;  %3984 = vmatprep.subr.bf16.mxu0 %v5163_v40  ;;  %v1293_v32 = vsel %vm275_vm1, %v4599_v30, %v1282_v20  ;;  %v1139_v34 = vsel %vm275_vm1, %v4518_v28, %v1103_v24  ;;  %v4542_v28 = vld [vmem:[%s4706_s27 + $0x74] ss:$0 sps:$4 sm:$0x33]   ;;  %v4607_v30 = vld [vmem:[%s4706_s27 + $0x84] sm:$0xff]  }
  0xbb   : > { %4010 = vmatprep.subr.bf16.mxu1 %v5124_v7  ;;  %1180 = vmatprep.mubr.bf16.mxu1 %v1142_v46 }
  0xbc   : > { %3095 = vrot.lane.b32.xlu0 %v3092_v36, %s4652_s30  ;;  %3246 = vrot.lane.b32.xlu1 %v3243_v60, %s4652_s30 }
  0xbd   : > { %3985 = vmatpush3.bf16.msra.mxu0 %v5247_v51  ;;  %v1433_v33 = vpop.permute.xlu1 %1432  ;;  %v1252_v8 = vpop.permute.xlu0 %1251 }
  0xbe   : > { %4011 = vmatpush3.bf16.msra.mxu1 %v5156_v39  ;;  %3986 = vmatprep.subr.bf16.mxu0 %v5255_v41  ;;  %v1444_v38 = vsel %vm275_vm1, %v4600_v35, %v1433_v33  ;;  %v1286_v44 = vsel %vm275_vm1, %v4601_v43, %v1252_v8  ;;  %v4608_v35 = vld [vmem:[%s4706_s27 + $0x90] sm:$0xff]   ;;  %v4609_v43 = vld [vmem:[%s4706_s27 + $0x78] sm:$0xff]  }
  0xbf   : > { %4012 = vmatprep.subr.bf16.mxu1 %v5163_v40 }
  0xc0   : > { %3065 = vrot.lane.b32.xlu0 %v3062_v59, %s4652_s30  ;;  %3216 = vrot.lane.b32.xlu1 %v3213_v3, %s4652_s30 }
  0xc1   : > { %3987 = vmatpush3.bf16.msra.mxu0 %v5264_v52  ;;  %v1284_v23 = vpop.permute.xlu0 %1283  ;;  %v1403_v42 = vpop.permute.xlu1 %1402 }
  0xc2   : > { %4013 = vmatpush3.bf16.msra.mxu1 %v5247_v51  ;;  %3988 = vmatprep.subr.bf16.mxu0 %v5271_v63  ;;  %v1297_v37 = vsel %vm275_vm1, %v4527_v14, %v1284_v23  ;;  %v1437_v29 = vsel %vm275_vm1, %v4602_v50, %v1403_v42  ;;  %v4551_v14 = vld [vmem:[%s4706_s27 + $0x8c] ss:$0 sps:$4 sm:$0x33]   ;;  %v4610_v50 = vld [vmem:[%s4706_s27 + $0x84] sm:$0xff]  }
  0xc3   : > { %4014 = vmatprep.subr.bf16.mxu1 %v5255_v41 }
  0xc5   : > { %3989 = vmatpush3.bf16.msra.mxu0 %v5280_v48  ;;  %v1435_v46 = vpop.permute.xlu1 %1434  ;;  %v1254_v49 = vpop.permute.xlu0 %1253 }
  0xc6   : > { %4015 = vmatpush3.bf16.msra.mxu1 %v5264_v52  ;;  %3990 = vmatprep.subr.bf16.mxu0 %v5287_v2  ;;  %v1448_v27 = vsel %vm275_vm1, %v4528_v19, %v1435_v46  ;;  %v1290_v54 = vsel %vm275_vm1, %v4529_v25, %v1254_v49  ;;  %v4552_v19 = vld [vmem:[%s4706_s27 + $0x98] ss:$0 sps:$4 sm:$0x33]   ;;  %v4553_v25 = vld [vmem:[%s4706_s27 + $0x80] ss:$0 sps:$4 sm:$0x33]  }
  0xc7   : > { %4016 = vmatprep.subr.bf16.mxu1 %v5271_v63 }
  0xc9   : > { %3991 = vmatpush3.bf16.msra.mxu0 %v5296_v6  ;;  %v1405_v53 = vpop.permute.xlu1 %1404  ;;  %v1584_v36 = vpop.permute.xlu0 %1583 }
  0xca   : > { %4017 = vmatpush3.bf16.msra.mxu1 %v5280_v48  ;;  %4032 = vmatprep.subr.bf16.mxu0 %v5186_v31  ;;  %v1595_v57 = vsel %vm275_vm1, %v4603_v56, %v1584_v36  ;;  %v1441_v60 = vsel %vm275_vm1, %v4530_v55, %v1405_v53  ;;  %v4554_v55 = vld [vmem:[%s4706_s27 + $0x8c] ss:$0 sps:$4 sm:$0x33]   ;;  %v4611_v56 = vld [vmem:[%s4706_s27 + $0x9c] sm:$0xff]  }
  0xcb   : > { %4018 = vmatprep.subr.bf16.mxu1 %v5287_v2 }
  0xcc   : > { %1030 = vmatmul.mubr.bf16.vlgmr.msra.gmra.mxu0 %v984_v9 }
  0xcd   : > { %4033 = vmatpush3.bf16.msra.mxu0 %v5056_v21  ;;  %1037 = vmatprep.mubr.bf16.mxu0 %v995_v10  ;;  %v1735_v59 = vpop.permute.xlu1 %1734  ;;  %v1554_v3 = vpop.permute.xlu0 %1553 }
  0xce   : > { %4019 = vmatpush3.bf16.msra.mxu1 %v5296_v6  ;;  %4034 = vmatprep.subr.bf16.mxu0 %v5066_v18  ;;  %v1746_v1 = vsel %vm275_vm1, %v4604_v61, %v1735_v59  ;;  %v1588_v9 = vsel %vm275_vm1, %v4605_v0, %v1554_v3  ;;  %v4612_v61 = vld [vmem:[%s4706_s27 + $0xa8] sm:$0xff]   ;;  %v4613_v0 = vld [vmem:[%s4706_s27 + $0x90] sm:$0xff]  }
  0xcf   : > { %4060 = vmatprep.subr.bf16.mxu1 %v5186_v31 }
  0xd1   : > { %1181 = vmatmul.mubr.bf16.vlgmr.msra.gmra.mxu1 %v1135_v17  ;;  %4035 = vmatpush3.bf16.msra.mxu0 %v5083_v45  ;;  %v1586_v4 = vpop.permute.xlu0 %1585  ;;  %v1705_v5 = vpop.permute.xlu1 %1704 }
  0xd2   : > { %4061 = vmatpush3.bf16.msra.mxu1 %v5056_v21  ;;  %4036 = vmatprep.subr.bf16.mxu0 %v5091_v47  ;;  %v1599_v10 = vsel %vm275_vm1, %v4539_v58, %v1586_v4  ;;  %v1739_v17 = vsel %vm275_vm1, %v4606_v16, %v1705_v5  ;;  %v4555_v5 = vld [vmem:[%s4706_s27 + $0xa4] ss:$0 sps:$4 sm:$0x33]   ;;  %v4557_v16 = vld [vmem:[%s4706_s27 + $0x98] ss:$0 sps:$4 sm:$0x33]  }
  0xd3   : > { %4062 = vmatprep.subr.bf16.mxu1 %v5066_v18  ;;  %1188 = vmatprep.mubr.bf16.mxu1 %v1146_v22 }
  0xd4   : > { %1038 = vmatmul.mubr.bf16.gmra.mxu0 %v988_v26 }
  0xd5   : > { %4037 = vmatpush3.bf16.msra.mxu0 %v5115_v62  ;;  %1331 = vmatprep.mubr.bf16.mxu0 %v1293_v32  ;;  %v1737_v11 = vpop.permute.xlu1 %1736  ;;  %v1556_v12 = vpop.permute.xlu0 %1555 }
  0xd6   : > { %4063 = vmatpush3.bf16.msra.mxu1 %v5083_v45  ;;  %4038 = vmatprep.subr.bf16.mxu0 %v5124_v7  ;;  %v1750_v22 = vsel %vm275_vm1, %v4540_v13, %v1737_v11  ;;  %v1592_v26 = vsel %vm275_vm1, %v4541_v15, %v1556_v12  ;;  %v4556_v15 = vld [vmem:[%s4706_s27 + $0xb0] ss:$0 sps:$4 sm:$0x33]  }
  0xd7   : > { %4064 = vmatprep.subr.bf16.mxu1 %v5091_v47 }
  0xd9   : > { %4039 = vmatpush3.bf16.msra.mxu0 %v5156_v39  ;;  %1189 = vmatmul.mubr.bf16.gmra.mxu1 %v1139_v34  ;;  %v1707_v24 = vpop.permute.xlu1 %1706  ;;  %v1886_v20 = vpop.permute.xlu0 %1885 }
  0xda   : > { %4065 = vmatpush3.bf16.msra.mxu1 %v5115_v62  ;;  %4040 = vmatprep.subr.bf16.mxu0 %v5163_v40  ;;  %v1897_v32 = vsel %vm275_vm1, %v4607_v30, %v1886_v20  ;;  %v1743_v34 = vsel %vm275_vm1, %v4542_v28, %v1707_v24  ;;  %v5506_v24 = vld [vmem:[%s5898_s2] ss:$0 sm:$0xff] }
  0xdb   : > { %4066 = vmatprep.subr.bf16.mxu1 %v5124_v7  ;;  %1482 = vmatprep.mubr.bf16.mxu1 %v1444_v38 }
  0xdd   : > { %4041 = vmatpush3.bf16.msra.mxu0 %v5247_v51  ;;  %v2037_v33 = vpop.permute.xlu1 %2036  ;;  %v1856_v8 = vpop.permute.xlu0 %1855 }
  0xde   : > { %4067 = vmatpush3.bf16.msra.mxu1 %v5156_v39  ;;  %4042 = vmatprep.subr.bf16.mxu0 %v5255_v41  ;;  %v2048_v38 = vsel %vm275_vm1, %v4608_v35, %v2037_v33 }
  0xdf   : > { %4068 = vmatprep.subr.bf16.mxu1 %v5163_v40 }
  0xe1   : > { %4043 = vmatpush3.bf16.msra.mxu0 %v5264_v52  ;;  %v1888_v23 = vpop.permute.xlu0 %1887  ;;  %v2007_v42 = vpop.permute.xlu1 %2006 }
  0xe2   : > { %4069 = vmatpush3.bf16.msra.mxu1 %v5247_v51  ;;  %4044 = vmatprep.subr.bf16.mxu0 %v5271_v63 }
  0xe3   : > { %4070 = vmatprep.subr.bf16.mxu1 %v5255_v41 }
  0xe5   : > { %4045 = vmatpush3.bf16.msra.mxu0 %v5280_v48  ;;  %v2039_v46 = vpop.permute.xlu1 %2038  ;;  %v1858_v49 = vpop.permute.xlu0 %1857 }
  0xe6   : > { %4071 = vmatpush3.bf16.msra.mxu1 %v5264_v52  ;;  %4046 = vmatprep.subr.bf16.mxu0 %v5287_v2 }
  0xe7   : > { %4072 = vmatprep.subr.bf16.mxu1 %v5271_v63 }
  0xe9   : > { %4047 = vmatpush3.bf16.msra.mxu0 %v5296_v6  ;;  %v2009_v53 = vpop.permute.xlu1 %2008  ;;  %v2188_v36 = vpop.permute.xlu0 %2187 }
  0xea   : > { %4073 = vmatpush3.bf16.msra.mxu1 %v5280_v48  ;;  %4088 = vmatprep.subr.bf16.mxu0 %v5186_v31 }
  0xeb   : > { %4074 = vmatprep.subr.bf16.mxu1 %v5287_v2 }
  0xec   : > { %1332 = vmatmul.mubr.bf16.vlgmr.msra.gmra.mxu0 %v1286_v44  ;;  %v1890_v44 = vsel %vm275_vm1, %v4609_v43, %v1856_v8 }
  0xed   : > { %4089 = vmatpush3.bf16.msra.mxu0 %v5056_v21  ;;  %1339 = vmatprep.mubr.bf16.mxu0 %v1297_v37  ;;  %v1901_v37 = vsel %vm275_vm1, %v4551_v14, %v1888_v23  ;;  %v2339_v59 = vpop.permute.xlu1 %2338  ;;  %v2158_v3 = vpop.permute.xlu0 %2157  ;;  %v4558_v23 = vld [vmem:[%s4706_s27 + $0xa4] ss:$0 sps:$4 sm:$0x33]   ;;  %v4615_v14 = vld [vmem:[%s4706_s27 + $0xb4] sm:$0xff]  }
  0xee   : > { %4075 = vmatpush3.bf16.msra.mxu1 %v5296_v6  ;;  %4090 = vmatprep.subr.bf16.mxu0 %v5066_v18 }
  0xef   : > { %4116 = vmatprep.subr.bf16.mxu1 %v5186_v31 }
  0xf1   : > { %1483 = vmatmul.mubr.bf16.vlgmr.msra.gmra.mxu1 %v1437_v29  ;;  %4091 = vmatpush3.bf16.msra.mxu0 %v5083_v45  ;;  %v2041_v29 = vsel %vm275_vm1, %v4610_v50, %v2007_v42  ;;  %v2190_v4 = vpop.permute.xlu0 %2189  ;;  %v2309_v58 = vpop.permute.xlu1 %2308 }
  0xf2   : > { %4117 = vmatpush3.bf16.msra.mxu1 %v5056_v21  ;;  %4092 = vmatprep.subr.bf16.mxu0 %v5091_v47  ;;  %v2203_v11 = vsel %vm275_vm1, %v4555_v5, %v2190_v4 }
  0xf3   : > { %4118 = vmatprep.subr.bf16.mxu1 %v5066_v18  ;;  %1490 = vmatprep.mubr.bf16.mxu1 %v1448_v27  ;;  %v2052_v27 = vsel %vm275_vm1, %v4552_v19, %v2039_v46 }
  0xf4   : > { %1340 = vmatmul.mubr.bf16.gmra.mxu0 %v1290_v54  ;;  %v1894_v54 = vsel %vm275_vm1, %v4553_v25, %v1858_v49 }
  0xf5   : > { %4093 = vmatpush3.bf16.msra.mxu0 %v5115_v62  ;;  %1633 = vmatprep.mubr.bf16.mxu0 %v1595_v57  ;;  %v2199_v57 = vsel %vm275_vm1, %v4611_v56, %v2188_v36  ;;  %v2160_v12 = vpop.permute.xlu0 %2159 }
  0xf6   : > { %4119 = vmatpush3.bf16.msra.mxu1 %v5083_v45  ;;  %4094 = vmatprep.subr.bf16.mxu0 %v5124_v7  ;;  %v2196_v35 = vsel %vm275_vm1, %v4557_v16, %v2160_v12 }
  0xf7   : > { %4120 = vmatprep.subr.bf16.mxu1 %v5091_v47 }
  0xf9   : > { %4095 = vmatpush3.bf16.msra.mxu0 %v5156_v39  ;;  %1491 = vmatmul.mubr.bf16.gmra.mxu1 %v1441_v60  ;;  %v2045_v60 = vsel %vm275_vm1, %v4554_v55, %v2009_v53  ;;  %v4616_v55 = vld [vmem:[%s4706_s27 + $0xc0] sm:$0xff]  }
  0xfa   : > { %4121 = vmatpush3.bf16.msra.mxu1 %v5115_v62  ;;  %4096 = vmatprep.subr.bf16.mxu0 %v5163_v40 }
  0xfb   : > { %4122 = vmatprep.subr.bf16.mxu1 %v5124_v7  ;;  %1784 = vmatprep.mubr.bf16.mxu1 %v1746_v1  ;;  %v2350_v1 = vsel %vm275_vm1, %v4612_v61, %v2339_v59 }
  0xfd   : > { %4097 = vmatpush3.bf16.msra.mxu0 %v5247_v51 }
  0xfe   : > { %4123 = vmatpush3.bf16.msra.mxu1 %v5156_v39  ;;  %4098 = vmatprep.subr.bf16.mxu0 %v5255_v41 }
  0xff   : > { %4124 = vmatprep.subr.bf16.mxu1 %v5163_v40 }
 0x101   : > { %4099 = vmatpush3.bf16.msra.mxu0 %v5264_v52 }
 0x102   : > { %4125 = vmatpush3.bf16.msra.mxu1 %v5247_v51  ;;  %4100 = vmatprep.subr.bf16.mxu0 %v5271_v63 }
 0x103   : > { %4126 = vmatprep.subr.bf16.mxu1 %v5255_v41 }
 0x105   : > { %4101 = vmatpush3.bf16.msra.mxu0 %v5280_v48 }
 0x106   : > { %4127 = vmatpush3.bf16.msra.mxu1 %v5264_v52  ;;  %4102 = vmatprep.subr.bf16.mxu0 %v5287_v2 }
 0x107   : > { %4128 = vmatprep.subr.bf16.mxu1 %v5271_v63 }
 0x109   : > { %4103 = vmatpush3.bf16.msra.mxu0 %v5296_v6 }
 0x10a   : > { %4129 = vmatpush3.bf16.msra.mxu1 %v5280_v48  ;;  %4144 = vmatprep.subr.bf16.mxu0 %v5186_v31 }
 0x10b   : > { %4130 = vmatprep.subr.bf16.mxu1 %v5287_v2 }
 0x10c   : > { %1634 = vmatmul.mubr.bf16.vlgmr.msra.gmra.mxu0 %v1588_v9  ;;  %v2192_v9 = vsel %vm275_vm1, %v4613_v0, %v2158_v3 }
 0x10d   : > { %4145 = vmatpush3.bf16.msra.mxu0 %v5056_v21  ;;  %1641 = vmatprep.mubr.bf16.mxu0 %v1599_v10  ;;  %v2341_v10 = vpop.permute.xlu1 %2340 }
 0x10e   : > { %4131 = vmatpush3.bf16.msra.mxu1 %v5296_v6  ;;  %4146 = vmatprep.subr.bf16.mxu0 %v5066_v18 }
 0x10f   : > { %4172 = vmatprep.subr.bf16.mxu1 %v5186_v31 }
 0x111   : > { %1785 = vmatmul.mubr.bf16.vlgmr.msra.gmra.mxu1 %v1739_v17  ;;  %4147 = vmatpush3.bf16.msra.mxu0 %v5083_v45  ;;  %v4614_v17 = vld [vmem:[%s4706_s27 + $0x9c] sm:$0xff]   ;;  %v2311_v30 = vpop.permute.xlu1 %2310 }
 0x112   : > { %4173 = vmatpush3.bf16.msra.mxu1 %v5056_v21  ;;  %4148 = vmatprep.subr.bf16.mxu0 %v5091_v47  ;;  %v2347_v50 = vsel %vm275_vm1, %v4558_v23, %v2311_v30 }
 0x113   : > { %4174 = vmatprep.subr.bf16.mxu1 %v5066_v18  ;;  %1792 = vmatprep.mubr.bf16.mxu1 %v1750_v22  ;;  %v2343_v22 = vsel %vm275_vm1, %v4614_v17, %v2309_v58  ;;  %v4559_v17 = vld [vmem:[%s4706_s27 + $0xbc] ss:$0 sps:$4 sm:$0x33]  }
 0x114   : > { %1642 = vmatmul.mubr.bf16.gmra.mxu0 %v1592_v26 }
 0x115   : > { %4149 = vmatpush3.bf16.msra.mxu0 %v5115_v62  ;;  %1935 = vmatprep.mubr.bf16.mxu0 %v1897_v32  ;;  %v2354_v32 = vsel %vm275_vm1, %v4556_v15, %v2341_v10  ;;  %v2641_v25 = vpop.permute.xlu1 %2640 }
 0x116   : > { %4175 = vmatpush3.bf16.msra.mxu1 %v5083_v45  ;;  %4150 = vmatprep.subr.bf16.mxu0 %v5124_v7  ;;  %v2652_v56 = vsel %vm275_vm1, %v4616_v55, %v2641_v25 }
 0x117   : > { %4176 = vmatprep.subr.bf16.mxu1 %v5091_v47 }
 0x119   : > { %4151 = vmatpush3.bf16.msra.mxu0 %v5156_v39  ;;  %1793 = vmatmul.mubr.bf16.gmra.mxu1 %v1743_v34  ;;  %v2611_v16 = vpop.permute.xlu1 %2610 }
 0x11a   : > { %4177 = vmatpush3.bf16.msra.mxu1 %v5115_v62  ;;  %4152 = vmatprep.subr.bf16.mxu0 %v5163_v40 }
 0x11b   : > { %4178 = vmatprep.subr.bf16.mxu1 %v5124_v7  ;;  %2086 = vmatprep.mubr.bf16.mxu1 %v2048_v38  ;;  %v2490_v38 = vpop.permute.xlu0 %2489 }
 0x11c   : > { %v2501_v42 = vsel %vm275_vm1, %v4615_v14, %v2490_v38  ;;  %v5588_v14 = vld [vmem:[%s5897_s1 + $0x70] sm:$0xff]  }
 0x11d   : > { %4153 = vmatpush3.bf16.msra.mxu0 %v5247_v51 }
 0x11e   : > { %4179 = vmatpush3.bf16.msra.mxu1 %v5156_v39  ;;  %4154 = vmatprep.subr.bf16.mxu0 %v5255_v41 }
 0x11f   : > { %4180 = vmatprep.subr.bf16.mxu1 %v5163_v40  ;;  %v2460_v15 = vpop.permute.xlu0 %2459 }
 0x121   : > { %4155 = vmatpush3.bf16.msra.mxu0 %v5264_v52 }
 0x122   : > { %4181 = vmatpush3.bf16.msra.mxu1 %v5247_v51  ;;  %4156 = vmatprep.subr.bf16.mxu0 %v5271_v63 }
 0x123   : > { %4182 = vmatprep.subr.bf16.mxu1 %v5255_v41 }
 0x125   : > { %4157 = vmatpush3.bf16.msra.mxu0 %v5280_v48 }
 0x126   : > { %4183 = vmatpush3.bf16.msra.mxu1 %v5264_v52  ;;  %4158 = vmatprep.subr.bf16.mxu0 %v5287_v2 }
 0x127   : > { %4184 = vmatprep.subr.bf16.mxu1 %v5271_v63 }
 0x129   : > { %4159 = vmatpush3.bf16.msra.mxu0 %v5296_v6 }
 0x12a   : > { %4185 = vmatpush3.bf16.msra.mxu1 %v5280_v48  ;;  %4200 = vmatprep.subr.bf16.mxu0 %v5186_v31 }
 0x12b   : > { %4186 = vmatprep.subr.bf16.mxu1 %v5287_v2 }
 0x12c   : > { %1936 = vmatmul.mubr.bf16.vlgmr.msra.gmra.mxu0 %v1890_v44 }
 0x12d   : > { %4201 = vmatpush3.bf16.msra.mxu0 %v5056_v21  ;;  %1943 = vmatprep.mubr.bf16.mxu0 %v1901_v37 }
 0x12e   : > { %4187 = vmatpush3.bf16.msra.mxu1 %v5296_v6  ;;  %4202 = vmatprep.subr.bf16.mxu0 %v5066_v18 }
 0x12f   : > { %4228 = vmatprep.subr.bf16.mxu1 %v5186_v31 }
 0x131   : > { %2087 = vmatmul.mubr.bf16.vlgmr.msra.gmra.mxu1 %v2041_v29  ;;  %4203 = vmatpush3.bf16.msra.mxu0 %v5083_v45 }
 0x132   : > { %4229 = vmatpush3.bf16.msra.mxu1 %v5056_v21  ;;  %4204 = vmatprep.subr.bf16.mxu0 %v5091_v47 }
 0x133   : > { %4230 = vmatprep.subr.bf16.mxu1 %v5066_v18  ;;  %2094 = vmatprep.mubr.bf16.mxu1 %v2052_v27 }
 0x134   : > { %1944 = vmatmul.mubr.bf16.gmra.mxu0 %v1894_v54 }
 0x135   : > { %4205 = vmatpush3.bf16.msra.mxu0 %v5115_v62  ;;  %2237 = vmatprep.mubr.bf16.mxu0 %v2199_v57 }
 0x136   : > { %4231 = vmatpush3.bf16.msra.mxu1 %v5083_v45  ;;  %4206 = vmatprep.subr.bf16.mxu0 %v5124_v7 }
 0x137   : > { %4232 = vmatprep.subr.bf16.mxu1 %v5091_v47 }
 0x139   : > { %4207 = vmatpush3.bf16.msra.mxu0 %v5156_v39  ;;  %2095 = vmatmul.mubr.bf16.gmra.mxu1 %v2045_v60 }
 0x13a   : > { %4233 = vmatpush3.bf16.msra.mxu1 %v5115_v62  ;;  %4208 = vmatprep.subr.bf16.mxu0 %v5163_v40 }
 0x13b   : > { %4234 = vmatprep.subr.bf16.mxu1 %v5124_v7  ;;  %2388 = vmatprep.mubr.bf16.mxu1 %v2350_v1 }
 0x13d   : > { %4209 = vmatpush3.bf16.msra.mxu0 %v5247_v51 }
 0x13e   : > { %4235 = vmatpush3.bf16.msra.mxu1 %v5156_v39  ;;  %4210 = vmatprep.subr.bf16.mxu0 %v5255_v41 }
 0x13f   : > { %4236 = vmatprep.subr.bf16.mxu1 %v5163_v40 }
 0x141   : > { %4211 = vmatpush3.bf16.msra.mxu0 %v5264_v52 }
 0x142   : > { %4237 = vmatpush3.bf16.msra.mxu1 %v5247_v51  ;;  %4212 = vmatprep.subr.bf16.mxu0 %v5271_v63 }
 0x143   : > { %4238 = vmatprep.subr.bf16.mxu1 %v5255_v41 }
 0x145   : > { %4213 = vmatpush3.bf16.msra.mxu0 %v5280_v48 }
 0x146   : > { %4239 = vmatpush3.bf16.msra.mxu1 %v5264_v52  ;;  %4214 = vmatprep.subr.bf16.mxu0 %v5287_v2 }
 0x147   : > { %4240 = vmatprep.subr.bf16.mxu1 %v5271_v63 }
 0x149   : > { %4215 = vmatpush3.bf16.msra.mxu0 %v5296_v6 }
 0x14a   : > { %4241 = vmatpush3.bf16.msra.mxu1 %v5280_v48  ;;  %4256 = vmatprep.subr.bf16.mxu0 %v5186_v31 }
 0x14b   : > { %4242 = vmatprep.subr.bf16.mxu1 %v5287_v2 }
 0x14c   : > { %2238 = vmatmul.mubr.bf16.vlgmr.msra.gmra.mxu0 %v2192_v9  ;;  %v3880_v13 = vpop.f32.mrf.mxu0 }
 0x14d   : > { %4257 = vmatpush3.bf16.msra.mxu0 %v5056_v21  ;;  %2245 = vmatprep.mubr.bf16.mxu0 %v2203_v11 }
 0x14e   : > { %4243 = vmatpush3.bf16.msra.mxu1 %v5296_v6  ;;  %v3881_v26 = vpop.f32.mrf.mxu0  ;;  %4258 = vmatprep.subr.bf16.mxu0 %v5066_v18 }
 0x14f   : > { %v3882_v20 = vadd.f32 %v3881_v26, %v3880_v13  ;;  %4284 = vmatprep.subr.bf16.mxu1 %v5186_v31 }
 0x150   : > { %v3883_v28 = vpop.f32.mrf.mxu0  ;;  %v3908_v34 = vpop.f32.mrf.mxu1 }
 0x151   : > { %v427_v33 = vadd.f32 %v3882_v20, %v5506_v24  ;;  %2389 = vmatmul.mubr.bf16.vlgmr.msra.gmra.mxu1 %v2343_v22  ;;  %4259 = vmatpush3.bf16.msra.mxu0 %v5083_v45  ;;  %v4617_v22 = vld [vmem:[%s4706_s27 + $0xa8] sm:$0xff]   ;;  %v2643_v20 = vpop.permute.xlu1 %2642 }
 0x152   : > { %4285 = vmatpush3.bf16.msra.mxu1 %v5056_v21  ;;  %v3884_v8 = vpop.f32.mrf.mxu0  ;;  %4260 = vmatprep.subr.bf16.mxu0 %v5091_v47  ;;  %v3909_v37 = vpop.f32.mrf.mxu1  ;;  %v2494_v26 = vsel %vm275_vm1, %v4617_v22, %v2460_v15 }
 0x153   : > { %v440_v43 = vmax.f32 %v427_v33, 0.0  ;;  %v3885_v44 = vadd.f32 %v3884_v8, %v3883_v28  ;;  %4286 = vmatprep.subr.bf16.mxu1 %v5066_v18  ;;  %2396 = vmatprep.mubr.bf16.mxu1 %v2354_v32  ;;  %v3910_v21 = vadd.f32 %v3909_v37, %v3908_v34  ;;  %v4560_v33 = vld [vmem:[%s4706_s27 + $0xc8] ss:$0 sps:$4 sm:$0x33]   ;;  %v5578_v34 = vld [vmem:[%s5897_s1 + $0x38] sm:$0xff]  }
 0x154   : > { %2246 = vmatmul.mubr.bf16.gmra.mxu0 %v2196_v35  ;;  %v3911_v19 = vpop.f32.mrf.mxu1  ;;  %v4561_v35 = vld [vmem:[%s4706_s27 + $0xb0] ss:$0 sps:$4 sm:$0x33]   ;;  %v4619_v8 = vld [vmem:[%s4706_s27 + $0xb4] sm:$0xff]   ;;  %v2656_v37 = vsel %vm275_vm1, %v4560_v33, %v2643_v20 }
 0x155   : > { %v3804_v46 = vpack.c.bf16 %v440_v43, %v440_v43  ;;  %v430_v49 = vadd.f32 %v3885_v44, %v5506_v24  ;;  %4261 = vmatpush3.bf16.msra.mxu0 %v5115_v62  ;;  %2539 = vmatprep.mubr.bf16.mxu0 %v2501_v42  ;;  %v579_v18 = vadd.f32 %v3910_v21, %v5506_v24  ;;  %v2613_v44 = vpop.permute.xlu1 %2612 }
 0x156   : > { %4287 = vmatpush3.bf16.msra.mxu1 %v5083_v45  ;;  %4262 = vmatprep.subr.bf16.mxu0 %v5124_v7  ;;  %v3912_v27 = vpop.f32.mrf.mxu1  ;;  %v2645_v23 = vsel %vm275_vm1, %v4619_v8, %v2611_v16 }
 0x157   : > { %457 = vst.msk [vmem:[%s5524_s15] sm:$0xf] %vm456_vm2, %v3804_v46  ;;  %v441_v29 = vmax.f32 %v430_v49, 0.0  ;;  %4288 = vmatprep.subr.bf16.mxu1 %v5091_v47  ;;  %v3886_v53 = vpop.f32.mrf.mxu0  ;;  %v592_v54 = vmax.f32 %v579_v18, 0.0  ;;  %v3913_v36 = vadd.f32 %v3912_v27, %v3911_v19  ;;  %v5597_v49 = vld [vmem:[%s5897_s1 + $0x30] sm:$0xff]   ;;  %v5605_v18 = vld [vmem:[%s5897_s1 + $0x68] sm:$0xff]  }
 0x158   : > { %v3914_v45 = vpop.f32.mrf.mxu1 }
 0x159   : > { %v3805_v57 = vpack.c.bf16 %v441_v29, %v441_v29  ;;  %4263 = vmatpush3.bf16.msra.mxu0 %v5156_v39  ;;  %2397 = vmatmul.mubr.bf16.gmra.mxu1 %v2347_v50  ;;  %v3887_v59 = vpop.f32.mrf.mxu0  ;;  %v3807_v60 = vpack.c.bf16 %v592_v54, %v592_v54  ;;  %v582_v61 = vadd.f32 %v3913_v36, %v5506_v24  ;;  %v4562_v50 = vld [vmem:[%s4706_s27 + $0xbc] ss:$0 sps:$4 sm:$0x33]   ;;  %v4623_v29 = vld [vmem:[%s4706_s27 + $0xcc] sm:$0xff]  }
 0x15a   : > { %4289 = vmatpush3.bf16.msra.mxu1 %v5115_v62  ;;  %4264 = vmatprep.subr.bf16.mxu0 %v5163_v40  ;;  %v3888_v47 = vadd.f32 %v3887_v59, %v3886_v53  ;;  %v3915_v1 = vpop.f32.mrf.mxu1 }
 0x15b   : > { %458 = vst.msk [vmem:[%s5524_s15 + $0x4] sm:$0xf] %vm456_vm2, %v3805_v57  ;;  %4290 = vmatprep.subr.bf16.mxu1 %v5124_v7  ;;  %v3889_v3 = vpop.f32.mrf.mxu0  ;;  %2690 = vmatprep.mubr.bf16.mxu1 %v2652_v56  ;;  %3439 = vst.msk [vmem:[%s5524_s15 + $0xc] sm:$0xf] %vm456_vm2, %v3807_v60  ;;  %v593_v4 = vmax.f32 %v582_v61, 0.0  ;;  %v3916_v5 = vadd.f32 %v3915_v1, %v3914_v45  ;;  %v5616_v60 = vld [vmem:[%s5897_s1 + $0x28] sm:$0xff]   ;;  %v2943_v61 = vpop.permute.xlu1 %2942 }
 0x15c   : > { %v435_v58 = vadd.f32 %v3888_v47, %v5506_v24  ;;  %v3917_v62 = vpop.f32.mrf.mxu1  ;;  %v5624_v1 = vld [vmem:[%s5897_s1 + $0x60] sm:$0xff]   ;;  %v2649_v3 = vsel %vm275_vm1, %v4562_v50, %v2613_v44  ;;  %v4565_v50 = vld [vmem:[%s4706_s27 + $0xc8] ss:$0 sps:$4 sm:$0x33]  }
 0x15d   : > { %4265 = vmatpush3.bf16.msra.mxu0 %v5247_v51  ;;  %v3890_v0 = vpop.f32.mrf.mxu0  ;;  %v3808_v9 = vpack.c.bf16 %v593_v4, %v593_v4  ;;  %v587_v10 = vadd.f32 %v3916_v5, %v5506_v24 }
 0x15e   : > { %4291 = vmatpush3.bf16.msra.mxu1 %v5156_v39  ;;  %4266 = vmatprep.subr.bf16.mxu0 %v5255_v41  ;;  %v442_v7 = vmax.f32 %v435_v58, 0.0  ;;  %v3918_v11 = vpop.f32.mrf.mxu1 }
 0x15f   : > { %4292 = vmatprep.subr.bf16.mxu1 %v5163_v40  ;;  %3440 = vst.msk [vmem:[%s5524_s15 + $0x10] sm:$0xf] %vm456_vm2, %v3808_v9  ;;  %v594_v13 = vmax.f32 %v587_v10, 0.0  ;;  %v2492_v40 = vpop.permute.xlu0 %2491  ;;  %v4626_v10 = vld [vmem:[%s4706_s27 + $0xd8] sm:$0xff]   ;;  %v2913_v44 = vpop.permute.xlu1 %2912 }
 0x160   : > { %v3806_v12 = vpack.c.bf16 %v442_v7, %v442_v7  ;;  %v2505_v28 = vsel %vm275_vm1, %v4559_v17, %v2492_v40  ;;  %v2954_v11 = vsel %vm275_vm1, %v4626_v10, %v2943_v61  ;;  %v5645_v17 = vld [vmem:[%s5897_s1 + $0x58] sm:$0xff]   ;;  %v4632_v61 = vld [vmem:[%s4706_s27 + $0xe4] sm:$0xff]  }
 0x161   : > { %4267 = vmatpush3.bf16.msra.mxu0 %v5264_v52  ;;  %v3809_v39 = vpack.c.bf16 %v594_v13, %v594_v13  ;;  %v5636_v13 = vld [vmem:[%s5897_s1 + $0x20] sm:$0xff]  }
 0x162   : > { %4293 = vmatpush3.bf16.msra.mxu1 %v5247_v51  ;;  %4268 = vmatprep.subr.bf16.mxu0 %v5271_v63  ;;  %460 = vst.msk [vmem:[%s5524_s15 + $0x8] sm:$0x3] %vm459_vm3, %v3806_v12 }
 0x163   : > { %4294 = vmatprep.subr.bf16.mxu1 %v5255_v41  ;;  %3441 = vst.msk [vmem:[%s5524_s15 + $0x14] sm:$0x3] %vm459_vm3, %v3809_v39  ;;  %v2462_v30 = vpop.permute.xlu0 %2461 }
 0x164   : > { %v2498_v19 = vsel %vm275_vm1, %v4561_v35, %v2462_v30 }
 0x165   : > { %4269 = vmatpush3.bf16.msra.mxu0 %v5280_v48 }
 0x166   : > { %4295 = vmatpush3.bf16.msra.mxu1 %v5264_v52  ;;  %4270 = vmatprep.subr.bf16.mxu0 %v5287_v2 }
 0x167   : > { %4296 = vmatprep.subr.bf16.mxu1 %v5271_v63  ;;  %v2792_v25 = vpop.permute.xlu0 %2791 }
 0x168   : > { %v2803_v27 = vsel %vm275_vm1, %v4623_v29, %v2792_v25  ;;  %v4564_v25 = vld [vmem:[%s4706_s27 + $0xe0] ss:$0 sps:$4 sm:$0x33]   ;;  %v4631_v29 = vld [vmem:[%s4706_s27 + $0xcc] sm:$0xff]  }
 0x169   : > { %4271 = vmatpush3.bf16.msra.mxu0 %v5296_v6 }
 0x16a   : > { %4297 = vmatpush3.bf16.msra.mxu1 %v5280_v48  ;;  %4312 = vmatprep.subr.bf16.mxu0 %v5186_v31 }
 0x16b   : > { %4298 = vmatprep.subr.bf16.mxu1 %v5287_v2 }
 0x16c   : > { %v3936_v32 = vpop.f32.mrf.mxu0  ;;  %2540 = vmatmul.mubr.bf16.vlgmr.msra.gmra.mxu0 %v2494_v26 }
 0x16d   : > { %4313 = vmatpush3.bf16.msra.mxu0 %v5578_v34  ;;  %2547 = vmatprep.mubr.bf16.mxu0 %v2505_v28 }
 0x16e   : > { %4299 = vmatpush3.bf16.msra.mxu1 %v5296_v6  ;;  %v3937_v38 = vpop.f32.mrf.mxu0  ;;  %4314 = vmatprep.subr.bf16.mxu0 %v5588_v14 }
 0x16f   : > { %v3938_v42 = vadd.f32 %v3937_v38, %v3936_v32  ;;  %4340 = vmatprep.subr.bf16.mxu1 %v5186_v31 }
 0x170   : > { %v3939_v43 = vpop.f32.mrf.mxu0 }
 0x171   : > { %v730_v21 = vadd.f32 %v3938_v42, %v5506_v24  ;;  %v3964_v46 = vpop.f32.mrf.mxu1  ;;  %2691 = vmatmul.mubr.bf16.vlgmr.msra.gmra.mxu1 %v2645_v23  ;;  %4315 = vmatpush3.bf16.msra.mxu0 %v5597_v49 }
 0x172   : > { %4341 = vmatpush3.bf16.msra.mxu1 %v5578_v34  ;;  %v3940_v31 = vpop.f32.mrf.mxu0  ;;  %4316 = vmatprep.subr.bf16.mxu0 %v5605_v18 }
 0x173   : > { %v743_v53 = vmax.f32 %v730_v21, 0.0  ;;  %v3941_v54 = vadd.f32 %v3940_v31, %v3939_v43  ;;  %v3965_v36 = vpop.f32.mrf.mxu1  ;;  %4342 = vmatprep.subr.bf16.mxu1 %v5588_v14  ;;  %2698 = vmatprep.mubr.bf16.mxu1 %v2656_v37  ;;  %v2762_v43 = vpop.permute.xlu0 %2761  ;;  %v4563_v37 = vld [vmem:[%s4706_s27 + $0xd4] ss:$0 sps:$4 sm:$0x33]   ;;  %v4629_v21 = vld [vmem:[%s4706_s27 + $0xc0] sm:$0xff]  }
 0x174   : > { %v3966_v55 = vadd.f32 %v3965_v36, %v3964_v46  ;;  %v3942_v56 = vpop.f32.mrf.mxu0  ;;  %2548 = vmatmul.mubr.bf16.gmra.mxu0 %v2498_v19  ;;  %v2945_v46 = vpop.permute.xlu1 %2944 }
 0x175   : > { %v3810_v57 = vpack.c.bf16 %v743_v53, %v743_v53  ;;  %v733_v45 = vadd.f32 %v3941_v54, %v5506_v24  ;;  %v3967_v59 = vpop.f32.mrf.mxu1  ;;  %4317 = vmatpush3.bf16.msra.mxu0 %v5616_v60  ;;  %2841 = vmatprep.mubr.bf16.mxu0 %v2803_v27  ;;  %v2947_v27 = vsel %vm275_vm1, %v4631_v29, %v2913_v44 }
 0x176   : > { %v881_v47 = vadd.f32 %v3966_v55, %v5506_v24  ;;  %4343 = vmatpush3.bf16.msra.mxu1 %v5597_v49  ;;  %4318 = vmatprep.subr.bf16.mxu0 %v5624_v1  ;;  %v3943_v4 = vpop.f32.mrf.mxu0  ;;  %v2958_v36 = vsel %vm275_vm1, %v4564_v25, %v2945_v46  ;;  %v4638_v46 = vld [vmem:[%s5897_s1 + $0x8] sm:$0xff]  }
 0x177   : > { %3459 = vst.msk [vmem:[%s5524_s15 + $0x18] sm:$0xf] %vm456_vm2, %v3810_v57  ;;  %v744_v58 = vmax.f32 %v733_v45, 0.0  ;;  %v3968_v5 = vpop.f32.mrf.mxu1  ;;  %4344 = vmatprep.subr.bf16.mxu1 %v5605_v18  ;;  %v3944_v62 = vadd.f32 %v3943_v4, %v3942_v56  ;;  %v4567_v25 = vld [vmem:[%s4706_s27 + $0xec] ss:$0 sps:$4 sm:$0x33]  }
 0x178   : > { %v894_v0 = vmax.f32 %v881_v47, 0.0  ;;  %v3969_v9 = vadd.f32 %v3968_v5, %v3967_v59  ;;  %v3945_v7 = vpop.f32.mrf.mxu0  ;;  %v2915_v54 = vpop.permute.xlu1 %2914  ;;  %v4566_v59 = vld [vmem:[%s4706_s27 + $0xd4] ss:$0 sps:$4 sm:$0x33]  }
 0x179   : > { %v3811_v12 = vpack.c.bf16 %v744_v58, %v744_v58  ;;  %4319 = vmatpush3.bf16.msra.mxu0 %v5636_v13  ;;  %v3970_v15 = vpop.f32.mrf.mxu1  ;;  %2699 = vmatmul.mubr.bf16.gmra.mxu1 %v2649_v3  ;;  %v738_v39 = vadd.f32 %v3944_v62, %v5506_v24 }
 0x17a   : > { %v3813_v40 = vpack.c.bf16 %v894_v0, %v894_v0  ;;  %v884_v16 = vadd.f32 %v3969_v9, %v5506_v24  ;;  %4345 = vmatpush3.bf16.msra.mxu1 %v5616_v60  ;;  %4320 = vmatprep.subr.bf16.mxu0 %v5645_v17  ;;  %v3946_v22 = vpop.f32.mrf.mxu0 }
 0x17b   : > { %3460 = vst.msk [vmem:[%s5524_s15 + $0x1c] sm:$0xf] %vm456_vm2, %v3811_v12  ;;  %4346 = vmatprep.subr.bf16.mxu1 %v5624_v1  ;;  %v745_v26 = vmax.f32 %v738_v39, 0.0  ;;  %v3971_v20 = vpop.f32.mrf.mxu1  ;;  %2992 = vmatprep.mubr.bf16.mxu1 %v2954_v11 }
 0x17c   : > { %3479 = vst.msk [vmem:[%s5524_s15 + $0x24] sm:$0xf] %vm456_vm2, %v3813_v40  ;;  %v895_v28 = vmax.f32 %v884_v16, 0.0  ;;  %v3972_v30 = vadd.f32 %v3971_v20, %v3970_v15  ;;  %v3245_v7 = vpop.permute.xlu1 %3244 }
 0x17d   : > { %4321 = vmatpush3.bf16.msra.mxu0 %v5247_v51  ;;  %v3812_v32 = vpack.c.bf16 %v745_v26, %v745_v26  ;;  %v3973_v33 = vpop.f32.mrf.mxu1  ;;  %v4633_v26 = vld [vmem:[%s4706_s27 + $0xf0] sm:$0xff]  }
 0x17e   : > { %v3814_v35 = vpack.c.bf16 %v895_v28, %v895_v28  ;;  %4347 = vmatpush3.bf16.msra.mxu1 %v5636_v13  ;;  %4322 = vmatprep.subr.bf16.mxu0 %v5255_v41  ;;  %v889_v38 = vadd.f32 %v3972_v30, %v5506_v24  ;;  %v3256_v20 = vsel %vm275_vm1, %v4633_v26, %v3245_v7 }
 0x17f   : > { %4348 = vmatprep.subr.bf16.mxu1 %v5645_v17  ;;  %3461 = vst.msk [vmem:[%s5524_s15 + $0x20] sm:$0x3] %vm459_vm3, %v3812_v32  ;;  %v3974_v8 = vpop.f32.mrf.mxu1 }
 0x180   : > { %3480 = vst.msk [vmem:[%s5524_s15 + $0x28] sm:$0xf] %vm456_vm2, %v3814_v35  ;;  %v896_v23 = vmax.f32 %v889_v38, 0.0 }
 0x181   : > { %4323 = vmatpush3.bf16.msra.mxu0 %v5264_v52 }
 0x182   : > { %4349 = vmatpush3.bf16.msra.mxu1 %v5247_v51  ;;  %4324 = vmatprep.subr.bf16.mxu0 %v5271_v63  ;;  %v3815_v42 = vpack.c.bf16 %v896_v23, %v896_v23  ;;  %v2794_v51 = vpop.permute.xlu0 %2793 }
 0x183   : > { %4350 = vmatprep.subr.bf16.mxu1 %v5255_v41  ;;  %v2796_v41 = vsel %vm275_vm1, %v4629_v21, %v2762_v43  ;;  %v2807_v19 = vsel %vm275_vm1, %v4563_v37, %v2794_v51 }
 0x184   : > { %3481 = vst.msk [vmem:[%s5524_s15 + $0x2c] sm:$0x3] %vm459_vm3, %v3815_v42 }
 0x185   : > { %4325 = vmatpush3.bf16.msra.mxu0 %v5280_v48 }
 0x186   : > { %4351 = vmatpush3.bf16.msra.mxu1 %v5264_v52  ;;  %4326 = vmatprep.subr.bf16.mxu0 %v5287_v2  ;;  %v4630_v52 = vld [vmem:[%s5897_s1 + $0x78] sm:$0xff]   ;;  %v2764_v31 = vpop.permute.xlu0 %2763 }
 0x187   : > { %4352 = vmatprep.subr.bf16.mxu1 %v5271_v63 }
 0x189   : > { %4327 = vmatpush3.bf16.msra.mxu0 %v5296_v6 }
 0x18a   : > { %4353 = vmatpush3.bf16.msra.mxu1 %v5280_v48  ;;  %4368 = vmatprep.subr.bf16.mxu0 %v4630_v52  ;;  %v3094_v57 = vpop.permute.xlu0 %3093 }
 0x18b   : > { %4354 = vmatprep.subr.bf16.mxu1 %v5287_v2  ;;  %v3105_v47 = vsel %vm275_vm1, %v4632_v61, %v3094_v57 }
 0x18c   : > { %v3992_v63 = vpop.f32.mrf.mxu0  ;;  %2842 = vmatmul.mubr.bf16.vlgmr.msra.gmra.mxu0 %v2796_v41  ;;  %v4637_v41 = vld [vmem:[%s5897_s1 + $0x48] sm:$0xff]  }
 0x18d   : > { %4369 = vmatpush3.bf16.msra.mxu0 %v5578_v34  ;;  %2849 = vmatprep.mubr.bf16.mxu0 %v2807_v19  ;;  %v4639_v19 = vld [vmem:[%s5897_s1 + $0x40] sm:$0xff]  }
 0x18e   : > { %4355 = vmatpush3.bf16.msra.mxu1 %v5296_v6  ;;  %v3993_v48 = vpop.f32.mrf.mxu0  ;;  %4370 = vmatprep.subr.bf16.mxu0 %v5588_v14  ;;  %v2800_v6 = vsel %vm275_vm1, %v4565_v50, %v2764_v31  ;;  %v4640_v50 = vld [vmem:[%s5897_s1] sm:$0xff]  }
 0x18f   : > { %v3994_v53 = vadd.f32 %v3993_v48, %v3992_v63  ;;  %4396 = vmatprep.subr.bf16.mxu1 %v4630_v52  ;;  %v3064_v52 = vpop.permute.xlu0 %3063  ;;  %v3215_v63 = vpop.permute.xlu1 %3214  ;;  %v4641_v48 = vld [vmem:[%s4706_s27 + $0xd8] sm:$0xff]  }
 0x190   : > { %v3995_v2 = vpop.f32.mrf.mxu0  ;;  %v3098_v29 = vsel %vm275_vm1, %v4641_v48, %v3064_v52 }
 0x191   : > { %v1032_v55 = vadd.f32 %v3994_v53, %v5506_v24  ;;  %v4020_v56 = vpop.f32.mrf.mxu1  ;;  %2993 = vmatmul.mubr.bf16.vlgmr.msra.gmra.mxu1 %v2947_v27  ;;  %4371 = vmatpush3.bf16.msra.mxu0 %v5597_v49  ;;  %v4569_v53 = vld [vmem:[%s4706_s27 + $0xf8] ss:$0 sps:$4 sm:$0x33]  }
 0x192   : > { %4397 = vmatpush3.bf16.msra.mxu1 %v5578_v34  ;;  %v3996_v45 = vpop.f32.mrf.mxu0  ;;  %4372 = vmatprep.subr.bf16.mxu0 %v5605_v18 }
 0x193   : > { %v1045_v3 = vmax.f32 %v1032_v55, 0.0  ;;  %v3997_v4 = vadd.f32 %v3996_v45, %v3995_v2  ;;  %v4021_v58 = vpop.f32.mrf.mxu1  ;;  %4398 = vmatprep.subr.bf16.mxu1 %v5588_v14  ;;  %3000 = vmatprep.mubr.bf16.mxu1 %v2958_v36  ;;  %v2951_v14 = vsel %vm275_vm1, %v4566_v59, %v2915_v54  ;;  %v3096_v31 = vpop.permute.xlu0 %3095  ;;  %v4568_v36 = vld [vmem:[%s4706_s27 + $0xe0] ss:$0 sps:$4 sm:$0x33]  }
 0x194   : > { %v4022_v5 = vadd.f32 %v4021_v58, %v4020_v56  ;;  %2850 = vmatmul.mubr.bf16.gmra.mxu0 %v2800_v6  ;;  %v3998_v62 = vpop.f32.mrf.mxu0  ;;  %v3109_v27 = vsel %vm275_vm1, %v4567_v25, %v3096_v31  ;;  %v3247_v54 = vpop.permute.xlu1 %3246  ;;  %v4642_v56 = vld [vmem:[%s4706_s27 + $0xe4] sm:$0xff]  }
 0x195   : > { %v3816_v0 = vpack.c.bf16 %v1045_v3, %v1045_v3  ;;  %v1035_v34 = vadd.f32 %v3997_v4, %v5506_v24  ;;  %v4023_v9 = vpop.f32.mrf.mxu1  ;;  %4373 = vmatpush3.bf16.msra.mxu0 %v5616_v60  ;;  %3143 = vmatprep.mubr.bf16.mxu0 %v3105_v47  ;;  %v3249_v6 = vsel %vm275_vm1, %v4642_v56, %v3215_v63 }
 0x196   : > { %v1183_v10 = vadd.f32 %v4022_v5, %v5506_v24  ;;  %4399 = vmatpush3.bf16.msra.mxu1 %v5597_v49  ;;  %4374 = vmatprep.subr.bf16.mxu0 %v5624_v1  ;;  %v3999_v11 = vpop.f32.mrf.mxu0  ;;  %v3260_v59 = vsel %vm275_vm1, %v4569_v53, %v3247_v54  ;;  %v4570_v5 = vld [vmem:[%s4706_s27 + $0xec] ss:$0 sps:$4 sm:$0x33]  }
 0x197   : > { %3499 = vst.msk [vmem:[%s5524_s15 + $0x30] sm:$0xf] %vm456_vm2, %v3816_v0  ;;  %v1046_v12 = vmax.f32 %v1035_v34, 0.0  ;;  %v4024_v15 = vpop.f32.mrf.mxu1  ;;  %4400 = vmatprep.subr.bf16.mxu1 %v5605_v18  ;;  %v4000_v39 = vadd.f32 %v3999_v11, %v3998_v62  ;;  %v3066_v57 = vpop.permute.xlu0 %3065 }
 0x198   : > { %v1196_v40 = vmax.f32 %v1183_v10, 0.0  ;;  %v4025_v16 = vadd.f32 %v4024_v15, %v4023_v9  ;;  %v4001_v22 = vpop.f32.mrf.mxu0  ;;  %v3102_v4 = vsel %vm275_vm1, %v4568_v36, %v3066_v57  ;;  %v3217_v9 = vpop.permute.xlu1 %3216 }
 0x199   : > { %v3817_v49 = vpack.c.bf16 %v1046_v12, %v1046_v12  ;;  %4375 = vmatpush3.bf16.msra.mxu0 %v5636_v13  ;;  %3001 = vmatmul.mubr.bf16.gmra.mxu1 %v2951_v14  ;;  %v4026_v28 = vpop.f32.mrf.mxu1  ;;  %v1040_v30 = vadd.f32 %v4000_v39, %v5506_v24  ;;  %v3253_v39 = vsel %vm275_vm1, %v4570_v5, %v3217_v9 }
 0x19a   : > { %v3819_v32 = vpack.c.bf16 %v1196_v40, %v1196_v40  ;;  %v1186_v33 = vadd.f32 %v4025_v16, %v5506_v24  ;;  %4401 = vmatpush3.bf16.msra.mxu1 %v5616_v60  ;;  %4376 = vmatprep.subr.bf16.mxu0 %v5645_v17  ;;  %v4002_v18 = vpop.f32.mrf.mxu0  ;;  %v4634_v60 = vld [vmem:[%s5897_s1 + $0x18] sm:$0xff]  }
 0x19b   : > { %3500 = vst.msk [vmem:[%s5524_s15 + $0x34] sm:$0xf] %vm456_vm2, %v3817_v49  ;;  %4402 = vmatprep.subr.bf16.mxu1 %v5624_v1  ;;  %v1047_v35 = vmax.f32 %v1040_v30, 0.0  ;;  %v4027_v38 = vpop.f32.mrf.mxu1  ;;  %3294 = vmatprep.mubr.bf16.mxu1 %v3256_v20  ;;  %v4635_v1 = vld [vmem:[%s5897_s1 + $0x50] sm:$0xff]  }
 0x19c   : > { %3519 = vst.msk [vmem:[%s5524_s15 + $0x3c] sm:$0xf] %vm456_vm2, %v3819_v32  ;;  %v1197_v8 = vmax.f32 %v1186_v33, 0.0  ;;  %v4028_v23 = vadd.f32 %v4027_v38, %v4026_v28 }
 0x19d   : > { %4377 = vmatpush3.bf16.msra.mxu0 %v4634_v60  ;;  %v3818_v42 = vpack.c.bf16 %v1047_v35, %v1047_v35  ;;  %v4029_v43 = vpop.f32.mrf.mxu1 }
 0x19e   : > { %v3820_v44 = vpack.c.bf16 %v1197_v8, %v1197_v8  ;;  %4403 = vmatpush3.bf16.msra.mxu1 %v5636_v13  ;;  %4378 = vmatprep.subr.bf16.mxu0 %v4635_v1  ;;  %v1191_v37 = vadd.f32 %v4028_v23, %v5506_v24  ;;  %v4636_v13 = vld [vmem:[%s5897_s1 + $0x10] sm:$0xff]  }
 0x19f   : > { %4404 = vmatprep.subr.bf16.mxu1 %v5645_v17  ;;  %3501 = vst.msk [vmem:[%s5524_s15 + $0x38] sm:$0x3] %vm459_vm3, %v3818_v42  ;;  %v4030_v51 = vpop.f32.mrf.mxu1 }
 0x1a0   : > { %3520 = vst.msk [vmem:[%s5524_s15 + $0x40] sm:$0xf] %vm456_vm2, %v3820_v44  ;;  %v1198_v21 = vmax.f32 %v1191_v37, 0.0 }
 0x1a1   : > { %4379 = vmatpush3.bf16.msra.mxu0 %v4636_v13 }
 0x1a2   : > { %4405 = vmatpush3.bf16.msra.mxu1 %v4634_v60  ;;  %4380 = vmatprep.subr.bf16.mxu0 %v4637_v41  ;;  %v3821_v17 = vpack.c.bf16 %v1198_v21, %v1198_v21 }
 0x1a3   : > { %4406 = vmatprep.subr.bf16.mxu1 %v4635_v1 }
 0x1a4   : > { %3521 = vst.msk [vmem:[%s5524_s15 + $0x44] sm:$0x3] %vm459_vm3, %v3821_v17 }
 0x1a5   : > { %4381 = vmatpush3.bf16.msra.mxu0 %v4638_v46 }
 0x1a6   : > { %4407 = vmatpush3.bf16.msra.mxu1 %v4636_v13  ;;  %4382 = vmatprep.subr.bf16.mxu0 %v4639_v19 }
 0x1a7   : > { %4408 = vmatprep.subr.bf16.mxu1 %v4637_v41 }
 0x1a9   : > { %4383 = vmatpush3.bf16.msra.mxu0 %v4640_v50 }
 0x1aa   : > { %4409 = vmatpush3.bf16.msra.mxu1 %v4638_v46 }
 0x1ab   : > { %4410 = vmatprep.subr.bf16.mxu1 %v4639_v19 }
 0x1ac   : > { %v4048_v2 = vpop.f32.mrf.mxu0  ;;  %3144 = vmatmul.mubr.bf16.vlgmr.msra.gmra.mxu0 %v3098_v29 }
 0x1ad   : > { %3151 = vmatprep.mubr.bf16.mxu0 %v3109_v27 }
 0x1ae   : > { %4411 = vmatpush3.bf16.msra.mxu1 %v4640_v50  ;;  %v4049_v55 = vpop.f32.mrf.mxu0 }
 0x1af   : > { %v4050_v45 = vadd.f32 %v4049_v55, %v4048_v2 }
 0x1b0   : > { %v4051_v61 = vpop.f32.mrf.mxu0 }
 0x1b1   : > { %v1334_v47 = vadd.f32 %v4050_v45, %v5506_v24  ;;  %v4076_v3 = vpop.f32.mrf.mxu1  ;;  %3295 = vmatmul.mubr.bf16.vlgmr.msra.gmra.mxu1 %v3249_v6 }
 0x1b2   : > { %v4052_v58 = vpop.f32.mrf.mxu0  ;;  %3302 = vmatprep.mubr.bf16.mxu1 %v3260_v59 }
 0x1b3   : > { %v1347_v62 = vmax.f32 %v1334_v47, 0.0  ;;  %v4053_v0 = vadd.f32 %v4052_v58, %v4051_v61  ;;  %v4077_v34 = vpop.f32.mrf.mxu1 }
 0x1b4   : > { %v4078_v7 = vadd.f32 %v4077_v34, %v4076_v3  ;;  %3152 = vmatmul.mubr.bf16.gmra.mxu0 %v3102_v4  ;;  %v4054_v10 = vpop.f32.mrf.mxu0 }
 0x1b5   : > { %v3822_v14 = vpack.c.bf16 %v1347_v62, %v1347_v62  ;;  %v1337_v11 = vadd.f32 %v4053_v0, %v5506_v24  ;;  %v4079_v12 = vpop.f32.mrf.mxu1 }
 0x1b6   : > { %v1485_v15 = vadd.f32 %v4078_v7, %v5506_v24  ;;  %v4055_v40 = vpop.f32.mrf.mxu0 }
 0x1b7   : > { %3539 = vst.msk [vmem:[%s5524_s15 + $0x48] sm:$0xf] %vm456_vm2, %v3822_v14  ;;  %v1348_v16 = vmax.f32 %v1337_v11, 0.0  ;;  %v4080_v22 = vpop.f32.mrf.mxu1  ;;  %v4056_v26 = vadd.f32 %v4055_v40, %v4054_v10 }
 0x1b8   : > { %v1498_v20 = vmax.f32 %v1485_v15, 0.0  ;;  %v4081_v49 = vadd.f32 %v4080_v22, %v4079_v12  ;;  %v4057_v28 = vpop.f32.mrf.mxu0 }
 0x1b9   : > { %v3823_v30 = vpack.c.bf16 %v1348_v16, %v1348_v16  ;;  %3303 = vmatmul.mubr.bf16.gmra.mxu1 %v3253_v39  ;;  %v4082_v32 = vpop.f32.mrf.mxu1  ;;  %v1342_v33 = vadd.f32 %v4056_v26, %v5506_v24 }
 0x1ba   : > { %v3825_v18 = vpack.c.bf16 %v1498_v20, %v1498_v20  ;;  %v1488_v35 = vadd.f32 %v4081_v49, %v5506_v24  ;;  %v4058_v38 = vpop.f32.mrf.mxu0 }
 0x1bb   : > { %3540 = vst.msk [vmem:[%s5524_s15 + $0x4c] sm:$0xf] %vm456_vm2, %v3823_v30  ;;  %v1349_v8 = vmax.f32 %v1342_v33, 0.0  ;;  %v4083_v23 = vpop.f32.mrf.mxu1 }
 0x1bc   : > { %3559 = vst.msk [vmem:[%s5524_s15 + $0x54] sm:$0xf] %vm456_vm2, %v3825_v18  ;;  %v1499_v60 = vmax.f32 %v1488_v35, 0.0  ;;  %v4084_v42 = vadd.f32 %v4083_v23, %v4082_v32 }
 0x1bd   : > { %v3824_v43 = vpack.c.bf16 %v1349_v8, %v1349_v8  ;;  %v4085_v44 = vpop.f32.mrf.mxu1 }
 0x1be   : > { %v3826_v1 = vpack.c.bf16 %v1499_v60, %v1499_v60  ;;  %v1493_v37 = vadd.f32 %v4084_v42, %v5506_v24 }
 0x1bf   : > { %3541 = vst.msk [vmem:[%s5524_s15 + $0x50] sm:$0x3] %vm459_vm3, %v3824_v43  ;;  %v4086_v51 = vpop.f32.mrf.mxu1 }
 0x1c0   : > { %3560 = vst.msk [vmem:[%s5524_s15 + $0x58] sm:$0xf] %vm456_vm2, %v3826_v1  ;;  %v1500_v21 = vmax.f32 %v1493_v37, 0.0 }
 0x1c2   : > { %v3827_v13 = vpack.c.bf16 %v1500_v21, %v1500_v21 }
 0x1c4   : > { %3561 = vst.msk [vmem:[%s5524_s15 + $0x5c] sm:$0x3] %vm459_vm3, %v3827_v13 }
 0x1cc   : > { %v4104_v41 = vpop.f32.mrf.mxu0 }
 0x1ce   : > { %v4105_v17 = vpop.f32.mrf.mxu0 }
 0x1cf   : > { %v4106_v52 = vadd.f32 %v4105_v17, %v4104_v41 }
 0x1d0   : > { %v4107_v46 = vpop.f32.mrf.mxu0 }
 0x1d1   : > { %v1636_v19 = vadd.f32 %v4106_v52, %v5506_v24  ;;  %v4132_v63 = vpop.f32.mrf.mxu1 }
 0x1d2   : > { %v4108_v25 = vpop.f32.mrf.mxu0 }
 0x1d3   : > { %v1649_v31 = vmax.f32 %v1636_v19, 0.0  ;;  %v4109_v50 = vadd.f32 %v4108_v25, %v4107_v46  ;;  %v4133_v48 = vpop.f32.mrf.mxu1 }
 0x1d4   : > { %v4134_v29 = vadd.f32 %v4133_v48, %v4132_v63  ;;  %v4110_v27 = vpop.f32.mrf.mxu0 }
 0x1d5   : > { %v3828_v53 = vpack.c.bf16 %v1649_v31, %v1649_v31  ;;  %v1639_v2 = vadd.f32 %v4109_v50, %v5506_v24  ;;  %v4135_v54 = vpop.f32.mrf.mxu1 }
 0x1d6   : > { %v1787_v36 = vadd.f32 %v4134_v29, %v5506_v24  ;;  %v4111_v55 = vpop.f32.mrf.mxu0 }
 0x1d7   : > { %3579 = vst.msk [vmem:[%s5524_s15 + $0x60] sm:$0xf] %vm456_vm2, %v3828_v53  ;;  %v1650_v56 = vmax.f32 %v1639_v2, 0.0  ;;  %v4136_v6 = vpop.f32.mrf.mxu1  ;;  %v4112_v57 = vadd.f32 %v4111_v55, %v4110_v27 }
 0x1d8   : > { %v1800_v45 = vmax.f32 %v1787_v36, 0.0  ;;  %v4137_v59 = vadd.f32 %v4136_v6, %v4135_v54  ;;  %v4113_v61 = vpop.f32.mrf.mxu0 }
 0x1d9   : > { %v3829_v47 = vpack.c.bf16 %v1650_v56, %v1650_v56  ;;  %v4138_v3 = vpop.f32.mrf.mxu1  ;;  %v1644_v4 = vadd.f32 %v4112_v57, %v5506_v24 }
 0x1da   : > { %v3831_v58 = vpack.c.bf16 %v1800_v45, %v1800_v45  ;;  %v1790_v5 = vadd.f32 %v4137_v59, %v5506_v24  ;;  %v4114_v62 = vpop.f32.mrf.mxu0 }
 0x1db   : > { %3580 = vst.msk [vmem:[%s5524_s15 + $0x64] sm:$0xf] %vm456_vm2, %v3829_v47  ;;  %v1651_v0 = vmax.f32 %v1644_v4, 0.0  ;;  %v4139_v34 = vpop.f32.mrf.mxu1 }
 0x1dc   : > { %3599 = vst.msk [vmem:[%s5524_s15 + $0x6c] sm:$0xf] %vm456_vm2, %v3831_v58  ;;  %v1801_v9 = vmax.f32 %v1790_v5, 0.0  ;;  %v4140_v7 = vadd.f32 %v4139_v34, %v4138_v3 }
 0x1dd   : > { %v3830_v10 = vpack.c.bf16 %v1651_v0, %v1651_v0  ;;  %v4141_v14 = vpop.f32.mrf.mxu1 }
 0x1de   : > { %v3832_v11 = vpack.c.bf16 %v1801_v9, %v1801_v9  ;;  %v1795_v12 = vadd.f32 %v4140_v7, %v5506_v24 }
 0x1df   : > { %3581 = vst.msk [vmem:[%s5524_s15 + $0x68] sm:$0x3] %vm459_vm3, %v3830_v10  ;;  %v4142_v15 = vpop.f32.mrf.mxu1 }
 0x1e0   : > { %3600 = vst.msk [vmem:[%s5524_s15 + $0x70] sm:$0xf] %vm456_vm2, %v3832_v11  ;;  %v1802_v39 = vmax.f32 %v1795_v12, 0.0 }
 0x1e2   : > { %v3833_v40 = vpack.c.bf16 %v1802_v39, %v1802_v39 }
 0x1e4   : > { %3601 = vst.msk [vmem:[%s5524_s15 + $0x74] sm:$0x3] %vm459_vm3, %v3833_v40 }
 0x1ec   : > { %v4160_v16 = vpop.f32.mrf.mxu0 }
 0x1ee   : > { %v4161_v22 = vpop.f32.mrf.mxu0 }
 0x1ef   : > { %v4162_v26 = vadd.f32 %v4161_v22, %v4160_v16 }
 0x1f0   : > { %v4163_v20 = vpop.f32.mrf.mxu0 }
 0x1f1   : > { %v1938_v49 = vadd.f32 %v4162_v26, %v5506_v24  ;;  %v4188_v28 = vpop.f32.mrf.mxu1 }
 0x1f2   : > { %v4164_v30 = vpop.f32.mrf.mxu0 }
 0x1f3   : > { %v1951_v32 = vmax.f32 %v1938_v49, 0.0  ;;  %v4165_v33 = vadd.f32 %v4164_v30, %v4163_v20  ;;  %v4189_v18 = vpop.f32.mrf.mxu1 }
 0x1f4   : > { %v4190_v35 = vadd.f32 %v4189_v18, %v4188_v28  ;;  %v4166_v38 = vpop.f32.mrf.mxu0 }
 0x1f5   : > { %v3834_v8 = vpack.c.bf16 %v1951_v32, %v1951_v32  ;;  %v1941_v23 = vadd.f32 %v4165_v33, %v5506_v24  ;;  %v4191_v60 = vpop.f32.mrf.mxu1 }
 0x1f6   : > { %v2089_v42 = vadd.f32 %v4190_v35, %v5506_v24  ;;  %v4167_v43 = vpop.f32.mrf.mxu0 }
 0x1f7   : > { %3619 = vst.msk [vmem:[%s5524_s15 + $0x78] sm:$0xf] %vm456_vm2, %v3834_v8  ;;  %v1952_v44 = vmax.f32 %v1941_v23, 0.0  ;;  %v4192_v1 = vpop.f32.mrf.mxu1  ;;  %v4168_v37 = vadd.f32 %v4167_v43, %v4166_v38 }
 0x1f8   : > { %v2102_v51 = vmax.f32 %v2089_v42, 0.0  ;;  %v4193_v21 = vadd.f32 %v4192_v1, %v4191_v60  ;;  %v4169_v13 = vpop.f32.mrf.mxu0 }
 0x1f9   : > { %v3835_v41 = vpack.c.bf16 %v1952_v44, %v1952_v44  ;;  %v4194_v17 = vpop.f32.mrf.mxu1  ;;  %v1946_v52 = vadd.f32 %v4168_v37, %v5506_v24 }
 0x1fa   : > { %v3837_v46 = vpack.c.bf16 %v2102_v51, %v2102_v51  ;;  %v2092_v19 = vadd.f32 %v4193_v21, %v5506_v24  ;;  %v4170_v63 = vpop.f32.mrf.mxu0  ;;  %v5837_v21 = vld [vmem:[%s5898_s2] ss:$0 sm:$0xff] }
 0x1fb   : > { %3620 = vst.msk [vmem:[%s5524_s15 + $0x7c] sm:$0xf] %vm456_vm2, %v3835_v41  ;;  %v1953_v25 = vmax.f32 %v1946_v52, 0.0  ;;  %v4195_v31 = vpop.f32.mrf.mxu1 }
 0x1fc   : > { %3639 = vst.msk [vmem:[%s5524_s15 + $0x84] sm:$0xf] %vm456_vm2, %v3837_v46  ;;  %v2103_v50 = vmax.f32 %v2092_v19, 0.0  ;;  %v4196_v48 = vadd.f32 %v4195_v31, %v4194_v17 }
 0x1fd   : > { %v3836_v29 = vpack.c.bf16 %v1953_v25, %v1953_v25  ;;  %v4197_v27 = vpop.f32.mrf.mxu1 }
 0x1fe   : > { %v3838_v53 = vpack.c.bf16 %v2103_v50, %v2103_v50  ;;  %v2097_v2 = vadd.f32 %v4196_v48, %v5506_v24 }
 0x1ff   : > { %3621 = vst.msk [vmem:[%s5524_s15 + $0x80] sm:$0x3] %vm459_vm3, %v3836_v29  ;;  %v4198_v54 = vpop.f32.mrf.mxu1 }
 0x200   : > { %3640 = vst.msk [vmem:[%s5524_s15 + $0x88] sm:$0xf] %vm456_vm2, %v3838_v53  ;;  %v2104_v36 = vmax.f32 %v2097_v2, 0.0 }
 0x202   : > { %v3839_v55 = vpack.c.bf16 %v2104_v36, %v2104_v36 }
 0x204   : > { %3641 = vst.msk [vmem:[%s5524_s15 + $0x8c] sm:$0x3] %vm459_vm3, %v3839_v55 }
 0x20c   : > { %v4216_v56 = vpop.f32.mrf.mxu0 }
 0x20e   : > { %v4217_v6 = vpop.f32.mrf.mxu0 }
 0x20f   : > { %v4218_v57 = vadd.f32 %v4217_v6, %v4216_v56 }
 0x210   : > { %v4219_v45 = vpop.f32.mrf.mxu0 }
 0x211   : > { %v2240_v59 = vadd.f32 %v4218_v57, %v5506_v24  ;;  %v4244_v61 = vpop.f32.mrf.mxu1 }
 0x212   : > { %v4220_v47 = vpop.f32.mrf.mxu0 }
 0x213   : > { %v2253_v3 = vmax.f32 %v2240_v59, 0.0  ;;  %v4221_v4 = vadd.f32 %v4220_v47, %v4219_v45  ;;  %v4245_v58 = vpop.f32.mrf.mxu1 }
 0x214   : > { %v4246_v5 = vadd.f32 %v4245_v58, %v4244_v61  ;;  %v4222_v62 = vpop.f32.mrf.mxu0 }
 0x215   : > { %v3840_v0 = vpack.c.bf16 %v2253_v3, %v2253_v3  ;;  %v2243_v34 = vadd.f32 %v4221_v4, %v5506_v24  ;;  %v4247_v9 = vpop.f32.mrf.mxu1 }
 0x216   : > { %v2391_v7 = vadd.f32 %v4246_v5, %v5506_v24  ;;  %v4223_v10 = vpop.f32.mrf.mxu0 }
 0x217   : > { %3659 = vst.msk [vmem:[%s5524_s15 + $0x90] sm:$0xf] %vm456_vm2, %v3840_v0  ;;  %v2254_v14 = vmax.f32 %v2243_v34, 0.0  ;;  %v4248_v11 = vpop.f32.mrf.mxu1  ;;  %v4224_v12 = vadd.f32 %v4223_v10, %v4222_v62 }
 0x218   : > { %v2404_v15 = vmax.f32 %v2391_v7, 0.0  ;;  %v4249_v39 = vadd.f32 %v4248_v11, %v4247_v9  ;;  %v4225_v40 = vpop.f32.mrf.mxu0 }
 0x219   : > { %v3841_v16 = vpack.c.bf16 %v2254_v14, %v2254_v14  ;;  %v4250_v22 = vpop.f32.mrf.mxu1  ;;  %v2248_v26 = vadd.f32 %v4224_v12, %v5506_v24 }
 0x21a   : > { %v3843_v20 = vpack.c.bf16 %v2404_v15, %v2404_v15  ;;  %v2394_v49 = vadd.f32 %v4249_v39, %v5506_v24  ;;  %v4226_v28 = vpop.f32.mrf.mxu0 }
 0x21b   : > { %3660 = vst.msk [vmem:[%s5524_s15 + $0x94] sm:$0xf] %vm456_vm2, %v3841_v16  ;;  %v2255_v30 = vmax.f32 %v2248_v26, 0.0  ;;  %v4251_v32 = vpop.f32.mrf.mxu1 }
 0x21c   : > { %3679 = vst.msk [vmem:[%s5524_s15 + $0x9c] sm:$0xf] %vm456_vm2, %v3843_v20  ;;  %v2405_v33 = vmax.f32 %v2394_v49, 0.0  ;;  %v4252_v18 = vadd.f32 %v4251_v32, %v4250_v22 }
 0x21d   : > { %v3842_v35 = vpack.c.bf16 %v2255_v30, %v2255_v30  ;;  %v4253_v38 = vpop.f32.mrf.mxu1 }
 0x21e   : > { %v3844_v8 = vpack.c.bf16 %v2405_v33, %v2405_v33  ;;  %v2399_v23 = vadd.f32 %v4252_v18, %v5506_v24 }
 0x21f   : > { %3661 = vst.msk [vmem:[%s5524_s15 + $0x98] sm:$0x3] %vm459_vm3, %v3842_v35  ;;  %v4254_v60 = vpop.f32.mrf.mxu1 }
 0x220   : > { %3680 = vst.msk [vmem:[%s5524_s15 + $0xa0] sm:$0xf] %vm456_vm2, %v3844_v8  ;;  %v2406_v42 = vmax.f32 %v2399_v23, 0.0 }
 0x222   : > { %v3845_v43 = vpack.c.bf16 %v2406_v42, %v2406_v42 }
 0x224   : > { %3681 = vst.msk [vmem:[%s5524_s15 + $0xa4] sm:$0x3] %vm459_vm3, %v3845_v43 }
 0x22c   : > { %v4272_v44 = vpop.f32.mrf.mxu0 }
 0x22e   : > { %v4273_v1 = vpop.f32.mrf.mxu0 }
 0x22f   : > { %v4274_v37 = vadd.f32 %v4273_v1, %v4272_v44 }
 0x230   : > { %v4275_v51 = vpop.f32.mrf.mxu0 }
 0x231   : > { %v2542_v24 = vadd.f32 %v5837_v21, %v4274_v37  ;;  %v4300_v13 = vpop.f32.mrf.mxu1 }
 0x232   : > { %v4276_v41 = vpop.f32.mrf.mxu0 }
 0x233   : > { %v2555_v17 = vmax.f32 %v2542_v24, 0.0  ;;  %v4277_v52 = vadd.f32 %v4276_v41, %v4275_v51  ;;  %v4301_v46 = vpop.f32.mrf.mxu1 }
 0x234   : > { %v4302_v19 = vadd.f32 %v4301_v46, %v4300_v13  ;;  %v4278_v63 = vpop.f32.mrf.mxu0 }
 0x235   : > { %v3846_v25 = vpack.c.bf16 %v2555_v17, %v2555_v17  ;;  %v2545_v31 = vadd.f32 %v5837_v21, %v4277_v52  ;;  %v4303_v50 = vpop.f32.mrf.mxu1 }
 0x236   : > { %v2693_v48 = vadd.f32 %v5837_v21, %v4302_v19  ;;  %v4279_v29 = vpop.f32.mrf.mxu0 }
 0x237   : > { %3699 = vst.msk [vmem:[%s5524_s15 + $0xa8] sm:$0xf] %vm456_vm2, %v3846_v25  ;;  %v2556_v27 = vmax.f32 %v2545_v31, 0.0  ;;  %v4304_v53 = vpop.f32.mrf.mxu1  ;;  %v4280_v2 = vadd.f32 %v4279_v29, %v4278_v63 }
 0x238   : > { %v2706_v54 = vmax.f32 %v2693_v48, 0.0  ;;  %v4305_v36 = vadd.f32 %v4304_v53, %v4303_v50  ;;  %v4281_v55 = vpop.f32.mrf.mxu0 }
 0x239   : > { %v3847_v56 = vpack.c.bf16 %v2556_v27, %v2556_v27  ;;  %v4306_v6 = vpop.f32.mrf.mxu1  ;;  %v2550_v57 = vadd.f32 %v5837_v21, %v4280_v2 }
 0x23a   : > { %v3849_v45 = vpack.c.bf16 %v2706_v54, %v2706_v54  ;;  %v2696_v59 = vadd.f32 %v5837_v21, %v4305_v36  ;;  %v4282_v61 = vpop.f32.mrf.mxu0 }
 0x23b   : > { %3700 = vst.msk [vmem:[%s5524_s15 + $0xac] sm:$0xf] %vm456_vm2, %v3847_v56  ;;  %v2557_v47 = vmax.f32 %v2550_v57, 0.0  ;;  %v4307_v3 = vpop.f32.mrf.mxu1 }
 0x23c   : > { %3719 = vst.msk [vmem:[%s5524_s15 + $0xb4] sm:$0xf] %vm456_vm2, %v3849_v45  ;;  %v2707_v4 = vmax.f32 %v2696_v59, 0.0  ;;  %v4308_v58 = vadd.f32 %v4307_v3, %v4306_v6 }
 0x23d   : > { %v3848_v5 = vpack.c.bf16 %v2557_v47, %v2557_v47  ;;  %v4309_v62 = vpop.f32.mrf.mxu1 }
 0x23e   : > { %v3850_v0 = vpack.c.bf16 %v2707_v4, %v2707_v4  ;;  %v2701_v34 = vadd.f32 %v5837_v21, %v4308_v58 }
 0x23f   : > { %3701 = vst.msk [vmem:[%s5524_s15 + $0xb0] sm:$0x3] %vm459_vm3, %v3848_v5  ;;  %v4310_v9 = vpop.f32.mrf.mxu1 }
 0x240   : > { %3720 = vst.msk [vmem:[%s5524_s15 + $0xb8] sm:$0xf] %vm456_vm2, %v3850_v0  ;;  %v2708_v7 = vmax.f32 %v2701_v34, 0.0 }
 0x242   : > { %v3851_v10 = vpack.c.bf16 %v2708_v7, %v2708_v7 }
 0x244   : > { %3721 = vst.msk [vmem:[%s5524_s15 + $0xbc] sm:$0x3] %vm459_vm3, %v3851_v10 }
 0x24c   : > { %v4328_v14 = vpop.f32.mrf.mxu0 }
 0x24e   : > { %v4329_v11 = vpop.f32.mrf.mxu0 }
 0x24f   : > { %v4330_v12 = vadd.f32 %v4329_v11, %v4328_v14 }
 0x250   : > { %v4331_v15 = vpop.f32.mrf.mxu0 }
 0x251   : > { %v2844_v39 = vadd.f32 %v5837_v21, %v4330_v12  ;;  %v4356_v40 = vpop.f32.mrf.mxu1 }
 0x252   : > { %v4332_v16 = vpop.f32.mrf.mxu0 }
 0x253   : > { %v2857_v22 = vmax.f32 %v2844_v39, 0.0  ;;  %v4333_v26 = vadd.f32 %v4332_v16, %v4331_v15  ;;  %v4357_v20 = vpop.f32.mrf.mxu1 }
 0x254   : > { %v4358_v49 = vadd.f32 %v4357_v20, %v4356_v40  ;;  %v4334_v28 = vpop.f32.mrf.mxu0 }
 0x255   : > { %v3852_v30 = vpack.c.bf16 %v2857_v22, %v2857_v22  ;;  %v2847_v32 = vadd.f32 %v5837_v21, %v4333_v26  ;;  %v4359_v33 = vpop.f32.mrf.mxu1 }
 0x256   : > { %v2995_v18 = vadd.f32 %v5837_v21, %v4358_v49  ;;  %v4335_v35 = vpop.f32.mrf.mxu0 }
 0x257   : > { %3739 = vst.msk [vmem:[%s5524_s15 + $0xc0] sm:$0xf] %vm456_vm2, %v3852_v30  ;;  %v2858_v38 = vmax.f32 %v2847_v32, 0.0  ;;  %v4360_v8 = vpop.f32.mrf.mxu1  ;;  %v4336_v23 = vadd.f32 %v4335_v35, %v4334_v28 }
 0x258   : > { %v3008_v60 = vmax.f32 %v2995_v18, 0.0  ;;  %v4361_v42 = vadd.f32 %v4360_v8, %v4359_v33  ;;  %v4337_v43 = vpop.f32.mrf.mxu0 }
 0x259   : > { %v3853_v44 = vpack.c.bf16 %v2858_v38, %v2858_v38  ;;  %v4362_v1 = vpop.f32.mrf.mxu1  ;;  %v2852_v37 = vadd.f32 %v5837_v21, %v4336_v23 }
 0x25a   : > { %v3855_v51 = vpack.c.bf16 %v3008_v60, %v3008_v60  ;;  %v2998_v24 = vadd.f32 %v5837_v21, %v4361_v42  ;;  %v4338_v13 = vpop.f32.mrf.mxu0 }
 0x25b   : > { %3740 = vst.msk [vmem:[%s5524_s15 + $0xc4] sm:$0xf] %vm456_vm2, %v3853_v44  ;;  %v2859_v41 = vmax.f32 %v2852_v37, 0.0  ;;  %v4363_v17 = vpop.f32.mrf.mxu1 }
 0x25c   : > { %3759 = vst.msk [vmem:[%s5524_s15 + $0xcc] sm:$0xf] %vm456_vm2, %v3855_v51  ;;  %v3009_v52 = vmax.f32 %v2998_v24, 0.0  ;;  %v4364_v46 = vadd.f32 %v4363_v17, %v4362_v1 }
 0x25d   : > { %v3854_v19 = vpack.c.bf16 %v2859_v41, %v2859_v41  ;;  %v4365_v63 = vpop.f32.mrf.mxu1 }
 0x25e   : > { %v3856_v25 = vpack.c.bf16 %v3009_v52, %v3009_v52  ;;  %v3003_v31 = vadd.f32 %v5837_v21, %v4364_v46 }
 0x25f   : > { %3741 = vst.msk [vmem:[%s5524_s15 + $0xc8] sm:$0x3] %vm459_vm3, %v3854_v19  ;;  %v4366_v50 = vpop.f32.mrf.mxu1 }
 0x260   : > { %3760 = vst.msk [vmem:[%s5524_s15 + $0xd0] sm:$0xf] %vm456_vm2, %v3856_v25  ;;  %v3010_v48 = vmax.f32 %v3003_v31, 0.0 }
 0x262   : > { %v3857_v29 = vpack.c.bf16 %v3010_v48, %v3010_v48 }
 0x264   : > { %3761 = vst.msk [vmem:[%s5524_s15 + $0xd4] sm:$0x3] %vm459_vm3, %v3857_v29 }
 0x26c   : > { %v4384_v27 = vpop.f32.mrf.mxu0 }
 0x26e   : > { %v4385_v53 = vpop.f32.mrf.mxu0 }
 0x26f   : > { %v4386_v2 = vadd.f32 %v4385_v53, %v4384_v27 }
 0x270   : > { %v4387_v54 = vpop.f32.mrf.mxu0 }
 0x271   : > { %v3146_v36 = vadd.f32 %v5837_v21, %v4386_v2  ;;  %v4412_v55 = vpop.f32.mrf.mxu1 }
 0x272   : > { %v4388_v56 = vpop.f32.mrf.mxu0 }
 0x273   : > { %v3159_v6 = vmax.f32 %v3146_v36, 0.0  ;;  %v4389_v57 = vadd.f32 %v4388_v56, %v4387_v54  ;;  %v4413_v45 = vpop.f32.mrf.mxu1 }
 0x274   : > { %v4414_v59 = vadd.f32 %v4413_v45, %v4412_v55  ;;  %v4390_v61 = vpop.f32.mrf.mxu0 }
 0x275   : > { %v3858_v47 = vpack.c.bf16 %v3159_v6, %v3159_v6  ;;  %v3149_v3 = vadd.f32 %v5837_v21, %v4389_v57  ;;  %v4415_v4 = vpop.f32.mrf.mxu1 }
 0x276   : > { %v3297_v58 = vadd.f32 %v5837_v21, %v4414_v59  ;;  %v4391_v5 = vpop.f32.mrf.mxu0 }
 0x277   : > { %3779 = vst.msk [vmem:[%s5524_s15 + $0xd8] sm:$0xf] %vm456_vm2, %v3858_v47  ;;  %v3160_v62 = vmax.f32 %v3149_v3, 0.0  ;;  %v4392_v0 = vadd.f32 %v4391_v5, %v4390_v61  ;;  %v4416_v34 = vpop.f32.mrf.mxu1 }
 0x278   : > { %v3310_v9 = vmax.f32 %v3297_v58, 0.0  ;;  %v4417_v7 = vadd.f32 %v4416_v34, %v4415_v4  ;;  %v4393_v10 = vpop.f32.mrf.mxu0 }
 0x279   : > { %v3859_v14 = vpack.c.bf16 %v3160_v62, %v3160_v62  ;;  %v3154_v11 = vadd.f32 %v5837_v21, %v4392_v0  ;;  %v4418_v12 = vpop.f32.mrf.mxu1 }
 0x27a   : > { %v3861_v15 = vpack.c.bf16 %v3310_v9, %v3310_v9  ;;  %v3300_v39 = vadd.f32 %v5837_v21, %v4417_v7  ;;  %v4394_v40 = vpop.f32.mrf.mxu0 }
 0x27b   : > { %3780 = vst.msk [vmem:[%s5524_s15 + $0xdc] sm:$0xf] %vm456_vm2, %v3859_v14  ;;  %v3161_v16 = vmax.f32 %v3154_v11, 0.0  ;;  %v4419_v22 = vpop.f32.mrf.mxu1 }
 0x27c   : > { %3799 = vst.msk [vmem:[%s5524_s15 + $0xe4] sm:$0xf] %vm456_vm2, %v3861_v15  ;;  %v3311_v26 = vmax.f32 %v3300_v39, 0.0  ;;  %v4420_v20 = vadd.f32 %v4419_v22, %v4418_v12 }
 0x27d   : > { %v3860_v49 = vpack.c.bf16 %v3161_v16, %v3161_v16  ;;  %v4421_v28 = vpop.f32.mrf.mxu1 }
 0x27e   : > { %v3862_v30 = vpack.c.bf16 %v3311_v26, %v3311_v26  ;;  %v3305_v32 = vadd.f32 %v5837_v21, %v4420_v20 }
 0x27f   : > { %3781 = vst.msk [vmem:[%s5524_s15 + $0xe0] sm:$0x3] %vm459_vm3, %v3860_v49  ;;  %v4422_v33 = vpop.f32.mrf.mxu1 }
 0x280   : > { %3800 = vst.msk [vmem:[%s5524_s15 + $0xe8] sm:$0xf] %vm456_vm2, %v3862_v30  ;;  %v3312_v18 = vmax.f32 %v3305_v32, 0.0 }
 0x282   : > { %v3863_v35 = vpack.c.bf16 %v3312_v18, %v3312_v18 }
 0x284   : > { %3801 = vst.msk [vmem:[%s5524_s15 + $0xec] sm:$0x3] %vm459_vm3, %v3863_v35 }
 0x285 PF: > { %s13_s12 = sadd.s32 1, %s4650_s12  }
 0x286   : > { %p10_p4 = scmp.ge.s32.totalorder %s13_s12, 4  }
 0x288   :  { %12 = sbr.rel (!%p10_p4) target bundleno = 1 (0x1), region = 101 }

// kernel: qnetwork_forward.5
= control target key start
LH: loop header
LB: loop body
LE: loop exit
PB: predicated region body
PF: predicated region fallthrough
CT: control target
= control target key end

     0   :  { %s2321_s12 = smov 0   ;;  %s3007_s0 = inlined_call_operand.vmem [shape: bf16[2,10,10,128], index: 0, kind: input, shape index: {}]   ;;  %s3008_s1 = inlined_call_operand.vmem [shape: bf16[512,64], index: 1, kind: input, shape index: {}]   ;;  %s3009_s2 = inlined_call_operand.vmem [shape: f32[1,64], index: 2, kind: input, shape index: {}]   ;;  %s3010_s3 = inlined_call_operand.vmem [shape: bf16[2,9,9,64], index: 3, kind: output, shape index: {}]  }
   0x1 LB: > { %s1663_s13 = sadd.s32 4294967295, %s2299_s12   ;;  %p1667_p0 = scmp.ge.s32.totalorder %s2299_s12, 1  ;;  %s2299_s12 = sphi %s2321_s12, %s13_s12  }
   0x2   : > { %p137_p1 = scmp.lt.s32.totalorder %s2299_s12, 3 }
   0x4   : > { %p138_p2 = pnand %p1667_p0, %p137_p1 }
   0x5   : > { %p161_p3 = scmp.lt.s32.totalorder (!%p138_p2), %s1663_s13, 1 }
   0x6   : > { %141 = sbr.rel (%p138_p2) target bundleno = 512 (0x200), region = 32 }
   0xb   : > { %v2332_v0 = vld [vmem:[%s3008_s1 + $0x78] sm:$0xff]   ;;  %v2355_v4 = vld [vmem:[%s3008_s1 + $0x70] sm:$0xff]   ;;  %v2379_v8 = vld [vmem:[%s3008_s1 + $0x68] sm:$0xff]   ;;  %s3014_s13 = smov (!%p161_p3, %s1663_s13), 1  ;;  %vm560_vm0 = vcmask 519168   ;;  %vm562_vm1 = vcmask 516096  }
   0xc   : > { %v2337_v1 = vld [vmem:[%s3008_s1 + $0xf8] sm:$0xff]   ;;  %1817 = vmatprep.subr.bf16.mxu0 %v2332_v0  ;;  %v2361_v5 = vld [vmem:[%s3008_s1 + $0xf0] sm:$0xff]   ;;  %v2385_v9 = vld [vmem:[%s3008_s1 + $0xe8] sm:$0xff]   ;;  %s2213_s16 = smul.u32 80, %s3014_s13  ;;  %vm563_vm2 = vsmask.f32 256 }
   0xd   : > { %v2343_v2 = vld [vmem:[%s3008_s1 + $0x38] sm:$0xff]   ;;  %1839 = vmatprep.subr.bf16.mxu1 %v2337_v1  ;;  %v2367_v6 = vld [vmem:[%s3008_s1 + $0x30] sm:$0xff]   ;;  %v2391_v10 = vld [vmem:[%s3008_s1 + $0x28] sm:$0xff]   ;;  %s2214_s7 = smul.u32 72, %s3014_s13 }
   0xe   : > { %v2349_v3 = vld [vmem:[%s3008_s1 + $0xb8] sm:$0xff]   ;;  %1818 = vmatpush3.bf16.msra.mxu0 %v2343_v2  ;;  %v2373_v7 = vld [vmem:[%s3008_s1 + $0xb0] sm:$0xff]   ;;  %v2397_v11 = vld [vmem:[%s3008_s1 + $0xa8] sm:$0xff]   ;;  %s2517_s27 = scalar_lea.vmem %s3007_s0, %s2213_s16 }
   0xf   : > { %1840 = vmatpush3.bf16.msra.mxu1 %v2349_v3  ;;  %1819 = vmatprep.subr.bf16.mxu0 %v2355_v4  ;;  %v2403_v12 = vld [vmem:[%s3008_s1 + $0x60] sm:$0xff]   ;;  %v2427_v16 = vld [vmem:[%s3008_s1 + $0x58] sm:$0xff]   ;;  %v2453_v20 = vld [vmem:[%s3008_s1 + $0x50] sm:$0xff]   ;;  %s2821_s13 = scalar_lea.vmem %s3010_s3, %s2214_s7 }
  0x10   : > { %1841 = vmatprep.subr.bf16.mxu1 %v2361_v5  ;;  %v2409_v13 = vld [vmem:[%s3008_s1 + $0xe0] sm:$0xff]   ;;  %v2433_v17 = vld [vmem:[%s3008_s1 + $0xd8] sm:$0xff]   ;;  %v2459_v21 = vld [vmem:[%s3008_s1 + $0xd0] sm:$0xff]  }
  0x11   : > { %v2415_v14 = vld [vmem:[%s3008_s1 + $0x20] sm:$0xff]   ;;  %v2441_v18 = vld [vmem:[%s3008_s1 + $0x18] sm:$0xff]   ;;  %v2469_v22 = vld [vmem:[%s3008_s1 + $0x10] sm:$0xff]  }
  0x12   : > { %1820 = vmatpush3.bf16.msra.mxu0 %v2367_v6  ;;  %v2421_v15 = vld [vmem:[%s3008_s1 + $0xa0] sm:$0xff]   ;;  %v2447_v19 = vld [vmem:[%s3008_s1 + $0x98] sm:$0xff]   ;;  %v2475_v23 = vld [vmem:[%s3008_s1 + $0x90] sm:$0xff]  }
  0x13   : > { %1842 = vmatpush3.bf16.msra.mxu1 %v2373_v7  ;;  %1821 = vmatprep.subr.bf16.mxu0 %v2379_v8  ;;  %v2481_v24 = vld [vmem:[%s3008_s1 + $0x48] sm:$0xff]   ;;  %v2506_v28 = vld [vmem:[%s3008_s1 + $0x40] sm:$0xff]   ;;  %v2258_v40 = vld [vmem:[%s2517_s27 + $0x10] sm:$0x1f]  }
  0x14   : > { %1843 = vmatprep.subr.bf16.mxu1 %v2385_v9  ;;  %v2487_v25 = vld [vmem:[%s3008_s1 + $0xc8] sm:$0xff]   ;;  %v2512_v29 = vld [vmem:[%s3008_s1 + $0xc0] sm:$0xff]   ;;  %v594_v45 = vshrl.u32 %v2258_v40, 16  ;;  %v596_v46 = vshll.u32 %v2258_v40, 16  ;;  %v2560_v52 = vld [vmem:[%s2517_s27 + $0x10] sm:$0x1f]  }
  0x15   : > { %v2494_v26 = vld [vmem:[%s3008_s1 + $0x8] sm:$0xff]   ;;  %v2523_v30 = vld [vmem:[%s3008_s1] sm:$0xff]   ;;  %v2563_v53 = vld [vmem:[%s2517_s27 + $0x18] sm:$0x1f]   ;;  %v712_v54 = vshll.u32 %v2560_v52, 16  ;;  %v710_v56 = vshrl.u32 %v2560_v52, 16 }
  0x16   : > { %1822 = vmatpush3.bf16.msra.mxu0 %v2391_v10  ;;  %v2500_v27 = vld [vmem:[%s3008_s1 + $0x88] sm:$0xff]   ;;  %v2529_v31 = vld [vmem:[%s3008_s1 + $0x80] sm:$0xff]   ;;  %v598_v49 = vrot.slane %v596_v46, 1  ;;  %v726_v55 = vshll.u32 %v2563_v53, 16  ;;  %v724_v58 = vshrl.u32 %v2563_v53, 16  ;;  %vm2829_vm3 = vmand %vm562_vm1, %vm563_vm2 }
  0x17   : > { %1844 = vmatpush3.bf16.msra.mxu1 %v2397_v11  ;;  %1823 = vmatprep.subr.bf16.mxu0 %v2403_v12  ;;  %v2255_v32 = vld [vmem:[%s2517_s27] sm:$0x1f]   ;;  %v2256_v33 = vld [vmem:[%s2517_s27 + $0x8] sm:$0x1f]   ;;  %v714_v57 = vrot.slane %v712_v54, 1 }
  0x18   : > { %1845 = vmatprep.subr.bf16.mxu1 %v2409_v13  ;;  %v249_v34 = vshrl.u32 %v2255_v32, 16  ;;  %v251_v35 = vshll.u32 %v2255_v32, 16  ;;  %v263_v36 = vshrl.u32 %v2256_v33, 16  ;;  %v265_v37 = vshll.u32 %v2256_v33, 16  ;;  %v2257_v38 = vld [vmem:[%s2517_s27 + $0x8] sm:$0x1f]  }
  0x19   : > { %v580_v42 = vshrl.u32 %v2257_v38, 16  ;;  %v582_v43 = vshll.u32 %v2257_v38, 16  ;;  %v599_v51 = vor.u32 %v598_v49, %v594_v45  ;;  %v728_v59 = vrot.slane %v726_v55, 1  ;;  %v2602_v62 = vld [vmem:[%s2517_s27 + $0x18] sm:$0x1f]  }
  0x1a   : > { %1824 = vmatpush3.bf16.msra.mxu0 %v2415_v14  ;;  %v253_v39 = vrot.slane %v251_v35, 1  ;;  %v267_v41 = vrot.slane %v265_v37, 1  ;;  %v715_v60 = vor.u32 %v714_v57, %v710_v56  ;;  %v2605_v63 = vld [vmem:[%s2517_s27 + $0x20] sm:$0x1f]  }
  0x1b   : > { %1846 = vmatpush3.bf16.msra.mxu1 %v2421_v15  ;;  %1825 = vmatprep.subr.bf16.mxu0 %v2427_v16  ;;  %v584_v48 = vrot.slane %v582_v43, 1  ;;  %v729_v61 = vor.u32 %v728_v59, %v724_v58 }
  0x1c   : > { %1847 = vmatprep.subr.bf16.mxu1 %v2433_v17  ;;  %v254_v44 = vor.u32 %v253_v39, %v249_v34  ;;  %v268_v47 = vor.u32 %v267_v41, %v263_v36  ;;  %v840_v34 = vshrl.u32 %v2602_v62, 16  ;;  %v854_v36 = vshrl.u32 %v2605_v63, 16  ;;  %v2649_v41 = vld [vmem:[%s2517_s27 + $0x28] sm:$0x1f]  }
  0x1d   : > { %v585_v50 = vor.u32 %v584_v48, %v580_v42  ;;  %v986_v43 = vshll.u32 %v2649_v41, 16  ;;  %v984_v46 = vshrl.u32 %v2649_v41, 16 }
  0x1e   : > { %1826 = vmatpush3.bf16.msra.mxu0 %v2441_v18  ;;  %500 = vmatprep.mubr.bf16.mxu0 %v254_v44 }
  0x1f   : > { %1848 = vmatpush3.bf16.msra.mxu1 %v2447_v19  ;;  %1827 = vmatprep.subr.bf16.mxu0 %v2453_v20 }
  0x20   : > { %1849 = vmatprep.subr.bf16.mxu1 %v2459_v21  ;;  %541 = vmatprep.mubr.bf16.mxu1 %v268_v47  ;;  %v988_v47 = vrot.slane %v986_v43, 1 }
  0x22   : > { %1828 = vmatpush3.bf16.msra.mxu0 %v2469_v22  ;;  %v989_v49 = vor.u32 %v988_v47, %v984_v46 }
  0x23   : > { %1850 = vmatpush3.bf16.msra.mxu1 %v2475_v23  ;;  %1829 = vmatprep.subr.bf16.mxu0 %v2481_v24 }
  0x24   : > { %1851 = vmatprep.subr.bf16.mxu1 %v2487_v25 }
  0x26   : > { %1830 = vmatpush3.bf16.msra.mxu0 %v2494_v26 }
  0x27   : > { %1852 = vmatpush3.bf16.msra.mxu1 %v2500_v27  ;;  %1831 = vmatprep.subr.bf16.mxu0 %v2506_v28 }
  0x28   : > { %1853 = vmatprep.subr.bf16.mxu1 %v2512_v29 }
  0x2a   : > { %1832 = vmatpush3.bf16.msra.mxu0 %v2523_v30 }
  0x2b   : > { %1854 = vmatpush3.bf16.msra.mxu1 %v2529_v31  ;;  %1861 = vmatprep.subr.bf16.mxu0 %v2332_v0 }
  0x2c   : > { %1883 = vmatprep.subr.bf16.mxu1 %v2337_v1 }
  0x2d   : > { %501 = vmatmul.mubr.bf16.vlgmr.msra.gmra.mxu0 %v2255_v32  ;;  %v842_v32 = vshll.u32 %v2602_v62, 16 }
  0x2e   : > { %542 = vmatmul.mubr.bf16.vlgmr.msra.gmra.mxu1 %v2256_v33  ;;  %1862 = vmatpush3.bf16.msra.mxu0 %v2343_v2  ;;  %v856_v33 = vshll.u32 %v2605_v63, 16 }
  0x2f   : > { %1884 = vmatpush3.bf16.msra.mxu1 %v2349_v3  ;;  %1863 = vmatprep.subr.bf16.mxu0 %v2355_v4  ;;  %v844_v35 = vrot.slane %v842_v32, 1 }
  0x30   : > { %1885 = vmatprep.subr.bf16.mxu1 %v2361_v5  ;;  %633 = vmatprep.mubr.bf16.mxu0 %v585_v50  ;;  %v858_v37 = vrot.slane %v856_v33, 1  ;;  %v2690_v50 = vld [vmem:[%s2517_s27 + $0x28] sm:$0x1f]  }
  0x31   : > { %674 = vmatprep.mubr.bf16.mxu1 %v599_v51  ;;  %v2693_v51 = vld [vmem:[%s2517_s27 + $0x30] sm:$0x1f]   ;;  %v1100_v54 = vshrl.u32 %v2690_v50, 16 }
  0x32   : > { %1864 = vmatpush3.bf16.msra.mxu0 %v2367_v6  ;;  %v859_v39 = vor.u32 %v858_v37, %v854_v36  ;;  %v1114_v56 = vshrl.u32 %v2693_v51, 16 }
  0x33   : > { %1886 = vmatpush3.bf16.msra.mxu1 %v2373_v7  ;;  %1865 = vmatprep.subr.bf16.mxu0 %v2379_v8 }
  0x34   : > { %1887 = vmatprep.subr.bf16.mxu1 %v2385_v9 }
  0x36   : > { %1866 = vmatpush3.bf16.msra.mxu0 %v2391_v10 }
  0x37   : > { %1888 = vmatpush3.bf16.msra.mxu1 %v2397_v11  ;;  %1867 = vmatprep.subr.bf16.mxu0 %v2403_v12 }
  0x38   : > { %1889 = vmatprep.subr.bf16.mxu1 %v2409_v13 }
  0x3a   : > { %1868 = vmatpush3.bf16.msra.mxu0 %v2415_v14 }
  0x3b   : > { %1890 = vmatpush3.bf16.msra.mxu1 %v2421_v15  ;;  %1869 = vmatprep.subr.bf16.mxu0 %v2427_v16 }
  0x3c   : > { %1891 = vmatprep.subr.bf16.mxu1 %v2433_v17 }
  0x3e   : > { %1870 = vmatpush3.bf16.msra.mxu0 %v2441_v18 }
  0x3f   : > { %1892 = vmatpush3.bf16.msra.mxu1 %v2447_v19  ;;  %1871 = vmatprep.subr.bf16.mxu0 %v2453_v20 }
  0x40   : > { %1893 = vmatprep.subr.bf16.mxu1 %v2459_v21 }
  0x42   : > { %1872 = vmatpush3.bf16.msra.mxu0 %v2469_v22 }
  0x43   : > { %1894 = vmatpush3.bf16.msra.mxu1 %v2475_v23  ;;  %1873 = vmatprep.subr.bf16.mxu0 %v2481_v24 }
  0x44   : > { %1895 = vmatprep.subr.bf16.mxu1 %v2487_v25 }
  0x46   : > { %1874 = vmatpush3.bf16.msra.mxu0 %v2494_v26 }
  0x47   : > { %1896 = vmatpush3.bf16.msra.mxu1 %v2500_v27  ;;  %1875 = vmatprep.subr.bf16.mxu0 %v2506_v28 }
  0x48   : > { %1897 = vmatprep.subr.bf16.mxu1 %v2512_v29 }
  0x4a   : > { %1876 = vmatpush3.bf16.msra.mxu0 %v2523_v30 }
  0x4b   : > { %1898 = vmatpush3.bf16.msra.mxu1 %v2529_v31  ;;  %1905 = vmatprep.subr.bf16.mxu0 %v2332_v0 }
  0x4c   : > { %1927 = vmatprep.subr.bf16.mxu1 %v2337_v1 }
  0x4d   : > { %634 = vmatmul.mubr.bf16.vlgmr.msra.gmra.mxu0 %v2257_v38  ;;  %v845_v38 = vor.u32 %v844_v35, %v840_v34 }
  0x4e   : > { %675 = vmatmul.mubr.bf16.vlgmr.msra.gmra.mxu1 %v2258_v40  ;;  %1906 = vmatpush3.bf16.msra.mxu0 %v2343_v2  ;;  %v2646_v40 = vld [vmem:[%s2517_s27 + $0x20] sm:$0x1f]  }
  0x4f   : > { %1928 = vmatpush3.bf16.msra.mxu1 %v2349_v3  ;;  %1907 = vmatprep.subr.bf16.mxu0 %v2355_v4  ;;  %v972_v42 = vshll.u32 %v2646_v40, 16  ;;  %v970_v44 = vshrl.u32 %v2646_v40, 16 }
  0x50   : > { %1929 = vmatprep.subr.bf16.mxu1 %v2361_v5  ;;  %763 = vmatprep.mubr.bf16.mxu0 %v715_v60  ;;  %v2734_v60 = vld [vmem:[%s2517_s27 + $0x30] sm:$0x1f]  }
  0x51   : > { %804 = vmatprep.mubr.bf16.mxu1 %v729_v61  ;;  %v974_v45 = vrot.slane %v972_v42, 1  ;;  %v2737_v61 = vld [vmem:[%s2517_s27 + $0x38] sm:$0x1f]   ;;  %v1230_v32 = vshrl.u32 %v2734_v60, 16 }
  0x52   : > { %1908 = vmatpush3.bf16.msra.mxu0 %v2367_v6  ;;  %v1244_v34 = vshrl.u32 %v2737_v61, 16 }
  0x53   : > { %1930 = vmatpush3.bf16.msra.mxu1 %v2373_v7  ;;  %1909 = vmatprep.subr.bf16.mxu0 %v2379_v8  ;;  %v975_v48 = vor.u32 %v974_v45, %v970_v44 }
  0x54   : > { %1931 = vmatprep.subr.bf16.mxu1 %v2385_v9 }
  0x56   : > { %1910 = vmatpush3.bf16.msra.mxu0 %v2391_v10 }
  0x57   : > { %1932 = vmatpush3.bf16.msra.mxu1 %v2397_v11  ;;  %1911 = vmatprep.subr.bf16.mxu0 %v2403_v12 }
  0x58   : > { %1933 = vmatprep.subr.bf16.mxu1 %v2409_v13 }
  0x5a   : > { %1912 = vmatpush3.bf16.msra.mxu0 %v2415_v14 }
  0x5b   : > { %1934 = vmatpush3.bf16.msra.mxu1 %v2421_v15  ;;  %1913 = vmatprep.subr.bf16.mxu0 %v2427_v16 }
  0x5c   : > { %1935 = vmatprep.subr.bf16.mxu1 %v2433_v17 }
  0x5e   : > { %1914 = vmatpush3.bf16.msra.mxu0 %v2441_v18 }
  0x5f   : > { %1936 = vmatpush3.bf16.msra.mxu1 %v2447_v19  ;;  %1915 = vmatprep.subr.bf16.mxu0 %v2453_v20 }
  0x60   : > { %1937 = vmatprep.subr.bf16.mxu1 %v2459_v21 }
  0x62   : > { %1916 = vmatpush3.bf16.msra.mxu0 %v2469_v22 }
  0x63   : > { %1938 = vmatpush3.bf16.msra.mxu1 %v2475_v23  ;;  %1917 = vmatprep.subr.bf16.mxu0 %v2481_v24 }
  0x64   : > { %1939 = vmatprep.subr.bf16.mxu1 %v2487_v25 }
  0x66   : > { %1918 = vmatpush3.bf16.msra.mxu0 %v2494_v26 }
  0x67   : > { %1940 = vmatpush3.bf16.msra.mxu1 %v2500_v27  ;;  %1919 = vmatprep.subr.bf16.mxu0 %v2506_v28 }
  0x68   : > { %1941 = vmatprep.subr.bf16.mxu1 %v2512_v29 }
  0x6a   : > { %1920 = vmatpush3.bf16.msra.mxu0 %v2523_v30 }
  0x6b   : > { %1942 = vmatpush3.bf16.msra.mxu1 %v2529_v31  ;;  %1949 = vmatprep.subr.bf16.mxu0 %v2332_v0 }
  0x6c   : > { %1971 = vmatprep.subr.bf16.mxu1 %v2337_v1 }
  0x6d   : > { %764 = vmatmul.mubr.bf16.vlgmr.msra.gmra.mxu0 %v2560_v52  ;;  %v1102_v52 = vshll.u32 %v2690_v50, 16 }
  0x6e   : > { %805 = vmatmul.mubr.bf16.vlgmr.msra.gmra.mxu1 %v2563_v53  ;;  %1950 = vmatpush3.bf16.msra.mxu0 %v2343_v2  ;;  %v1116_v53 = vshll.u32 %v2693_v51, 16 }
  0x6f   : > { %1972 = vmatpush3.bf16.msra.mxu1 %v2349_v3  ;;  %1951 = vmatprep.subr.bf16.mxu0 %v2355_v4  ;;  %v1104_v55 = vrot.slane %v1102_v52, 1 }
  0x70   : > { %1973 = vmatprep.subr.bf16.mxu1 %v2361_v5  ;;  %893 = vmatprep.mubr.bf16.mxu0 %v845_v38  ;;  %v1118_v57 = vrot.slane %v1116_v53, 1  ;;  %v2778_v38 = vld [vmem:[%s2517_s27 + $0x38] sm:$0x1f]  }
  0x71   : > { %934 = vmatprep.mubr.bf16.mxu1 %v859_v39  ;;  %v1105_v58 = vor.u32 %v1104_v55, %v1100_v54  ;;  %v2781_v39 = vld [vmem:[%s2517_s27 + $0x40] sm:$0x1f]   ;;  %v1360_v42 = vshrl.u32 %v2778_v38, 16 }
  0x72   : > { %1952 = vmatpush3.bf16.msra.mxu0 %v2367_v6  ;;  %v1119_v59 = vor.u32 %v1118_v57, %v1114_v56  ;;  %v1374_v44 = vshrl.u32 %v2781_v39, 16 }
  0x73   : > { %1974 = vmatpush3.bf16.msra.mxu1 %v2373_v7  ;;  %1953 = vmatprep.subr.bf16.mxu0 %v2379_v8 }
  0x74   : > { %1975 = vmatprep.subr.bf16.mxu1 %v2385_v9 }
  0x76   : > { %1954 = vmatpush3.bf16.msra.mxu0 %v2391_v10 }
  0x77   : > { %1976 = vmatpush3.bf16.msra.mxu1 %v2397_v11  ;;  %1955 = vmatprep.subr.bf16.mxu0 %v2403_v12 }
  0x78   : > { %1977 = vmatprep.subr.bf16.mxu1 %v2409_v13 }
  0x7a   : > { %1956 = vmatpush3.bf16.msra.mxu0 %v2415_v14 }
  0x7b   : > { %1978 = vmatpush3.bf16.msra.mxu1 %v2421_v15  ;;  %1957 = vmatprep.subr.bf16.mxu0 %v2427_v16 }
  0x7c   : > { %1979 = vmatprep.subr.bf16.mxu1 %v2433_v17 }
  0x7e   : > { %1958 = vmatpush3.bf16.msra.mxu0 %v2441_v18 }
  0x7f   : > { %1980 = vmatpush3.bf16.msra.mxu1 %v2447_v19  ;;  %1959 = vmatprep.subr.bf16.mxu0 %v2453_v20 }
  0x80   : > { %1981 = vmatprep.subr.bf16.mxu1 %v2459_v21 }
  0x82   : > { %1960 = vmatpush3.bf16.msra.mxu0 %v2469_v22 }
  0x83   : > { %1982 = vmatpush3.bf16.msra.mxu1 %v2475_v23  ;;  %1961 = vmatprep.subr.bf16.mxu0 %v2481_v24 }
  0x84   : > { %1983 = vmatprep.subr.bf16.mxu1 %v2487_v25 }
  0x86   : > { %1962 = vmatpush3.bf16.msra.mxu0 %v2494_v26 }
  0x87   : > { %1984 = vmatpush3.bf16.msra.mxu1 %v2500_v27  ;;  %1963 = vmatprep.subr.bf16.mxu0 %v2506_v28 }
  0x88   : > { %1985 = vmatprep.subr.bf16.mxu1 %v2512_v29 }
  0x8a   : > { %1964 = vmatpush3.bf16.msra.mxu0 %v2523_v30 }
  0x8b   : > { %1986 = vmatpush3.bf16.msra.mxu1 %v2529_v31  ;;  %1993 = vmatprep.subr.bf16.mxu0 %v2332_v0 }
  0x8c   : > { %2015 = vmatprep.subr.bf16.mxu1 %v2337_v1 }
  0x8d   : > { %894 = vmatmul.mubr.bf16.vlgmr.msra.gmra.mxu0 %v2602_v62  ;;  %v1232_v62 = vshll.u32 %v2734_v60, 16 }
  0x8e   : > { %935 = vmatmul.mubr.bf16.vlgmr.msra.gmra.mxu1 %v2605_v63  ;;  %1994 = vmatpush3.bf16.msra.mxu0 %v2343_v2  ;;  %v1246_v63 = vshll.u32 %v2737_v61, 16 }
  0x8f   : > { %2016 = vmatpush3.bf16.msra.mxu1 %v2349_v3  ;;  %1995 = vmatprep.subr.bf16.mxu0 %v2355_v4  ;;  %v1234_v33 = vrot.slane %v1232_v62, 1 }
  0x90   : > { %2017 = vmatprep.subr.bf16.mxu1 %v2361_v5  ;;  %1023 = vmatprep.mubr.bf16.mxu0 %v975_v48  ;;  %v1248_v35 = vrot.slane %v1246_v63, 1 }
  0x91   : > { %1064 = vmatprep.mubr.bf16.mxu1 %v989_v49  ;;  %v1235_v36 = vor.u32 %v1234_v33, %v1230_v32 }
  0x92   : > { %1996 = vmatpush3.bf16.msra.mxu0 %v2367_v6  ;;  %v1249_v37 = vor.u32 %v1248_v35, %v1244_v34  ;;  %v2275_v34 = vld [vmem:[%s3008_s1 + $0x38] sm:$0xff]  }
  0x93   : > { %2018 = vmatpush3.bf16.msra.mxu1 %v2373_v7  ;;  %1997 = vmatprep.subr.bf16.mxu0 %v2379_v8  ;;  %v2276_v35 = vld [vmem:[%s3008_s1 + $0xb8] sm:$0xff]  }
  0x94   : > { %2019 = vmatprep.subr.bf16.mxu1 %v2385_v9 }
  0x96   : > { %1998 = vmatpush3.bf16.msra.mxu0 %v2391_v10 }
  0x97   : > { %2020 = vmatpush3.bf16.msra.mxu1 %v2397_v11  ;;  %1999 = vmatprep.subr.bf16.mxu0 %v2403_v12 }
  0x98   : > { %2021 = vmatprep.subr.bf16.mxu1 %v2409_v13 }
  0x9a   : > { %2000 = vmatpush3.bf16.msra.mxu0 %v2415_v14 }
  0x9b   : > { %2022 = vmatpush3.bf16.msra.mxu1 %v2421_v15  ;;  %2001 = vmatprep.subr.bf16.mxu0 %v2427_v16 }
  0x9c   : > { %2023 = vmatprep.subr.bf16.mxu1 %v2433_v17 }
  0x9e   : > { %2002 = vmatpush3.bf16.msra.mxu0 %v2441_v18 }
  0x9f   : > { %2024 = vmatpush3.bf16.msra.mxu1 %v2447_v19  ;;  %2003 = vmatprep.subr.bf16.mxu0 %v2453_v20 }
  0xa0   : > { %2025 = vmatprep.subr.bf16.mxu1 %v2459_v21 }
  0xa2   : > { %2004 = vmatpush3.bf16.msra.mxu0 %v2469_v22 }
  0xa3   : > { %2026 = vmatpush3.bf16.msra.mxu1 %v2475_v23  ;;  %2005 = vmatprep.subr.bf16.mxu0 %v2481_v24 }
  0xa4   : > { %2027 = vmatprep.subr.bf16.mxu1 %v2487_v25 }
  0xa6   : > { %2006 = vmatpush3.bf16.msra.mxu0 %v2494_v26 }
  0xa7   : > { %2028 = vmatpush3.bf16.msra.mxu1 %v2500_v27  ;;  %2007 = vmatprep.subr.bf16.mxu0 %v2506_v28 }
  0xa8   : > { %2029 = vmatprep.subr.bf16.mxu1 %v2512_v29 }
  0xaa   : > { %2008 = vmatpush3.bf16.msra.mxu0 %v2523_v30 }
  0xab   : > { %2030 = vmatpush3.bf16.msra.mxu1 %v2529_v31  ;;  %2037 = vmatprep.subr.bf16.mxu0 %v2332_v0 }
  0xac   : > { %2059 = vmatprep.subr.bf16.mxu1 %v2337_v1 }
  0xad   : > { %1024 = vmatmul.mubr.bf16.vlgmr.msra.gmra.mxu0 %v2646_v40  ;;  %v1362_v40 = vshll.u32 %v2778_v38, 16 }
  0xae   : > { %1065 = vmatmul.mubr.bf16.vlgmr.msra.gmra.mxu1 %v2649_v41  ;;  %2038 = vmatpush3.bf16.msra.mxu0 %v2343_v2  ;;  %v1376_v41 = vshll.u32 %v2781_v39, 16 }
  0xaf   : > { %2060 = vmatpush3.bf16.msra.mxu1 %v2349_v3  ;;  %2039 = vmatprep.subr.bf16.mxu0 %v2355_v4  ;;  %v1364_v43 = vrot.slane %v1362_v40, 1 }
  0xb0   : > { %2061 = vmatprep.subr.bf16.mxu1 %v2361_v5  ;;  %1153 = vmatprep.mubr.bf16.mxu0 %v1105_v58  ;;  %v1378_v45 = vrot.slane %v1376_v41, 1 }
  0xb1   : > { %1194 = vmatprep.mubr.bf16.mxu1 %v1119_v59  ;;  %v1365_v46 = vor.u32 %v1364_v43, %v1360_v42 }
  0xb2   : > { %2040 = vmatpush3.bf16.msra.mxu0 %v2367_v6  ;;  %v1379_v48 = vor.u32 %v1378_v45, %v1374_v44  ;;  %v2279_v45 = vld [vmem:[%s3008_s1 + $0x30] sm:$0xff]  }
  0xb3   : > { %2062 = vmatpush3.bf16.msra.mxu1 %v2373_v7  ;;  %2041 = vmatprep.subr.bf16.mxu0 %v2379_v8 }
  0xb4   : > { %2063 = vmatprep.subr.bf16.mxu1 %v2385_v9 }
  0xb6   : > { %2042 = vmatpush3.bf16.msra.mxu0 %v2391_v10 }
  0xb7   : > { %2064 = vmatpush3.bf16.msra.mxu1 %v2397_v11  ;;  %2043 = vmatprep.subr.bf16.mxu0 %v2403_v12 }
  0xb8   : > { %2065 = vmatprep.subr.bf16.mxu1 %v2409_v13 }
  0xba   : > { %2044 = vmatpush3.bf16.msra.mxu0 %v2415_v14 }
  0xbb   : > { %2066 = vmatpush3.bf16.msra.mxu1 %v2421_v15  ;;  %2045 = vmatprep.subr.bf16.mxu0 %v2427_v16 }
  0xbc   : > { %2067 = vmatprep.subr.bf16.mxu1 %v2433_v17 }
  0xbe   : > { %2046 = vmatpush3.bf16.msra.mxu0 %v2441_v18 }
  0xbf   : > { %2068 = vmatpush3.bf16.msra.mxu1 %v2447_v19  ;;  %2047 = vmatprep.subr.bf16.mxu0 %v2453_v20 }
  0xc0   : > { %2069 = vmatprep.subr.bf16.mxu1 %v2459_v21 }
  0xc2   : > { %2048 = vmatpush3.bf16.msra.mxu0 %v2469_v22 }
  0xc3   : > { %2070 = vmatpush3.bf16.msra.mxu1 %v2475_v23  ;;  %2049 = vmatprep.subr.bf16.mxu0 %v2481_v24 }
  0xc4   : > { %2071 = vmatprep.subr.bf16.mxu1 %v2487_v25 }
  0xc6   : > { %2050 = vmatpush3.bf16.msra.mxu0 %v2494_v26 }
  0xc7   : > { %2072 = vmatpush3.bf16.msra.mxu1 %v2500_v27  ;;  %2051 = vmatprep.subr.bf16.mxu0 %v2506_v28 }
  0xc8   : > { %2073 = vmatprep.subr.bf16.mxu1 %v2512_v29 }
  0xca   : > { %2052 = vmatpush3.bf16.msra.mxu0 %v2523_v30 }
  0xcb   : > { %2074 = vmatpush3.bf16.msra.mxu1 %v2529_v31  ;;  %2081 = vmatprep.subr.bf16.mxu0 %v2332_v0 }
  0xcc   : > { %2103 = vmatprep.subr.bf16.mxu1 %v2337_v1 }
  0xcd   : > { %1154 = vmatmul.mubr.bf16.vlgmr.msra.gmra.mxu0 %v2690_v50  ;;  %v2806_v50 = vld [vmem:[%s3009_s2] ss:$0 sm:$0xff] }
  0xce   : > { %1195 = vmatmul.mubr.bf16.vlgmr.msra.gmra.mxu1 %v2693_v51  ;;  %2082 = vmatpush3.bf16.msra.mxu0 %v2343_v2 }
  0xcf   : > { %2104 = vmatpush3.bf16.msra.mxu1 %v2349_v3  ;;  %2083 = vmatprep.subr.bf16.mxu0 %v2355_v4 }
  0xd0   : > { %2105 = vmatprep.subr.bf16.mxu1 %v2361_v5  ;;  %1283 = vmatprep.mubr.bf16.mxu0 %v1235_v36 }
  0xd1   : > { %1324 = vmatprep.mubr.bf16.mxu1 %v1249_v37  ;;  %v2277_v37 = vld [vmem:[%s3008_s1 + $0x70] sm:$0xff]  }
  0xd2   : > { %2084 = vmatpush3.bf16.msra.mxu0 %v2367_v6 }
  0xd3   : > { %2106 = vmatpush3.bf16.msra.mxu1 %v2373_v7  ;;  %2085 = vmatprep.subr.bf16.mxu0 %v2379_v8 }
  0xd4   : > { %2107 = vmatprep.subr.bf16.mxu1 %v2385_v9 }
  0xd6   : > { %2086 = vmatpush3.bf16.msra.mxu0 %v2391_v10 }
  0xd7   : > { %2108 = vmatpush3.bf16.msra.mxu1 %v2397_v11  ;;  %2087 = vmatprep.subr.bf16.mxu0 %v2403_v12 }
  0xd8   : > { %2109 = vmatprep.subr.bf16.mxu1 %v2409_v13 }
  0xda   : > { %2088 = vmatpush3.bf16.msra.mxu0 %v2415_v14 }
  0xdb   : > { %2110 = vmatpush3.bf16.msra.mxu1 %v2421_v15  ;;  %2089 = vmatprep.subr.bf16.mxu0 %v2427_v16 }
  0xdc   : > { %2111 = vmatprep.subr.bf16.mxu1 %v2433_v17 }
  0xde   : > { %2090 = vmatpush3.bf16.msra.mxu0 %v2441_v18 }
  0xdf   : > { %2112 = vmatpush3.bf16.msra.mxu1 %v2447_v19  ;;  %2091 = vmatprep.subr.bf16.mxu0 %v2453_v20 }
  0xe0   : > { %2113 = vmatprep.subr.bf16.mxu1 %v2459_v21 }
  0xe2   : > { %2092 = vmatpush3.bf16.msra.mxu0 %v2469_v22 }
  0xe3   : > { %2114 = vmatpush3.bf16.msra.mxu1 %v2475_v23  ;;  %2093 = vmatprep.subr.bf16.mxu0 %v2481_v24 }
  0xe4   : > { %2115 = vmatprep.subr.bf16.mxu1 %v2487_v25 }
  0xe6   : > { %2094 = vmatpush3.bf16.msra.mxu0 %v2494_v26 }
  0xe7   : > { %2116 = vmatpush3.bf16.msra.mxu1 %v2500_v27  ;;  %2095 = vmatprep.subr.bf16.mxu0 %v2506_v28 }
  0xe8   : > { %2117 = vmatprep.subr.bf16.mxu1 %v2512_v29 }
  0xea   : > { %2096 = vmatpush3.bf16.msra.mxu0 %v2523_v30 }
  0xeb   : > { %2118 = vmatpush3.bf16.msra.mxu1 %v2529_v31  ;;  %2125 = vmatprep.subr.bf16.mxu0 %v2332_v0 }
  0xec   : > { %2147 = vmatprep.subr.bf16.mxu1 %v2337_v1 }
  0xed   : > { %v1833_v47 = vpop.f32.mrf.mxu0  ;;  %1284 = vmatmul.mubr.bf16.vlgmr.msra.gmra.mxu0 %v2734_v60  ;;  %v2273_v60 = vld [vmem:[%s3008_s1 + $0x78] sm:$0xff]  }
  0xee   : > { %v1855_v49 = vpop.f32.mrf.mxu1  ;;  %1325 = vmatmul.mubr.bf16.vlgmr.msra.gmra.mxu1 %v2737_v61  ;;  %2126 = vmatpush3.bf16.msra.mxu0 %v2343_v2  ;;  %v2274_v61 = vld [vmem:[%s3008_s1 + $0xf8] sm:$0xff]  }
  0xef   : > { %2148 = vmatpush3.bf16.msra.mxu1 %v2349_v3  ;;  %v1834_v0 = vpop.f32.mrf.mxu0  ;;  %2127 = vmatprep.subr.bf16.mxu0 %v2355_v4 }
  0xf0   : > { %v1835_v1 = vadd.f32 %v1834_v0, %v1833_v47  ;;  %v1856_v51 = vpop.f32.mrf.mxu1  ;;  %2149 = vmatprep.subr.bf16.mxu1 %v2361_v5  ;;  %1413 = vmatprep.mubr.bf16.mxu0 %v1365_v46  ;;  %v2280_v46 = vld [vmem:[%s3008_s1 + $0xb0] sm:$0xff]  }
  0xf1   : > { %v1857_v52 = vadd.f32 %v1856_v51, %v1855_v49  ;;  %v1836_v53 = vpop.f32.mrf.mxu0  ;;  %1454 = vmatprep.mubr.bf16.mxu1 %v1379_v48  ;;  %v2281_v48 = vld [vmem:[%s3008_s1 + $0x68] sm:$0xff]  }
  0xf2   : > { %v503_v2 = vadd.f32 %v1835_v1, %v2806_v50  ;;  %v1858_v54 = vpop.f32.mrf.mxu1  ;;  %2128 = vmatpush3.bf16.msra.mxu0 %v2367_v6  ;;  %v2282_v51 = vld [vmem:[%s3008_s1 + $0xe8] sm:$0xff]  }
  0xf3   : > { %2150 = vmatpush3.bf16.msra.mxu1 %v2373_v7  ;;  %v1837_v3 = vpop.f32.mrf.mxu0  ;;  %2129 = vmatprep.subr.bf16.mxu0 %v2379_v8 }
  0xf4   : > { %v544_v4 = vadd.f32 %v1857_v52, %v503_v2  ;;  %v1838_v55 = vadd.f32 %v1837_v3, %v1836_v53  ;;  %v1859_v56 = vpop.f32.mrf.mxu1  ;;  %2151 = vmatprep.subr.bf16.mxu1 %v2385_v9  ;;  %v2284_v3 = vld [vmem:[%s3008_s1 + $0xa8] sm:$0xff]  }
  0xf5   : > { %v1860_v58 = vadd.f32 %v1859_v56, %v1858_v54  ;;  %v2283_v54 = vld [vmem:[%s3008_s1 + $0x28] sm:$0xff]  }
  0xf6   : > { %v550_v5 = vmax.f32 %v544_v4, 0.0  ;;  %v506_v57 = vadd.f32 %v1838_v55, %v2806_v50  ;;  %2130 = vmatpush3.bf16.msra.mxu0 %v2391_v10  ;;  %v565_v10 = vld [vmem:[%s2821_s13 + $0x4] sm:$0x1] }
  0xf7   : > { %2152 = vmatpush3.bf16.msra.mxu1 %v2397_v11  ;;  %2131 = vmatprep.subr.bf16.mxu0 %v2403_v12  ;;  %v2285_v4 = vld [vmem:[%s3008_s1 + $0x60] sm:$0xff]  }
  0xf8   : > { %v1799_v6 = vpack.c.bf16 %v550_v5, %v550_v5  ;;  %v547_v7 = vadd.f32 %v1860_v58, %v506_v57  ;;  %2153 = vmatprep.subr.bf16.mxu1 %v2409_v13  ;;  %v2845_v13 = vld [vmem:[%s2517_s27 + $0x40] sm:$0x1f]  }
  0xf9   : > { %v2286_v5 = vld [vmem:[%s3008_s1 + $0xe0] sm:$0xff]  }
  0xfa   : > { %561 = vst.msk [vmem:[%s2821_s13] sm:$0xf] %vm560_vm0, %v1799_v6  ;;  %v551_v8 = vmax.f32 %v547_v7, 0.0  ;;  %2132 = vmatpush3.bf16.msra.mxu0 %v2415_v14  ;;  %v2848_v14 = vld [vmem:[%s2517_s27 + $0x48] sm:$0x1f]   ;;  %v2287_v58 = vld [vmem:[%s3008_s1 + $0x20] sm:$0xff]  }
  0xfb   : > { %2154 = vmatpush3.bf16.msra.mxu1 %v2421_v15  ;;  %2133 = vmatprep.subr.bf16.mxu0 %v2427_v16  ;;  %v1492_v15 = vshll.u32 %v2845_v13, 16  ;;  %v1506_v16 = vshll.u32 %v2848_v14, 16  ;;  %v1718_v6 = vld [vmem:[%s2821_s13 + $0xc] sm:$0x1]  ;;  %v2288_v7 = vld [vmem:[%s3008_s1 + $0xa0] sm:$0xff]  }
  0xfc   : > { %v1800_v11 = vpack.c.bf16 %v551_v8, %v551_v8  ;;  %2155 = vmatprep.subr.bf16.mxu1 %v2433_v17  ;;  %v1490_v17 = vshrl.u32 %v2845_v13, 16  ;;  %v2289_v8 = vld [vmem:[%s3008_s1 + $0x58] sm:$0xff]  }
  0xfd   : > { %v1508_v59 = vrot.slane %v1506_v16, 1  ;;  %v2292_v16 = vld [vmem:[%s3008_s1 + $0x98] sm:$0xff]  }
  0xfe   : > { %v566_v12 = vsel %vm2829_vm3, %v1800_v11, %v565_v10  ;;  %2134 = vmatpush3.bf16.msra.mxu0 %v2441_v18  ;;  %v1494_v18 = vrot.slane %v1492_v15, 1  ;;  %v2290_v11 = vld [vmem:[%s3008_s1 + $0xd8] sm:$0xff]  }
  0xff   : > { %567 = vst [vmem:[%s2821_s13 + $0x4] sm:$0x1] %v566_v12  ;;  %2156 = vmatpush3.bf16.msra.mxu1 %v2447_v19  ;;  %2135 = vmatprep.subr.bf16.mxu0 %v2453_v20  ;;  %v1504_v19 = vshrl.u32 %v2848_v14, 16  ;;  %v2291_v15 = vld [vmem:[%s3008_s1 + $0x18] sm:$0xff]  }
 0x100   : > { %2157 = vmatprep.subr.bf16.mxu1 %v2459_v21  ;;  %v1495_v62 = vor.u32 %v1494_v18, %v1490_v17 }
 0x101   : > { %v1509_v32 = vor.u32 %v1508_v59, %v1504_v19 }
 0x102   : > { %2136 = vmatpush3.bf16.msra.mxu0 %v2469_v22 }
 0x103   : > { %2158 = vmatpush3.bf16.msra.mxu1 %v2475_v23  ;;  %2137 = vmatprep.subr.bf16.mxu0 %v2481_v24 }
 0x104   : > { %2159 = vmatprep.subr.bf16.mxu1 %v2487_v25 }
 0x106   : > { %2138 = vmatpush3.bf16.msra.mxu0 %v2494_v26 }
 0x107   : > { %2160 = vmatpush3.bf16.msra.mxu1 %v2500_v27  ;;  %2139 = vmatprep.subr.bf16.mxu0 %v2506_v28 }
 0x108   : > { %2161 = vmatprep.subr.bf16.mxu1 %v2512_v29 }
 0x10a   : > { %2140 = vmatpush3.bf16.msra.mxu0 %v2523_v30 }
 0x10b   : > { %2162 = vmatpush3.bf16.msra.mxu1 %v2529_v31  ;;  %2169 = vmatprep.subr.bf16.mxu0 %v2273_v60 }
 0x10c   : > { %2191 = vmatprep.subr.bf16.mxu1 %v2274_v61  ;;  %v1729_v61 = vld [vmem:[%s2821_s13 + $0x14] sm:$0x1] }
 0x10d   : > { %v1877_v63 = vpop.f32.mrf.mxu0  ;;  %1414 = vmatmul.mubr.bf16.vlgmr.msra.gmra.mxu0 %v2778_v38 }
 0x10e   : > { %v1899_v33 = vpop.f32.mrf.mxu1  ;;  %1455 = vmatmul.mubr.bf16.vlgmr.msra.gmra.mxu1 %v2781_v39  ;;  %2170 = vmatpush3.bf16.msra.mxu0 %v2275_v34  ;;  %v2278_v39 = vld [vmem:[%s3008_s1 + $0xf0] sm:$0xff]  }
 0x10f   : > { %2192 = vmatpush3.bf16.msra.mxu1 %v2276_v35  ;;  %v1878_v36 = vpop.f32.mrf.mxu0  ;;  %2171 = vmatprep.subr.bf16.mxu0 %v2277_v37 }
 0x110   : > { %v1879_v38 = vadd.f32 %v1878_v36, %v1877_v63  ;;  %v1900_v40 = vpop.f32.mrf.mxu1  ;;  %2193 = vmatprep.subr.bf16.mxu1 %v2278_v39  ;;  %1543 = vmatprep.mubr.bf16.mxu0 %v1495_v62 }
 0x111   : > { %v1901_v41 = vadd.f32 %v1900_v40, %v1899_v33  ;;  %v1880_v42 = vpop.f32.mrf.mxu0  ;;  %1584 = vmatprep.mubr.bf16.mxu1 %v1509_v32 }
 0x112   : > { %v636_v43 = vadd.f32 %v1879_v38, %v2806_v50  ;;  %v1902_v44 = vpop.f32.mrf.mxu1  ;;  %2172 = vmatpush3.bf16.msra.mxu0 %v2279_v45 }
 0x113   : > { %2194 = vmatpush3.bf16.msra.mxu1 %v2280_v46  ;;  %v1881_v47 = vpop.f32.mrf.mxu0  ;;  %2173 = vmatprep.subr.bf16.mxu0 %v2281_v48 }
 0x114   : > { %v677_v49 = vadd.f32 %v1901_v41, %v636_v43  ;;  %v1882_v0 = vadd.f32 %v1881_v47, %v1880_v42  ;;  %v1903_v1 = vpop.f32.mrf.mxu1  ;;  %2195 = vmatprep.subr.bf16.mxu1 %v2282_v51 }
 0x115   : > { %v1904_v2 = vadd.f32 %v1903_v1, %v1902_v44  ;;  %v1740_v1 = vld [vmem:[%s2821_s13 + $0x1c] sm:$0x1] }
 0x116   : > { %v683_v52 = vmax.f32 %v677_v49, 0.0  ;;  %v639_v53 = vadd.f32 %v1882_v0, %v2806_v50  ;;  %2174 = vmatpush3.bf16.msra.mxu0 %v2283_v54 }
 0x117   : > { %2196 = vmatpush3.bf16.msra.mxu1 %v2284_v3  ;;  %2175 = vmatprep.subr.bf16.mxu0 %v2285_v4 }
 0x118   : > { %v1801_v55 = vpack.c.bf16 %v683_v52, %v683_v52  ;;  %v680_v56 = vadd.f32 %v1904_v2, %v639_v53  ;;  %2197 = vmatprep.subr.bf16.mxu1 %v2286_v5 }
 0x11a   : > { %1717 = vst.msk [vmem:[%s2821_s13 + $0x8] sm:$0xf] %vm560_vm0, %v1801_v55  ;;  %v684_v57 = vmax.f32 %v680_v56, 0.0  ;;  %2176 = vmatpush3.bf16.msra.mxu0 %v2287_v58 }
 0x11b   : > { %2198 = vmatpush3.bf16.msra.mxu1 %v2288_v7  ;;  %2177 = vmatprep.subr.bf16.mxu0 %v2289_v8 }
 0x11c   : > { %v1802_v10 = vpack.c.bf16 %v684_v57, %v684_v57  ;;  %2199 = vmatprep.subr.bf16.mxu1 %v2290_v11 }
 0x11e   : > { %v696_v12 = vsel %vm2829_vm3, %v1802_v10, %v1718_v6  ;;  %2178 = vmatpush3.bf16.msra.mxu0 %v2291_v15 }
 0x11f   : > { %1719 = vst [vmem:[%s2821_s13 + $0xc] sm:$0x1] %v696_v12  ;;  %2200 = vmatpush3.bf16.msra.mxu1 %v2292_v16  ;;  %2179 = vmatprep.subr.bf16.mxu0 %v2453_v20 }
 0x120   : > { %2201 = vmatprep.subr.bf16.mxu1 %v2459_v21 }
 0x122   : > { %2180 = vmatpush3.bf16.msra.mxu0 %v2469_v22 }
 0x123   : > { %2202 = vmatpush3.bf16.msra.mxu1 %v2475_v23  ;;  %2181 = vmatprep.subr.bf16.mxu0 %v2481_v24 }
 0x124   : > { %2203 = vmatprep.subr.bf16.mxu1 %v2487_v25 }
 0x126   : > { %2182 = vmatpush3.bf16.msra.mxu0 %v2494_v26 }
 0x127   : > { %2204 = vmatpush3.bf16.msra.mxu1 %v2500_v27  ;;  %2183 = vmatprep.subr.bf16.mxu0 %v2506_v28 }
 0x128   : > { %2205 = vmatprep.subr.bf16.mxu1 %v2512_v29 }
 0x12a   : > { %2184 = vmatpush3.bf16.msra.mxu0 %v2523_v30 }
 0x12b   : > { %2206 = vmatpush3.bf16.msra.mxu1 %v2529_v31 }
 0x12d   : > { %v1921_v20 = vpop.f32.mrf.mxu0  ;;  %1544 = vmatmul.mubr.bf16.vlgmr.msra.gmra.mxu0 %v2845_v13 }
 0x12e   : > { %v1943_v21 = vpop.f32.mrf.mxu1  ;;  %1585 = vmatmul.mubr.bf16.vlgmr.msra.gmra.mxu1 %v2848_v14 }
 0x12f   : > { %v1922_v22 = vpop.f32.mrf.mxu0 }
 0x130   : > { %v1923_v23 = vadd.f32 %v1922_v22, %v1921_v20  ;;  %v1944_v24 = vpop.f32.mrf.mxu1 }
 0x131   : > { %v1945_v25 = vadd.f32 %v1944_v24, %v1943_v21  ;;  %v1924_v26 = vpop.f32.mrf.mxu0  ;;  %v1751_v21 = vld [vmem:[%s2821_s13 + $0x24] sm:$0x1] }
 0x132   : > { %v766_v27 = vadd.f32 %v1923_v23, %v2806_v50  ;;  %v1946_v28 = vpop.f32.mrf.mxu1 }
 0x133   : > { %v1925_v29 = vpop.f32.mrf.mxu0 }
 0x134   : > { %v807_v30 = vadd.f32 %v1945_v25, %v766_v27  ;;  %v1926_v31 = vadd.f32 %v1925_v29, %v1924_v26  ;;  %v1947_v17 = vpop.f32.mrf.mxu1 }
 0x135   : > { %v1948_v19 = vadd.f32 %v1947_v17, %v1946_v28 }
 0x136   : > { %v813_v18 = vmax.f32 %v807_v30, 0.0  ;;  %v769_v13 = vadd.f32 %v1926_v31, %v2806_v50 }
 0x138   : > { %v1803_v14 = vpack.c.bf16 %v813_v18, %v813_v18  ;;  %v810_v59 = vadd.f32 %v1948_v19, %v769_v13 }
 0x13a   : > { %1728 = vst.msk [vmem:[%s2821_s13 + $0x10] sm:$0xf] %vm560_vm0, %v1803_v14  ;;  %v814_v60 = vmax.f32 %v810_v59, 0.0 }
 0x13c   : > { %v1804_v62 = vpack.c.bf16 %v814_v60, %v814_v60 }
 0x13e   : > { %v826_v63 = vsel %vm2829_vm3, %v1804_v62, %v1729_v61 }
 0x13f   : > { %1730 = vst [vmem:[%s2821_s13 + $0x14] sm:$0x1] %v826_v63 }
 0x14d   : > { %v1965_v32 = vpop.f32.mrf.mxu0 }
 0x14e   : > { %v1987_v33 = vpop.f32.mrf.mxu1 }
 0x14f   : > { %v1966_v34 = vpop.f32.mrf.mxu0 }
 0x150   : > { %v1967_v35 = vadd.f32 %v1966_v34, %v1965_v32  ;;  %v1988_v36 = vpop.f32.mrf.mxu1 }
 0x151   : > { %v1989_v37 = vadd.f32 %v1988_v36, %v1987_v33  ;;  %v1968_v38 = vpop.f32.mrf.mxu0  ;;  %v1762_v33 = vld [vmem:[%s2821_s13 + $0x2c] sm:$0x1] }
 0x152   : > { %v896_v40 = vadd.f32 %v1967_v35, %v2806_v50  ;;  %v1990_v39 = vpop.f32.mrf.mxu1 }
 0x153   : > { %v1969_v41 = vpop.f32.mrf.mxu0 }
 0x154   : > { %v937_v42 = vadd.f32 %v1989_v37, %v896_v40  ;;  %v1970_v43 = vadd.f32 %v1969_v41, %v1968_v38  ;;  %v1991_v44 = vpop.f32.mrf.mxu1 }
 0x155   : > { %v1992_v47 = vadd.f32 %v1991_v44, %v1990_v39 }
 0x156   : > { %v943_v45 = vmax.f32 %v937_v42, 0.0  ;;  %v899_v46 = vadd.f32 %v1970_v43, %v2806_v50 }
 0x158   : > { %v1805_v48 = vpack.c.bf16 %v943_v45, %v943_v45  ;;  %v940_v49 = vadd.f32 %v1992_v47, %v899_v46 }
 0x15a   : > { %1739 = vst.msk [vmem:[%s2821_s13 + $0x18] sm:$0xf] %vm560_vm0, %v1805_v48  ;;  %v944_v0 = vmax.f32 %v940_v49, 0.0 }
 0x15c   : > { %v1806_v51 = vpack.c.bf16 %v944_v0, %v944_v0 }
 0x15e   : > { %v956_v52 = vsel %vm2829_vm3, %v1806_v51, %v1740_v1 }
 0x15f   : > { %1741 = vst [vmem:[%s2821_s13 + $0x1c] sm:$0x1] %v956_v52 }
 0x16d   : > { %v2009_v53 = vpop.f32.mrf.mxu0 }
 0x16e   : > { %v2031_v2 = vpop.f32.mrf.mxu1 }
 0x16f   : > { %v2010_v54 = vpop.f32.mrf.mxu0 }
 0x170   : > { %v2011_v3 = vadd.f32 %v2010_v54, %v2009_v53  ;;  %v2032_v4 = vpop.f32.mrf.mxu1 }
 0x171   : > { %v2033_v55 = vadd.f32 %v2032_v4, %v2031_v2  ;;  %v2012_v56 = vpop.f32.mrf.mxu0  ;;  %v1773_v2 = vld [vmem:[%s2821_s13 + $0x34] sm:$0x1] }
 0x172   : > { %v1026_v5 = vadd.f32 %v2011_v3, %v2806_v50  ;;  %v2034_v57 = vpop.f32.mrf.mxu1 }
 0x173   : > { %v2013_v58 = vpop.f32.mrf.mxu0 }
 0x174   : > { %v1067_v6 = vadd.f32 %v2033_v55, %v1026_v5  ;;  %v2014_v7 = vadd.f32 %v2013_v58, %v2012_v56  ;;  %v2035_v8 = vpop.f32.mrf.mxu1 }
 0x175   : > { %v2036_v12 = vadd.f32 %v2035_v8, %v2034_v57 }
 0x176   : > { %v1073_v10 = vmax.f32 %v1067_v6, 0.0  ;;  %v1029_v11 = vadd.f32 %v2014_v7, %v2806_v50 }
 0x178   : > { %v1807_v15 = vpack.c.bf16 %v1073_v10, %v1073_v10  ;;  %v1070_v16 = vadd.f32 %v2036_v12, %v1029_v11 }
 0x17a   : > { %1750 = vst.msk [vmem:[%s2821_s13 + $0x20] sm:$0xf] %vm560_vm0, %v1807_v15  ;;  %v1074_v20 = vmax.f32 %v1070_v16, 0.0 }
 0x17c   : > { %v1808_v22 = vpack.c.bf16 %v1074_v20, %v1074_v20 }
 0x17e   : > { %v1086_v23 = vsel %vm2829_vm3, %v1808_v22, %v1751_v21 }
 0x17f   : > { %1752 = vst [vmem:[%s2821_s13 + $0x24] sm:$0x1] %v1086_v23 }
 0x18d   : > { %v2053_v24 = vpop.f32.mrf.mxu0 }
 0x18e   : > { %v2075_v25 = vpop.f32.mrf.mxu1 }
 0x18f   : > { %v2054_v26 = vpop.f32.mrf.mxu0 }
 0x190   : > { %v2055_v27 = vadd.f32 %v2054_v26, %v2053_v24  ;;  %v2076_v28 = vpop.f32.mrf.mxu1 }
 0x191   : > { %v2077_v29 = vadd.f32 %v2076_v28, %v2075_v25  ;;  %v2056_v30 = vpop.f32.mrf.mxu0  ;;  %v1784_v25 = vld [vmem:[%s2821_s13 + $0x3c] sm:$0x1] }
 0x192   : > { %v1156_v31 = vadd.f32 %v2055_v27, %v2806_v50  ;;  %v2078_v17 = vpop.f32.mrf.mxu1 }
 0x193   : > { %v2057_v18 = vpop.f32.mrf.mxu0 }
 0x194   : > { %v1197_v13 = vadd.f32 %v2077_v29, %v1156_v31  ;;  %v2058_v19 = vadd.f32 %v2057_v18, %v2056_v30  ;;  %v2079_v14 = vpop.f32.mrf.mxu1 }
 0x195   : > { %v2080_v61 = vadd.f32 %v2079_v14, %v2078_v17 }
 0x196   : > { %v1203_v59 = vmax.f32 %v1197_v13, 0.0  ;;  %v1159_v60 = vadd.f32 %v2058_v19, %v2806_v50 }
 0x198   : > { %v1809_v62 = vpack.c.bf16 %v1203_v59, %v1203_v59  ;;  %v1200_v63 = vadd.f32 %v2080_v61, %v1159_v60 }
 0x19a   : > { %1761 = vst.msk [vmem:[%s2821_s13 + $0x28] sm:$0xf] %vm560_vm0, %v1809_v62  ;;  %v1204_v32 = vmax.f32 %v1200_v63, 0.0 }
 0x19c   : > { %v1810_v34 = vpack.c.bf16 %v1204_v32, %v1204_v32 }
 0x19e   : > { %v1216_v35 = vsel %vm2829_vm3, %v1810_v34, %v1762_v33 }
 0x19f   : > { %1763 = vst [vmem:[%s2821_s13 + $0x2c] sm:$0x1] %v1216_v35 }
 0x1ad   : > { %v2097_v36 = vpop.f32.mrf.mxu0 }
 0x1ae   : > { %v2119_v37 = vpop.f32.mrf.mxu1 }
 0x1af   : > { %v2098_v38 = vpop.f32.mrf.mxu0 }
 0x1b0   : > { %v2099_v40 = vadd.f32 %v2098_v38, %v2097_v36  ;;  %v2120_v39 = vpop.f32.mrf.mxu1 }
 0x1b1   : > { %v2121_v41 = vadd.f32 %v2120_v39, %v2119_v37  ;;  %v2100_v42 = vpop.f32.mrf.mxu0  ;;  %v1795_v37 = vld [vmem:[%s2821_s13 + $0x44] sm:$0x1] }
 0x1b2   : > { %v1286_v43 = vadd.f32 %v2099_v40, %v2806_v50  ;;  %v2122_v44 = vpop.f32.mrf.mxu1 }
 0x1b3   : > { %v2101_v45 = vpop.f32.mrf.mxu0 }
 0x1b4   : > { %v1327_v46 = vadd.f32 %v2121_v41, %v1286_v43  ;;  %v2102_v47 = vadd.f32 %v2101_v45, %v2100_v42  ;;  %v2123_v48 = vpop.f32.mrf.mxu1 }
 0x1b5   : > { %v2124_v1 = vadd.f32 %v2123_v48, %v2122_v44 }
 0x1b6   : > { %v1333_v49 = vmax.f32 %v1327_v46, 0.0  ;;  %v1289_v0 = vadd.f32 %v2102_v47, %v2806_v50 }
 0x1b8   : > { %v1811_v51 = vpack.c.bf16 %v1333_v49, %v1333_v49  ;;  %v1330_v52 = vadd.f32 %v2124_v1, %v1289_v0 }
 0x1ba   : > { %1772 = vst.msk [vmem:[%s2821_s13 + $0x30] sm:$0xf] %vm560_vm0, %v1811_v51  ;;  %v1334_v53 = vmax.f32 %v1330_v52, 0.0 }
 0x1bc   : > { %v1812_v54 = vpack.c.bf16 %v1334_v53, %v1334_v53 }
 0x1be   : > { %v1346_v3 = vsel %vm2829_vm3, %v1812_v54, %v1773_v2 }
 0x1bf   : > { %1774 = vst [vmem:[%s2821_s13 + $0x34] sm:$0x1] %v1346_v3 }
 0x1cd   : > { %v2141_v4 = vpop.f32.mrf.mxu0 }
 0x1ce   : > { %v2163_v55 = vpop.f32.mrf.mxu1 }
 0x1cf   : > { %v2142_v56 = vpop.f32.mrf.mxu0 }
 0x1d0   : > { %v2143_v5 = vadd.f32 %v2142_v56, %v2141_v4  ;;  %v2164_v57 = vpop.f32.mrf.mxu1 }
 0x1d1   : > { %v2165_v58 = vadd.f32 %v2164_v57, %v2163_v55  ;;  %v2144_v6 = vpop.f32.mrf.mxu0 }
 0x1d2   : > { %v1416_v7 = vadd.f32 %v2143_v5, %v2806_v50  ;;  %v2166_v8 = vpop.f32.mrf.mxu1 }
 0x1d3   : > { %v2145_v10 = vpop.f32.mrf.mxu0 }
 0x1d4   : > { %v1457_v11 = vadd.f32 %v2165_v58, %v1416_v7  ;;  %v2146_v12 = vadd.f32 %v2145_v10, %v2144_v6  ;;  %v2167_v15 = vpop.f32.mrf.mxu1 }
 0x1d5   : > { %v2168_v21 = vadd.f32 %v2167_v15, %v2166_v8 }
 0x1d6   : > { %v1463_v16 = vmax.f32 %v1457_v11, 0.0  ;;  %v1419_v20 = vadd.f32 %v2146_v12, %v2806_v50 }
 0x1d8   : > { %v1813_v22 = vpack.c.bf16 %v1463_v16, %v1463_v16  ;;  %v1460_v23 = vadd.f32 %v2168_v21, %v1419_v20 }
 0x1da   : > { %1783 = vst.msk [vmem:[%s2821_s13 + $0x38] sm:$0xf] %vm560_vm0, %v1813_v22  ;;  %v1464_v24 = vmax.f32 %v1460_v23, 0.0 }
 0x1dc   : > { %v1814_v26 = vpack.c.bf16 %v1464_v24, %v1464_v24 }
 0x1de   : > { %v1476_v27 = vsel %vm2829_vm3, %v1814_v26, %v1784_v25 }
 0x1df   : > { %1785 = vst [vmem:[%s2821_s13 + $0x3c] sm:$0x1] %v1476_v27 }
 0x1ed   : > { %v2185_v28 = vpop.f32.mrf.mxu0 }
 0x1ee   : > { %v2207_v29 = vpop.f32.mrf.mxu1 }
 0x1ef   : > { %v2186_v30 = vpop.f32.mrf.mxu0 }
 0x1f0   : > { %v2187_v31 = vadd.f32 %v2186_v30, %v2185_v28  ;;  %v2208_v17 = vpop.f32.mrf.mxu1 }
 0x1f1   : > { %v2188_v18 = vpop.f32.mrf.mxu0  ;;  %v2209_v19 = vadd.f32 %v2208_v17, %v2207_v29 }
 0x1f2   : > { %v1546_v13 = vadd.f32 %v2187_v31, %v2806_v50  ;;  %v2210_v14 = vpop.f32.mrf.mxu1 }
 0x1f3   : > { %v2189_v59 = vpop.f32.mrf.mxu0 }
 0x1f4   : > { %v1587_v60 = vadd.f32 %v2209_v19, %v1546_v13  ;;  %v2190_v61 = vadd.f32 %v2189_v59, %v2188_v18  ;;  %v2211_v62 = vpop.f32.mrf.mxu1 }
 0x1f5   : > { %v2212_v33 = vadd.f32 %v2211_v62, %v2210_v14 }
 0x1f6   : > { %v1593_v63 = vmax.f32 %v1587_v60, 0.0  ;;  %v1549_v32 = vadd.f32 %v2190_v61, %v2806_v50 }
 0x1f8   : > { %v1815_v34 = vpack.c.bf16 %v1593_v63, %v1593_v63  ;;  %v1590_v35 = vadd.f32 %v2212_v33, %v1549_v32 }
 0x1fa   : > { %1794 = vst.msk [vmem:[%s2821_s13 + $0x40] sm:$0xf] %vm560_vm0, %v1815_v34  ;;  %v1594_v36 = vmax.f32 %v1590_v35, 0.0 }
 0x1fc   : > { %v1816_v38 = vpack.c.bf16 %v1594_v36, %v1594_v36 }
 0x1fe   : > { %v1606_v40 = vsel %vm2829_vm3, %v1816_v38, %v1795_v37 }
 0x1ff   : > { %1796 = vst [vmem:[%s2821_s13 + $0x44] sm:$0x1] %v1606_v40 }
 0x200 PF: > { %s13_s12 = sadd.s32 1, %s2299_s12  }
 0x201   : > { %p10_p4 = scmp.ge.s32.totalorder %s13_s12, 4  }
 0x203   :  { %12 = sbr.rel (!%p10_p4) target bundleno = 1 (0x1), region = 79 }

// kernel: qnetwork_forward.6
= control target key start
LH: loop header
LB: loop body
LE: loop exit
PB: predicated region body
PF: predicated region fallthrough
CT: control target
= control target key end

     0   :  { %s2751_s12 = smov 0   ;;  %s3610_s0 = inlined_call_operand.vmem [shape: bf16[2,9,9,64], index: 0, kind: input, shape index: {}]   ;;  %s3611_s1 = inlined_call_operand.vmem [shape: bf16[576,64], index: 1, kind: input, shape index: {}]   ;;  %s3612_s2 = inlined_call_operand.vmem [shape: f32[1,64], index: 2, kind: input, shape index: {}]   ;;  %s3613_s3 = inlined_call_operand.vmem [shape: bf16[2,7,7,64], index: 3, kind: output, shape index: {}]  }
   0x1 LB: > { %s2003_s13 = sadd.s32 4294967295, %s2726_s12   ;;  %p2007_p0 = scmp.ge.s32.totalorder %s2726_s12, 1  ;;  %s2726_s12 = sphi %s2751_s12, %s13_s12  }
   0x2   : > { %p137_p1 = scmp.lt.s32.totalorder %s2726_s12, 3 }
   0x4   : > { %p138_p2 = pnand %p2007_p0, %p137_p1 }
   0x6   : > { %141 = sbr.rel (%p138_p2) target bundleno = 600 (0x258), region = 32 }
   0xb   : > { %p161_p3 = scmp.lt.s32.totalorder %s2003_s13, 1  ;;  %v2762_v0 = vld [vmem:[%s3611_s1 + $0x78] sm:$0xff]   ;;  %v2775_v2 = vld [vmem:[%s3611_s1 + $0x70] sm:$0xff]   ;;  %s2728_s30 = smov 64   ;;  %v2821_v11 = vld [vmem:[%s3611_s1 + $0x68] sm:$0xff]   ;;  %vm312_vm0 = vcmask 523264  }
   0xc   : > { %v2769_v1 = vld [vmem:[%s3611_s1 + $0x38] sm:$0xff]   ;;  %2170 = vmatprep.subr.bf16.mxu0 %v2762_v0  ;;  %v2788_v4 = vld [vmem:[%s3611_s1 + $0x30] sm:$0xff]   ;;  %v2844_v25 = vld [vmem:[%s3611_s1 + $0x28] sm:$0xff]   ;;  %vm2730_vm1 = vmmov 0   ;;  %vm676_vm2 = vcmask 519168  }
   0xd   : > { %s3636_s13 = smov (!%p161_p3, %s2003_s13), 1  ;;  %2171 = vmatpush3.bf16.msra.mxu0 %v2769_v1  ;;  %v2782_v3 = vld [vmem:[%s3611_s1 + $0xf8] sm:$0xff]   ;;  %v2836_v20 = vld [vmem:[%s3611_s1 + $0xf0] sm:$0xff]   ;;  %v2873_v45 = vld [vmem:[%s3611_s1 + $0x60] sm:$0xff]   ;;  %vm677_vm3 = vsmask.f32 3328 }
   0xe   : > { %s2597_s20 = smul.u32 72, %s3636_s13  ;;  %2172 = vmatprep.subr.bf16.mxu0 %v2775_v2  ;;  %2192 = vmatprep.subr.bf16.mxu1 %v2782_v3  ;;  %v2799_v5 = vld [vmem:[%s3611_s1 + $0xb8] sm:$0xff]   ;;  %v2866_v40 = vld [vmem:[%s3611_s1 + $0xb0] sm:$0xff]   ;;  %v2880_v48 = vld [vmem:[%s3611_s1 + $0xe8] sm:$0xff]  }
   0xf   : > { %2193 = vmatpush3.bf16.msra.mxu1 %v2799_v5  ;;  %v2890_v51 = vld [vmem:[%s3611_s1 + $0x20] sm:$0xff]   ;;  %v2896_v53 = vld [vmem:[%s3611_s1 + $0xa8] sm:$0xff]   ;;  %v2903_v55 = vld [vmem:[%s3611_s1 + $0x58] sm:$0xff]   ;;  %s2598_s25 = smul.u32 28, %s3636_s13 }
  0x10   : > { %s2793_s27 = scalar_lea.vmem %s3610_s0, %s2597_s20  ;;  %2194 = vmatprep.subr.bf16.mxu1 %v2836_v20  ;;  %v2910_v57 = vld [vmem:[%s3611_s1 + $0xe0] sm:$0xff]   ;;  %v2916_v58 = vld [vmem:[%s3611_s1 + $0x18] sm:$0xff]   ;;  %v2931_v62 = vld [vmem:[%s3611_s1 + $0x50] sm:$0xff]  }
  0x11   : > { %v2802_v6 = vld [vmem:[%s2793_s27 + $0x8] ss:$0 sps:$4 sm:$0xff]   ;;  %v2805_v7 = vld [vmem:[%s2793_s27 + $0x10] sm:$0xf]  ;;  %v2810_v9 = vld [vmem:[%s2793_s27] sm:$0xf]  ;;  %2173 = vmatpush3.bf16.msra.mxu0 %v2788_v4  ;;  %s3480_s29 = scalar_lea.vmem %s3613_s3, %s2598_s25 }
  0x12   : > { %v2020_v8 = vcombine.low %v2805_v7, %v2805_v7  ;;  %277 = vrot.lane.b32.xlu0 %v2802_v6, %s2728_s30  ;;  %v2016_v10 = vcombine.low %v2810_v9, %v2810_v9  ;;  %v2613_v14 = vld [vmem:[%s2793_s27 + $0x8] sm:$0x1e]   ;;  %v2830_v19 = vld [vmem:[%s2793_s27 + $0x18] sm:$0xf]  ;;  %2174 = vmatprep.subr.bf16.mxu0 %v2821_v11  ;;  %v2847_v30 = vld [vmem:[%s2793_s27 + $0x10] ss:$0 sps:$4 sm:$0xff]  }
  0x13   : > { %v2825_v15 = vld [vmem:[%s2793_s27 + $0x8] sm:$0xf]  ;;  %v2073_v22 = vcombine.low %v2830_v19, %v2830_v19  ;;  %v291_v27 = vrot.slane %v2613_v14, 1  ;;  %v2617_v31 = vld [vmem:[%s2793_s27 + $0x10] sm:$0x1e]   ;;  %2195 = vmatpush3.bf16.msra.mxu1 %v2866_v40  ;;  %v2923_v60 = vld [vmem:[%s3611_s1 + $0xa0] sm:$0xff]  }
  0x14   : > { %v298_v12 = vshrl.u32 %v2020_v8, 16  ;;  %v300_v13 = vshll.u32 %v2020_v8, 16  ;;  %v260_v16 = vshrl.u32 %v2016_v10, 16  ;;  %v262_v17 = vshll.u32 %v2016_v10, 16  ;;  %v2851_v32 = vld [vmem:[%s2793_s27 + $0x10] sm:$0xf]  ;;  %2196 = vmatprep.subr.bf16.mxu1 %v2880_v48  ;;  %vm3488_vm4 = vmand %vm676_vm2, %vm677_vm3 }
  0x15   : > { %v2069_v18 = vcombine.low %v2825_v15, %v2825_v15  ;;  %v736_v28 = vshll.u32 %v2073_v22, 16  ;;  %v2854_v33 = vld [vmem:[%s2793_s27 + $0x20] sm:$0xf]  ;;  %2175 = vmatpush3.bf16.msra.mxu0 %v2844_v25  ;;  %v2087_v36 = vcombine.low %v2851_v32, %v2851_v32  ;;  %v734_v37 = vshrl.u32 %v2073_v22, 16  ;;  %v2884_v49 = vld [vmem:[%s2793_s27 + $0x18] ss:$0 sps:$4 sm:$0xff]  }
  0x16   : > { %v302_v21 = vrot.slane %v300_v13, 1  ;;  %v264_v23 = vrot.slane %v262_v17, 1  ;;  %v2091_v39 = vcombine.low %v2854_v33, %v2854_v33  ;;  %v727_v41 = vrot.slane %v2617_v31, 1  ;;  %2176 = vmatprep.subr.bf16.mxu0 %v2873_v45  ;;  %v2622_v56 = vld [vmem:[%s2793_s27 + $0x18] sm:$0x1e]   ;;  %v2943_v8 = vld [vmem:[%s3611_s1 + $0x10] sm:$0xff]  }
  0x17   : > { %v698_v24 = vshll.u32 %v2069_v18, 16  ;;  %v696_v34 = vshrl.u32 %v2069_v18, 16  ;;  %v738_v38 = vrot.slane %v736_v28, 1  ;;  %v907_v42 = vshrl.u32 %v2087_v36, 16  ;;  %2197 = vmatpush3.bf16.msra.mxu1 %v2896_v53  ;;  %v2937_v63 = vld [vmem:[%s3611_s1 + $0xd8] sm:$0xff]   ;;  %v2957_v13 = vld [vmem:[%s3611_s1 + $0x48] sm:$0xff]  }
  0x18   : > { %v303_v26 = vor.u32 %v302_v21, %v298_v12  ;;  %v265_v29 = vor.u32 %v264_v23, %v260_v16  ;;  %v909_v44 = vshll.u32 %v2087_v36, 16  ;;  %v947_v47 = vshll.u32 %v2091_v39, 16  ;;  %2198 = vmatprep.subr.bf16.mxu1 %v2910_v57  ;;  %v2950_v12 = vld [vmem:[%s3611_s1 + $0x98] sm:$0xff]   ;;  %v2963_v14 = vld [vmem:[%s3611_s1 + $0xd0] sm:$0xff]   ;;  %v2969_v16 = vld [vmem:[%s3611_s1 + $0x8] sm:$0xff]  }
  0x19   : > { %v700_v35 = vrot.slane %v698_v24, 1  ;;  %v739_v46 = vor.u32 %v738_v38, %v734_v37  ;;  %v945_v50 = vshrl.u32 %v2091_v39, 16  ;;  %2177 = vmatpush3.bf16.msra.mxu0 %v2890_v51  ;;  %v938_v10 = vrot.slane %v2622_v56, 1  ;;  %v2976_v17 = vld [vmem:[%s3611_s1 + $0x90] sm:$0xff]   ;;  %v2982_v18 = vld [vmem:[%s3611_s1 + $0x40] sm:$0xff]   ;;  %v2988_v21 = vld [vmem:[%s3611_s1 + $0xc8] sm:$0xff]  }
  0x1a   : > { %304 = vrot.lane.b32.xlu1 %v303_v26, %s2728_s30  ;;  %266 = vrot.lane.b32.xlu0 %v265_v29, %s2728_s30  ;;  %v911_v52 = vrot.slane %v909_v44, 1  ;;  %v949_v54 = vrot.slane %v947_v47, 1  ;;  %v2994_v22 = vld [vmem:[%s3611_s1] sm:$0xff]   ;;  %v3001_v23 = vld [vmem:[%s3611_s1 + $0x88] sm:$0xff]   ;;  %v3614_v26 = vmov 0.0  }
  0x1b   : > { %v701_v43 = vor.u32 %v700_v35, %v696_v34  ;;  %2178 = vmatprep.subr.bf16.mxu0 %v2903_v55  ;;  %2199 = vmatpush3.bf16.msra.mxu1 %v2923_v60  ;;  %v3006_v24 = vld [vmem:[%s3611_s1 + $0xc0] sm:$0xff]   ;;  %v3022_v29 = vld [vmem:[%s2793_s27 + $0x18] sm:$0xf]  ;;  %v3028_v36 = vld [vmem:[%s2793_s27 + $0x28] sm:$0xf] }
  0x1c   : > { %v912_v59 = vor.u32 %v911_v52, %v907_v42  ;;  %v950_v61 = vor.u32 %v949_v54, %v945_v50  ;;  %2200 = vmatprep.subr.bf16.mxu1 %v2937_v63  ;;  %v3016_v28 = vld [vmem:[%s3611_s1 + $0x80] sm:$0xff]   ;;  %v2105_v31 = vcombine.low %v3022_v29, %v3022_v29  ;;  %v2109_v37 = vcombine.low %v3028_v36, %v3028_v36  ;;  %v3039_v52 = vld [vmem:[%s2793_s27 + $0x30] sm:$0xf]  ;;  %v3042_v54 = vld [vmem:[%s2793_s27 + $0x28] ss:$0 sps:$4 sm:$0xff]  }
  0x1d   : > { %2179 = vmatpush3.bf16.msra.mxu0 %v2916_v58  ;;  %v2661_v38 = vld [vmem:[%s2793_s27 + $0x20] sm:$0x1e]  }
  0x1e   : > { %292 = vrot.lane.b32.xlu1 %v291_v27, %s2728_s30  ;;  %713 = vrot.lane.b32.xlu0 %v2847_v30, %s2728_s30  ;;  %v3010_v27 = vld [vmem:[%s2793_s27 + $0x20] ss:$0 sps:$4 sm:$0xff]   ;;  %v1118_v34 = vshrl.u32 %v2105_v31, 16  ;;  %v1120_v35 = vshll.u32 %v2105_v31, 16  ;;  %v1158_v42 = vshll.u32 %v2109_v37, 16 }
  0x1f   : > { %2180 = vmatprep.subr.bf16.mxu0 %v2931_v62  ;;  %2201 = vmatpush3.bf16.msra.mxu1 %v2950_v12  ;;  %v3036_v50 = vld [vmem:[%s2793_s27 + $0x20] sm:$0xf] }
  0x20   : > { %2202 = vmatprep.subr.bf16.mxu1 %v2963_v14  ;;  %v1122_v39 = vrot.slane %v1120_v35, 1  ;;  %v1160_v44 = vrot.slane %v1158_v42, 1  ;;  %v2123_v56 = vcombine.low %v3036_v50, %v3036_v50 }
  0x21   : > { %2181 = vmatpush3.bf16.msra.mxu0 %v2943_v8 }
  0x22   : > { %702 = vrot.lane.b32.xlu1 %v701_v43, %s2728_s30  ;;  %740 = vrot.lane.b32.xlu0 %v739_v46, %s2728_s30  ;;  %v1123_v43 = vor.u32 %v1122_v39, %v1118_v34  ;;  %v1149_v46 = vrot.slane %v2661_v38, 1  ;;  %v1331_v31 = vshll.u32 %v2123_v56, 16 }
  0x23   : > { %2182 = vmatprep.subr.bf16.mxu0 %v2957_v13  ;;  %2203 = vmatpush3.bf16.msra.mxu1 %v2976_v17 }
  0x24   : > { %2204 = vmatprep.subr.bf16.mxu1 %v2988_v21 }
  0x25   : > { %2183 = vmatpush3.bf16.msra.mxu0 %v2969_v16 }
  0x26   : > { %728 = vrot.lane.b32.xlu1 %v727_v41, %s2728_s30  ;;  %924 = vrot.lane.b32.xlu0 %v2884_v49, %s2728_s30  ;;  %v1156_v41 = vshrl.u32 %v2109_v37, 16  ;;  %v1333_v37 = vrot.slane %v1331_v31, 1 }
  0x27   : > { %2184 = vmatprep.subr.bf16.mxu0 %v2982_v18  ;;  %2205 = vmatpush3.bf16.msra.mxu1 %v3001_v23 }
  0x28   : > { %2206 = vmatprep.subr.bf16.mxu1 %v3006_v24  ;;  %v1161_v47 = vor.u32 %v1160_v44, %v1156_v41 }
  0x29   : > { %2185 = vmatpush3.bf16.msra.mxu0 %v2994_v22 }
  0x2a   : > { %913 = vrot.lane.b32.xlu1 %v912_v59, %s2728_s30  ;;  %951 = vrot.lane.b32.xlu0 %v950_v61, %s2728_s30  ;;  %v2127_v59 = vcombine.low %v3039_v52, %v3039_v52  ;;  %v2668_v61 = vld [vmem:[%s2793_s27 + $0x28] sm:$0x1e]  }
  0x2b   : > { %2513 = vmatprep.subr.bf16.mxu0 %v3614_v26  ;;  %2207 = vmatpush3.bf16.msra.mxu1 %v3016_v28  ;;  %v1360_v39 = vrot.slane %v2668_v61, 1  ;;  %v280_v26 = vshrl.u32 %v2802_v6, 16 }
  0x2c   : > { %2219 = vmatprep.subr.bf16.mxu1 %v2762_v0  ;;  %v1367_v34 = vshrl.u32 %v2127_v59, 16  ;;  %v1369_v35 = vshll.u32 %v2127_v59, 16 }
  0x2e   : > { %939 = vrot.lane.b32.xlu1 %v938_v10, %s2728_s30  ;;  %1135 = vrot.lane.b32.xlu0 %v3010_v27, %s2728_s30  ;;  %v1329_v10 = vshrl.u32 %v2123_v56, 16  ;;  %v1371_v38 = vrot.slane %v1369_v35, 1 }
  0x30   : > { %v1334_v41 = vor.u32 %v1333_v37, %v1329_v10  ;;  %v1372_v42 = vor.u32 %v1371_v38, %v1367_v34  ;;  %v3068_v10 = vld [vmem:[%s2793_s27 + $0x38] sm:$0xf]  ;;  %v2674_v38 = vld [vmem:[%s2793_s27 + $0x30] sm:$0x1e]  }
  0x31   : > { %3624 = vst [vmem:[#allocation4_spill] sm:$0xff] %v3068_v10  ;;  %v2145_v31 = vcombine.low %v3068_v10, %v3068_v10 }
  0x32   : > { %1124 = vrot.lane.b32.xlu1 %v1123_v43, %s2728_s30  ;;  %1162 = vrot.lane.b32.xlu0 %v1161_v47, %s2728_s30  ;;  %v3057_v43 = vld [vmem:[%s2793_s27 + $0x28] sm:$0xf]  ;;  %v3062_v47 = vld [vmem:[%s2793_s27 + $0x30] ss:$0 sps:$4 sm:$0xff]  }
  0x33   : > { %3622 = vst [vmem:[#allocation2_spill] sm:$0xff] %v3057_v43  ;;  %v2141_v44 = vcombine.low %v3057_v43, %v3057_v43  ;;  %3623 = vst [vmem:[#allocation3_spill] sm:$0xff] %v3062_v47  ;;  %v1580_v34 = vshll.u32 %v2145_v31, 16  ;;  %v1578_v35 = vshrl.u32 %v2145_v31, 16  ;;  %v2664_v43 = vld [vmem:[%s2793_s27 + $0x8] sm:$0x1e]  }
  0x35   : > { %v1540_v56 = vshrl.u32 %v2141_v44, 16  ;;  %v1582_v37 = vrot.slane %v1580_v34, 1  ;;  %v3083_v34 = vld [vmem:[%s2793_s27 + $0x40] sm:$0xf] }
  0x36   : > { %1150 = vrot.lane.b32.xlu1 %v1149_v46, %s2728_s30  ;;  %1346 = vrot.lane.b32.xlu0 %v3042_v54, %s2728_s30  ;;  %v1542_v46 = vshll.u32 %v2141_v44, 16  ;;  %3626 = vst [vmem:[#allocation6_spill] sm:$0xff] %v3083_v34 }
  0x38   : > { %v1544_v59 = vrot.slane %v1542_v46, 1  ;;  %v3077_v46 = vld [vmem:[%s2793_s27 + $0x30] sm:$0xf] }
  0x39   : > { %3625 = vst [vmem:[#allocation5_spill] sm:$0xff] %v3077_v46 }
  0x3a   : > { %1335 = vrot.lane.b32.xlu1 %v1334_v41, %s2728_s30  ;;  %1373 = vrot.lane.b32.xlu0 %v1372_v42, %s2728_s30  ;;  %v1545_v61 = vor.u32 %v1544_v59, %v1540_v56  ;;  %v1571_v41 = vrot.slane %v2674_v38, 1  ;;  %v2651_v42 = vld [vmem:[%s2793_s27] sm:$0x1e]   ;;  %v2159_v56 = vcombine.low %v3077_v46, %v3077_v46  ;;  %v282_v59 = vshll.u32 %v2802_v6, 16 }
  0x3b   : > { %v273_v44 = vrot.slane %v2651_v42, 1 }
  0x3c   : > { %v1753_v31 = vshll.u32 %v2159_v56, 16  ;;  %v1751_v38 = vshrl.u32 %v2159_v56, 16  ;;  %v284_v46 = vrot.slane %v282_v59, 1  ;;  %v3100_v56 = vld [vmem:[%s3611_s1 + $0x118] sm:$0xff]  }
  0x3e   : > { %1361 = vrot.lane.b32.xlu1 %v1360_v39, %s2728_s30  ;;  %1557 = vrot.lane.b32.xlu0 %v3062_v47, %s2728_s30  ;;  %v1583_v39 = vor.u32 %v1582_v37, %v1578_v35  ;;  %v2163_v37 = vcombine.low %v3083_v34, %v3083_v34  ;;  %v285_v59 = vor.u32 %v284_v46, %v280_v26  ;;  %v2663_v46 = vld [vmem:[%s2793_s27 + $0x10] sm:$0x1e]  }
  0x40   : > { %v1791_v42 = vshll.u32 %v2163_v37, 16  ;;  %v1789_v10 = vshrl.u32 %v2163_v37, 16 }
  0x42   : > { %1546 = vrot.lane.b32.xlu1 %v1545_v61, %s2728_s30  ;;  %1584 = vrot.lane.b32.xlu0 %v1583_v39, %s2728_s30  ;;  %v1755_v39 = vrot.slane %v1753_v31, 1 }
  0x44   : > { %v1756_v47 = vor.u32 %v1755_v39, %v1751_v38 }
  0x46   : > { %1572 = vrot.lane.b32.xlu1 %v1571_v41, %s2728_s30  ;;  %v3089_v41 = vld [vmem:[%s2793_s27 + $0x38] ss:$0 sps:$4 sm:$0xff]  }
  0x47   : > { %1768 = vrot.lane.b32.xlu0 %v3089_v41, %s2728_s30 }
  0x4a   : > { %1757 = vrot.lane.b32.xlu1 %v1756_v47, %s2728_s30  ;;  %v709_v47 = vrot.slane %v2664_v43, 1 }
  0x84   : > { %v278_v61 = vpop.permute.xlu0 %277 }
  0x85   : > { %v319_v35 = vsel %vm312_vm0, %v273_v44, %v278_v61  ;;  %v1793_v44 = vrot.slane %v1791_v42, 1  ;;  %v2680_v61 = vld [vmem:[%s2793_s27 + $0x38] sm:$0x1e]   ;;  %v3111_v42 = vld [vmem:[%s3611_s1 + $0x110] sm:$0xff]  }
  0x86   : > { %586 = vmatprep.mubr.bf16.mxu0 %v319_v35  ;;  %v1782_v38 = vrot.slane %v2680_v61, 1 }
  0x87   : > { %v1794_v35 = vor.u32 %v1793_v44, %v1789_v10  ;;  %v3125_v10 = vld [vmem:[%s3611_s1 + $0x108] sm:$0xff]   ;;  %v311_v44 = vrot.slane %v2663_v46, 1 }
  0x88   : > { %1783 = vrot.lane.b32.xlu1 %v1782_v38, %s2728_s30  ;;  %v2670_v38 = vld [vmem:[%s2793_s27 + $0x10] sm:$0x1e]  }
  0x89   : > { %1795 = vrot.lane.b32.xlu0 %v1794_v35, %s2728_s30 }
  0x8c   : > { %v305_v34 = vpop.permute.xlu1 %304  ;;  %v267_v31 = vpop.permute.xlu0 %266 }
  0x8d   : > { %v327_v6 = vsel %vm312_vm0, %v2805_v7, %v305_v34  ;;  %v315_v37 = vsel %vm312_vm0, %v2810_v9, %v267_v31  ;;  %v3627_v7 = vmov 0.0   ;;  %v3135_v34 = vld [vmem:[%s3611_s1 + $0x100] sm:$0xff]  }
  0x8e   : > { %626 = vmatprep.mubr.bf16.mxu1 %v327_v6  ;;  %587 = vmatmul.mubr.bf16.vlgmr.msra.gmra.mxu0 %v315_v37 }
  0x8f   : > { %2514 = vmatpush3.bf16.msra.mxu0 %v3100_v56  ;;  %2521 = vmatprep.mubr.msk.bf16.mxu0 %vm2730_vm1, %v3627_v7 }
  0x90   : > { %v293_v39 = vpop.permute.xlu1 %292  ;;  %2515 = vmatprep.subr.bf16.mxu0 %v3627_v7  ;;  %v714_v26 = vpop.permute.xlu0 %713 }
  0x91   : > { %v323_v9 = vsel %vm312_vm0, %v285_v59, %v293_v39  ;;  %v754_v43 = vsel %vm312_vm0, %v709_v47, %v714_v26  ;;  %v718_v59 = vshll.u32 %v2847_v30, 16  ;;  %v920_v26 = vrot.slane %v2670_v38, 1 }
  0x92   : > { %627 = vmatmul.mubr.bf16.vlgmr.msra.gmra.mxu1 %v323_v9  ;;  %v2669_v9 = vld [vmem:[%s2793_s27 + $0x18] sm:$0x1e]  }
  0x93   : > { %2220 = vmatpush3.bf16.msra.mxu1 %v2769_v1  ;;  %799 = vmatprep.mubr.bf16.mxu1 %v754_v43  ;;  %v720_v35 = vrot.slane %v718_v59, 1  ;;  %v747_v46 = vrot.slane %v2669_v9, 1  ;;  %v2676_v59 = vld [vmem:[%s2793_s27 + $0x18] sm:$0x1e]  }
  0x94   : > { %2516 = vmatpush3.bf16.msra.mxu0 %v3111_v42  ;;  %2221 = vmatprep.subr.bf16.mxu1 %v2775_v2  ;;  %v741_v61 = vpop.permute.xlu0 %740 }
  0x95   : > { %2517 = vmatprep.subr.bf16.mxu0 %v3627_v7  ;;  %v762_v31 = vsel %vm312_vm0, %v2830_v19, %v741_v61  ;;  %v703_v19 = vpop.permute.xlu1 %702 }
  0x96   : > { %v750_v6 = vsel %vm312_vm0, %v2825_v15, %v703_v19  ;;  %v716_v15 = vshrl.u32 %v2847_v30, 16  ;;  %v927_v19 = vshrl.u32 %v2884_v49, 16 }
  0x97   : > { %2222 = vmatpush3.bf16.msra.mxu1 %v2788_v4 }
  0x98   : > { %2518 = vmatpush3.bf16.msra.mxu0 %v3125_v10  ;;  %2223 = vmatprep.subr.bf16.mxu1 %v2821_v11  ;;  %v925_v37 = vpop.permute.xlu0 %924  ;;  %v721_v47 = vor.u32 %v720_v35, %v716_v15 }
  0x99   : > { %2519 = vmatprep.subr.bf16.mxu0 %v3627_v7  ;;  %v729_v39 = vpop.permute.xlu1 %728 }
  0x9a   : > { %v758_v30 = vsel %vm312_vm0, %v721_v47, %v729_v39 }
  0x9b   : > { %2224 = vmatpush3.bf16.msra.mxu1 %v2844_v25 }
  0x9c   : > { %2520 = vmatpush3.bf16.msra.mxu0 %v3135_v34  ;;  %2225 = vmatprep.subr.bf16.mxu1 %v2873_v45  ;;  %v952_v43 = vpop.permute.xlu0 %951 }
  0x9d   : > { %2241 = vmatprep.subr.bf16.mxu0 %v2782_v3  ;;  %v973_v61 = vsel %vm312_vm0, %v2854_v33, %v952_v43  ;;  %v929_v33 = vshll.u32 %v2884_v49, 16  ;;  %v1131_v49 = vrot.slane %v2676_v59, 1  ;;  %v2681_v43 = vld [vmem:[%s2793_s27 + $0x28] sm:$0x1e]  }
  0x9f   : > { %2522 = vmatmul.mubr.msk.bf16.vlgmr.msra.gmra.mxu0 %vm312_vm0, %v311_v44  ;;  %2226 = vmatpush3.bf16.msra.mxu1 %v2890_v51  ;;  %v965_v44 = vsel %vm312_vm0, %v920_v26, %v925_v37 }
  0xa0   : > { %2242 = vmatpush3.bf16.msra.mxu0 %v2799_v5  ;;  %2227 = vmatprep.subr.bf16.mxu1 %v2903_v55  ;;  %v1136_v37 = vpop.permute.xlu0 %1135 }
  0xa1   : > { %2243 = vmatprep.subr.bf16.mxu0 %v2836_v20  ;;  %839 = vmatprep.mubr.bf16.mxu0 %v762_v31  ;;  %v914_v31 = vpop.permute.xlu1 %913  ;;  %v1176_v39 = vsel %vm312_vm0, %v1131_v49, %v1136_v37 }
  0xa2   : > { %v961_v35 = vsel %vm312_vm0, %v2851_v32, %v914_v31 }
  0xa3   : > { %2228 = vmatpush3.bf16.msra.mxu1 %v2916_v58 }
  0xa4   : > { %2244 = vmatpush3.bf16.msra.mxu0 %v2866_v40  ;;  %2229 = vmatprep.subr.bf16.mxu1 %v2931_v62 }
  0xa5   : > { %2245 = vmatprep.subr.bf16.mxu0 %v2880_v48  ;;  %v940_v38 = vpop.permute.xlu1 %939 }
  0xa7   : > { %2230 = vmatpush3.bf16.msra.mxu1 %v2943_v8 }
  0xa8   : > { %2246 = vmatpush3.bf16.msra.mxu0 %v2896_v53  ;;  %2231 = vmatprep.subr.bf16.mxu1 %v2957_v13 }
  0xa9   : > { %2247 = vmatprep.subr.bf16.mxu0 %v2910_v57 }
  0xab   : > { %2232 = vmatpush3.bf16.msra.mxu1 %v2969_v16 }
  0xac   : > { %2248 = vmatpush3.bf16.msra.mxu0 %v2923_v60  ;;  %2233 = vmatprep.subr.bf16.mxu1 %v2982_v18 }
  0xad   : > { %2249 = vmatprep.subr.bf16.mxu0 %v2937_v63 }
  0xaf   : > { %2234 = vmatpush3.bf16.msra.mxu1 %v2994_v22 }
  0xb0   : > { %2250 = vmatpush3.bf16.msra.mxu0 %v2950_v12  ;;  %2525 = vmatprep.subr.bf16.mxu1 %v3627_v7 }
  0xb1   : > { %2251 = vmatprep.subr.bf16.mxu0 %v2963_v14 }
  0xb2   : > { %800 = vmatmul.mubr.bf16.vlgmr.msra.gmra.mxu1 %v750_v6  ;;  %v931_v6 = vrot.slane %v929_v33, 1  ;;  %v1169_v33 = vrot.slane %v2681_v43, 1 }
  0xb3   : > { %2526 = vmatpush3.bf16.msra.mxu1 %v3100_v56  ;;  %2533 = vmatprep.mubr.msk.bf16.mxu1 %vm2730_vm1, %v3627_v7 }
  0xb4   : > { %2252 = vmatpush3.bf16.msra.mxu0 %v2976_v17  ;;  %2527 = vmatprep.subr.bf16.mxu1 %v3627_v7  ;;  %v932_v15 = vor.u32 %v931_v6, %v927_v19  ;;  %v3302_v19 = vld [vmem:[%s3611_s1 + $0x38] sm:$0xff]  }
  0xb5   : > { %2253 = vmatprep.subr.bf16.mxu0 %v2988_v21  ;;  %v3308_v6 = vld [vmem:[%s3611_s1 + $0xf8] sm:$0xff]  }
  0xb6   : > { %v969_v47 = vsel %vm312_vm0, %v932_v15, %v940_v38  ;;  %v3316_v15 = vld [vmem:[%s3611_s1 + $0x70] sm:$0xff]   ;;  %v3336_v38 = vld [vmem:[%s3611_s1 + $0x68] sm:$0xff]  }
  0xb7   : > { %2528 = vmatpush3.bf16.msra.mxu1 %v3111_v42 }
  0xb8   : > { %2254 = vmatpush3.bf16.msra.mxu0 %v3001_v23  ;;  %2529 = vmatprep.subr.bf16.mxu1 %v3627_v7 }
  0xb9   : > { %2255 = vmatprep.subr.bf16.mxu0 %v3006_v24 }
  0xbb   : > { %2530 = vmatpush3.bf16.msra.mxu1 %v3125_v10 }
  0xbc   : > { %2256 = vmatpush3.bf16.msra.mxu0 %v3016_v28  ;;  %2531 = vmatprep.subr.bf16.mxu1 %v3627_v7 }
  0xbd   : > { %2268 = vmatprep.subr.bf16.mxu0 %v2762_v0 }
  0xbf   : > { %840 = vmatmul.mubr.bf16.vlgmr.msra.gmra.mxu0 %v758_v30  ;;  %2532 = vmatpush3.bf16.msra.mxu1 %v3135_v34 }
  0xc0   : > { %2269 = vmatpush3.bf16.msra.mxu0 %v2769_v1  ;;  %2290 = vmatprep.subr.bf16.mxu1 %v2782_v3 }
  0xc1   : > { %2270 = vmatprep.subr.bf16.mxu0 %v2775_v2  ;;  %1010 = vmatprep.mubr.bf16.mxu0 %v965_v44  ;;  %v3294_v44 = vld [vmem:[%s3611_s1 + $0x78] sm:$0xff]  }
  0xc2   : > { %2534 = vmatmul.mubr.msk.bf16.vlgmr.msra.gmra.mxu1 %vm312_vm0, %v747_v46 }
  0xc3   : > { %2291 = vmatpush3.bf16.msra.mxu1 %v2799_v5  ;;  %1050 = vmatprep.mubr.bf16.mxu1 %v973_v61 }
  0xc4   : > { %2271 = vmatpush3.bf16.msra.mxu0 %v2788_v4  ;;  %2292 = vmatprep.subr.bf16.mxu1 %v2836_v20 }
  0xc5   : > { %2272 = vmatprep.subr.bf16.mxu0 %v2821_v11 }
  0xc7   : > { %2293 = vmatpush3.bf16.msra.mxu1 %v2866_v40 }
  0xc8   : > { %2273 = vmatpush3.bf16.msra.mxu0 %v2844_v25  ;;  %2294 = vmatprep.subr.bf16.mxu1 %v2880_v48 }
  0xc9   : > { %2274 = vmatprep.subr.bf16.mxu0 %v2873_v45 }
  0xcb   : > { %2295 = vmatpush3.bf16.msra.mxu1 %v2896_v53 }
  0xcc   : > { %2275 = vmatpush3.bf16.msra.mxu0 %v2890_v51  ;;  %2296 = vmatprep.subr.bf16.mxu1 %v2910_v57 }
  0xcd   : > { %2276 = vmatprep.subr.bf16.mxu0 %v2903_v55 }
  0xcf   : > { %2297 = vmatpush3.bf16.msra.mxu1 %v2923_v60 }
  0xd0   : > { %2277 = vmatpush3.bf16.msra.mxu0 %v2916_v58  ;;  %2298 = vmatprep.subr.bf16.mxu1 %v2937_v63 }
  0xd1   : > { %2278 = vmatprep.subr.bf16.mxu0 %v2931_v62 }
  0xd3   : > { %2299 = vmatpush3.bf16.msra.mxu1 %v2950_v12 }
  0xd4   : > { %2279 = vmatpush3.bf16.msra.mxu0 %v2943_v8  ;;  %2300 = vmatprep.subr.bf16.mxu1 %v2963_v14 }
  0xd5   : > { %2280 = vmatprep.subr.bf16.mxu0 %v2957_v13 }
  0xd7   : > { %2301 = vmatpush3.bf16.msra.mxu1 %v2976_v17 }
  0xd8   : > { %2281 = vmatpush3.bf16.msra.mxu0 %v2969_v16  ;;  %2302 = vmatprep.subr.bf16.mxu1 %v2988_v21 }
  0xd9   : > { %2282 = vmatprep.subr.bf16.mxu0 %v2982_v18 }
  0xdb   : > { %2303 = vmatpush3.bf16.msra.mxu1 %v3001_v23 }
  0xdc   : > { %2283 = vmatpush3.bf16.msra.mxu0 %v2994_v22  ;;  %2304 = vmatprep.subr.bf16.mxu1 %v3006_v24 }
  0xdd   : > { %2537 = vmatprep.subr.bf16.mxu0 %v3627_v7 }
  0xdf   : > { %1011 = vmatmul.mubr.bf16.vlgmr.msra.gmra.mxu0 %v961_v35  ;;  %2305 = vmatpush3.bf16.msra.mxu1 %v3016_v28  ;;  %v3323_v35 = vld [vmem:[%s3611_s1 + $0xb8] sm:$0xff]  }
  0xe0   : > { %2538 = vmatpush3.bf16.msra.mxu0 %v3100_v56  ;;  %2317 = vmatprep.subr.bf16.mxu1 %v2762_v0  ;;  %v2675_v0 = vld [vmem:[%s2793_s27 + $0x20] sm:$0x1e]  }
  0xe1   : > { %2539 = vmatprep.subr.bf16.mxu0 %v3627_v7  ;;  %2545 = vmatprep.mubr.msk.bf16.mxu0 %vm2730_vm1, %v3627_v7  ;;  %v958_v32 = vrot.slane %v2675_v0, 1  ;;  %v3388_v0 = vld [vmem:[%s3611_s1 + $0x28] sm:$0xff]  }
  0xe2   : > { %1051 = vmatmul.mubr.bf16.vlgmr.msra.gmra.mxu1 %v969_v47 }
  0xe3   : > { %2318 = vmatpush3.bf16.msra.mxu1 %v2769_v1  ;;  %1221 = vmatprep.mubr.bf16.mxu1 %v1176_v39  ;;  %v1163_v1 = vpop.permute.xlu0 %1162 }
  0xe4   : > { %2540 = vmatpush3.bf16.msra.mxu0 %v3111_v42  ;;  %2319 = vmatprep.subr.bf16.mxu1 %v2775_v2  ;;  %v1184_v2 = vsel %vm312_vm0, %v3028_v36, %v1163_v1  ;;  %v2682_v36 = vld [vmem:[%s2793_s27 + $0x20] sm:$0x1e]  }
  0xe5   : > { %2541 = vmatprep.subr.bf16.mxu0 %v3627_v7  ;;  %v1342_v46 = vrot.slane %v2682_v36, 1  ;;  %v3629_v36 = vld [vmem:[#allocation2_spill] sm:$0xff] }
  0xe7   : > { %2320 = vmatpush3.bf16.msra.mxu1 %v2788_v4  ;;  %v1347_v9 = vpop.permute.xlu0 %1346 }
  0xe8   : > { %2542 = vmatpush3.bf16.msra.mxu0 %v3125_v10  ;;  %2321 = vmatprep.subr.bf16.mxu1 %v2821_v11  ;;  %v1138_v11 = vshrl.u32 %v3010_v27, 16  ;;  %v1387_v31 = vsel %vm312_vm0, %v1342_v46, %v1347_v9 }
  0xe9   : > { %2543 = vmatprep.subr.bf16.mxu0 %v3627_v7 }
  0xeb   : > { %2322 = vmatpush3.bf16.msra.mxu1 %v2844_v25  ;;  %v1374_v61 = vpop.permute.xlu0 %1373 }
  0xec   : > { %2544 = vmatpush3.bf16.msra.mxu0 %v3135_v34  ;;  %2323 = vmatprep.subr.bf16.mxu1 %v2873_v45  ;;  %v1395_v59 = vsel %vm312_vm0, %v3039_v52, %v1374_v61  ;;  %v3329_v52 = vld [vmem:[%s3611_s1 + $0x30] sm:$0xff]   ;;  %v3464_v61 = vld [vmem:[%s3612_s2] ss:$0 sm:$0xff] }
  0xed   : > { %2339 = vmatprep.subr.bf16.mxu0 %v2782_v3  ;;  %v1125_v3 = vpop.permute.xlu1 %1124 }
  0xee   : > { %v1172_v4 = vsel %vm312_vm0, %v3022_v29, %v1125_v3  ;;  %v3628_v3 = vld [vmem:[#allocation4_spill] sm:$0xff] }
  0xef   : > { %2546 = vmatmul.mubr.msk.bf16.vlgmr.msra.gmra.mxu0 %vm312_vm0, %v958_v32  ;;  %2324 = vmatpush3.bf16.msra.mxu1 %v2890_v51  ;;  %v1558_v37 = vpop.permute.xlu0 %1557 }
  0xf0   : > { %2340 = vmatpush3.bf16.msra.mxu0 %v2799_v5  ;;  %2325 = vmatprep.subr.bf16.mxu1 %v2903_v55  ;;  %v1140_v5 = vshll.u32 %v3010_v27, 16 }
  0xf1   : > { %2341 = vmatprep.subr.bf16.mxu0 %v2836_v20  ;;  %1261 = vmatprep.mubr.bf16.mxu0 %v1184_v2  ;;  %v1151_v30 = vpop.permute.xlu1 %1150  ;;  %v3395_v2 = vld [vmem:[%s3611_s1 + $0x60] sm:$0xff]  }
  0xf2   : > { %v1142_v29 = vrot.slane %v1140_v5, 1  ;;  %v3405_v5 = vld [vmem:[%s3611_s1 + $0x20] sm:$0xff]  }
  0xf3   : > { %2326 = vmatpush3.bf16.msra.mxu1 %v2916_v58  ;;  %v1585_v1 = vpop.permute.xlu0 %1584 }
  0xf4   : > { %2342 = vmatpush3.bf16.msra.mxu0 %v2866_v40  ;;  %2327 = vmatprep.subr.bf16.mxu1 %v2931_v62  ;;  %v1143_v26 = vor.u32 %v1142_v29, %v1138_v11  ;;  %v3413_v11 = vld [vmem:[%s3611_s1 + $0xf0] sm:$0xff]  }
  0xf5   : > { %2343 = vmatprep.subr.bf16.mxu0 %v2880_v48  ;;  %v3420_v29 = vld [vmem:[%s3611_s1 + $0xb0] sm:$0xff]  }
  0xf6   : > { %v1180_v27 = vsel %vm312_vm0, %v1143_v26, %v1151_v30  ;;  %v3630_v26 = vld [vmem:[#allocation3_spill] sm:$0xff] }
  0xf7   : > { %2328 = vmatpush3.bf16.msra.mxu1 %v2943_v8  ;;  %v1562_v30 = vshll.u32 %v3630_v26, 16  ;;  %v1769_v43 = vpop.permute.xlu0 %1768 }
  0xf8   : > { %2344 = vmatpush3.bf16.msra.mxu0 %v2896_v53  ;;  %2329 = vmatprep.subr.bf16.mxu1 %v2957_v13 }
  0xf9   : > { %2345 = vmatprep.subr.bf16.mxu0 %v2910_v57 }
  0xfb   : > { %2330 = vmatpush3.bf16.msra.mxu1 %v2969_v16 }
  0xfc   : > { %2346 = vmatpush3.bf16.msra.mxu0 %v2923_v60  ;;  %2331 = vmatprep.subr.bf16.mxu1 %v2982_v18 }
  0xfd   : > { %2347 = vmatprep.subr.bf16.mxu0 %v2937_v63 }
  0xff   : > { %2332 = vmatpush3.bf16.msra.mxu1 %v2994_v22 }
 0x100   : > { %2348 = vmatpush3.bf16.msra.mxu0 %v2950_v12  ;;  %2549 = vmatprep.subr.bf16.mxu1 %v3627_v7 }
 0x101   : > { %2349 = vmatprep.subr.bf16.mxu0 %v2963_v14 }
 0x102   : > { %1222 = vmatmul.mubr.bf16.vlgmr.msra.gmra.mxu1 %v1172_v4  ;;  %v1606_v4 = vsel %vm312_vm0, %v3628_v3, %v1585_v1  ;;  %v1773_v1 = vshll.u32 %v3089_v41, 16  ;;  %v2709_v3 = vld [vmem:[%s3611_s1 + $0x10] sm:$0xff]  }
 0x103   : > { %2550 = vmatpush3.bf16.msra.mxu1 %v3100_v56  ;;  %2557 = vmatprep.mubr.msk.bf16.mxu1 %vm2730_vm1, %v3627_v7 }
 0x104   : > { %2350 = vmatpush3.bf16.msra.mxu0 %v2976_v17  ;;  %2551 = vmatprep.subr.bf16.mxu1 %v3627_v7 }
 0x105   : > { %2351 = vmatprep.subr.bf16.mxu0 %v2988_v21 }
 0x107   : > { %2552 = vmatpush3.bf16.msra.mxu1 %v3111_v42 }
 0x108   : > { %2352 = vmatpush3.bf16.msra.mxu0 %v3001_v23  ;;  %2553 = vmatprep.subr.bf16.mxu1 %v3627_v7 }
 0x109   : > { %2353 = vmatprep.subr.bf16.mxu0 %v3006_v24 }
 0x10b   : > { %2554 = vmatpush3.bf16.msra.mxu1 %v3125_v10 }
 0x10c   : > { %2354 = vmatpush3.bf16.msra.mxu0 %v3016_v28  ;;  %2555 = vmatprep.subr.bf16.mxu1 %v3627_v7 }
 0x10d   : > { %2366 = vmatprep.subr.bf16.mxu0 %v3294_v44 }
 0x10f   : > { %1262 = vmatmul.mubr.bf16.vlgmr.msra.gmra.mxu0 %v1180_v27  ;;  %2556 = vmatpush3.bf16.msra.mxu1 %v3135_v34 }
 0x110   : > { %2367 = vmatpush3.bf16.msra.mxu0 %v3302_v19  ;;  %2388 = vmatprep.subr.bf16.mxu1 %v3308_v6 }
 0x111   : > { %2368 = vmatprep.subr.bf16.mxu0 %v3316_v15  ;;  %1432 = vmatprep.mubr.bf16.mxu0 %v1387_v31  ;;  %v2685_v31 = vld [vmem:[%s2793_s27 + $0x38] sm:$0x1e]  }
 0x112   : > { %2558 = vmatmul.mubr.msk.bf16.vlgmr.msra.gmra.mxu1 %vm312_vm0, %v1169_v33 }
 0x113   : > { %2389 = vmatpush3.bf16.msra.mxu1 %v3323_v35  ;;  %1472 = vmatprep.mubr.bf16.mxu1 %v1395_v59 }
 0x114   : > { %2369 = vmatpush3.bf16.msra.mxu0 %v3329_v52  ;;  %2390 = vmatprep.subr.bf16.mxu1 %v2836_v20  ;;  %v1351_v20 = vshll.u32 %v3042_v54, 16 }
 0x115   : > { %2370 = vmatprep.subr.bf16.mxu0 %v3336_v38 }
 0x117   : > { %2391 = vmatpush3.bf16.msra.mxu1 %v2866_v40  ;;  %v1349_v40 = vshrl.u32 %v3042_v54, 16 }
 0x118   : > { %2371 = vmatpush3.bf16.msra.mxu0 %v2844_v25  ;;  %2392 = vmatprep.subr.bf16.mxu1 %v2880_v48  ;;  %v1336_v25 = vpop.permute.xlu1 %1335  ;;  %v2684_v48 = vld [vmem:[%s2793_s27 + $0x28] sm:$0x1e]  }
 0x119   : > { %2372 = vmatprep.subr.bf16.mxu0 %v2873_v45  ;;  %v1353_v45 = vrot.slane %v1351_v20, 1  ;;  %v1553_v54 = vrot.slane %v2684_v48, 1 }
 0x11b   : > { %2393 = vmatpush3.bf16.msra.mxu1 %v2896_v53  ;;  %v1383_v53 = vsel %vm312_vm0, %v3036_v50, %v1336_v25  ;;  %v1598_v39 = vsel %vm312_vm0, %v1553_v54, %v1558_v37  ;;  %v2683_v50 = vld [vmem:[%s2793_s27 + $0x30] sm:$0x1e]   ;;  %v1796_v25 = vpop.permute.xlu0 %1795  ;;  %v679_v37 = vld [vmem:[%s3480_s29] sm:$0xf] }
 0x11c   : > { %2373 = vmatpush3.bf16.msra.mxu0 %v2890_v51  ;;  %2394 = vmatprep.subr.bf16.mxu1 %v2910_v57  ;;  %v1354_v51 = vor.u32 %v1353_v45, %v1349_v40  ;;  %v1362_v49 = vpop.permute.xlu1 %1361  ;;  %v1380_v32 = vrot.slane %v2683_v50, 1  ;;  %v2706_v50 = vld [vmem:[%s3611_s1 + $0xd8] sm:$0xff]  }
 0x11d   : > { %2374 = vmatprep.subr.bf16.mxu0 %v2903_v55 }
 0x11e   : > { %v1391_v47 = vsel %vm312_vm0, %v1354_v51, %v1362_v49 }
 0x11f   : > { %2395 = vmatpush3.bf16.msra.mxu1 %v2923_v60 }
 0x120   : > { %2375 = vmatpush3.bf16.msra.mxu0 %v2916_v58  ;;  %2396 = vmatprep.subr.bf16.mxu1 %v2937_v63 }
 0x121   : > { %2376 = vmatprep.subr.bf16.mxu0 %v2931_v62 }
 0x123   : > { %2397 = vmatpush3.bf16.msra.mxu1 %v2950_v12 }
 0x124   : > { %2377 = vmatpush3.bf16.msra.mxu0 %v2943_v8  ;;  %2398 = vmatprep.subr.bf16.mxu1 %v2963_v14 }
 0x125   : > { %2378 = vmatprep.subr.bf16.mxu0 %v2957_v13 }
 0x127   : > { %2399 = vmatpush3.bf16.msra.mxu1 %v2976_v17 }
 0x128   : > { %2379 = vmatpush3.bf16.msra.mxu0 %v2969_v16  ;;  %2400 = vmatprep.subr.bf16.mxu1 %v2988_v21 }
 0x129   : > { %2380 = vmatprep.subr.bf16.mxu0 %v2982_v18 }
 0x12b   : > { %2401 = vmatpush3.bf16.msra.mxu1 %v3001_v23 }
 0x12c   : > { %2381 = vmatpush3.bf16.msra.mxu0 %v2994_v22  ;;  %2402 = vmatprep.subr.bf16.mxu1 %v3006_v24 }
 0x12d   : > { %2561 = vmatprep.subr.bf16.mxu0 %v3627_v7 }
 0x12f   : > { %1433 = vmatmul.mubr.bf16.vlgmr.msra.gmra.mxu0 %v1383_v53  ;;  %2403 = vmatpush3.bf16.msra.mxu1 %v3016_v28 }
 0x130   : > { %2562 = vmatpush3.bf16.msra.mxu0 %v3100_v56  ;;  %2415 = vmatprep.subr.bf16.mxu1 %v3294_v44 }
 0x131   : > { %2563 = vmatprep.subr.bf16.mxu0 %v3627_v7  ;;  %2569 = vmatprep.mubr.msk.bf16.mxu0 %vm2730_vm1, %v3627_v7 }
 0x132   : > { %1473 = vmatmul.mubr.bf16.vlgmr.msra.gmra.mxu1 %v1391_v47 }
 0x133   : > { %2416 = vmatpush3.bf16.msra.mxu1 %v3302_v19  ;;  %1643 = vmatprep.mubr.bf16.mxu1 %v1598_v39  ;;  %v2705_v39 = vld [vmem:[%s3611_s1 + $0x18] sm:$0xff]  }
 0x134   : > { %2564 = vmatpush3.bf16.msra.mxu0 %v3111_v42  ;;  %2417 = vmatprep.subr.bf16.mxu1 %v3316_v15 }
 0x135   : > { %2565 = vmatprep.subr.bf16.mxu0 %v3627_v7 }
 0x137   : > { %2418 = vmatpush3.bf16.msra.mxu1 %v3329_v52 }
 0x138   : > { %2566 = vmatpush3.bf16.msra.mxu0 %v3125_v10  ;;  %2419 = vmatprep.subr.bf16.mxu1 %v3336_v38 }
 0x139   : > { %2567 = vmatprep.subr.bf16.mxu0 %v3627_v7 }
 0x13b   : > { %2420 = vmatpush3.bf16.msra.mxu1 %v3388_v0 }
 0x13c   : > { %2568 = vmatpush3.bf16.msra.mxu0 %v3135_v34  ;;  %2421 = vmatprep.subr.bf16.mxu1 %v3395_v2 }
 0x13d   : > { %2437 = vmatprep.subr.bf16.mxu0 %v3308_v6 }
 0x13f   : > { %2570 = vmatmul.mubr.msk.bf16.vlgmr.msra.gmra.mxu0 %vm312_vm0, %v1380_v32  ;;  %2422 = vmatpush3.bf16.msra.mxu1 %v3405_v5 }
 0x140   : > { %2438 = vmatpush3.bf16.msra.mxu0 %v3323_v35  ;;  %2423 = vmatprep.subr.bf16.mxu1 %v2903_v55  ;;  %v3427_v55 = vld [vmem:[%s3611_s1 + $0xe8] sm:$0xff]  }
 0x141   : > { %2439 = vmatprep.subr.bf16.mxu0 %v3413_v11  ;;  %1683 = vmatprep.mubr.bf16.mxu0 %v1606_v4 }
 0x143   : > { %2424 = vmatpush3.bf16.msra.mxu1 %v2916_v58  ;;  %v3434_v58 = vld [vmem:[%s3611_s1 + $0xa8] sm:$0xff]  }
 0x144   : > { %2440 = vmatpush3.bf16.msra.mxu0 %v3420_v29  ;;  %2425 = vmatprep.subr.bf16.mxu1 %v2931_v62  ;;  %v1547_v62 = vpop.permute.xlu1 %1546 }
 0x145   : > { %2441 = vmatprep.subr.bf16.mxu0 %v3427_v55  ;;  %v1594_v9 = vsel %vm312_vm0, %v3629_v36, %v1547_v62  ;;  %v1771_v62 = vshrl.u32 %v3089_v41, 16  ;;  %v2713_v36 = vld [vmem:[%s3611_s1 + $0x8] sm:$0xff]  }
 0x146   : > { %v2716_v41 = vld [vmem:[%s3611_s1 + $0x88] sm:$0xff]  }
 0x147   : > { %2426 = vmatpush3.bf16.msra.mxu1 %v2943_v8 }
 0x148   : > { %2442 = vmatpush3.bf16.msra.mxu0 %v3434_v58  ;;  %2427 = vmatprep.subr.bf16.mxu1 %v2957_v13 }
 0x149   : > { %2443 = vmatprep.subr.bf16.mxu0 %v2910_v57 }
 0x14b   : > { %2428 = vmatpush3.bf16.msra.mxu1 %v2969_v16  ;;  %v1564_v16 = vrot.slane %v1562_v30, 1  ;;  %v2715_v30 = vld [vmem:[%s3611_s1 + $0x40] sm:$0xff]  }
 0x14c   : > { %2444 = vmatpush3.bf16.msra.mxu0 %v2923_v60  ;;  %2429 = vmatprep.subr.bf16.mxu1 %v2982_v18 }
 0x14d   : > { %2445 = vmatprep.subr.bf16.mxu0 %v2937_v63 }
 0x14e   : > { %v2186_v8 = vpop.f32.mrf.mxu0 }
 0x14f   : > { %2430 = vmatpush3.bf16.msra.mxu1 %v2994_v22  ;;  %v2686_v22 = vld [vmem:[%s2793_s27 + $0x30] sm:$0x1e]  }
 0x150   : > { %2446 = vmatpush3.bf16.msra.mxu0 %v2950_v12  ;;  %2573 = vmatprep.subr.bf16.mxu1 %v3627_v7  ;;  %v2187_v57 = vpop.f32.mrf.mxu0  ;;  %v1560_v12 = vshrl.u32 %v3630_v26, 16  ;;  %v1764_v59 = vrot.slane %v2686_v22, 1  ;;  %v2714_v26 = vld [vmem:[%s3611_s1 + $0xc8] sm:$0xff]   ;;  %v2719_v22 = vld [vmem:[%s3611_s1 + $0x80] sm:$0xff]  }
 0x151   : > { %2447 = vmatprep.subr.bf16.mxu0 %v2963_v14  ;;  %v2188_v46 = vadd.f32 %v2187_v57, %v2186_v8  ;;  %v1775_v8 = vrot.slane %v1773_v1, 1 }
 0x152   : > { %v2208_v60 = vpop.f32.mrf.mxu1  ;;  %1644 = vmatmul.mubr.bf16.vlgmr.msra.gmra.mxu1 %v1594_v9  ;;  %v2189_v13 = vpop.f32.mrf.mxu0  ;;  %v1565_v27 = vor.u32 %v1564_v16, %v1560_v12  ;;  %v1809_v45 = vsel %vm312_vm0, %v1764_v59, %v1769_v43  ;;  %v2718_v12 = vld [vmem:[%s3611_s1 + $0xc0] sm:$0xff]  }
 0x153   : > { %2574 = vmatpush3.bf16.msra.mxu1 %v3100_v56  ;;  %2581 = vmatprep.mubr.msk.bf16.mxu1 %vm2730_vm1, %v3627_v7  ;;  %v589_v20 = vadd.f32 %v2188_v46, %v3464_v61  ;;  %v1776_v57 = vor.u32 %v1775_v8, %v1771_v62  ;;  %v3634_v13 = vld [vmem:[#allocation5_spill] sm:$0xff] }
 0x154   : > { %2448 = vmatpush3.bf16.msra.mxu0 %v2976_v17  ;;  %v2209_v63 = vpop.f32.mrf.mxu1  ;;  %2575 = vmatprep.subr.bf16.mxu1 %v3627_v7  ;;  %v2190_v18 = vpop.f32.mrf.mxu0 }
 0x155   : > { %2449 = vmatprep.subr.bf16.mxu0 %v2988_v21  ;;  %v1573_v21 = vpop.permute.xlu1 %1572  ;;  %v2210_v33 = vadd.f32 %v2209_v63, %v2208_v60  ;;  %v2717_v60 = vld [vmem:[%s3611_s1] sm:$0xff]  }
 0x156   : > { %v2211_v14 = vpop.f32.mrf.mxu1 }
 0x157   : > { %2576 = vmatpush3.bf16.msra.mxu1 %v3111_v42  ;;  %v629_v40 = vadd.f32 %v2210_v33, %v589_v20 }
 0x158   : > { %2450 = vmatpush3.bf16.msra.mxu0 %v3001_v23  ;;  %v2212_v17 = vpop.f32.mrf.mxu1  ;;  %2577 = vmatprep.subr.bf16.mxu1 %v3627_v7  ;;  %v1602_v23 = vsel %vm312_vm0, %v1565_v27, %v1573_v21 }
 0x159   : > { %2451 = vmatprep.subr.bf16.mxu0 %v3006_v24  ;;  %v1591_v24 = vrot.slane %v2685_v31, 1 }
 0x15b   : > { %2578 = vmatpush3.bf16.msra.mxu1 %v3125_v10 }
 0x15c   : > { %2452 = vmatpush3.bf16.msra.mxu0 %v3016_v28  ;;  %2579 = vmatprep.subr.bf16.mxu1 %v3627_v7 }
 0x15d   : > { %2464 = vmatprep.subr.bf16.mxu0 %v3294_v44  ;;  %v3631_v44 = vld [vmem:[#allocation6_spill] sm:$0xff] }
 0x15e   : > { %v1817_v51 = vsel %vm312_vm0, %v3631_v44, %v1796_v25  ;;  %v2687_v25 = vld [vmem:[%s2793_s27 + $0x40] sm:$0x1e]  }
 0x15f   : > { %v668_v48 = vpop.f32.mrf.mxu0  ;;  %1684 = vmatmul.mubr.bf16.vlgmr.msra.gmra.mxu0 %v1602_v23  ;;  %2580 = vmatpush3.bf16.msra.mxu1 %v3135_v34 }
 0x160   : > { %v669_v28 = vadd.f32 %v668_v48, %v629_v40  ;;  %2465 = vmatpush3.bf16.msra.mxu0 %v3302_v19  ;;  %2486 = vmatprep.subr.bf16.mxu1 %v3308_v6 }
 0x161   : > { %v2523_v53 = vpop.f32.mrf.mxu0  ;;  %2466 = vmatprep.subr.bf16.mxu0 %v3316_v15  ;;  %1854 = vmatprep.mubr.bf16.mxu0 %v1809_v45  ;;  %v2076_v45 = vld [vmem:[%s3480_s29 + $0x4] sm:$0xf] }
 0x162   : > { %v674_v49 = vmax.f32 %v669_v28, 0.0  ;;  %2582 = vmatmul.mubr.msk.bf16.vlgmr.msra.gmra.mxu1 %vm312_vm0, %v1591_v24  ;;  %v1802_v28 = vrot.slane %v2687_v25, 1 }
 0x163   : > { %v671_v47 = vpop.f32.mrf.mxu0  ;;  %2487 = vmatpush3.bf16.msra.mxu1 %v3323_v35  ;;  %1894 = vmatprep.mubr.bf16.mxu1 %v1817_v51  ;;  %v2702_v35 = vld [vmem:[%s3611_s1 + $0xe0] sm:$0xff]  }
 0x164   : > { %v675_v19 = vpack.c.bf16 %v674_v49, %v674_v49  ;;  %2467 = vmatpush3.bf16.msra.mxu0 %v3329_v52  ;;  %2488 = vmatprep.subr.bf16.mxu1 %v3413_v11  ;;  %v2703_v52 = vld [vmem:[%s3611_s1 + $0x58] sm:$0xff]   ;;  %v2711_v11 = vld [vmem:[%s3611_s1 + $0x48] sm:$0xff]  }
 0x165   : > { %v2524_v6 = vpop.f32.mrf.mxu0  ;;  %2468 = vmatprep.subr.bf16.mxu0 %v3336_v38  ;;  %v2704_v38 = vld [vmem:[%s3611_s1 + $0xa0] sm:$0xff]  }
 0x166   : > { %v680_v15 = vsel %vm3488_vm4, %v675_v19, %v679_v37 }
 0x167   : > { %681 = vst [vmem:[%s3480_s29] sm:$0xf] %v680_v15  ;;  %2489 = vmatpush3.bf16.msra.mxu1 %v3420_v29 }
 0x168   : > { %2469 = vmatpush3.bf16.msra.mxu0 %v3388_v0  ;;  %2490 = vmatprep.subr.bf16.mxu1 %v3427_v55  ;;  %v2707_v0 = vld [vmem:[%s3611_s1 + $0x50] sm:$0xff]   ;;  %v1758_v55 = vpop.permute.xlu1 %1757 }
 0x169   : > { %2470 = vmatprep.subr.bf16.mxu0 %v3395_v2  ;;  %v2708_v2 = vld [vmem:[%s3611_s1 + $0x98] sm:$0xff]   ;;  %v1805_v63 = vsel %vm312_vm0, %v3634_v13, %v1758_v55 }
 0x16b   : > { %2491 = vmatpush3.bf16.msra.mxu1 %v3434_v58  ;;  %v2712_v58 = vld [vmem:[%s3611_s1 + $0x90] sm:$0xff]  }
 0x16c   : > { %2471 = vmatpush3.bf16.msra.mxu0 %v3405_v5  ;;  %2492 = vmatprep.subr.bf16.mxu1 %v2702_v35  ;;  %v2710_v5 = vld [vmem:[%s3611_s1 + $0xd0] sm:$0xff]   ;;  %v1784_v16 = vpop.permute.xlu1 %1783 }
 0x16d   : > { %2472 = vmatprep.subr.bf16.mxu0 %v2703_v52  ;;  %v1813_v43 = vsel %vm312_vm0, %v1776_v57, %v1784_v16 }
 0x16f   : > { %2493 = vmatpush3.bf16.msra.mxu1 %v2704_v38 }
 0x170   : > { %2473 = vmatpush3.bf16.msra.mxu0 %v2705_v39  ;;  %2494 = vmatprep.subr.bf16.mxu1 %v2706_v50  ;;  %v2094_v50 = vld [vmem:[%s3480_s29 + $0x8] sm:$0xf] }
 0x171   : > { %2474 = vmatprep.subr.bf16.mxu0 %v2707_v0 }
 0x172   : > { %v2235_v32 = vpop.f32.mrf.mxu1 }
 0x173   : > { %2495 = vmatpush3.bf16.msra.mxu1 %v2708_v2 }
 0x174   : > { %2475 = vmatpush3.bf16.msra.mxu0 %v2709_v3  ;;  %v2236_v4 = vpop.f32.mrf.mxu1  ;;  %2496 = vmatprep.subr.bf16.mxu1 %v2710_v5 }
 0x175   : > { %2476 = vmatprep.subr.bf16.mxu0 %v2711_v11  ;;  %v2237_v18 = vadd.f32 %v2236_v4, %v2235_v32 }
 0x176   : > { %v2238_v29 = vpop.f32.mrf.mxu1 }
 0x177   : > { %2497 = vmatpush3.bf16.msra.mxu1 %v2712_v58  ;;  %v802_v17 = vadd.f32 %v2237_v18, %v3464_v61 }
 0x178   : > { %2477 = vmatpush3.bf16.msra.mxu0 %v2713_v36  ;;  %v2239_v9 = vpop.f32.mrf.mxu1  ;;  %2498 = vmatprep.subr.bf16.mxu1 %v2714_v26 }
 0x179   : > { %2478 = vmatprep.subr.bf16.mxu0 %v2715_v30 }
 0x17b   : > { %2499 = vmatpush3.bf16.msra.mxu1 %v2716_v41 }
 0x17c   : > { %2479 = vmatpush3.bf16.msra.mxu0 %v2717_v60  ;;  %2500 = vmatprep.subr.bf16.mxu1 %v2718_v12  ;;  %v2112_v12 = vld [vmem:[%s3480_s29 + $0xc] sm:$0xf] }
 0x17d   : > { %2585 = vmatprep.subr.bf16.mxu0 %v3627_v7 }
 0x17f   : > { %v2257_v14 = vpop.f32.mrf.mxu0  ;;  %1855 = vmatmul.mubr.bf16.vlgmr.msra.gmra.mxu0 %v1805_v63  ;;  %2501 = vmatpush3.bf16.msra.mxu1 %v2719_v22 }
 0x180   : > { %2586 = vmatpush3.bf16.msra.mxu0 %v3100_v56  ;;  %2593 = vmatprep.mubr.msk.bf16.mxu0 %vm2730_vm1, %v3627_v7 }
 0x181   : > { %v2258_v46 = vpop.f32.mrf.mxu0  ;;  %2587 = vmatprep.subr.bf16.mxu0 %v3627_v7 }
 0x182   : > { %v2259_v27 = vadd.f32 %v2258_v46, %v2257_v14  ;;  %1895 = vmatmul.mubr.bf16.vlgmr.msra.gmra.mxu1 %v1813_v43  ;;  %v881_v21 = vpop.f32.mrf.mxu1 }
 0x183   : > { %v2260_v33 = vpop.f32.mrf.mxu0 }
 0x184   : > { %v842_v31 = vadd.f32 %v2259_v27, %v802_v17  ;;  %2588 = vmatpush3.bf16.msra.mxu0 %v3111_v42  ;;  %v2535_v59 = vpop.f32.mrf.mxu1 }
 0x185   : > { %v2261_v56 = vpop.f32.mrf.mxu0  ;;  %2589 = vmatprep.subr.bf16.mxu0 %v3627_v7 }
 0x186   : > { %v882_v20 = vadd.f32 %v881_v21, %v842_v31  ;;  %v884_v23 = vpop.f32.mrf.mxu1 }
 0x188   : > { %v887_v40 = vmax.f32 %v882_v20, 0.0  ;;  %2590 = vmatpush3.bf16.msra.mxu0 %v3125_v10  ;;  %v2536_v24 = vpop.f32.mrf.mxu1 }
 0x189   : > { %2591 = vmatprep.subr.bf16.mxu0 %v3627_v7 }
 0x18a   : > { %v888_v48 = vpack.c.bf16 %v887_v40, %v887_v40 }
 0x18c   : > { %v891_v42 = vsel %vm3488_vm4, %v888_v48, %v2076_v45  ;;  %2592 = vmatpush3.bf16.msra.mxu0 %v3135_v34  ;;  %v2130_v45 = vld [vmem:[%s3480_s29 + $0x10] sm:$0xf] }
 0x18d   : > { %2077 = vst [vmem:[%s3480_s29 + $0x4] sm:$0xf] %v891_v42 }
 0x18f   : > { %2594 = vmatmul.mubr.msk.bf16.vlgmr.msra.gmra.mxu0 %vm312_vm0, %v1802_v28 }
 0x19f   : > { %v2284_v44 = vpop.f32.mrf.mxu0 }
 0x1a1   : > { %v2285_v51 = vpop.f32.mrf.mxu0 }
 0x1a2   : > { %v2306_v53 = vpop.f32.mrf.mxu1  ;;  %v2286_v7 = vadd.f32 %v2285_v51, %v2284_v44 }
 0x1a3   : > { %v2287_v49 = vpop.f32.mrf.mxu0 }
 0x1a4   : > { %v2307_v10 = vpop.f32.mrf.mxu1  ;;  %v1013_v15 = vadd.f32 %v2286_v7, %v3464_v61 }
 0x1a5   : > { %v2288_v37 = vpop.f32.mrf.mxu0  ;;  %v2308_v6 = vadd.f32 %v2307_v10, %v2306_v53 }
 0x1a6   : > { %v2309_v47 = vpop.f32.mrf.mxu1 }
 0x1a7   : > { %v1053_v35 = vadd.f32 %v2308_v6, %v1013_v15 }
 0x1a8   : > { %v2310_v19 = vpop.f32.mrf.mxu1 }
 0x1af   : > { %v1092_v52 = vpop.f32.mrf.mxu0 }
 0x1b0   : > { %v1093_v34 = vadd.f32 %v1092_v52, %v1053_v35 }
 0x1b1   : > { %v2547_v38 = vpop.f32.mrf.mxu0 }
 0x1b2   : > { %v1098_v39 = vmax.f32 %v1093_v34, 0.0 }
 0x1b3   : > { %v1095_v0 = vpop.f32.mrf.mxu0 }
 0x1b4   : > { %v1099_v32 = vpack.c.bf16 %v1098_v39, %v1098_v39 }
 0x1b5   : > { %v2548_v1 = vpop.f32.mrf.mxu0 }
 0x1b6   : > { %v1102_v2 = vsel %vm3488_vm4, %v1099_v32, %v2094_v50  ;;  %v2148_v1 = vld [vmem:[%s3480_s29 + $0x14] sm:$0xf] }
 0x1b7   : > { %2095 = vst [vmem:[%s3480_s29 + $0x8] sm:$0xf] %v1102_v2 }
 0x1c2   : > { %v2333_v3 = vpop.f32.mrf.mxu1 }
 0x1c4   : > { %v2334_v4 = vpop.f32.mrf.mxu1 }
 0x1c5   : > { %v2335_v29 = vadd.f32 %v2334_v4, %v2333_v3 }
 0x1c6   : > { %v2336_v5 = vpop.f32.mrf.mxu1 }
 0x1c7   : > { %v1224_v62 = vadd.f32 %v2335_v29, %v3464_v61 }
 0x1c8   : > { %v2337_v11 = vpop.f32.mrf.mxu1 }
 0x1cf   : > { %v2355_v55 = vpop.f32.mrf.mxu0 }
 0x1d1   : > { %v2356_v58 = vpop.f32.mrf.mxu0 }
 0x1d2   : > { %v2357_v8 = vadd.f32 %v2356_v58, %v2355_v55  ;;  %v1303_v36 = vpop.f32.mrf.mxu1 }
 0x1d3   : > { %v2358_v9 = vpop.f32.mrf.mxu0 }
 0x1d4   : > { %v1264_v26 = vadd.f32 %v2357_v8, %v1224_v62  ;;  %v2559_v30 = vpop.f32.mrf.mxu1 }
 0x1d5   : > { %v2359_v41 = vpop.f32.mrf.mxu0 }
 0x1d6   : > { %v1304_v57 = vadd.f32 %v1303_v36, %v1264_v26  ;;  %v1306_v60 = vpop.f32.mrf.mxu1 }
 0x1d8   : > { %v1309_v13 = vmax.f32 %v1304_v57, 0.0  ;;  %v2560_v63 = vpop.f32.mrf.mxu1 }
 0x1d9   : > { %v2166_v63 = vld [vmem:[%s3480_s29 + $0x18] sm:$0xf] }
 0x1da   : > { %v1310_v16 = vpack.c.bf16 %v1309_v13, %v1309_v13 }
 0x1dc   : > { %v1313_v18 = vsel %vm3488_vm4, %v1310_v16, %v2112_v12 }
 0x1dd   : > { %2113 = vst [vmem:[%s3480_s29 + $0xc] sm:$0xf] %v1313_v18 }
 0x1ef   : > { %v2382_v14 = vpop.f32.mrf.mxu0 }
 0x1f1   : > { %v2383_v22 = vpop.f32.mrf.mxu0 }
 0x1f2   : > { %v2404_v43 = vpop.f32.mrf.mxu1  ;;  %v2384_v33 = vadd.f32 %v2383_v22, %v2382_v14 }
 0x1f3   : > { %v2385_v46 = vpop.f32.mrf.mxu0 }
 0x1f4   : > { %v2405_v17 = vpop.f32.mrf.mxu1  ;;  %v1435_v56 = vadd.f32 %v2384_v33, %v3464_v61 }
 0x1f5   : > { %v2386_v27 = vpop.f32.mrf.mxu0  ;;  %v2406_v59 = vadd.f32 %v2405_v17, %v2404_v43 }
 0x1f6   : > { %v2407_v21 = vpop.f32.mrf.mxu1 }
 0x1f7   : > { %v1475_v20 = vadd.f32 %v2406_v59, %v1435_v56 }
 0x1f8   : > { %v2408_v31 = vpop.f32.mrf.mxu1 }
 0x1ff   : > { %v1514_v23 = vpop.f32.mrf.mxu0 }
 0x200   : > { %v1515_v25 = vadd.f32 %v1514_v23, %v1475_v20 }
 0x201   : > { %v2571_v40 = vpop.f32.mrf.mxu0 }
 0x202   : > { %v1520_v24 = vmax.f32 %v1515_v25, 0.0 }
 0x203   : > { %v1517_v48 = vpop.f32.mrf.mxu0 }
 0x204   : > { %v1521_v28 = vpack.c.bf16 %v1520_v24, %v1520_v24 }
 0x205   : > { %v2572_v42 = vpop.f32.mrf.mxu0 }
 0x206   : > { %v1524_v44 = vsel %vm3488_vm4, %v1521_v28, %v2130_v45 }
 0x207   : > { %2131 = vst [vmem:[%s3480_s29 + $0x10] sm:$0xf] %v1524_v44 }
 0x212   : > { %v2431_v51 = vpop.f32.mrf.mxu1 }
 0x214   : > { %v2432_v53 = vpop.f32.mrf.mxu1 }
 0x215   : > { %v2433_v37 = vadd.f32 %v2432_v53, %v2431_v51 }
 0x216   : > { %v2434_v49 = vpop.f32.mrf.mxu1 }
 0x217   : > { %v1646_v19 = vadd.f32 %v2433_v37, %v3464_v61 }
 0x218   : > { %v2435_v10 = vpop.f32.mrf.mxu1 }
 0x21f   : > { %v2453_v47 = vpop.f32.mrf.mxu0 }
 0x221   : > { %v2454_v7 = vpop.f32.mrf.mxu0 }
 0x222   : > { %v2455_v6 = vadd.f32 %v2454_v7, %v2453_v47  ;;  %v1725_v15 = vpop.f32.mrf.mxu1 }
 0x223   : > { %v2456_v35 = vpop.f32.mrf.mxu0 }
 0x224   : > { %v1686_v52 = vadd.f32 %v2455_v6, %v1646_v19  ;;  %v2583_v34 = vpop.f32.mrf.mxu1 }
 0x225   : > { %v2457_v38 = vpop.f32.mrf.mxu0 }
 0x226   : > { %v1726_v39 = vadd.f32 %v1725_v15, %v1686_v52  ;;  %v1728_v50 = vpop.f32.mrf.mxu1 }
 0x228   : > { %v1731_v0 = vmax.f32 %v1726_v39, 0.0  ;;  %v2584_v32 = vpop.f32.mrf.mxu1 }
 0x22a   : > { %v1732_v2 = vpack.c.bf16 %v1731_v0, %v1731_v0 }
 0x22c   : > { %v1735_v3 = vsel %vm3488_vm4, %v1732_v2, %v2148_v1 }
 0x22d   : > { %2149 = vst [vmem:[%s3480_s29 + $0x14] sm:$0xf] %v1735_v3 }
 0x23f   : > { %v2480_v4 = vpop.f32.mrf.mxu0 }
 0x241   : > { %v2481_v5 = vpop.f32.mrf.mxu0 }
 0x242   : > { %v2502_v11 = vpop.f32.mrf.mxu1  ;;  %v2482_v8 = vadd.f32 %v2481_v5, %v2480_v4 }
 0x243   : > { %v2483_v29 = vpop.f32.mrf.mxu0 }
 0x244   : > { %v2503_v55 = vpop.f32.mrf.mxu1  ;;  %v1857_v26 = vadd.f32 %v2482_v8, %v3464_v61 }
 0x245   : > { %v2484_v58 = vpop.f32.mrf.mxu0  ;;  %v2504_v9 = vadd.f32 %v2503_v55, %v2502_v11 }
 0x246   : > { %v2505_v62 = vpop.f32.mrf.mxu1 }
 0x247   : > { %v1897_v30 = vadd.f32 %v2504_v9, %v1857_v26 }
 0x248   : > { %v2506_v36 = vpop.f32.mrf.mxu1 }
 0x24f   : > { %v1936_v41 = vpop.f32.mrf.mxu0 }
 0x250   : > { %v1937_v57 = vadd.f32 %v1936_v41, %v1897_v30 }
 0x251   : > { %v2595_v60 = vpop.f32.mrf.mxu0 }
 0x252   : > { %v1942_v13 = vmax.f32 %v1937_v57, 0.0 }
 0x253   : > { %v1939_v12 = vpop.f32.mrf.mxu0 }
 0x254   : > { %v1943_v16 = vpack.c.bf16 %v1942_v13, %v1942_v13 }
 0x255   : > { %v2596_v18 = vpop.f32.mrf.mxu0 }
 0x256   : > { %v1946_v14 = vsel %vm3488_vm4, %v1943_v16, %v2166_v63 }
 0x257   : > { %2167 = vst [vmem:[%s3480_s29 + $0x18] sm:$0xf] %v1946_v14 }
 0x258 PF: > { %s13_s12 = sadd.s32 1, %s2726_s12  }
 0x259   : > { %p10_p4 = scmp.ge.s32.totalorder %s13_s12, 4  }
 0x25b   :  { %12 = sbr.rel (!%p10_p4) target bundleno = 1 (0x1), region = 76 }

// kernel: qnetwork_forward.7
= control target key start
LH: loop header
LB: loop body
LE: loop exit
PB: predicated region body
PF: predicated region fallthrough
CT: control target
= control target key end

     0   :  { %v812_v36 = vlaneseq  ;;  %v8478_v37 = vmov 1966171168   ;;  %vm4941_vm0 = vcmask 523264   ;;  %s11222_s0 = inlined_call_operand.vmem [shape: bf16[2,3136], index: 0, kind: input, shape index: {}]   ;;  %s11223_s1 = inlined_call_operand.vmem [shape: bf16[3136,512], index: 1, kind: input, shape index: {}]   ;;  %s11224_s2 = inlined_call_operand.vmem [shape: f32[1,512], index: 2, kind: input, shape index: {}]   ;;  %s11225_s3 = inlined_call_operand.vmem [shape: bf16[512,128], index: 3, kind: input, shape index: {}]   ;;  %s11226_s4 = inlined_call_operand.vmem [shape: f32[1,128], index: 4, kind: input, shape index: {}]   ;;  %s11227_s5 = inlined_call_operand.hbm [shape: f32[2,128], index: 5, kind: output, shape index: {}]  }
   0x1   :  { %v7244_v0 = vld [vmem:[%s11223_s1 + $0xe4] ss:$16 sps:$4 sm:$0xff]   ;;  %v7248_v2 = vld [vmem:[%s11223_s1 + $0xe0] ss:$16 sps:$4 sm:$0xff]   ;;  %v838_v38 = vunpack.c.l.s4 %v8478_v37 }
   0x2   :  { %v7246_v1 = vld [vmem:[%s11223_s1 + $0x2e4] ss:$16 sps:$4 sm:$0xff]   ;;  %4945 = vmatprep.subr.bf16.mxu0 %v7244_v0  ;;  %v7249_v3 = vld [vmem:[%s11223_s1 + $0x2e0] ss:$16 sps:$4 sm:$0xff]   ;;  %v8628_v42 = vshrl.u32 %v812_v36, 7 }
   0x3   :  { %4986 = vmatprep.subr.bf16.mxu1 %v7246_v1  ;;  %v7250_v4 = vld [vmem:[%s11223_s1 + $0xc4] ss:$16 sps:$4 sm:$0xff]   ;;  %4946 = vmatpush1.bf16.msra.mxu0 %v7248_v2  ;;  %v7254_v6 = vld [vmem:[%s11223_s1 + $0xc0] ss:$16 sps:$4 sm:$0xff]   ;;  %v839_v43 = vunpack.c.0.s8 %v838_v38 }
   0x4   :  { %4987 = vmatpush1.bf16.msra.mxu1 %v7249_v3  ;;  %v7252_v5 = vld [vmem:[%s11223_s1 + $0x2c4] ss:$16 sps:$4 sm:$0xff]   ;;  %4947 = vmatprep.subr.bf16.mxu0 %v7250_v4  ;;  %v7255_v7 = vld [vmem:[%s11223_s1 + $0x2c0] ss:$16 sps:$4 sm:$0xff]  }
   0x5   :  { %4988 = vmatprep.subr.bf16.mxu1 %v7252_v5  ;;  %v7256_v8 = vld [vmem:[%s11223_s1 + $0xa4] ss:$16 sps:$4 sm:$0xff]   ;;  %v7260_v10 = vld [vmem:[%s11223_s1 + $0xa0] ss:$16 sps:$4 sm:$0xff]   ;;  %v8646_v49 = vsub.s32 %v839_v43, %v8628_v42 }
   0x6   :  { %v7258_v9 = vld [vmem:[%s11223_s1 + $0x2a4] ss:$16 sps:$4 sm:$0xff]   ;;  %v7261_v11 = vld [vmem:[%s11223_s1 + $0x2a0] ss:$16 sps:$4 sm:$0xff]  }
   0x7   :  { %4948 = vmatpush1.bf16.msra.mxu0 %v7254_v6  ;;  %v7262_v12 = vld [vmem:[%s11223_s1 + $0x84] ss:$16 sps:$4 sm:$0xff]   ;;  %v7266_v14 = vld [vmem:[%s11223_s1 + $0x80] ss:$16 sps:$4 sm:$0xff]  }
   0x8   :  { %4989 = vmatpush1.bf16.msra.mxu1 %v7255_v7  ;;  %4949 = vmatprep.subr.bf16.mxu0 %v7256_v8  ;;  %v7264_v13 = vld [vmem:[%s11223_s1 + $0x284] ss:$16 sps:$4 sm:$0xff]   ;;  %v7267_v15 = vld [vmem:[%s11223_s1 + $0x280] ss:$16 sps:$4 sm:$0xff]  }
   0x9   :  { %4990 = vmatprep.subr.bf16.mxu1 %v7258_v9  ;;  %v7268_v16 = vld [vmem:[%s11223_s1 + $0x64] ss:$16 sps:$4 sm:$0xff]   ;;  %v7272_v18 = vld [vmem:[%s11223_s1 + $0x60] ss:$16 sps:$4 sm:$0xff]  }
   0xa   :  { %v7270_v17 = vld [vmem:[%s11223_s1 + $0x264] ss:$16 sps:$4 sm:$0xff]   ;;  %v7273_v19 = vld [vmem:[%s11223_s1 + $0x260] ss:$16 sps:$4 sm:$0xff]  }
   0xb   :  { %4950 = vmatpush1.bf16.msra.mxu0 %v7260_v10  ;;  %v7274_v20 = vld [vmem:[%s11223_s1 + $0x44] ss:$16 sps:$4 sm:$0xff]   ;;  %v7278_v22 = vld [vmem:[%s11223_s1 + $0x40] ss:$16 sps:$4 sm:$0xff]  }
   0xc   :  { %4991 = vmatpush1.bf16.msra.mxu1 %v7261_v11  ;;  %4951 = vmatprep.subr.bf16.mxu0 %v7262_v12  ;;  %v7276_v21 = vld [vmem:[%s11223_s1 + $0x244] ss:$16 sps:$4 sm:$0xff]   ;;  %v7279_v23 = vld [vmem:[%s11223_s1 + $0x240] ss:$16 sps:$4 sm:$0xff]  }
   0xd   :  { %4992 = vmatprep.subr.bf16.mxu1 %v7264_v13  ;;  %v7280_v24 = vld [vmem:[%s11223_s1 + $0x24] ss:$16 sps:$4 sm:$0xff]   ;;  %v7284_v26 = vld [vmem:[%s11223_s1 + $0x20] ss:$16 sps:$4 sm:$0xff]  }
   0xe   :  { %v7282_v25 = vld [vmem:[%s11223_s1 + $0x224] ss:$16 sps:$4 sm:$0xff]   ;;  %v7285_v27 = vld [vmem:[%s11223_s1 + $0x220] ss:$16 sps:$4 sm:$0xff]  }
   0xf   :  { %4952 = vmatpush1.bf16.msra.mxu0 %v7266_v14  ;;  %v7286_v28 = vld [vmem:[%s11223_s1 + $0x4] ss:$16 sps:$4 sm:$0xff]   ;;  %v7290_v30 = vld [vmem:[%s11223_s1] ss:$16 sps:$4 sm:$0xff]  }
  0x10   :  { %4993 = vmatpush1.bf16.msra.mxu1 %v7267_v15  ;;  %4953 = vmatprep.subr.bf16.mxu0 %v7268_v16  ;;  %v7288_v29 = vld [vmem:[%s11223_s1 + $0x204] ss:$16 sps:$4 sm:$0xff]   ;;  %v7291_v31 = vld [vmem:[%s11223_s1 + $0x200] ss:$16 sps:$4 sm:$0xff]  }
  0x11   :  { %4994 = vmatprep.subr.bf16.mxu1 %v7270_v17  ;;  %v7292_v32 = vld [vmem:[%s11223_s1 + $0x1e4] ss:$16 sps:$4 sm:$0xff]   ;;  %v7296_v34 = vld [vmem:[%s11223_s1 + $0x1e0] ss:$16 sps:$4 sm:$0xff]  }
  0x12   :  { %v7294_v33 = vld [vmem:[%s11223_s1 + $0x3e4] ss:$16 sps:$4 sm:$0xff]   ;;  %v7297_v35 = vld [vmem:[%s11223_s1 + $0x3e0] ss:$16 sps:$4 sm:$0xff]  }
  0x13   :  { %4954 = vmatpush1.bf16.msra.mxu0 %v7272_v18  ;;  %v7298_v39 = vld [vmem:[%s11223_s1 + $0x1c4] ss:$16 sps:$4 sm:$0xff]   ;;  %v7302_v41 = vld [vmem:[%s11223_s1 + $0x1c0] ss:$16 sps:$4 sm:$0xff]  }
  0x14   :  { %4995 = vmatpush1.bf16.msra.mxu1 %v7273_v19  ;;  %4955 = vmatprep.subr.bf16.mxu0 %v7274_v20  ;;  %v7300_v40 = vld [vmem:[%s11223_s1 + $0x3c4] ss:$16 sps:$4 sm:$0xff]   ;;  %v7303_v44 = vld [vmem:[%s11223_s1 + $0x3c0] ss:$16 sps:$4 sm:$0xff]  }
  0x15   :  { %4996 = vmatprep.subr.bf16.mxu1 %v7276_v21  ;;  %v7304_v45 = vld [vmem:[%s11223_s1 + $0x1a4] ss:$16 sps:$4 sm:$0xff]   ;;  %v7308_v47 = vld [vmem:[%s11223_s1 + $0x1a0] ss:$16 sps:$4 sm:$0xff]  }
  0x16   :  { %v7306_v46 = vld [vmem:[%s11223_s1 + $0x3a4] ss:$16 sps:$4 sm:$0xff]   ;;  %v7309_v48 = vld [vmem:[%s11223_s1 + $0x3a0] ss:$16 sps:$4 sm:$0xff]  }
  0x17   :  { %4956 = vmatpush1.bf16.msra.mxu0 %v7278_v22  ;;  %v7310_v50 = vld [vmem:[%s11223_s1 + $0x184] ss:$16 sps:$4 sm:$0xff]   ;;  %v7314_v53 = vld [vmem:[%s11223_s1 + $0x180] ss:$16 sps:$4 sm:$0xff]  }
  0x18   :  { %4997 = vmatpush1.bf16.msra.mxu1 %v7279_v23  ;;  %4957 = vmatprep.subr.bf16.mxu0 %v7280_v24  ;;  %v7312_v51 = vld [vmem:[%s11223_s1 + $0x384] ss:$16 sps:$4 sm:$0xff]   ;;  %v7315_v55 = vld [vmem:[%s11223_s1 + $0x380] ss:$16 sps:$4 sm:$0xff]  }
  0x19   :  { %4998 = vmatprep.subr.bf16.mxu1 %v7282_v25  ;;  %v22_v52 = vld [vmem:[%s11222_s0] sm:$0xff] }
  0x1a   :  { %v843_v54 = vrot.slane %v22_v52, %v8646_v49  ;;  %v7316_v56 = vld [vmem:[%s11223_s1 + $0x164] ss:$16 sps:$4 sm:$0xff]   ;;  %v7320_v59 = vld [vmem:[%s11223_s1 + $0x160] ss:$16 sps:$4 sm:$0xff]   ;;  %v836_v1 = vcombine.high %v22_v52, %v22_v52 }
  0x1b   :  { %4958 = vmatpush1.bf16.msra.mxu0 %v7284_v26  ;;  %v7318_v57 = vld [vmem:[%s11223_s1 + $0x364] ss:$16 sps:$4 sm:$0xff]   ;;  %v7321_v61 = vld [vmem:[%s11223_s1 + $0x360] ss:$16 sps:$4 sm:$0xff]  }
  0x1c   :  { %4999 = vmatpush1.bf16.msra.mxu1 %v7285_v27  ;;  %4959 = vmatprep.subr.bf16.mxu0 %v7286_v28  ;;  %v851_v58 = vcombine.high %v843_v54, %v843_v54  ;;  %v7322_v62 = vld [vmem:[%s11223_s1 + $0x144] ss:$16 sps:$4 sm:$0xff]   ;;  %v7326_v2 = vld [vmem:[%s11223_s1 + $0x140] ss:$16 sps:$4 sm:$0xff]   ;;  %v8704_v6 = vrot.slane %v836_v1, %v8646_v49  ;;  %v8724_v13 = vrot.slane %v843_v54, %v8646_v49 }
  0x1d   :  { %5000 = vmatprep.subr.bf16.mxu1 %v7288_v29  ;;  %v7324_v63 = vld [vmem:[%s11223_s1 + $0x344] ss:$16 sps:$4 sm:$0xff]   ;;  %v7327_v3 = vld [vmem:[%s11223_s1 + $0x340] ss:$16 sps:$4 sm:$0xff]  }
  0x1e   :  { %v8674_v60 = vrot.slane %v851_v58, %v8646_v49  ;;  %v7328_v4 = vld [vmem:[%s11223_s1 + $0x124] ss:$16 sps:$4 sm:$0xff]   ;;  %v7332_v7 = vld [vmem:[%s11223_s1 + $0x120] ss:$16 sps:$4 sm:$0xff]   ;;  %v852_v11 = vcombine.high %v8704_v6, %v8704_v6  ;;  %v8740_v18 = vcombine.high %v8724_v13, %v8724_v13 }
  0x1f   :  { %4960 = vmatpush1.bf16.msra.mxu0 %v7290_v30  ;;  %v7330_v5 = vld [vmem:[%s11223_s1 + $0x324] ss:$16 sps:$4 sm:$0xff]   ;;  %v7333_v8 = vld [vmem:[%s11223_s1 + $0x320] ss:$16 sps:$4 sm:$0xff]  }
  0x20   :  { %5001 = vmatpush1.bf16.msra.mxu1 %v7291_v31  ;;  %4961 = vmatprep.subr.bf16.mxu0 %v7292_v32  ;;  %v8687_v0 = vcombine.high %v8674_v60, %v8674_v60  ;;  %v7334_v9 = vld [vmem:[%s11223_s1 + $0x104] ss:$16 sps:$4 sm:$0xff]   ;;  %v7338_v12 = vld [vmem:[%s11223_s1 + $0x100] ss:$16 sps:$4 sm:$0xff]   ;;  %v8736_v17 = vrot.slane %v852_v11, %v8646_v49 }
  0x21   :  { %5002 = vmatprep.subr.bf16.mxu1 %v7294_v33  ;;  %4977 = vmatprep.mubr.bf16.mxu0 %v8674_v60  ;;  %v7336_v10 = vld [vmem:[%s11223_s1 + $0x304] ss:$16 sps:$4 sm:$0xff]   ;;  %v7339_v14 = vld [vmem:[%s11223_s1 + $0x300] ss:$16 sps:$4 sm:$0xff]  }
  0x22   :  { %5018 = vmatprep.mubr.bf16.mxu1 %v8687_v0  ;;  %v7342_v15 = vld [vmem:[%s11223_s1 + $0x4e4] ss:$16 sps:$4 sm:$0xff]   ;;  %v7340_v19 = vld [vmem:[%s11223_s1 + $0x4e0] ss:$16 sps:$4 sm:$0xff]   ;;  %v8756_v23 = vcombine.high %v8736_v17, %v8736_v17 }
  0x23   :  { %4962 = vmatpush2.bf16.msra.mxu0 %v7296_v34  ;;  %v7345_v16 = vld [vmem:[%s11223_s1 + $0x6e4] ss:$16 sps:$4 sm:$0xff]   ;;  %v7343_v20 = vld [vmem:[%s11223_s1 + $0x6e0] ss:$16 sps:$4 sm:$0xff]  }
  0x24   :  { %5003 = vmatpush2.bf16.msra.mxu1 %v7297_v35  ;;  %4963 = vmatprep.subr.bf16.mxu0 %v7298_v39  ;;  %v7348_v21 = vld [vmem:[%s11223_s1 + $0x4c4] ss:$16 sps:$4 sm:$0xff]   ;;  %v7346_v24 = vld [vmem:[%s11223_s1 + $0x4c0] ss:$16 sps:$4 sm:$0xff]  }
  0x25   :  { %5004 = vmatprep.subr.bf16.mxu1 %v7300_v40  ;;  %v7351_v22 = vld [vmem:[%s11223_s1 + $0x6c4] ss:$16 sps:$4 sm:$0xff]   ;;  %v7349_v25 = vld [vmem:[%s11223_s1 + $0x6c0] ss:$16 sps:$4 sm:$0xff]  }
  0x26   :  { %v7354_v26 = vld [vmem:[%s11223_s1 + $0x4a4] ss:$16 sps:$4 sm:$0xff]   ;;  %v7352_v28 = vld [vmem:[%s11223_s1 + $0x4a0] ss:$16 sps:$4 sm:$0xff]  }
  0x27   :  { %4964 = vmatpush2.bf16.msra.mxu0 %v7302_v41  ;;  %v7357_v27 = vld [vmem:[%s11223_s1 + $0x6a4] ss:$16 sps:$4 sm:$0xff]   ;;  %v7355_v29 = vld [vmem:[%s11223_s1 + $0x6a0] ss:$16 sps:$4 sm:$0xff]  }
  0x28   :  { %5005 = vmatpush2.bf16.msra.mxu1 %v7303_v44  ;;  %4965 = vmatprep.subr.bf16.mxu0 %v7304_v45  ;;  %v7360_v30 = vld [vmem:[%s11223_s1 + $0x484] ss:$16 sps:$4 sm:$0xff]   ;;  %v7358_v32 = vld [vmem:[%s11223_s1 + $0x480] ss:$16 sps:$4 sm:$0xff]  }
  0x29   :  { %5006 = vmatprep.subr.bf16.mxu1 %v7306_v46  ;;  %v7363_v31 = vld [vmem:[%s11223_s1 + $0x684] ss:$16 sps:$4 sm:$0xff]   ;;  %v7361_v33 = vld [vmem:[%s11223_s1 + $0x680] ss:$16 sps:$4 sm:$0xff]  }
  0x2a   :  { %v7366_v34 = vld [vmem:[%s11223_s1 + $0x464] ss:$16 sps:$4 sm:$0xff]   ;;  %v7364_v36 = vld [vmem:[%s11223_s1 + $0x460] ss:$16 sps:$4 sm:$0xff]  }
  0x2b   :  { %4966 = vmatpush2.bf16.msra.mxu0 %v7308_v47  ;;  %v7369_v35 = vld [vmem:[%s11223_s1 + $0x664] ss:$16 sps:$4 sm:$0xff]   ;;  %v7367_v37 = vld [vmem:[%s11223_s1 + $0x660] ss:$16 sps:$4 sm:$0xff]  }
  0x2c   :  { %5007 = vmatpush2.bf16.msra.mxu1 %v7309_v48  ;;  %4967 = vmatprep.subr.bf16.mxu0 %v7310_v50  ;;  %v7372_v38 = vld [vmem:[%s11223_s1 + $0x444] ss:$16 sps:$4 sm:$0xff]   ;;  %v7370_v40 = vld [vmem:[%s11223_s1 + $0x440] ss:$16 sps:$4 sm:$0xff]  }
  0x2d   :  { %5008 = vmatprep.subr.bf16.mxu1 %v7312_v51  ;;  %v7375_v39 = vld [vmem:[%s11223_s1 + $0x644] ss:$16 sps:$4 sm:$0xff]   ;;  %v7373_v41 = vld [vmem:[%s11223_s1 + $0x640] ss:$16 sps:$4 sm:$0xff]  }
  0x2e   :  { %v7378_v43 = vld [vmem:[%s11223_s1 + $0x424] ss:$16 sps:$4 sm:$0xff]   ;;  %v7376_v45 = vld [vmem:[%s11223_s1 + $0x420] ss:$16 sps:$4 sm:$0xff]  }
  0x2f   :  { %4968 = vmatpush2.bf16.msra.mxu0 %v7314_v53  ;;  %v7381_v44 = vld [vmem:[%s11223_s1 + $0x624] ss:$16 sps:$4 sm:$0xff]   ;;  %v7379_v46 = vld [vmem:[%s11223_s1 + $0x620] ss:$16 sps:$4 sm:$0xff]  }
  0x30   :  { %5009 = vmatpush2.bf16.msra.mxu1 %v7315_v55  ;;  %4969 = vmatprep.subr.bf16.mxu0 %v7316_v56  ;;  %v7384_v47 = vld [vmem:[%s11223_s1 + $0x404] ss:$16 sps:$4 sm:$0xff]   ;;  %v7382_v50 = vld [vmem:[%s11223_s1 + $0x400] ss:$16 sps:$4 sm:$0xff]  }
  0x31   :  { %5010 = vmatprep.subr.bf16.mxu1 %v7318_v57  ;;  %v7387_v48 = vld [vmem:[%s11223_s1 + $0x604] ss:$16 sps:$4 sm:$0xff]   ;;  %v7385_v51 = vld [vmem:[%s11223_s1 + $0x600] ss:$16 sps:$4 sm:$0xff]  }
  0x32   :  { %v7390_v52 = vld [vmem:[%s11223_s1 + $0x5e4] ss:$16 sps:$4 sm:$0xff]   ;;  %v7388_v54 = vld [vmem:[%s11223_s1 + $0x5e0] ss:$16 sps:$4 sm:$0xff]  }
  0x33   :  { %4970 = vmatpush2.bf16.msra.mxu0 %v7320_v59  ;;  %v7393_v53 = vld [vmem:[%s11223_s1 + $0x7e4] ss:$16 sps:$4 sm:$0xff]   ;;  %v7391_v55 = vld [vmem:[%s11223_s1 + $0x7e0] ss:$16 sps:$4 sm:$0xff]  }
  0x34   :  { %5011 = vmatpush2.bf16.msra.mxu1 %v7321_v61  ;;  %4971 = vmatprep.subr.bf16.mxu0 %v7322_v62  ;;  %v7396_v56 = vld [vmem:[%s11223_s1 + $0x5c4] ss:$16 sps:$4 sm:$0xff]   ;;  %v7394_v58 = vld [vmem:[%s11223_s1 + $0x5c0] ss:$16 sps:$4 sm:$0xff]  }
  0x35   :  { %5012 = vmatprep.subr.bf16.mxu1 %v7324_v63  ;;  %v7399_v57 = vld [vmem:[%s11223_s1 + $0x7c4] ss:$16 sps:$4 sm:$0xff]   ;;  %v7397_v59 = vld [vmem:[%s11223_s1 + $0x7c0] ss:$16 sps:$4 sm:$0xff]  }
  0x36   :  { %v7402_v61 = vld [vmem:[%s11223_s1 + $0x5a4] ss:$16 sps:$4 sm:$0xff]   ;;  %v7400_v63 = vld [vmem:[%s11223_s1 + $0x5a0] ss:$16 sps:$4 sm:$0xff]  }
  0x37   :  { %4972 = vmatpush2.bf16.msra.mxu0 %v7326_v2  ;;  %v7405_v62 = vld [vmem:[%s11223_s1 + $0x7a4] ss:$16 sps:$4 sm:$0xff]   ;;  %v7403_v1 = vld [vmem:[%s11223_s1 + $0x7a0] ss:$16 sps:$4 sm:$0xff]  }
  0x38   :  { %5013 = vmatpush2.bf16.msra.mxu1 %v7327_v3  ;;  %4973 = vmatprep.subr.bf16.mxu0 %v7328_v4  ;;  %v7408_v2 = vld [vmem:[%s11223_s1 + $0x584] ss:$16 sps:$4 sm:$0xff]   ;;  %v7406_v4 = vld [vmem:[%s11223_s1 + $0x580] ss:$16 sps:$4 sm:$0xff]  }
  0x39   :  { %5014 = vmatprep.subr.bf16.mxu1 %v7330_v5  ;;  %v7411_v3 = vld [vmem:[%s11223_s1 + $0x784] ss:$16 sps:$4 sm:$0xff]   ;;  %v7409_v5 = vld [vmem:[%s11223_s1 + $0x780] ss:$16 sps:$4 sm:$0xff]  }
  0x3a   :  { %v7420_v11 = vld [vmem:[%s11223_s1 + $0x544] ss:$16 sps:$4 sm:$0xff]  }
  0x3b   :  { %4974 = vmatpush2.bf16.msra.mxu0 %v7332_v7  ;;  %v7414_v7 = vld [vmem:[%s11223_s1 + $0x564] ss:$16 sps:$4 sm:$0xff]  }
  0x3c   :  { %5015 = vmatpush2.bf16.msra.mxu1 %v7333_v8  ;;  %4975 = vmatprep.subr.bf16.mxu0 %v7334_v9  ;;  %v7417_v8 = vld [vmem:[%s11223_s1 + $0x764] ss:$16 sps:$4 sm:$0xff]   ;;  %v7412_v9 = vld [vmem:[%s11223_s1 + $0x560] ss:$16 sps:$4 sm:$0xff]  }
  0x3d   :  { %5016 = vmatprep.subr.bf16.mxu1 %v7336_v10  ;;  %v7415_v10 = vld [vmem:[%s11223_s1 + $0x760] ss:$16 sps:$4 sm:$0xff]  }
  0x3f   :  { %4976 = vmatpush2.bf16.msra.mxu0 %v7338_v12  ;;  %v7423_v12 = vld [vmem:[%s11223_s1 + $0x744] ss:$16 sps:$4 sm:$0xff]  }
  0x40   :  { %5017 = vmatpush2.bf16.msra.mxu1 %v7339_v14  ;;  %5027 = vmatprep.subr.bf16.mxu0 %v7342_v15  ;;  %v7418_v14 = vld [vmem:[%s11223_s1 + $0x540] ss:$16 sps:$4 sm:$0xff]  }
  0x41   :  { %5068 = vmatprep.subr.bf16.mxu1 %v7345_v16  ;;  %v7421_v15 = vld [vmem:[%s11223_s1 + $0x740] ss:$16 sps:$4 sm:$0xff]   ;;  %v7426_v16 = vld [vmem:[%s11223_s1 + $0x524] ss:$16 sps:$4 sm:$0xff]  }
  0x42   :  { %4978 = vmatmul.mubr.bf16.vlgmr.msra.gmra.mxu0 %v8724_v13 }
  0x43   :  { %5019 = vmatmul.mubr.bf16.vlgmr.msra.gmra.mxu1 %v8740_v18  ;;  %5028 = vmatpush1.bf16.msra.mxu0 %v7340_v19  ;;  %v7429_v19 = vld [vmem:[%s11223_s1 + $0x724] ss:$16 sps:$4 sm:$0xff]  }
  0x44   :  { %5069 = vmatpush1.bf16.msra.mxu1 %v7343_v20  ;;  %5029 = vmatprep.subr.bf16.mxu0 %v7348_v21  ;;  %v7424_v20 = vld [vmem:[%s11223_s1 + $0x520] ss:$16 sps:$4 sm:$0xff]  }
  0x45   :  { %5070 = vmatprep.subr.bf16.mxu1 %v7351_v22  ;;  %5059 = vmatprep.mubr.bf16.mxu0 %v8736_v17  ;;  %v7427_v21 = vld [vmem:[%s11223_s1 + $0x720] ss:$16 sps:$4 sm:$0xff]   ;;  %v7432_v22 = vld [vmem:[%s11223_s1 + $0x504] ss:$16 sps:$4 sm:$0xff]  }
  0x46   :  { %5100 = vmatprep.mubr.bf16.mxu1 %v8756_v23 }
  0x47   :  { %5030 = vmatpush1.bf16.msra.mxu0 %v7346_v24  ;;  %v7435_v24 = vld [vmem:[%s11223_s1 + $0x704] ss:$16 sps:$4 sm:$0xff]  }
  0x48   :  { %5071 = vmatpush1.bf16.msra.mxu1 %v7349_v25  ;;  %5031 = vmatprep.subr.bf16.mxu0 %v7354_v26  ;;  %v7430_v25 = vld [vmem:[%s11223_s1 + $0x500] ss:$16 sps:$4 sm:$0xff]   ;;  %v8935_v26 = vrot.slane %v8704_v6, %v8646_v49 }
  0x49   :  { %5072 = vmatprep.subr.bf16.mxu1 %v7357_v27  ;;  %v7433_v27 = vld [vmem:[%s11223_s1 + $0x700] ss:$16 sps:$4 sm:$0xff]  }
  0x4a   :  { %v8948_v6 = vcombine.high %v8935_v26, %v8935_v26 }
  0x4b   :  { %5032 = vmatpush1.bf16.msra.mxu0 %v7352_v28  ;;  %v7439_v28 = vld [vmem:[%s11223_s1 + $0x8e4] ss:$16 sps:$4 sm:$0xff]  }
  0x4c   :  { %5073 = vmatpush1.bf16.msra.mxu1 %v7355_v29  ;;  %5033 = vmatprep.subr.bf16.mxu0 %v7360_v30  ;;  %v7442_v29 = vld [vmem:[%s11223_s1 + $0xae4] ss:$16 sps:$4 sm:$0xff]   ;;  %v7437_v30 = vld [vmem:[%s11223_s1 + $0x8e0] ss:$16 sps:$4 sm:$0xff]  }
  0x4d   :  { %5074 = vmatprep.subr.bf16.mxu1 %v7363_v31  ;;  %v7440_v31 = vld [vmem:[%s11223_s1 + $0xae0] ss:$16 sps:$4 sm:$0xff]  }
  0x4f   :  { %5034 = vmatpush1.bf16.msra.mxu0 %v7358_v32  ;;  %v8959_v32 = vld [vmem:[%s11222_s0 + $0x8] sm:$0xff] }
  0x50   :  { %5075 = vmatpush1.bf16.msra.mxu1 %v7361_v33  ;;  %5035 = vmatprep.subr.bf16.mxu0 %v7366_v34  ;;  %v7445_v33 = vld [vmem:[%s11223_s1 + $0x8c4] ss:$16 sps:$4 sm:$0xff]  }
  0x51   :  { %5076 = vmatprep.subr.bf16.mxu1 %v7369_v35  ;;  %v7448_v34 = vld [vmem:[%s11223_s1 + $0xac4] ss:$16 sps:$4 sm:$0xff]   ;;  %v8969_v35 = vrot.slane %v8959_v32, %v8646_v49 }
  0x53   :  { %5036 = vmatpush1.bf16.msra.mxu0 %v7364_v36  ;;  %v900_v36 = vcombine.high %v8969_v35, %v8969_v35 }
  0x54   :  { %5077 = vmatpush1.bf16.msra.mxu1 %v7367_v37  ;;  %5037 = vmatprep.subr.bf16.mxu0 %v7372_v38  ;;  %v7443_v37 = vld [vmem:[%s11223_s1 + $0x8c0] ss:$16 sps:$4 sm:$0xff]  }
  0x55   :  { %5078 = vmatprep.subr.bf16.mxu1 %v7375_v39  ;;  %v7446_v38 = vld [vmem:[%s11223_s1 + $0xac0] ss:$16 sps:$4 sm:$0xff]   ;;  %v7451_v39 = vld [vmem:[%s11223_s1 + $0x8a4] ss:$16 sps:$4 sm:$0xff]  }
  0x57   :  { %5038 = vmatpush1.bf16.msra.mxu0 %v7370_v40  ;;  %v7454_v40 = vld [vmem:[%s11223_s1 + $0xaa4] ss:$16 sps:$4 sm:$0xff]  }
  0x58   :  { %5079 = vmatpush1.bf16.msra.mxu1 %v7373_v41  ;;  %5039 = vmatprep.subr.bf16.mxu0 %v7378_v43  ;;  %v8988_v41 = vrot.slane %v900_v36, %v8646_v49  ;;  %v7515_v36 = vld [vmem:[%s11223_s1 + $0x940] ss:$16 sps:$4 sm:$0xff]  }
  0x59   :  { %5080 = vmatprep.subr.bf16.mxu1 %v7381_v44  ;;  %v7449_v44 = vld [vmem:[%s11223_s1 + $0x8a0] ss:$16 sps:$4 sm:$0xff]  }
  0x5a   :  { %v8993_v43 = vcombine.high %v8988_v41, %v8988_v41 }
  0x5b   :  { %5040 = vmatpush1.bf16.msra.mxu0 %v7376_v45  ;;  %v7452_v45 = vld [vmem:[%s11223_s1 + $0xaa0] ss:$16 sps:$4 sm:$0xff]  }
  0x5c   :  { %5081 = vmatpush1.bf16.msra.mxu1 %v7379_v46  ;;  %5041 = vmatprep.subr.bf16.mxu0 %v7384_v47  ;;  %v7457_v46 = vld [vmem:[%s11223_s1 + $0x884] ss:$16 sps:$4 sm:$0xff]  }
  0x5d   :  { %5082 = vmatprep.subr.bf16.mxu1 %v7387_v48  ;;  %v7460_v47 = vld [vmem:[%s11223_s1 + $0xa84] ss:$16 sps:$4 sm:$0xff]   ;;  %v7455_v48 = vld [vmem:[%s11223_s1 + $0x880] ss:$16 sps:$4 sm:$0xff]  }
  0x5f   :  { %5042 = vmatpush1.bf16.msra.mxu0 %v7382_v50  ;;  %v7458_v50 = vld [vmem:[%s11223_s1 + $0xa80] ss:$16 sps:$4 sm:$0xff]  }
  0x60   :  { %5083 = vmatpush1.bf16.msra.mxu1 %v7385_v51  ;;  %5043 = vmatprep.subr.bf16.mxu0 %v7390_v52  ;;  %v7463_v51 = vld [vmem:[%s11223_s1 + $0x864] ss:$16 sps:$4 sm:$0xff]  }
  0x61   :  { %5084 = vmatprep.subr.bf16.mxu1 %v7393_v53  ;;  %v7466_v52 = vld [vmem:[%s11223_s1 + $0xa64] ss:$16 sps:$4 sm:$0xff]   ;;  %v7461_v53 = vld [vmem:[%s11223_s1 + $0x860] ss:$16 sps:$4 sm:$0xff]  }
  0x63   :  { %5044 = vmatpush2.bf16.msra.mxu0 %v7388_v54  ;;  %v7464_v54 = vld [vmem:[%s11223_s1 + $0xa60] ss:$16 sps:$4 sm:$0xff]  }
  0x64   :  { %5085 = vmatpush2.bf16.msra.mxu1 %v7391_v55  ;;  %5045 = vmatprep.subr.bf16.mxu0 %v7396_v56  ;;  %v7469_v55 = vld [vmem:[%s11223_s1 + $0x844] ss:$16 sps:$4 sm:$0xff]  }
  0x65   :  { %5086 = vmatprep.subr.bf16.mxu1 %v7399_v57  ;;  %v7472_v56 = vld [vmem:[%s11223_s1 + $0xa44] ss:$16 sps:$4 sm:$0xff]   ;;  %v7467_v57 = vld [vmem:[%s11223_s1 + $0x840] ss:$16 sps:$4 sm:$0xff]  }
  0x67   :  { %5046 = vmatpush2.bf16.msra.mxu0 %v7394_v58  ;;  %v7470_v58 = vld [vmem:[%s11223_s1 + $0xa40] ss:$16 sps:$4 sm:$0xff]  }
  0x68   :  { %5087 = vmatpush2.bf16.msra.mxu1 %v7397_v59  ;;  %5047 = vmatprep.subr.bf16.mxu0 %v7402_v61  ;;  %v7475_v59 = vld [vmem:[%s11223_s1 + $0x824] ss:$16 sps:$4 sm:$0xff]  }
  0x69   :  { %5088 = vmatprep.subr.bf16.mxu1 %v7405_v62  ;;  %v7478_v61 = vld [vmem:[%s11223_s1 + $0xa24] ss:$16 sps:$4 sm:$0xff]   ;;  %v7473_v62 = vld [vmem:[%s11223_s1 + $0x820] ss:$16 sps:$4 sm:$0xff]  }
  0x6b   :  { %5048 = vmatpush2.bf16.msra.mxu0 %v7400_v63  ;;  %v7476_v63 = vld [vmem:[%s11223_s1 + $0xa20] ss:$16 sps:$4 sm:$0xff]  }
  0x6c   :  { %5089 = vmatpush2.bf16.msra.mxu1 %v7403_v1  ;;  %5049 = vmatprep.subr.bf16.mxu0 %v7408_v2  ;;  %v7481_v1 = vld [vmem:[%s11223_s1 + $0x804] ss:$16 sps:$4 sm:$0xff]  }
  0x6d   :  { %5090 = vmatprep.subr.bf16.mxu1 %v7411_v3  ;;  %v7484_v2 = vld [vmem:[%s11223_s1 + $0xa04] ss:$16 sps:$4 sm:$0xff]   ;;  %v7479_v3 = vld [vmem:[%s11223_s1 + $0x800] ss:$16 sps:$4 sm:$0xff]  }
  0x6f   :  { %5050 = vmatpush2.bf16.msra.mxu0 %v7406_v4  ;;  %v7482_v4 = vld [vmem:[%s11223_s1 + $0xa00] ss:$16 sps:$4 sm:$0xff]  }
  0x70   :  { %5091 = vmatpush2.bf16.msra.mxu1 %v7409_v5  ;;  %5051 = vmatprep.subr.bf16.mxu0 %v7414_v7  ;;  %v7487_v5 = vld [vmem:[%s11223_s1 + $0x9e4] ss:$16 sps:$4 sm:$0xff]  }
  0x71   :  { %5092 = vmatprep.subr.bf16.mxu1 %v7417_v8  ;;  %v7490_v7 = vld [vmem:[%s11223_s1 + $0xbe4] ss:$16 sps:$4 sm:$0xff]   ;;  %v7485_v8 = vld [vmem:[%s11223_s1 + $0x9e0] ss:$16 sps:$4 sm:$0xff]  }
  0x73   :  { %5052 = vmatpush2.bf16.msra.mxu0 %v7412_v9  ;;  %v7488_v9 = vld [vmem:[%s11223_s1 + $0xbe0] ss:$16 sps:$4 sm:$0xff]  }
  0x74   :  { %5093 = vmatpush2.bf16.msra.mxu1 %v7415_v10  ;;  %5053 = vmatprep.subr.bf16.mxu0 %v7420_v11  ;;  %v7493_v10 = vld [vmem:[%s11223_s1 + $0x9c4] ss:$16 sps:$4 sm:$0xff]  }
  0x75   :  { %5094 = vmatprep.subr.bf16.mxu1 %v7423_v12  ;;  %v7496_v11 = vld [vmem:[%s11223_s1 + $0xbc4] ss:$16 sps:$4 sm:$0xff]   ;;  %v7491_v12 = vld [vmem:[%s11223_s1 + $0x9c0] ss:$16 sps:$4 sm:$0xff]  }
  0x77   :  { %5054 = vmatpush2.bf16.msra.mxu0 %v7418_v14  ;;  %v7494_v14 = vld [vmem:[%s11223_s1 + $0xbc0] ss:$16 sps:$4 sm:$0xff]  }
  0x78   :  { %5095 = vmatpush2.bf16.msra.mxu1 %v7421_v15  ;;  %5055 = vmatprep.subr.bf16.mxu0 %v7426_v16  ;;  %v7499_v15 = vld [vmem:[%s11223_s1 + $0x9a4] ss:$16 sps:$4 sm:$0xff]  }
  0x79   :  { %5096 = vmatprep.subr.bf16.mxu1 %v7429_v19  ;;  %v7502_v16 = vld [vmem:[%s11223_s1 + $0xba4] ss:$16 sps:$4 sm:$0xff]   ;;  %v7497_v19 = vld [vmem:[%s11223_s1 + $0x9a0] ss:$16 sps:$4 sm:$0xff]  }
  0x7b   :  { %5056 = vmatpush2.bf16.msra.mxu0 %v7424_v20  ;;  %v7500_v20 = vld [vmem:[%s11223_s1 + $0xba0] ss:$16 sps:$4 sm:$0xff]  }
  0x7c   :  { %5097 = vmatpush2.bf16.msra.mxu1 %v7427_v21  ;;  %5057 = vmatprep.subr.bf16.mxu0 %v7432_v22  ;;  %v7505_v21 = vld [vmem:[%s11223_s1 + $0x984] ss:$16 sps:$4 sm:$0xff]  }
  0x7d   :  { %5098 = vmatprep.subr.bf16.mxu1 %v7435_v24  ;;  %v7508_v22 = vld [vmem:[%s11223_s1 + $0xb84] ss:$16 sps:$4 sm:$0xff]   ;;  %v7503_v24 = vld [vmem:[%s11223_s1 + $0x980] ss:$16 sps:$4 sm:$0xff]  }
  0x7f   :  { %5058 = vmatpush2.bf16.msra.mxu0 %v7430_v25  ;;  %v7506_v25 = vld [vmem:[%s11223_s1 + $0xb80] ss:$16 sps:$4 sm:$0xff]  }
  0x80   :  { %5099 = vmatpush2.bf16.msra.mxu1 %v7433_v27  ;;  %5109 = vmatprep.subr.bf16.mxu0 %v7439_v28  ;;  %v7511_v27 = vld [vmem:[%s11223_s1 + $0x964] ss:$16 sps:$4 sm:$0xff]  }
  0x81   :  { %5150 = vmatprep.subr.bf16.mxu1 %v7442_v29  ;;  %v7514_v28 = vld [vmem:[%s11223_s1 + $0xb64] ss:$16 sps:$4 sm:$0xff]   ;;  %v7509_v29 = vld [vmem:[%s11223_s1 + $0x960] ss:$16 sps:$4 sm:$0xff]  }
  0x82   :  { %5060 = vmatmul.mubr.bf16.vlgmr.msra.gmra.mxu0 %v8935_v26 }
  0x83   :  { %5101 = vmatmul.mubr.bf16.vlgmr.msra.gmra.mxu1 %v8948_v6  ;;  %5110 = vmatpush1.bf16.msra.mxu0 %v7437_v30  ;;  %v7512_v30 = vld [vmem:[%s11223_s1 + $0xb60] ss:$16 sps:$4 sm:$0xff]  }
  0x84   :  { %5151 = vmatpush1.bf16.msra.mxu1 %v7440_v31  ;;  %5111 = vmatprep.subr.bf16.mxu0 %v7445_v33  ;;  %v7517_v31 = vld [vmem:[%s11223_s1 + $0x944] ss:$16 sps:$4 sm:$0xff]  }
  0x85   :  { %5152 = vmatprep.subr.bf16.mxu1 %v7448_v34  ;;  %5141 = vmatprep.mubr.bf16.mxu0 %v8988_v41  ;;  %v7520_v33 = vld [vmem:[%s11223_s1 + $0xb44] ss:$16 sps:$4 sm:$0xff]   ;;  %v885_v34 = vcombine.high %v8959_v32, %v8959_v32 }
  0x86   :  { %5182 = vmatprep.mubr.bf16.mxu1 %v8993_v43  ;;  %v7526_v32 = vld [vmem:[%s11223_s1 + $0xb24] ss:$16 sps:$4 sm:$0xff]  }
  0x87   :  { %5112 = vmatpush1.bf16.msra.mxu0 %v7443_v37  ;;  %v7518_v37 = vld [vmem:[%s11223_s1 + $0xb40] ss:$16 sps:$4 sm:$0xff]  }
  0x88   :  { %5153 = vmatpush1.bf16.msra.mxu1 %v7446_v38  ;;  %5113 = vmatprep.subr.bf16.mxu0 %v7451_v39  ;;  %v7523_v38 = vld [vmem:[%s11223_s1 + $0x924] ss:$16 sps:$4 sm:$0xff]   ;;  %v9143_v39 = vrot.slane %v885_v34, %v8646_v49  ;;  %v7584_v34 = vld [vmem:[%s11223_s1 + $0xfe0] ss:$16 sps:$4 sm:$0xff]  }
  0x89   :  { %5154 = vmatprep.subr.bf16.mxu1 %v7454_v40  ;;  %v7521_v40 = vld [vmem:[%s11223_s1 + $0x920] ss:$16 sps:$4 sm:$0xff]  }
  0x8b   :  { %5114 = vmatpush1.bf16.msra.mxu0 %v7449_v44  ;;  %v7524_v44 = vld [vmem:[%s11223_s1 + $0xb20] ss:$16 sps:$4 sm:$0xff]  }
  0x8c   :  { %5155 = vmatpush1.bf16.msra.mxu1 %v7452_v45  ;;  %5115 = vmatprep.subr.bf16.mxu0 %v7457_v46  ;;  %v7529_v45 = vld [vmem:[%s11223_s1 + $0x904] ss:$16 sps:$4 sm:$0xff]  }
  0x8d   :  { %5156 = vmatprep.subr.bf16.mxu1 %v7460_v47  ;;  %v7532_v46 = vld [vmem:[%s11223_s1 + $0xb04] ss:$16 sps:$4 sm:$0xff]   ;;  %v901_v47 = vcombine.high %v9143_v39, %v9143_v39 }
  0x8f   :  { %5116 = vmatpush1.bf16.msra.mxu0 %v7455_v48  ;;  %v7527_v48 = vld [vmem:[%s11223_s1 + $0x900] ss:$16 sps:$4 sm:$0xff]  }
  0x90   :  { %5157 = vmatpush1.bf16.msra.mxu1 %v7458_v50  ;;  %5117 = vmatprep.subr.bf16.mxu0 %v7463_v51  ;;  %v9164_v50 = vrot.slane %v8969_v35, %v8646_v49  ;;  %v7530_v51 = vld [vmem:[%s11223_s1 + $0xb00] ss:$16 sps:$4 sm:$0xff]  }
  0x91   :  { %5158 = vmatprep.subr.bf16.mxu1 %v7466_v52  ;;  %v7535_v52 = vld [vmem:[%s11223_s1 + $0xce4] ss:$16 sps:$4 sm:$0xff]  }
  0x92   :  { %v9180_v35 = vcombine.high %v9164_v50, %v9164_v50 }
  0x93   :  { %5118 = vmatpush1.bf16.msra.mxu0 %v7461_v53  ;;  %v7538_v53 = vld [vmem:[%s11223_s1 + $0xee4] ss:$16 sps:$4 sm:$0xff]  }
  0x94   :  { %5159 = vmatpush1.bf16.msra.mxu1 %v7464_v54  ;;  %5119 = vmatprep.subr.bf16.mxu0 %v7469_v55  ;;  %v9176_v54 = vrot.slane %v901_v47, %v8646_v49  ;;  %v7533_v55 = vld [vmem:[%s11223_s1 + $0xce0] ss:$16 sps:$4 sm:$0xff]   ;;  %v7601_v47 = vld [vmem:[%s11223_s1 + $0xd84] ss:$16 sps:$4 sm:$0xff]  }
  0x95   :  { %5160 = vmatprep.subr.bf16.mxu1 %v7472_v56  ;;  %v7536_v56 = vld [vmem:[%s11223_s1 + $0xee0] ss:$16 sps:$4 sm:$0xff]  }
  0x97   :  { %5120 = vmatpush1.bf16.msra.mxu0 %v7467_v57  ;;  %v7541_v57 = vld [vmem:[%s11223_s1 + $0xcc4] ss:$16 sps:$4 sm:$0xff]  }
  0x98   :  { %5161 = vmatpush1.bf16.msra.mxu1 %v7470_v58  ;;  %5121 = vmatprep.subr.bf16.mxu0 %v7475_v59  ;;  %v7544_v58 = vld [vmem:[%s11223_s1 + $0xec4] ss:$16 sps:$4 sm:$0xff]   ;;  %v9196_v59 = vcombine.high %v9176_v54, %v9176_v54 }
  0x99   :  { %5162 = vmatprep.subr.bf16.mxu1 %v7478_v61  ;;  %v7539_v61 = vld [vmem:[%s11223_s1 + $0xcc0] ss:$16 sps:$4 sm:$0xff]  }
  0x9b   :  { %5122 = vmatpush1.bf16.msra.mxu0 %v7473_v62  ;;  %v7542_v62 = vld [vmem:[%s11223_s1 + $0xec0] ss:$16 sps:$4 sm:$0xff]  }
  0x9c   :  { %5163 = vmatpush1.bf16.msra.mxu1 %v7476_v63  ;;  %5123 = vmatprep.subr.bf16.mxu0 %v7481_v1  ;;  %v7547_v63 = vld [vmem:[%s11223_s1 + $0xca4] ss:$16 sps:$4 sm:$0xff]  }
  0x9d   :  { %5164 = vmatprep.subr.bf16.mxu1 %v7484_v2  ;;  %v7550_v1 = vld [vmem:[%s11223_s1 + $0xea4] ss:$16 sps:$4 sm:$0xff]   ;;  %v7545_v2 = vld [vmem:[%s11223_s1 + $0xca0] ss:$16 sps:$4 sm:$0xff]  }
  0x9f   :  { %5124 = vmatpush1.bf16.msra.mxu0 %v7479_v3  ;;  %v7548_v3 = vld [vmem:[%s11223_s1 + $0xea0] ss:$16 sps:$4 sm:$0xff]  }
  0xa0   :  { %5165 = vmatpush1.bf16.msra.mxu1 %v7482_v4  ;;  %5125 = vmatprep.subr.bf16.mxu0 %v7487_v5  ;;  %v7553_v4 = vld [vmem:[%s11223_s1 + $0xc84] ss:$16 sps:$4 sm:$0xff]  }
  0xa1   :  { %5166 = vmatprep.subr.bf16.mxu1 %v7490_v7  ;;  %v7556_v5 = vld [vmem:[%s11223_s1 + $0xe84] ss:$16 sps:$4 sm:$0xff]   ;;  %v7551_v7 = vld [vmem:[%s11223_s1 + $0xc80] ss:$16 sps:$4 sm:$0xff]  }
  0xa3   :  { %5126 = vmatpush2.bf16.msra.mxu0 %v7485_v8  ;;  %v7554_v8 = vld [vmem:[%s11223_s1 + $0xe80] ss:$16 sps:$4 sm:$0xff]  }
  0xa4   :  { %5167 = vmatpush2.bf16.msra.mxu1 %v7488_v9  ;;  %5127 = vmatprep.subr.bf16.mxu0 %v7493_v10  ;;  %v7559_v9 = vld [vmem:[%s11223_s1 + $0xc64] ss:$16 sps:$4 sm:$0xff]  }
  0xa5   :  { %5168 = vmatprep.subr.bf16.mxu1 %v7496_v11  ;;  %v7562_v10 = vld [vmem:[%s11223_s1 + $0xe64] ss:$16 sps:$4 sm:$0xff]   ;;  %v7557_v11 = vld [vmem:[%s11223_s1 + $0xc60] ss:$16 sps:$4 sm:$0xff]  }
  0xa7   :  { %5128 = vmatpush2.bf16.msra.mxu0 %v7491_v12  ;;  %v7560_v12 = vld [vmem:[%s11223_s1 + $0xe60] ss:$16 sps:$4 sm:$0xff]  }
  0xa8   :  { %5169 = vmatpush2.bf16.msra.mxu1 %v7494_v14  ;;  %5129 = vmatprep.subr.bf16.mxu0 %v7499_v15  ;;  %v7565_v14 = vld [vmem:[%s11223_s1 + $0xc44] ss:$16 sps:$4 sm:$0xff]  }
  0xa9   :  { %5170 = vmatprep.subr.bf16.mxu1 %v7502_v16  ;;  %v7568_v15 = vld [vmem:[%s11223_s1 + $0xe44] ss:$16 sps:$4 sm:$0xff]   ;;  %v7563_v16 = vld [vmem:[%s11223_s1 + $0xc40] ss:$16 sps:$4 sm:$0xff]  }
  0xab   :  { %5130 = vmatpush2.bf16.msra.mxu0 %v7497_v19  ;;  %v7566_v19 = vld [vmem:[%s11223_s1 + $0xe40] ss:$16 sps:$4 sm:$0xff]  }
  0xac   :  { %5171 = vmatpush2.bf16.msra.mxu1 %v7500_v20  ;;  %5131 = vmatprep.subr.bf16.mxu0 %v7505_v21  ;;  %v7571_v20 = vld [vmem:[%s11223_s1 + $0xc24] ss:$16 sps:$4 sm:$0xff]  }
  0xad   :  { %5172 = vmatprep.subr.bf16.mxu1 %v7508_v22  ;;  %v7574_v21 = vld [vmem:[%s11223_s1 + $0xe24] ss:$16 sps:$4 sm:$0xff]   ;;  %v7569_v22 = vld [vmem:[%s11223_s1 + $0xc20] ss:$16 sps:$4 sm:$0xff]  }
  0xaf   :  { %5132 = vmatpush2.bf16.msra.mxu0 %v7503_v24  ;;  %v7572_v24 = vld [vmem:[%s11223_s1 + $0xe20] ss:$16 sps:$4 sm:$0xff]  }
  0xb0   :  { %5173 = vmatpush2.bf16.msra.mxu1 %v7506_v25  ;;  %5133 = vmatprep.subr.bf16.mxu0 %v7511_v27  ;;  %v7577_v25 = vld [vmem:[%s11223_s1 + $0xc04] ss:$16 sps:$4 sm:$0xff]  }
  0xb1   :  { %5174 = vmatprep.subr.bf16.mxu1 %v7514_v28  ;;  %v7580_v27 = vld [vmem:[%s11223_s1 + $0xe04] ss:$16 sps:$4 sm:$0xff]   ;;  %v7575_v28 = vld [vmem:[%s11223_s1 + $0xc00] ss:$16 sps:$4 sm:$0xff]  }
  0xb3   :  { %5134 = vmatpush2.bf16.msra.mxu0 %v7509_v29  ;;  %v7578_v29 = vld [vmem:[%s11223_s1 + $0xe00] ss:$16 sps:$4 sm:$0xff]  }
  0xb4   :  { %5175 = vmatpush2.bf16.msra.mxu1 %v7512_v30  ;;  %5135 = vmatprep.subr.bf16.mxu0 %v7517_v31  ;;  %v7583_v30 = vld [vmem:[%s11223_s1 + $0xde4] ss:$16 sps:$4 sm:$0xff]  }
  0xb5   :  { %5176 = vmatprep.subr.bf16.mxu1 %v7520_v33  ;;  %v7586_v31 = vld [vmem:[%s11223_s1 + $0xfe4] ss:$16 sps:$4 sm:$0xff]   ;;  %v7581_v33 = vld [vmem:[%s11223_s1 + $0xde0] ss:$16 sps:$4 sm:$0xff]  }
  0xb7   :  { %5136 = vmatpush2.bf16.msra.mxu0 %v7515_v36  ;;  %v7589_v36 = vld [vmem:[%s11223_s1 + $0xdc4] ss:$16 sps:$4 sm:$0xff]  }
  0xb8   :  { %5177 = vmatpush2.bf16.msra.mxu1 %v7518_v37  ;;  %5137 = vmatprep.subr.bf16.mxu0 %v7523_v38  ;;  %v7592_v37 = vld [vmem:[%s11223_s1 + $0xfc4] ss:$16 sps:$4 sm:$0xff]   ;;  %v7587_v38 = vld [vmem:[%s11223_s1 + $0xdc0] ss:$16 sps:$4 sm:$0xff]  }
  0xb9   :  { %5178 = vmatprep.subr.bf16.mxu1 %v7526_v32  ;;  %v7590_v32 = vld [vmem:[%s11223_s1 + $0xfc0] ss:$16 sps:$4 sm:$0xff]  }
  0xbb   :  { %5138 = vmatpush2.bf16.msra.mxu0 %v7521_v40  ;;  %v7595_v40 = vld [vmem:[%s11223_s1 + $0xda4] ss:$16 sps:$4 sm:$0xff]  }
  0xbc   :  { %5179 = vmatpush2.bf16.msra.mxu1 %v7524_v44  ;;  %5139 = vmatprep.subr.bf16.mxu0 %v7529_v45  ;;  %v7598_v44 = vld [vmem:[%s11223_s1 + $0xfa4] ss:$16 sps:$4 sm:$0xff]   ;;  %v7593_v45 = vld [vmem:[%s11223_s1 + $0xda0] ss:$16 sps:$4 sm:$0xff]  }
  0xbd   :  { %5180 = vmatprep.subr.bf16.mxu1 %v7532_v46  ;;  %v7596_v46 = vld [vmem:[%s11223_s1 + $0xfa0] ss:$16 sps:$4 sm:$0xff]  }
  0xbf   :  { %5140 = vmatpush2.bf16.msra.mxu0 %v7527_v48  ;;  %v7604_v48 = vld [vmem:[%s11223_s1 + $0xf84] ss:$16 sps:$4 sm:$0xff]  }
  0xc0   :  { %5181 = vmatpush2.bf16.msra.mxu1 %v7530_v51  ;;  %5191 = vmatprep.subr.bf16.mxu0 %v7535_v52  ;;  %v7599_v51 = vld [vmem:[%s11223_s1 + $0xd80] ss:$16 sps:$4 sm:$0xff]  }
  0xc1   :  { %5232 = vmatprep.subr.bf16.mxu1 %v7538_v53  ;;  %v7602_v52 = vld [vmem:[%s11223_s1 + $0xf80] ss:$16 sps:$4 sm:$0xff]   ;;  %v7607_v53 = vld [vmem:[%s11223_s1 + $0xd64] ss:$16 sps:$4 sm:$0xff]  }
  0xc2   :  { %5142 = vmatmul.mubr.bf16.vlgmr.msra.gmra.mxu0 %v9164_v50 }
  0xc3   :  { %5183 = vmatmul.mubr.bf16.vlgmr.msra.gmra.mxu1 %v9180_v35  ;;  %5192 = vmatpush1.bf16.msra.mxu0 %v7533_v55  ;;  %v7610_v55 = vld [vmem:[%s11223_s1 + $0xf64] ss:$16 sps:$4 sm:$0xff]  }
  0xc4   :  { %5233 = vmatpush1.bf16.msra.mxu1 %v7536_v56  ;;  %5193 = vmatprep.subr.bf16.mxu0 %v7541_v57  ;;  %v7605_v56 = vld [vmem:[%s11223_s1 + $0xd60] ss:$16 sps:$4 sm:$0xff]  }
  0xc5   :  { %5234 = vmatprep.subr.bf16.mxu1 %v7544_v58  ;;  %5223 = vmatprep.mubr.bf16.mxu0 %v9176_v54  ;;  %v7608_v57 = vld [vmem:[%s11223_s1 + $0xf60] ss:$16 sps:$4 sm:$0xff]   ;;  %v7613_v58 = vld [vmem:[%s11223_s1 + $0xd44] ss:$16 sps:$4 sm:$0xff]  }
  0xc6   :  { %5264 = vmatprep.mubr.bf16.mxu1 %v9196_v59 }
  0xc7   :  { %5194 = vmatpush1.bf16.msra.mxu0 %v7539_v61  ;;  %v7616_v61 = vld [vmem:[%s11223_s1 + $0xf44] ss:$16 sps:$4 sm:$0xff]  }
  0xc8   :  { %5235 = vmatpush1.bf16.msra.mxu1 %v7542_v62  ;;  %5195 = vmatprep.subr.bf16.mxu0 %v7547_v63  ;;  %v7611_v62 = vld [vmem:[%s11223_s1 + $0xd40] ss:$16 sps:$4 sm:$0xff]  }
  0xc9   :  { %5236 = vmatprep.subr.bf16.mxu1 %v7550_v1  ;;  %v7614_v63 = vld [vmem:[%s11223_s1 + $0xf40] ss:$16 sps:$4 sm:$0xff]  }
  0xca   :  { %v9355_v1 = vld [vmem:[%s11222_s0 + $0x10] sm:$0xff] }
  0xcb   :  { %5196 = vmatpush1.bf16.msra.mxu0 %v7545_v2  ;;  %v7619_v2 = vld [vmem:[%s11223_s1 + $0xd24] ss:$16 sps:$4 sm:$0xff]  }
  0xcc   :  { %5237 = vmatpush1.bf16.msra.mxu1 %v7548_v3  ;;  %5197 = vmatprep.subr.bf16.mxu0 %v7553_v4  ;;  %v7622_v3 = vld [vmem:[%s11223_s1 + $0xf24] ss:$16 sps:$4 sm:$0xff]   ;;  %v9365_v4 = vrot.slane %v9355_v1, %v8646_v49 }
  0xcd   :  { %5238 = vmatprep.subr.bf16.mxu1 %v7556_v5  ;;  %v7617_v5 = vld [vmem:[%s11223_s1 + $0xd20] ss:$16 sps:$4 sm:$0xff]  }
  0xcf   :  { %5198 = vmatpush1.bf16.msra.mxu0 %v7551_v7  ;;  %v7620_v7 = vld [vmem:[%s11223_s1 + $0xf20] ss:$16 sps:$4 sm:$0xff]  }
  0xd0   :  { %5239 = vmatpush1.bf16.msra.mxu1 %v7554_v8  ;;  %5199 = vmatprep.subr.bf16.mxu0 %v7559_v9  ;;  %v7625_v8 = vld [vmem:[%s11223_s1 + $0xd04] ss:$16 sps:$4 sm:$0xff]  }
  0xd1   :  { %5240 = vmatprep.subr.bf16.mxu1 %v7562_v10  ;;  %v7628_v9 = vld [vmem:[%s11223_s1 + $0xf04] ss:$16 sps:$4 sm:$0xff]   ;;  %v7623_v10 = vld [vmem:[%s11223_s1 + $0xd00] ss:$16 sps:$4 sm:$0xff]  }
  0xd3   :  { %5200 = vmatpush1.bf16.msra.mxu0 %v7557_v11  ;;  %v949_v11 = vcombine.high %v9365_v4, %v9365_v4 }
  0xd4   :  { %5241 = vmatpush1.bf16.msra.mxu1 %v7560_v12  ;;  %5201 = vmatprep.subr.bf16.mxu0 %v7565_v14  ;;  %v7626_v12 = vld [vmem:[%s11223_s1 + $0xf00] ss:$16 sps:$4 sm:$0xff]  }
  0xd5   :  { %5242 = vmatprep.subr.bf16.mxu1 %v7568_v15  ;;  %v810_v14 = vld [vmem:[%s11224_s2] sm:$0xf]  ;;  %v9392_v15 = vrot.slane %v9143_v39, %v8646_v49 }
  0xd7   :  { %5202 = vmatpush1.bf16.msra.mxu0 %v7563_v16  ;;  %v814_v16 = vsub.s32 0, %v8628_v42  ;;  %v9407_v39 = vcombine.high %v9392_v15, %v9392_v15 }
  0xd8   :  { %5243 = vmatpush1.bf16.msra.mxu1 %v7566_v19  ;;  %5203 = vmatprep.subr.bf16.mxu0 %v7571_v20  ;;  %v7632_v19 = vld [vmem:[%s11223_s1 + $0x10e4] ss:$16 sps:$4 sm:$0xff]  }
  0xd9   :  { %5244 = vmatprep.subr.bf16.mxu1 %v7574_v21  ;;  %v7635_v20 = vld [vmem:[%s11223_s1 + $0x12e4] ss:$16 sps:$4 sm:$0xff]   ;;  %v818_v21 = vsub.s32 1, %v8628_v42 }
  0xdb   :  { %5204 = vmatpush1.bf16.msra.mxu0 %v7569_v22  ;;  %v9403_v22 = vrot.slane %v949_v11, %v8646_v49  ;;  %v7663_v11 = vld [vmem:[%s11223_s1 + $0x1240] ss:$16 sps:$4 sm:$0xff]  }
  0xdc   :  { %5245 = vmatpush1.bf16.msra.mxu1 %v7572_v24  ;;  %5205 = vmatprep.subr.bf16.mxu0 %v7577_v25  ;;  %v7630_v24 = vld [vmem:[%s11223_s1 + $0x10e0] ss:$16 sps:$4 sm:$0xff]  }
  0xdd   :  { %5246 = vmatprep.subr.bf16.mxu1 %v7580_v27  ;;  %v7633_v25 = vld [vmem:[%s11223_s1 + $0x12e0] ss:$16 sps:$4 sm:$0xff]   ;;  %v815_v27 = vrot.slane %v810_v14, %v814_v16 }
  0xde   :  { %v7666_v16 = vld [vmem:[%s11223_s1 + $0x1020] ss:$16 sps:$4 sm:$0xff]  }
  0xdf   :  { %5206 = vmatpush1.bf16.msra.mxu0 %v7575_v28  ;;  %v7638_v28 = vld [vmem:[%s11223_s1 + $0x10c4] ss:$16 sps:$4 sm:$0xff]  }
  0xe0   :  { %5247 = vmatpush1.bf16.msra.mxu1 %v7578_v29  ;;  %5207 = vmatprep.subr.bf16.mxu0 %v7583_v30  ;;  %v7641_v29 = vld [vmem:[%s11223_s1 + $0x12c4] ss:$16 sps:$4 sm:$0xff]   ;;  %v819_v30 = vrot.slane %v810_v14, %v818_v21 }
  0xe1   :  { %5248 = vmatprep.subr.bf16.mxu1 %v7586_v31  ;;  %v9423_v31 = vcombine.high %v9403_v22, %v9403_v22  ;;  %v7671_v14 = vld [vmem:[%s11223_s1 + $0x1224] ss:$16 sps:$4 sm:$0xff]  }
  0xe2   :  { %v7677_v21 = vld [vmem:[%s11223_s1 + $0x1204] ss:$16 sps:$4 sm:$0xff]  }
  0xe3   :  { %5208 = vmatpush2.bf16.msra.mxu0 %v7581_v33 }
  0xe4   :  { %5249 = vmatpush2.bf16.msra.mxu1 %v7584_v34  ;;  %5209 = vmatprep.subr.bf16.mxu0 %v7589_v36  ;;  %v7636_v36 = vld [vmem:[%s11223_s1 + $0x10c0] ss:$16 sps:$4 sm:$0xff]  }
  0xe5   :  { %5250 = vmatprep.subr.bf16.mxu1 %v7592_v37  ;;  %v7639_v37 = vld [vmem:[%s11223_s1 + $0x12c0] ss:$16 sps:$4 sm:$0xff]  }
  0xe7   :  { %5210 = vmatpush2.bf16.msra.mxu0 %v7587_v38 }
  0xe8   :  { %5251 = vmatpush2.bf16.msra.mxu1 %v7590_v32  ;;  %5211 = vmatprep.subr.bf16.mxu0 %v7595_v40 }
  0xe9   :  { %5252 = vmatprep.subr.bf16.mxu1 %v7598_v44  ;;  %v7644_v44 = vld [vmem:[%s11223_s1 + $0x10a4] ss:$16 sps:$4 sm:$0xff]  }
  0xeb   :  { %5212 = vmatpush2.bf16.msra.mxu0 %v7593_v45  ;;  %v7647_v45 = vld [vmem:[%s11223_s1 + $0x12a4] ss:$16 sps:$4 sm:$0xff]  }
  0xec   :  { %5253 = vmatpush2.bf16.msra.mxu1 %v7596_v46  ;;  %5213 = vmatprep.subr.bf16.mxu0 %v7601_v47 }
  0xed   :  { %5254 = vmatprep.subr.bf16.mxu1 %v7604_v48  ;;  %v7642_v48 = vld [vmem:[%s11223_s1 + $0x10a0] ss:$16 sps:$4 sm:$0xff]  }
  0xef   :  { %5214 = vmatpush2.bf16.msra.mxu0 %v7599_v51  ;;  %v7645_v51 = vld [vmem:[%s11223_s1 + $0x12a0] ss:$16 sps:$4 sm:$0xff]  }
  0xf0   :  { %5255 = vmatpush2.bf16.msra.mxu1 %v7602_v52  ;;  %5215 = vmatprep.subr.bf16.mxu0 %v7607_v53 }
  0xf1   :  { %5256 = vmatprep.subr.bf16.mxu1 %v7610_v55 }
  0xf3   :  { %5216 = vmatpush2.bf16.msra.mxu0 %v7605_v56 }
  0xf4   :  { %5257 = vmatpush2.bf16.msra.mxu1 %v7608_v57  ;;  %5217 = vmatprep.subr.bf16.mxu0 %v7613_v58  ;;  %v7650_v58 = vld [vmem:[%s11223_s1 + $0x1084] ss:$16 sps:$4 sm:$0xff]  }
  0xf5   :  { %5258 = vmatprep.subr.bf16.mxu1 %v7616_v61  ;;  %v7653_v61 = vld [vmem:[%s11223_s1 + $0x1284] ss:$16 sps:$4 sm:$0xff]  }
  0xf7   :  { %5218 = vmatpush2.bf16.msra.mxu0 %v7611_v62  ;;  %v7648_v62 = vld [vmem:[%s11223_s1 + $0x1080] ss:$16 sps:$4 sm:$0xff]  }
  0xf8   :  { %5259 = vmatpush2.bf16.msra.mxu1 %v7614_v63  ;;  %5219 = vmatprep.subr.bf16.mxu0 %v7619_v2  ;;  %v7651_v63 = vld [vmem:[%s11223_s1 + $0x1280] ss:$16 sps:$4 sm:$0xff]   ;;  %v7656_v2 = vld [vmem:[%s11223_s1 + $0x1064] ss:$16 sps:$4 sm:$0xff]  }
  0xf9   :  { %5260 = vmatprep.subr.bf16.mxu1 %v7622_v3  ;;  %v7659_v3 = vld [vmem:[%s11223_s1 + $0x1264] ss:$16 sps:$4 sm:$0xff]  }
  0xfb   :  { %5220 = vmatpush2.bf16.msra.mxu0 %v7617_v5  ;;  %v7654_v5 = vld [vmem:[%s11223_s1 + $0x1060] ss:$16 sps:$4 sm:$0xff]  }
  0xfc   :  { %5261 = vmatpush2.bf16.msra.mxu1 %v7620_v7  ;;  %5221 = vmatprep.subr.bf16.mxu0 %v7625_v8  ;;  %v7657_v7 = vld [vmem:[%s11223_s1 + $0x1260] ss:$16 sps:$4 sm:$0xff]   ;;  %v7662_v8 = vld [vmem:[%s11223_s1 + $0x1044] ss:$16 sps:$4 sm:$0xff]  }
  0xfd   :  { %5262 = vmatprep.subr.bf16.mxu1 %v7628_v9  ;;  %v7665_v9 = vld [vmem:[%s11223_s1 + $0x1244] ss:$16 sps:$4 sm:$0xff]  }
  0xff   :  { %5222 = vmatpush2.bf16.msra.mxu0 %v7623_v10  ;;  %v7660_v10 = vld [vmem:[%s11223_s1 + $0x1040] ss:$16 sps:$4 sm:$0xff]  }
 0x100   :  { %5263 = vmatpush2.bf16.msra.mxu1 %v7626_v12  ;;  %5273 = vmatprep.subr.bf16.mxu0 %v7632_v19  ;;  %v7668_v12 = vld [vmem:[%s11223_s1 + $0x1024] ss:$16 sps:$4 sm:$0xff]   ;;  %v7669_v19 = vld [vmem:[%s11223_s1 + $0x1220] ss:$16 sps:$4 sm:$0xff]  }
 0x101   :  { %5314 = vmatprep.subr.bf16.mxu1 %v7635_v20  ;;  %v7674_v20 = vld [vmem:[%s11223_s1 + $0x1004] ss:$16 sps:$4 sm:$0xff]  }
 0x102   :  { %v4979_v33 = vpop.f32.mrf.mxu0  ;;  %5224 = vmatmul.mubr.bf16.vlgmr.msra.gmra.mxu0 %v9392_v15 }
 0x103   :  { %v5020_v34 = vpop.f32.mrf.mxu1  ;;  %5265 = vmatmul.mubr.bf16.vlgmr.msra.gmra.mxu1 %v9407_v39  ;;  %v4980_v38 = vadd.f32 %v4979_v33, %v815_v27  ;;  %5274 = vmatpush1.bf16.msra.mxu0 %v7630_v24  ;;  %v7672_v24 = vld [vmem:[%s11223_s1 + $0x1000] ss:$16 sps:$4 sm:$0xff]   ;;  %v7680_v27 = vld [vmem:[%s11223_s1 + $0x11e4] ss:$16 sps:$4 sm:$0xff]  }
 0x104   :  { %5315 = vmatpush1.bf16.msra.mxu1 %v7633_v25  ;;  %v4981_v32 = vpop.f32.mrf.mxu0  ;;  %5275 = vmatprep.subr.bf16.mxu0 %v7638_v28  ;;  %v7675_v25 = vld [vmem:[%s11223_s1 + $0x1200] ss:$16 sps:$4 sm:$0xff]   ;;  %v7683_v28 = vld [vmem:[%s11223_s1 + $0x13e4] ss:$16 sps:$4 sm:$0xff]  }
 0x105   :  { %v5022_v40 = vpop.f32.mrf.mxu1  ;;  %5316 = vmatprep.subr.bf16.mxu1 %v7641_v29  ;;  %v9439_v46 = vadd.f32 %v5020_v34, %v4980_v38  ;;  %v4982_v47 = vadd.f32 %v4981_v32, %v819_v30  ;;  %5305 = vmatprep.mubr.bf16.mxu0 %v9403_v22  ;;  %v7678_v29 = vld [vmem:[%s11223_s1 + $0x11e0] ss:$16 sps:$4 sm:$0xff]   ;;  %v7686_v33 = vld [vmem:[%s11223_s1 + $0x11c4] ss:$16 sps:$4 sm:$0xff]  }
 0x106   :  { %5346 = vmatprep.mubr.bf16.mxu1 %v9423_v31  ;;  %v4983_v52 = vpop.f32.mrf.mxu0  ;;  %v7681_v30 = vld [vmem:[%s11223_s1 + $0x13e0] ss:$16 sps:$4 sm:$0xff]   ;;  %v7689_v34 = vld [vmem:[%s11223_s1 + $0x13c4] ss:$16 sps:$4 sm:$0xff]  }
 0x107   :  { %v5024_v53 = vpop.f32.mrf.mxu1  ;;  %v9449_v55 = vadd.f32 %v5022_v40, %v4982_v47  ;;  %5276 = vmatpush1.bf16.msra.mxu0 %v7636_v36  ;;  %v7684_v36 = vld [vmem:[%s11223_s1 + $0x11c0] ss:$16 sps:$4 sm:$0xff]   ;;  %v7692_v38 = vld [vmem:[%s11223_s1 + $0x11a4] ss:$16 sps:$4 sm:$0xff]  }
 0x108   :  { %5317 = vmatpush1.bf16.msra.mxu1 %v7639_v37  ;;  %v4984_v56 = vpop.f32.mrf.mxu0  ;;  %5277 = vmatprep.subr.bf16.mxu0 %v7644_v44  ;;  %v7687_v37 = vld [vmem:[%s11223_s1 + $0x13c0] ss:$16 sps:$4 sm:$0xff]   ;;  %v7695_v32 = vld [vmem:[%s11223_s1 + $0x13a4] ss:$16 sps:$4 sm:$0xff]  }
 0x109   :  { %v5025_v57 = vpop.f32.mrf.mxu1  ;;  %5318 = vmatprep.subr.bf16.mxu1 %v7647_v45  ;;  %v7690_v40 = vld [vmem:[%s11223_s1 + $0x11a0] ss:$16 sps:$4 sm:$0xff]   ;;  %v7698_v45 = vld [vmem:[%s11223_s1 + $0x1184] ss:$16 sps:$4 sm:$0xff]  }
 0x10a   :  { %v7693_v44 = vld [vmem:[%s11223_s1 + $0x13a0] ss:$16 sps:$4 sm:$0xff]   ;;  %v7701_v47 = vld [vmem:[%s11223_s1 + $0x1384] ss:$16 sps:$4 sm:$0xff]  }
 0x10b   :  { %5278 = vmatpush1.bf16.msra.mxu0 %v7642_v48  ;;  %v7696_v48 = vld [vmem:[%s11223_s1 + $0x1180] ss:$16 sps:$4 sm:$0xff]   ;;  %v7704_v52 = vld [vmem:[%s11223_s1 + $0x1164] ss:$16 sps:$4 sm:$0xff]  }
 0x10c   :  { %5319 = vmatpush1.bf16.msra.mxu1 %v7645_v51  ;;  %5279 = vmatprep.subr.bf16.mxu0 %v7650_v58  ;;  %v7699_v51 = vld [vmem:[%s11223_s1 + $0x1380] ss:$16 sps:$4 sm:$0xff]   ;;  %v7707_v53 = vld [vmem:[%s11223_s1 + $0x1364] ss:$16 sps:$4 sm:$0xff]  }
 0x10d   :  { %5320 = vmatprep.subr.bf16.mxu1 %v7653_v61  ;;  %v7702_v56 = vld [vmem:[%s11223_s1 + $0x1160] ss:$16 sps:$4 sm:$0xff]   ;;  %v7710_v58 = vld [vmem:[%s11223_s1 + $0x1144] ss:$16 sps:$4 sm:$0xff]  }
 0x10e   :  { %v7705_v57 = vld [vmem:[%s11223_s1 + $0x1360] ss:$16 sps:$4 sm:$0xff]   ;;  %v7713_v61 = vld [vmem:[%s11223_s1 + $0x1344] ss:$16 sps:$4 sm:$0xff]  }
 0x10f   :  { %5280 = vmatpush1.bf16.msra.mxu0 %v7648_v62  ;;  %v934_v62 = vcombine.high %v9355_v1, %v9355_v1  ;;  %v7719_v1 = vld [vmem:[%s11223_s1 + $0x1324] ss:$16 sps:$4 sm:$0xff]  }
 0x110   :  { %5321 = vmatpush1.bf16.msra.mxu1 %v7651_v63  ;;  %5281 = vmatprep.subr.bf16.mxu0 %v7656_v2  ;;  %v7708_v63 = vld [vmem:[%s11223_s1 + $0x1140] ss:$16 sps:$4 sm:$0xff]  }
 0x111   :  { %5322 = vmatprep.subr.bf16.mxu1 %v7659_v3  ;;  %v7711_v2 = vld [vmem:[%s11223_s1 + $0x1340] ss:$16 sps:$4 sm:$0xff]   ;;  %v7716_v3 = vld [vmem:[%s11223_s1 + $0x1124] ss:$16 sps:$4 sm:$0xff]  }
 0x113   :  { %5282 = vmatpush1.bf16.msra.mxu0 %v7654_v5  ;;  %v9592_v5 = vrot.slane %v934_v62, %v8646_v49  ;;  %v7747_v62 = vld [vmem:[%s11223_s1 + $0x1680] ss:$16 sps:$4 sm:$0xff]  }
 0x114   :  { %5323 = vmatpush1.bf16.msra.mxu1 %v7657_v7  ;;  %5283 = vmatprep.subr.bf16.mxu0 %v7662_v8  ;;  %v7714_v7 = vld [vmem:[%s11223_s1 + $0x1120] ss:$16 sps:$4 sm:$0xff]  }
 0x115   :  { %5324 = vmatprep.subr.bf16.mxu1 %v7665_v9  ;;  %v7717_v8 = vld [vmem:[%s11223_s1 + $0x1320] ss:$16 sps:$4 sm:$0xff]   ;;  %v7722_v9 = vld [vmem:[%s11223_s1 + $0x1104] ss:$16 sps:$4 sm:$0xff]  }
 0x117   :  { %5284 = vmatpush1.bf16.msra.mxu0 %v7660_v10  ;;  %v7725_v10 = vld [vmem:[%s11223_s1 + $0x1304] ss:$16 sps:$4 sm:$0xff]  }
 0x118   :  { %5325 = vmatpush1.bf16.msra.mxu1 %v7663_v11  ;;  %5285 = vmatprep.subr.bf16.mxu0 %v7668_v12  ;;  %v950_v11 = vcombine.high %v9592_v5, %v9592_v5  ;;  %v9610_v12 = vrot.slane %v9365_v4, %v8646_v49  ;;  %v7731_v4 = vld [vmem:[%s11223_s1 + $0x16e4] ss:$16 sps:$4 sm:$0xff]  }
 0x119   :  { %5326 = vmatprep.subr.bf16.mxu1 %v7671_v14  ;;  %v7720_v14 = vld [vmem:[%s11223_s1 + $0x1100] ss:$16 sps:$4 sm:$0xff]  }
 0x11b   :  { %5286 = vmatpush1.bf16.msra.mxu0 %v7666_v16  ;;  %v7723_v16 = vld [vmem:[%s11223_s1 + $0x1300] ss:$16 sps:$4 sm:$0xff]  }
 0x11c   :  { %5327 = vmatpush1.bf16.msra.mxu1 %v7669_v19  ;;  %5287 = vmatprep.subr.bf16.mxu0 %v7674_v20  ;;  %v7728_v19 = vld [vmem:[%s11223_s1 + $0x14e4] ss:$16 sps:$4 sm:$0xff]   ;;  %v7726_v20 = vld [vmem:[%s11223_s1 + $0x14e0] ss:$16 sps:$4 sm:$0xff]  }
 0x11d   :  { %5328 = vmatprep.subr.bf16.mxu1 %v7677_v21  ;;  %v7729_v21 = vld [vmem:[%s11223_s1 + $0x16e0] ss:$16 sps:$4 sm:$0xff]  }
 0x11f   :  { %5288 = vmatpush1.bf16.msra.mxu0 %v7672_v24  ;;  %v9631_v24 = vrot.slane %v950_v11, %v8646_v49  ;;  %v7764_v11 = vld [vmem:[%s11223_s1 + $0x1424] ss:$16 sps:$4 sm:$0xff]  }
 0x120   :  { %5329 = vmatpush1.bf16.msra.mxu1 %v7675_v25  ;;  %5289 = vmatprep.subr.bf16.mxu0 %v7680_v27  ;;  %v9635_v25 = vcombine.high %v9610_v12, %v9610_v12  ;;  %v7734_v27 = vld [vmem:[%s11223_s1 + $0x14c4] ss:$16 sps:$4 sm:$0xff]  }
 0x121   :  { %5330 = vmatprep.subr.bf16.mxu1 %v7683_v28  ;;  %v7737_v28 = vld [vmem:[%s11223_s1 + $0x16c4] ss:$16 sps:$4 sm:$0xff]  }
 0x123   :  { %5290 = vmatpush2.bf16.msra.mxu0 %v7678_v29  ;;  %v7732_v29 = vld [vmem:[%s11223_s1 + $0x14c0] ss:$16 sps:$4 sm:$0xff]  }
 0x124   :  { %5331 = vmatpush2.bf16.msra.mxu1 %v7681_v30  ;;  %5291 = vmatprep.subr.bf16.mxu0 %v7686_v33  ;;  %v7735_v30 = vld [vmem:[%s11223_s1 + $0x16c0] ss:$16 sps:$4 sm:$0xff]   ;;  %v9651_v33 = vcombine.high %v9631_v24, %v9631_v24 }
 0x125   :  { %5332 = vmatprep.subr.bf16.mxu1 %v7689_v34 }
 0x127   :  { %5292 = vmatpush2.bf16.msra.mxu0 %v7684_v36 }
 0x128   :  { %5333 = vmatpush2.bf16.msra.mxu1 %v7687_v37  ;;  %5293 = vmatprep.subr.bf16.mxu0 %v7692_v38 }
 0x129   :  { %5334 = vmatprep.subr.bf16.mxu1 %v7695_v32 }
 0x12b   :  { %5294 = vmatpush2.bf16.msra.mxu0 %v7690_v40  ;;  %v7740_v40 = vld [vmem:[%s11223_s1 + $0x14a4] ss:$16 sps:$4 sm:$0xff]  }
 0x12c   :  { %5335 = vmatpush2.bf16.msra.mxu1 %v7693_v44  ;;  %5295 = vmatprep.subr.bf16.mxu0 %v7698_v45  ;;  %v7743_v44 = vld [vmem:[%s11223_s1 + $0x16a4] ss:$16 sps:$4 sm:$0xff]  }
 0x12d   :  { %5336 = vmatprep.subr.bf16.mxu1 %v7701_v47 }
 0x12f   :  { %5296 = vmatpush2.bf16.msra.mxu0 %v7696_v48  ;;  %v7741_v48 = vld [vmem:[%s11223_s1 + $0x16a0] ss:$16 sps:$4 sm:$0xff]  }
 0x130   :  { %5337 = vmatpush2.bf16.msra.mxu1 %v7699_v51  ;;  %5297 = vmatprep.subr.bf16.mxu0 %v7704_v52 }
 0x131   :  { %5338 = vmatprep.subr.bf16.mxu1 %v7707_v53 }
 0x133   :  { %5298 = vmatpush2.bf16.msra.mxu0 %v7702_v56 }
 0x134   :  { %5339 = vmatpush2.bf16.msra.mxu1 %v7705_v57  ;;  %5299 = vmatprep.subr.bf16.mxu0 %v7710_v58  ;;  %v7746_v57 = vld [vmem:[%s11223_s1 + $0x1484] ss:$16 sps:$4 sm:$0xff]  }
 0x135   :  { %5340 = vmatprep.subr.bf16.mxu1 %v7713_v61  ;;  %v7749_v58 = vld [vmem:[%s11223_s1 + $0x1684] ss:$16 sps:$4 sm:$0xff]   ;;  %v7744_v61 = vld [vmem:[%s11223_s1 + $0x1480] ss:$16 sps:$4 sm:$0xff]  }
 0x137   :  { %5300 = vmatpush2.bf16.msra.mxu0 %v7708_v63  ;;  %v7752_v63 = vld [vmem:[%s11223_s1 + $0x1464] ss:$16 sps:$4 sm:$0xff]  }
 0x138   :  { %5341 = vmatpush2.bf16.msra.mxu1 %v7711_v2  ;;  %5301 = vmatprep.subr.bf16.mxu0 %v7716_v3  ;;  %v7755_v2 = vld [vmem:[%s11223_s1 + $0x1664] ss:$16 sps:$4 sm:$0xff]   ;;  %v7750_v3 = vld [vmem:[%s11223_s1 + $0x1460] ss:$16 sps:$4 sm:$0xff]  }
 0x139   :  { %5342 = vmatprep.subr.bf16.mxu1 %v7719_v1  ;;  %v7753_v1 = vld [vmem:[%s11223_s1 + $0x1660] ss:$16 sps:$4 sm:$0xff]  }
 0x13b   :  { %5302 = vmatpush2.bf16.msra.mxu0 %v7714_v7  ;;  %v7758_v7 = vld [vmem:[%s11223_s1 + $0x1444] ss:$16 sps:$4 sm:$0xff]  }
 0x13c   :  { %5343 = vmatpush2.bf16.msra.mxu1 %v7717_v8  ;;  %5303 = vmatprep.subr.bf16.mxu0 %v7722_v9  ;;  %v7761_v8 = vld [vmem:[%s11223_s1 + $0x1644] ss:$16 sps:$4 sm:$0xff]   ;;  %v7756_v9 = vld [vmem:[%s11223_s1 + $0x1440] ss:$16 sps:$4 sm:$0xff]  }
 0x13d   :  { %5344 = vmatprep.subr.bf16.mxu1 %v7725_v10  ;;  %v7759_v10 = vld [vmem:[%s11223_s1 + $0x1640] ss:$16 sps:$4 sm:$0xff]  }
 0x13f   :  { %5304 = vmatpush2.bf16.msra.mxu0 %v7720_v14  ;;  %v7767_v14 = vld [vmem:[%s11223_s1 + $0x1624] ss:$16 sps:$4 sm:$0xff]  }
 0x140   :  { %5345 = vmatpush2.bf16.msra.mxu1 %v7723_v16  ;;  %5355 = vmatprep.subr.bf16.mxu0 %v7728_v19  ;;  %v7762_v16 = vld [vmem:[%s11223_s1 + $0x1420] ss:$16 sps:$4 sm:$0xff]  }
 0x141   :  { %5396 = vmatprep.subr.bf16.mxu1 %v7731_v4  ;;  %v7765_v19 = vld [vmem:[%s11223_s1 + $0x1620] ss:$16 sps:$4 sm:$0xff]   ;;  %v7770_v4 = vld [vmem:[%s11223_s1 + $0x1404] ss:$16 sps:$4 sm:$0xff]  }
 0x142   :  { %v5061_v34 = vpop.f32.mrf.mxu0  ;;  %5306 = vmatmul.mubr.bf16.vlgmr.msra.gmra.mxu0 %v9610_v12 }
 0x143   :  { %v5102_v36 = vpop.f32.mrf.mxu1  ;;  %5347 = vmatmul.mubr.bf16.vlgmr.msra.gmra.mxu1 %v9635_v25  ;;  %v5062_v37 = vadd.f32 %v5061_v34, %v9439_v46  ;;  %5356 = vmatpush1.bf16.msra.mxu0 %v7726_v20  ;;  %v7738_v46 = vld [vmem:[%s11223_s1 + $0x14a0] ss:$16 sps:$4 sm:$0xff]   ;;  %v7773_v20 = vld [vmem:[%s11223_s1 + $0x1604] ss:$16 sps:$4 sm:$0xff]  }
 0x144   :  { %5397 = vmatpush1.bf16.msra.mxu1 %v7729_v21  ;;  %v5063_v38 = vpop.f32.mrf.mxu0  ;;  %5357 = vmatprep.subr.bf16.mxu0 %v7734_v27  ;;  %v7768_v21 = vld [vmem:[%s11223_s1 + $0x1400] ss:$16 sps:$4 sm:$0xff]  }
 0x145   :  { %v5104_v32 = vpop.f32.mrf.mxu1  ;;  %5398 = vmatprep.subr.bf16.mxu1 %v7737_v28  ;;  %v9662_v45 = vadd.f32 %v5102_v36, %v5062_v37  ;;  %v5064_v47 = vadd.f32 %v5063_v38, %v9449_v55  ;;  %5387 = vmatprep.mubr.bf16.mxu0 %v9631_v24  ;;  %v7771_v27 = vld [vmem:[%s11223_s1 + $0x1600] ss:$16 sps:$4 sm:$0xff]   ;;  %v7776_v28 = vld [vmem:[%s11223_s1 + $0x15e4] ss:$16 sps:$4 sm:$0xff]  }
 0x146   :  { %5428 = vmatprep.mubr.bf16.mxu1 %v9651_v33  ;;  %v5065_v51 = vpop.f32.mrf.mxu0  ;;  %v7777_v34 = vld [vmem:[%s11223_s1 + $0x17e0] ss:$16 sps:$4 sm:$0xff]   ;;  %v7782_v36 = vld [vmem:[%s11223_s1 + $0x15c4] ss:$16 sps:$4 sm:$0xff]  }
 0x147   :  { %v5106_v52 = vpop.f32.mrf.mxu1  ;;  %v9673_v53 = vadd.f32 %v5104_v32, %v5064_v47  ;;  %5358 = vmatpush1.bf16.msra.mxu0 %v7732_v29  ;;  %v7779_v29 = vld [vmem:[%s11223_s1 + $0x17e4] ss:$16 sps:$4 sm:$0xff]   ;;  %v7780_v38 = vld [vmem:[%s11223_s1 + $0x15c0] ss:$16 sps:$4 sm:$0xff]  }
 0x148   :  { %5399 = vmatpush1.bf16.msra.mxu1 %v7735_v30  ;;  %v5066_v56 = vpop.f32.mrf.mxu0  ;;  %5359 = vmatprep.subr.bf16.mxu0 %v7740_v40  ;;  %v7774_v30 = vld [vmem:[%s11223_s1 + $0x15e0] ss:$16 sps:$4 sm:$0xff]   ;;  %v7785_v37 = vld [vmem:[%s11223_s1 + $0x17c4] ss:$16 sps:$4 sm:$0xff]  }
 0x149   :  { %v5107_v55 = vpop.f32.mrf.mxu1  ;;  %5400 = vmatprep.subr.bf16.mxu1 %v7743_v44  ;;  %v7783_v32 = vld [vmem:[%s11223_s1 + $0x17c0] ss:$16 sps:$4 sm:$0xff]   ;;  %v7788_v40 = vld [vmem:[%s11223_s1 + $0x15a4] ss:$16 sps:$4 sm:$0xff]  }
 0x14a   :  { %v7791_v44 = vld [vmem:[%s11223_s1 + $0x17a4] ss:$16 sps:$4 sm:$0xff]   ;;  %v7786_v47 = vld [vmem:[%s11223_s1 + $0x15a0] ss:$16 sps:$4 sm:$0xff]  }
 0x14b   :  { %5360 = vmatpush1.bf16.msra.mxu0 %v7738_v46  ;;  %v7789_v46 = vld [vmem:[%s11223_s1 + $0x17a0] ss:$16 sps:$4 sm:$0xff]   ;;  %v7797_v51 = vld [vmem:[%s11223_s1 + $0x1784] ss:$16 sps:$4 sm:$0xff]  }
 0x14c   :  { %5401 = vmatpush1.bf16.msra.mxu1 %v7741_v48  ;;  %5361 = vmatprep.subr.bf16.mxu0 %v7746_v57  ;;  %v7794_v48 = vld [vmem:[%s11223_s1 + $0x1584] ss:$16 sps:$4 sm:$0xff]   ;;  %v7792_v52 = vld [vmem:[%s11223_s1 + $0x1580] ss:$16 sps:$4 sm:$0xff]  }
 0x14d   :  { %5402 = vmatprep.subr.bf16.mxu1 %v7749_v58  ;;  %v7795_v56 = vld [vmem:[%s11223_s1 + $0x1780] ss:$16 sps:$4 sm:$0xff]   ;;  %v7800_v55 = vld [vmem:[%s11223_s1 + $0x1564] ss:$16 sps:$4 sm:$0xff]  }
 0x14e   :  { %v7803_v57 = vld [vmem:[%s11223_s1 + $0x1764] ss:$16 sps:$4 sm:$0xff]   ;;  %v7798_v58 = vld [vmem:[%s11223_s1 + $0x1560] ss:$16 sps:$4 sm:$0xff]  }
 0x14f   :  { %5362 = vmatpush1.bf16.msra.mxu0 %v7744_v61  ;;  %v7801_v61 = vld [vmem:[%s11223_s1 + $0x1760] ss:$16 sps:$4 sm:$0xff]  }
 0x150   :  { %5403 = vmatpush1.bf16.msra.mxu1 %v7747_v62  ;;  %5363 = vmatprep.subr.bf16.mxu0 %v7752_v63  ;;  %v7806_v62 = vld [vmem:[%s11223_s1 + $0x1544] ss:$16 sps:$4 sm:$0xff]  }
 0x151   :  { %5404 = vmatprep.subr.bf16.mxu1 %v7755_v2  ;;  %v7809_v63 = vld [vmem:[%s11223_s1 + $0x1744] ss:$16 sps:$4 sm:$0xff]   ;;  %v7804_v2 = vld [vmem:[%s11223_s1 + $0x1540] ss:$16 sps:$4 sm:$0xff]  }
 0x153   :  { %5364 = vmatpush1.bf16.msra.mxu0 %v7750_v3  ;;  %v7807_v3 = vld [vmem:[%s11223_s1 + $0x1740] ss:$16 sps:$4 sm:$0xff]  }
 0x154   :  { %5405 = vmatpush1.bf16.msra.mxu1 %v7753_v1  ;;  %5365 = vmatprep.subr.bf16.mxu0 %v7758_v7  ;;  %v7812_v1 = vld [vmem:[%s11223_s1 + $0x1524] ss:$16 sps:$4 sm:$0xff]  }
 0x155   :  { %5406 = vmatprep.subr.bf16.mxu1 %v7761_v8  ;;  %v7815_v7 = vld [vmem:[%s11223_s1 + $0x1724] ss:$16 sps:$4 sm:$0xff]   ;;  %v7810_v8 = vld [vmem:[%s11223_s1 + $0x1520] ss:$16 sps:$4 sm:$0xff]  }
 0x157   :  { %5366 = vmatpush1.bf16.msra.mxu0 %v7756_v9  ;;  %v7813_v9 = vld [vmem:[%s11223_s1 + $0x1720] ss:$16 sps:$4 sm:$0xff]  }
 0x158   :  { %5407 = vmatpush1.bf16.msra.mxu1 %v7759_v10  ;;  %5367 = vmatprep.subr.bf16.mxu0 %v7764_v11  ;;  %v7818_v10 = vld [vmem:[%s11223_s1 + $0x1504] ss:$16 sps:$4 sm:$0xff]  }
 0x159   :  { %5408 = vmatprep.subr.bf16.mxu1 %v7767_v14  ;;  %v7821_v11 = vld [vmem:[%s11223_s1 + $0x1704] ss:$16 sps:$4 sm:$0xff]   ;;  %v9827_v14 = vrot.slane %v9592_v5, %v8646_v49  ;;  %v7828_v5 = vld [vmem:[%s11223_s1 + $0xec] ss:$16 sps:$4 sm:$0xff]  }
 0x15b   :  { %5368 = vmatpush1.bf16.msra.mxu0 %v7762_v16  ;;  %v7816_v16 = vld [vmem:[%s11223_s1 + $0x1500] ss:$16 sps:$4 sm:$0xff]  }
 0x15c   :  { %5409 = vmatpush1.bf16.msra.mxu1 %v7765_v19  ;;  %5369 = vmatprep.subr.bf16.mxu0 %v7770_v4  ;;  %v7819_v19 = vld [vmem:[%s11223_s1 + $0x1700] ss:$16 sps:$4 sm:$0xff]   ;;  %v7825_v4 = vld [vmem:[%s11223_s1 + $0x1864] ss:$16 sps:$4 sm:$0xff]  }
 0x15d   :  { %5410 = vmatprep.subr.bf16.mxu1 %v7773_v20  ;;  %v7823_v20 = vld [vmem:[%s11223_s1 + $0x1860] ss:$16 sps:$4 sm:$0xff]  }
 0x15f   :  { %5370 = vmatpush1.bf16.msra.mxu0 %v7768_v21  ;;  %v7826_v21 = vld [vmem:[%s11223_s1 + $0xe8] ss:$16 sps:$4 sm:$0xff]  }
 0x160   :  { %5411 = vmatpush1.bf16.msra.mxu1 %v7771_v27  ;;  %5371 = vmatprep.subr.bf16.mxu0 %v7776_v28  ;;  %v9849_v27 = vcombine.high %v9827_v14, %v9827_v14  ;;  %v7831_v28 = vld [vmem:[%s11223_s1 + $0x1844] ss:$16 sps:$4 sm:$0xff]  }
 0x161   :  { %5412 = vmatprep.subr.bf16.mxu1 %v7779_v29  ;;  %v7834_v29 = vld [vmem:[%s11223_s1 + $0xcc] ss:$16 sps:$4 sm:$0xff]  }
 0x163   :  { %5372 = vmatpush2.bf16.msra.mxu0 %v7774_v30  ;;  %v7829_v30 = vld [vmem:[%s11223_s1 + $0x1840] ss:$16 sps:$4 sm:$0xff]  }
 0x164   :  { %5413 = vmatpush2.bf16.msra.mxu1 %v7777_v34  ;;  %5373 = vmatprep.subr.bf16.mxu0 %v7782_v36  ;;  %v7832_v34 = vld [vmem:[%s11223_s1 + $0xc8] ss:$16 sps:$4 sm:$0xff]  }
 0x165   :  { %5414 = vmatprep.subr.bf16.mxu1 %v7785_v37 }
 0x167   :  { %5374 = vmatpush2.bf16.msra.mxu0 %v7780_v38 }
 0x168   :  { %5415 = vmatpush2.bf16.msra.mxu1 %v7783_v32  ;;  %5375 = vmatprep.subr.bf16.mxu0 %v7788_v40 }
 0x169   :  { %5416 = vmatprep.subr.bf16.mxu1 %v7791_v44  ;;  %v7837_v44 = vld [vmem:[%s11223_s1 + $0x1824] ss:$16 sps:$4 sm:$0xff]  }
 0x16b   :  { %5376 = vmatpush2.bf16.msra.mxu0 %v7786_v47  ;;  %v7840_v47 = vld [vmem:[%s11223_s1 + $0xac] ss:$16 sps:$4 sm:$0xff]  }
 0x16c   :  { %5417 = vmatpush2.bf16.msra.mxu1 %v7789_v46  ;;  %5377 = vmatprep.subr.bf16.mxu0 %v7794_v48 }
 0x16d   :  { %5418 = vmatprep.subr.bf16.mxu1 %v7797_v51  ;;  %v7838_v51 = vld [vmem:[%s11223_s1 + $0xa8] ss:$16 sps:$4 sm:$0xff]  }
 0x16f   :  { %5378 = vmatpush2.bf16.msra.mxu0 %v7792_v52  ;;  %v8479_v52 = vmov 0  }
 0x170   :  { %5419 = vmatpush2.bf16.msra.mxu1 %v7795_v56  ;;  %5379 = vmatprep.subr.bf16.mxu0 %v7800_v55 }
 0x171   :  { %5420 = vmatprep.subr.bf16.mxu1 %v7803_v57 }
 0x173   :  { %5380 = vmatpush2.bf16.msra.mxu0 %v7798_v58 }
 0x174   :  { %5421 = vmatpush2.bf16.msra.mxu1 %v7801_v61  ;;  %5381 = vmatprep.subr.bf16.mxu0 %v7806_v62  ;;  %v7843_v61 = vld [vmem:[%s11223_s1 + $0x1804] ss:$16 sps:$4 sm:$0xff]   ;;  %v7846_v62 = vld [vmem:[%s11223_s1 + $0x8c] ss:$16 sps:$4 sm:$0xff]  }
 0x175   :  { %5422 = vmatprep.subr.bf16.mxu1 %v7809_v63  ;;  %v7844_v63 = vld [vmem:[%s11223_s1 + $0x88] ss:$16 sps:$4 sm:$0xff]  }
 0x177   :  { %5382 = vmatpush2.bf16.msra.mxu0 %v7804_v2  ;;  %v6377_v2 = vld.sshfl [vmem:[%s11222_s0 + $0x18] sm:$0x1 pattern:$0x75316420] }
 0x178   :  { %5423 = vmatpush2.bf16.msra.mxu1 %v7807_v3  ;;  %5383 = vmatprep.subr.bf16.mxu0 %v7812_v1  ;;  %v7849_v3 = vld [vmem:[%s11223_s1 + $0x6c] ss:$16 sps:$4 sm:$0xff]  }
 0x179   :  { %5424 = vmatprep.subr.bf16.mxu1 %v7815_v7  ;;  %v7852_v1 = vld [vmem:[%s11223_s1 + $0x2ec] ss:$16 sps:$4 sm:$0xff]   ;;  %v7847_v7 = vld [vmem:[%s11223_s1 + $0x68] ss:$16 sps:$4 sm:$0xff]  }
 0x17b   :  { %5384 = vmatpush2.bf16.msra.mxu0 %v7810_v8  ;;  %v7850_v8 = vld [vmem:[%s11223_s1 + $0x2e8] ss:$16 sps:$4 sm:$0xff]  }
 0x17c   :  { %5425 = vmatpush2.bf16.msra.mxu1 %v7813_v9  ;;  %5385 = vmatprep.subr.bf16.mxu0 %v7818_v10  ;;  %v9913_v9 = vrot.slane %v6377_v2, %v8646_v49  ;;  %v7855_v10 = vld [vmem:[%s11223_s1 + $0x4c] ss:$16 sps:$4 sm:$0xff]   ;;  %v7853_v49 = vld [vmem:[%s11223_s1 + $0x48] ss:$16 sps:$4 sm:$0xff]  }
 0x17d   :  { %5426 = vmatprep.subr.bf16.mxu1 %v7821_v11  ;;  %v7858_v11 = vld [vmem:[%s11223_s1 + $0x2cc] ss:$16 sps:$4 sm:$0xff]  }
 0x17e   :  { %v7903_v2 = vld [vmem:[%s11223_s1 + $0x14c] ss:$16 sps:$4 sm:$0xff]  }
 0x17f   :  { %5386 = vmatpush2.bf16.msra.mxu0 %v7816_v16  ;;  %v7856_v16 = vld [vmem:[%s11223_s1 + $0x2c8] ss:$16 sps:$4 sm:$0xff]  }
 0x180   :  { %5427 = vmatpush2.bf16.msra.mxu1 %v7819_v19  ;;  %5445 = vmatprep.subr.bf16.mxu0 %v7825_v4  ;;  %v7861_v19 = vld [vmem:[%s11223_s1 + $0x2c] ss:$16 sps:$4 sm:$0xff]  }
 0x181   :  { %5478 = vmatprep.subr.bf16.mxu1 %v7828_v5  ;;  %v7864_v4 = vld [vmem:[%s11223_s1 + $0x2ac] ss:$16 sps:$4 sm:$0xff]   ;;  %v7859_v5 = vld [vmem:[%s11223_s1 + $0x28] ss:$16 sps:$4 sm:$0xff]  }
 0x182   :  { %v5143_v36 = vpop.f32.mrf.mxu0  ;;  %5388 = vmatmul.mubr.bf16.vlgmr.msra.gmra.mxu0 %v9827_v14 }
 0x183   :  { %v5184_v37 = vpop.f32.mrf.mxu1  ;;  %5429 = vmatmul.mubr.bf16.vlgmr.msra.gmra.mxu1 %v9849_v27  ;;  %v5144_v38 = vadd.f32 %v5143_v36, %v9662_v45  ;;  %5446 = vmatpush1.bf16.msra.mxu0 %v7823_v20  ;;  %v7835_v45 = vld [vmem:[%s11223_s1 + $0x1820] ss:$16 sps:$4 sm:$0xff]   ;;  %v7862_v20 = vld [vmem:[%s11223_s1 + $0x2a8] ss:$16 sps:$4 sm:$0xff]  }
 0x184   :  { %5479 = vmatpush1.bf16.msra.mxu1 %v7826_v21  ;;  %v5145_v32 = vpop.f32.mrf.mxu0  ;;  %5447 = vmatprep.subr.bf16.mxu0 %v7831_v28  ;;  %v7867_v21 = vld [vmem:[%s11223_s1 + $0xc] ss:$16 sps:$4 sm:$0xff]   ;;  %v7865_v28 = vld [vmem:[%s11223_s1 + $0x8] ss:$16 sps:$4 sm:$0xff]  }
 0x185   :  { %v5186_v40 = vpop.f32.mrf.mxu1  ;;  %5480 = vmatprep.subr.bf16.mxu1 %v7834_v29  ;;  %v9872_v46 = vadd.f32 %v5184_v37, %v5144_v38  ;;  %v5146_v48 = vadd.f32 %v5145_v32, %v9673_v53  ;;  %5469 = vmatprep.mubr.bf16.mxu0 %v8479_v52  ;;  %v7868_v29 = vld [vmem:[%s11223_s1 + $0x288] ss:$16 sps:$4 sm:$0xff]   ;;  %v7879_v38 = vld [vmem:[%s11223_s1 + $0x1cc] ss:$16 sps:$4 sm:$0xff]  }
 0x186   :  { %5510 = vmatprep.mubr.bf16.mxu1 %v8674_v60  ;;  %v5147_v56 = vpop.f32.mrf.mxu0  ;;  %v7841_v60 = vld [vmem:[%s11223_s1 + $0x1800] ss:$16 sps:$4 sm:$0xff]   ;;  %v7871_v36 = vld [vmem:[%s11223_s1 + $0x1e8] ss:$16 sps:$4 sm:$0xff]   ;;  %v7882_v32 = vld [vmem:[%s11223_s1 + $0x24c] ss:$16 sps:$4 sm:$0xff]  }
 0x187   :  { %v5188_v55 = vpop.f32.mrf.mxu1  ;;  %v9883_v57 = vadd.f32 %v5186_v40, %v5146_v48  ;;  %5448 = vmatpush1.bf16.msra.mxu0 %v7829_v30  ;;  %v7873_v30 = vld [vmem:[%s11223_s1 + $0x1ec] ss:$16 sps:$4 sm:$0xff]   ;;  %v7874_v37 = vld [vmem:[%s11223_s1 + $0x268] ss:$16 sps:$4 sm:$0xff]  }
 0x188   :  { %5481 = vmatpush1.bf16.msra.mxu1 %v7832_v34  ;;  %v5148_v53 = vpop.f32.mrf.mxu0  ;;  %5449 = vmatprep.subr.bf16.mxu0 %v7837_v44  ;;  %v7876_v34 = vld [vmem:[%s11223_s1 + $0x26c] ss:$16 sps:$4 sm:$0xff]   ;;  %v7877_v40 = vld [vmem:[%s11223_s1 + $0x1c8] ss:$16 sps:$4 sm:$0xff]  }
 0x189   :  { %v5189_v58 = vpop.f32.mrf.mxu1  ;;  %5482 = vmatprep.subr.bf16.mxu1 %v7840_v47  ;;  %v7880_v44 = vld [vmem:[%s11223_s1 + $0x248] ss:$16 sps:$4 sm:$0xff]   ;;  %v7885_v47 = vld [vmem:[%s11223_s1 + $0x1ac] ss:$16 sps:$4 sm:$0xff]  }
 0x18a   :  { %v7888_v48 = vld [vmem:[%s11223_s1 + $0x22c] ss:$16 sps:$4 sm:$0xff]   ;;  %v7889_v53 = vld [vmem:[%s11223_s1 + $0x188] ss:$16 sps:$4 sm:$0xff]  }
 0x18b   :  { %5450 = vmatpush1.bf16.msra.mxu0 %v7835_v45  ;;  %v7883_v45 = vld [vmem:[%s11223_s1 + $0x1a8] ss:$16 sps:$4 sm:$0xff]   ;;  %v7891_v56 = vld [vmem:[%s11223_s1 + $0x18c] ss:$16 sps:$4 sm:$0xff]  }
 0x18c   :  { %5483 = vmatpush1.bf16.msra.mxu1 %v7838_v51  ;;  %5451 = vmatprep.subr.bf16.mxu0 %v7843_v61  ;;  %v7886_v51 = vld [vmem:[%s11223_s1 + $0x228] ss:$16 sps:$4 sm:$0xff]   ;;  %v7894_v55 = vld [vmem:[%s11223_s1 + $0x20c] ss:$16 sps:$4 sm:$0xff]  }
 0x18d   :  { %5484 = vmatprep.subr.bf16.mxu1 %v7846_v62  ;;  %v7892_v58 = vld [vmem:[%s11223_s1 + $0x208] ss:$16 sps:$4 sm:$0xff]   ;;  %v7897_v61 = vld [vmem:[%s11223_s1 + $0x16c] ss:$16 sps:$4 sm:$0xff]  }
 0x18e   :  { %v7900_v62 = vld [vmem:[%s11223_s1 + $0x3ec] ss:$16 sps:$4 sm:$0xff]  }
 0x18f   :  { %5452 = vmatpush1.bf16.msra.mxu0 %v7841_v60  ;;  %v7895_v60 = vld [vmem:[%s11223_s1 + $0x168] ss:$16 sps:$4 sm:$0xff]  }
 0x190   :  { %5485 = vmatpush1.bf16.msra.mxu1 %v7844_v63  ;;  %5519 = vmatprep.subr.bf16.mxu0 %v7852_v1  ;;  %v7898_v63 = vld [vmem:[%s11223_s1 + $0x3e8] ss:$16 sps:$4 sm:$0xff]  }
 0x191   :  { %5486 = vmatprep.subr.bf16.mxu1 %v7849_v3  ;;  %v7906_v3 = vld [vmem:[%s11223_s1 + $0x3cc] ss:$16 sps:$4 sm:$0xff]   ;;  %v7901_v1 = vld [vmem:[%s11223_s1 + $0x148] ss:$16 sps:$4 sm:$0xff]  }
 0x192   :  { %7162 = vmatmul.mubr.msk.bf16.vlgmr.msra.gmra.mxu0 %vm4941_vm0, %v9913_v9 }
 0x193   :  { %5520 = vmatpush1.bf16.msra.mxu0 %v7850_v8  ;;  %5551 = vmatprep.mubr.bf16.mxu0 %v8687_v0  ;;  %v7870_v0 = vld [vmem:[%s11223_s1 + $0x28c] ss:$16 sps:$4 sm:$0xff]  }
 0x194   :  { %5487 = vmatpush1.bf16.msra.mxu1 %v7847_v7  ;;  %5521 = vmatprep.subr.bf16.mxu0 %v7858_v11  ;;  %v7904_v7 = vld [vmem:[%s11223_s1 + $0x3c8] ss:$16 sps:$4 sm:$0xff]   ;;  %v7909_v8 = vld [vmem:[%s11223_s1 + $0x12c] ss:$16 sps:$4 sm:$0xff]  }
 0x195   :  { %5488 = vmatprep.subr.bf16.mxu1 %v7855_v10  ;;  %v7912_v10 = vld [vmem:[%s11223_s1 + $0x3ac] ss:$16 sps:$4 sm:$0xff]   ;;  %v7907_v11 = vld [vmem:[%s11223_s1 + $0x128] ss:$16 sps:$4 sm:$0xff]  }
 0x197   :  { %5522 = vmatpush1.bf16.msra.mxu0 %v7856_v16  ;;  %v7915_v16 = vld [vmem:[%s11223_s1 + $0x10c] ss:$16 sps:$4 sm:$0xff]  }
 0x198   :  { %5489 = vmatpush1.bf16.msra.mxu1 %v7853_v49  ;;  %5523 = vmatprep.subr.bf16.mxu0 %v7864_v4  ;;  %v7910_v49 = vld [vmem:[%s11223_s1 + $0x3a8] ss:$16 sps:$4 sm:$0xff]  }
 0x199   :  { %5490 = vmatprep.subr.bf16.mxu1 %v7861_v19  ;;  %v7918_v19 = vld [vmem:[%s11223_s1 + $0x38c] ss:$16 sps:$4 sm:$0xff]   ;;  %v7913_v4 = vld [vmem:[%s11223_s1 + $0x108] ss:$16 sps:$4 sm:$0xff]  }
 0x19b   :  { %5524 = vmatpush1.bf16.msra.mxu0 %v7862_v20  ;;  %v7921_v20 = vld [vmem:[%s11223_s1 + $0x36c] ss:$16 sps:$4 sm:$0xff]  }
 0x19c   :  { %5491 = vmatpush1.bf16.msra.mxu1 %v7859_v5  ;;  %5525 = vmatprep.subr.bf16.mxu0 %v7870_v0  ;;  %v7916_v5 = vld [vmem:[%s11223_s1 + $0x388] ss:$16 sps:$4 sm:$0xff]  }
 0x19d   :  { %5492 = vmatprep.subr.bf16.mxu1 %v7867_v21  ;;  %v7924_v21 = vld [vmem:[%s11223_s1 + $0x4ec] ss:$16 sps:$4 sm:$0xff]   ;;  %v7919_v0 = vld [vmem:[%s11223_s1 + $0x368] ss:$16 sps:$4 sm:$0xff]  }
 0x19f   :  { %5526 = vmatpush1.bf16.msra.mxu0 %v7868_v29  ;;  %v7927_v29 = vld [vmem:[%s11223_s1 + $0x34c] ss:$16 sps:$4 sm:$0xff]  }
 0x1a0   :  { %5493 = vmatpush1.bf16.msra.mxu1 %v7865_v28  ;;  %5527 = vmatprep.subr.bf16.mxu0 %v7876_v34  ;;  %v7922_v28 = vld [vmem:[%s11223_s1 + $0x4e8] ss:$16 sps:$4 sm:$0xff]  }
 0x1a1   :  { %5494 = vmatprep.subr.bf16.mxu1 %v7873_v30  ;;  %v7930_v30 = vld [vmem:[%s11223_s1 + $0x4cc] ss:$16 sps:$4 sm:$0xff]   ;;  %v7925_v34 = vld [vmem:[%s11223_s1 + $0x348] ss:$16 sps:$4 sm:$0xff]  }
 0x1a3   :  { %5528 = vmatpush1.bf16.msra.mxu0 %v7874_v37 }
 0x1a4   :  { %5495 = vmatpush2.bf16.msra.mxu1 %v7871_v36  ;;  %5529 = vmatprep.subr.bf16.mxu0 %v7882_v32  ;;  %v7928_v36 = vld [vmem:[%s11223_s1 + $0x4c8] ss:$16 sps:$4 sm:$0xff]  }
 0x1a5   :  { %5496 = vmatprep.subr.bf16.mxu1 %v7879_v38 }
 0x1a7   :  { %5530 = vmatpush1.bf16.msra.mxu0 %v7880_v44 }
 0x1a8   :  { %5497 = vmatpush2.bf16.msra.mxu1 %v7877_v40  ;;  %5531 = vmatprep.subr.bf16.mxu0 %v7888_v48  ;;  %v7936_v48 = vld [vmem:[%s11223_s1 + $0x4ac] ss:$16 sps:$4 sm:$0xff]  }
 0x1a9   :  { %5498 = vmatprep.subr.bf16.mxu1 %v7885_v47  ;;  %v7933_v47 = vld [vmem:[%s11223_s1 + $0x32c] ss:$16 sps:$4 sm:$0xff]  }
 0x1ab   :  { %5532 = vmatpush1.bf16.msra.mxu0 %v7886_v51  ;;  %v7934_v51 = vld [vmem:[%s11223_s1 + $0x4a8] ss:$16 sps:$4 sm:$0xff]  }
 0x1ac   :  { %5499 = vmatpush2.bf16.msra.mxu1 %v7883_v45  ;;  %5533 = vmatprep.subr.bf16.mxu0 %v7894_v55 }
 0x1ad   :  { %5500 = vmatprep.subr.bf16.mxu1 %v7891_v56 }
 0x1af   :  { %5534 = vmatpush1.bf16.msra.mxu0 %v7892_v58 }
 0x1b0   :  { %5501 = vmatpush2.bf16.msra.mxu1 %v7889_v53  ;;  %5535 = vmatprep.subr.bf16.mxu0 %v7900_v62  ;;  %v7942_v62 = vld [vmem:[%s11223_s1 + $0x48c] ss:$16 sps:$4 sm:$0xff]  }
 0x1b1   :  { %5502 = vmatprep.subr.bf16.mxu1 %v7897_v61 }
 0x1b3   :  { %5536 = vmatpush2.bf16.msra.mxu0 %v7898_v63  ;;  %v7945_v63 = vld [vmem:[%s11223_s1 + $0x46c] ss:$16 sps:$4 sm:$0xff]  }
 0x1b4   :  { %5503 = vmatpush2.bf16.msra.mxu1 %v7895_v60  ;;  %5537 = vmatprep.subr.bf16.mxu0 %v7906_v3  ;;  %v7940_v60 = vld [vmem:[%s11223_s1 + $0x488] ss:$16 sps:$4 sm:$0xff]  }
 0x1b5   :  { %5504 = vmatprep.subr.bf16.mxu1 %v7903_v2  ;;  %v7948_v2 = vld [vmem:[%s11223_s1 + $0x6ec] ss:$16 sps:$4 sm:$0xff]   ;;  %v7943_v3 = vld [vmem:[%s11223_s1 + $0x468] ss:$16 sps:$4 sm:$0xff]  }
 0x1b7   :  { %5538 = vmatpush2.bf16.msra.mxu0 %v7904_v7  ;;  %v7951_v7 = vld [vmem:[%s11223_s1 + $0x44c] ss:$16 sps:$4 sm:$0xff]  }
 0x1b8   :  { %5505 = vmatpush2.bf16.msra.mxu1 %v7901_v1  ;;  %5539 = vmatprep.subr.bf16.mxu0 %v7912_v10  ;;  %v7946_v1 = vld [vmem:[%s11223_s1 + $0x6e8] ss:$16 sps:$4 sm:$0xff]  }
 0x1b9   :  { %5506 = vmatprep.subr.bf16.mxu1 %v7909_v8  ;;  %v7954_v8 = vld [vmem:[%s11223_s1 + $0x6cc] ss:$16 sps:$4 sm:$0xff]   ;;  %v7949_v10 = vld [vmem:[%s11223_s1 + $0x448] ss:$16 sps:$4 sm:$0xff]  }
 0x1bb   :  { %5540 = vmatpush2.bf16.msra.mxu0 %v7910_v49  ;;  %v7957_v49 = vld [vmem:[%s11223_s1 + $0x42c] ss:$16 sps:$4 sm:$0xff]  }
 0x1bc   :  { %5507 = vmatpush2.bf16.msra.mxu1 %v7907_v11  ;;  %5541 = vmatprep.subr.bf16.mxu0 %v7918_v19  ;;  %v7952_v11 = vld [vmem:[%s11223_s1 + $0x6c8] ss:$16 sps:$4 sm:$0xff]  }
 0x1bd   :  { %5508 = vmatprep.subr.bf16.mxu1 %v7915_v16  ;;  %v7960_v16 = vld [vmem:[%s11223_s1 + $0x6ac] ss:$16 sps:$4 sm:$0xff]   ;;  %v7955_v19 = vld [vmem:[%s11223_s1 + $0x428] ss:$16 sps:$4 sm:$0xff]  }
 0x1bf   :  { %5542 = vmatpush2.bf16.msra.mxu0 %v7916_v5  ;;  %v7966_v5 = vld [vmem:[%s11223_s1 + $0x68c] ss:$16 sps:$4 sm:$0xff]  }
 0x1c0   :  { %5509 = vmatpush2.bf16.msra.mxu1 %v7913_v4  ;;  %5543 = vmatprep.subr.bf16.mxu0 %v7921_v20  ;;  %v7963_v4 = vld [vmem:[%s11223_s1 + $0x40c] ss:$16 sps:$4 sm:$0xff]   ;;  %v7961_v20 = vld [vmem:[%s11223_s1 + $0x408] ss:$16 sps:$4 sm:$0xff]  }
 0x1c1   :  { %5560 = vmatprep.subr.bf16.mxu1 %v7924_v21  ;;  %v7969_v21 = vld [vmem:[%s11223_s1 + $0x5ec] ss:$16 sps:$4 sm:$0xff]  }
 0x1c2   :  { %v5225_v37 = vpop.f32.mrf.mxu0 }
 0x1c3   :  { %v5266_v38 = vpop.f32.mrf.mxu1  ;;  %5511 = vmatmul.mubr.bf16.vlgmr.msra.gmra.mxu1 %v8724_v13  ;;  %v5226_v32 = vadd.f32 %v5225_v37, %v9872_v46  ;;  %5544 = vmatpush2.bf16.msra.mxu0 %v7919_v0  ;;  %v7931_v46 = vld [vmem:[%s11223_s1 + $0x328] ss:$16 sps:$4 sm:$0xff]   ;;  %v7972_v0 = vld [vmem:[%s11223_s1 + $0x66c] ss:$16 sps:$4 sm:$0xff]  }
 0x1c4   :  { %5561 = vmatpush1.bf16.msra.mxu1 %v7922_v28  ;;  %v5227_v40 = vpop.f32.mrf.mxu0  ;;  %5545 = vmatprep.subr.bf16.mxu0 %v7927_v29  ;;  %v7967_v28 = vld [vmem:[%s11223_s1 + $0x5e8] ss:$16 sps:$4 sm:$0xff]  }
 0x1c5   :  { %v5268_v44 = vpop.f32.mrf.mxu1  ;;  %5562 = vmatprep.subr.bf16.mxu1 %v7930_v30  ;;  %v10082_v45 = vadd.f32 %v5266_v38, %v5226_v32  ;;  %v5228_v13 = vadd.f32 %v5227_v40, %v9883_v57  ;;  %5592 = vmatprep.mubr.bf16.mxu1 %v8736_v17  ;;  %v7939_v57 = vld [vmem:[%s11223_s1 + $0x30c] ss:$16 sps:$4 sm:$0xff]   ;;  %v7937_v17 = vld [vmem:[%s11223_s1 + $0x308] ss:$16 sps:$4 sm:$0xff]  }
 0x1c6   :  { %v5229_v56 = vpop.f32.mrf.mxu0  ;;  %v7970_v29 = vld [vmem:[%s11223_s1 + $0x668] ss:$16 sps:$4 sm:$0xff]   ;;  %v7975_v30 = vld [vmem:[%s11223_s1 + $0x5cc] ss:$16 sps:$4 sm:$0xff]  }
 0x1c7   :  { %v5270_v55 = vpop.f32.mrf.mxu1  ;;  %v10092_v53 = vadd.f32 %v5268_v44, %v5228_v13  ;;  %5546 = vmatpush2.bf16.msra.mxu0 %v7925_v34  ;;  %v7978_v34 = vld [vmem:[%s11223_s1 + $0x64c] ss:$16 sps:$4 sm:$0xff]   ;;  %v7976_v37 = vld [vmem:[%s11223_s1 + $0x648] ss:$16 sps:$4 sm:$0xff]  }
 0x1c8   :  { %5563 = vmatpush1.bf16.msra.mxu1 %v7928_v36  ;;  %v5230_v58 = vpop.f32.mrf.mxu0  ;;  %5547 = vmatprep.subr.bf16.mxu0 %v7933_v47  ;;  %v7973_v36 = vld [vmem:[%s11223_s1 + $0x5c8] ss:$16 sps:$4 sm:$0xff]   ;;  %v7981_v38 = vld [vmem:[%s11223_s1 + $0x5ac] ss:$16 sps:$4 sm:$0xff]  }
 0x1c9   :  { %v5271_v61 = vpop.f32.mrf.mxu1  ;;  %5564 = vmatprep.subr.bf16.mxu1 %v7936_v48  ;;  %v7984_v32 = vld [vmem:[%s11223_s1 + $0x62c] ss:$16 sps:$4 sm:$0xff]   ;;  %v7979_v40 = vld [vmem:[%s11223_s1 + $0x5a8] ss:$16 sps:$4 sm:$0xff]  }
 0x1ca   :  { %v7982_v44 = vld [vmem:[%s11223_s1 + $0x628] ss:$16 sps:$4 sm:$0xff]   ;;  %v7987_v47 = vld [vmem:[%s11223_s1 + $0x58c] ss:$16 sps:$4 sm:$0xff]  }
 0x1cb   :  { %5548 = vmatpush2.bf16.msra.mxu0 %v7931_v46  ;;  %v7990_v48 = vld [vmem:[%s11223_s1 + $0x60c] ss:$16 sps:$4 sm:$0xff]  }
 0x1cc   :  { %5565 = vmatpush1.bf16.msra.mxu1 %v7934_v51  ;;  %5549 = vmatprep.subr.bf16.mxu0 %v7939_v57 }
 0x1cd   :  { %5566 = vmatprep.subr.bf16.mxu1 %v7942_v62 }
 0x1cf   :  { %5550 = vmatpush2.bf16.msra.mxu0 %v7937_v17 }
 0x1d0   :  { %5567 = vmatpush1.bf16.msra.mxu1 %v7940_v60  ;;  %5601 = vmatprep.subr.bf16.mxu0 %v7948_v2 }
 0x1d1   :  { %5568 = vmatprep.subr.bf16.mxu1 %v7945_v63 }
 0x1d2   :  { %5552 = vmatmul.mubr.bf16.vlgmr.msra.gmra.mxu0 %v8740_v18  ;;  %v7958_v18 = vld [vmem:[%s11223_s1 + $0x6a8] ss:$16 sps:$4 sm:$0xff]  }
 0x1d3   :  { %5602 = vmatpush1.bf16.msra.mxu0 %v7946_v1  ;;  %5633 = vmatprep.mubr.bf16.mxu0 %v8756_v23  ;;  %v7964_v23 = vld [vmem:[%s11223_s1 + $0x688] ss:$16 sps:$4 sm:$0xff]  }
 0x1d4   :  { %5569 = vmatpush1.bf16.msra.mxu1 %v7943_v3  ;;  %5603 = vmatprep.subr.bf16.mxu0 %v7954_v8 }
 0x1d5   :  { %5570 = vmatprep.subr.bf16.mxu1 %v7951_v7 }
 0x1d7   :  { %5604 = vmatpush1.bf16.msra.mxu0 %v7952_v11 }
 0x1d8   :  { %5571 = vmatpush1.bf16.msra.mxu1 %v7949_v10  ;;  %5605 = vmatprep.subr.bf16.mxu0 %v7960_v16 }
 0x1d9   :  { %5572 = vmatprep.subr.bf16.mxu1 %v7957_v49 }
 0x1db   :  { %5606 = vmatpush1.bf16.msra.mxu0 %v7958_v18 }
 0x1dc   :  { %5573 = vmatpush1.bf16.msra.mxu1 %v7955_v19  ;;  %5607 = vmatprep.subr.bf16.mxu0 %v7966_v5 }
 0x1dd   :  { %5574 = vmatprep.subr.bf16.mxu1 %v7963_v4 }
 0x1df   :  { %5608 = vmatpush1.bf16.msra.mxu0 %v7964_v23 }
 0x1e0   :  { %5575 = vmatpush1.bf16.msra.mxu1 %v7961_v20  ;;  %5609 = vmatprep.subr.bf16.mxu0 %v7972_v0 }
 0x1e1   :  { %5576 = vmatprep.subr.bf16.mxu1 %v7969_v21 }
 0x1e3   :  { %5610 = vmatpush1.bf16.msra.mxu0 %v7970_v29 }
 0x1e4   :  { %5577 = vmatpush2.bf16.msra.mxu1 %v7967_v28  ;;  %5611 = vmatprep.subr.bf16.mxu0 %v7978_v34 }
 0x1e5   :  { %5578 = vmatprep.subr.bf16.mxu1 %v7975_v30 }
 0x1e7   :  { %5612 = vmatpush1.bf16.msra.mxu0 %v7976_v37 }
 0x1e8   :  { %5579 = vmatpush2.bf16.msra.mxu1 %v7973_v36  ;;  %5613 = vmatprep.subr.bf16.mxu0 %v7984_v32 }
 0x1e9   :  { %5580 = vmatprep.subr.bf16.mxu1 %v7981_v38 }
 0x1ea   :  { %10 = vsyncpa [#allocation3], 0  ;;  %v7985_v13 = vld [vmem:[%s11223_s1 + $0x588] ss:$16 sps:$4 sm:$0xff]   ;;  %v7993_v51 = vld [vmem:[%s11223_s1 + $0x56c] ss:$16 sps:$4 sm:$0xff]  }
 0x1eb   :  { %5614 = vmatpush1.bf16.msra.mxu0 %v7982_v44  ;;  %v7988_v46 = vld [vmem:[%s11223_s1 + $0x608] ss:$16 sps:$4 sm:$0xff]   ;;  %v7996_v56 = vld [vmem:[%s11223_s1 + $0x7ec] ss:$16 sps:$4 sm:$0xff]   ;;  %s8480_s16 = smov [#allocation2]  }
 0x1ec   :  { %5581 = vmatpush2.bf16.msra.mxu1 %v7979_v40  ;;  %5615 = vmatprep.subr.bf16.mxu0 %v7990_v48  ;;  %v7991_v55 = vld [vmem:[%s11223_s1 + $0x568] ss:$16 sps:$4 sm:$0xff]   ;;  %v7999_v61 = vld [vmem:[%s11223_s1 + $0x54c] ss:$16 sps:$4 sm:$0xff]   ;;  %s6369_s17 = sshll.u32 %s8480_s16, 4  ;;  %s6370_s17 = int_to_ptr.vmem [resolvable:$true] %s6369_s17 }
 0x1ed   :  { %5582 = vmatprep.subr.bf16.mxu1 %v7987_v47  ;;  %v7994_v58 = vld [vmem:[%s11223_s1 + $0x7e8] ss:$16 sps:$4 sm:$0xff]   ;;  %v8002_v57 = vld [vmem:[%s11223_s1 + $0x7cc] ss:$16 sps:$4 sm:$0xff]   ;;  %s8456_s18 = scalar_lea.vmem %s6370_s17, 32  ;;  %p8461_p1 = scmp.lt.s32.totalorder %s6370_s17, %s6370_s17 }
 0x1ee   :  { %v7997_v62 = vld [vmem:[%s11223_s1 + $0x548] ss:$16 sps:$4 sm:$0xff]   ;;  %v8005_v60 = vld [vmem:[%s11223_s1 + $0x52c] ss:$16 sps:$4 sm:$0xff]   ;;  %p8457_p0 = scmp.ne.s32.totalorder %s6370_s17, %s8456_s18  ;;  %p8462_p2 = scmp.lt.s32.totalorder %s8456_s18, %s8456_s18 }
 0x1ef   :  { %5616 = vmatpush1.bf16.msra.mxu0 %v7988_v46  ;;  %v8000_v17 = vld [vmem:[%s11223_s1 + $0x7c8] ss:$16 sps:$4 sm:$0xff]   ;;  %v8008_v63 = vld [vmem:[%s11223_s1 + $0x7ac] ss:$16 sps:$4 sm:$0xff]  }
 0x1f0   :  { %5583 = vmatpush2.bf16.msra.mxu1 %v7985_v13  ;;  %5617 = vmatprep.subr.bf16.mxu0 %v7996_v56  ;;  %v8003_v2 = vld [vmem:[%s11223_s1 + $0x528] ss:$16 sps:$4 sm:$0xff]   ;;  %v8011_v1 = vld [vmem:[%s11223_s1 + $0x50c] ss:$16 sps:$4 sm:$0xff]   ;;  %p8463_p3 = por %p8462_p2, %p8461_p1 }
 0x1f1   :  { %5584 = vmatprep.subr.bf16.mxu1 %v7993_v51  ;;  %v8006_v3 = vld [vmem:[%s11223_s1 + $0x7a8] ss:$16 sps:$4 sm:$0xff]   ;;  %v8014_v7 = vld [vmem:[%s11223_s1 + $0x78c] ss:$16 sps:$4 sm:$0xff]  }
 0x1f2   :  { %v8009_v8 = vld [vmem:[%s11223_s1 + $0x508] ss:$16 sps:$4 sm:$0xff]   ;;  %v8017_v11 = vld [vmem:[%s11223_s1 + $0x76c] ss:$16 sps:$4 sm:$0xff]   ;;  %p8464_p4 = pnand %p8463_p3, %p8457_p0 }
 0x1f3   :  { %5618 = vmatpush2.bf16.msra.mxu0 %v7994_v58  ;;  %v8012_v10 = vld [vmem:[%s11223_s1 + $0x788] ss:$16 sps:$4 sm:$0xff]   ;;  %v8020_v49 = vld [vmem:[%s11223_s1 + $0x8ec] ss:$16 sps:$4 sm:$0xff]  }
 0x1f4   :  { %5585 = vmatpush2.bf16.msra.mxu1 %v7991_v55  ;;  %5619 = vmatprep.subr.bf16.mxu0 %v8002_v57  ;;  %v8015_v16 = vld [vmem:[%s11223_s1 + $0x768] ss:$16 sps:$4 sm:$0xff]   ;;  %v8023_v18 = vld [vmem:[%s11223_s1 + $0x74c] ss:$16 sps:$4 sm:$0xff]  }
 0x1f5   :  { %5586 = vmatprep.subr.bf16.mxu1 %v7999_v61  ;;  %v8018_v19 = vld [vmem:[%s11223_s1 + $0x8e8] ss:$16 sps:$4 sm:$0xff]   ;;  %v8026_v4 = vld [vmem:[%s11223_s1 + $0x8cc] ss:$16 sps:$4 sm:$0xff]  }
 0x1f6   :  { %v8021_v21 = vld [vmem:[%s11223_s1 + $0x748] ss:$16 sps:$4 sm:$0xff]   ;;  %v8041_v46 = vld [vmem:[%s11223_s1 + $0x86c] ss:$16 sps:$4 sm:$0xff]  }
 0x1f7   :  { %5620 = vmatpush2.bf16.msra.mxu0 %v8000_v17  ;;  %v8024_v0 = vld [vmem:[%s11223_s1 + $0x8c8] ss:$16 sps:$4 sm:$0xff]   ;;  %v8044_v51 = vld [vmem:[%s11223_s1 + $0xaec] ss:$16 sps:$4 sm:$0xff]  }
 0x1f8   :  { %5587 = vmatpush2.bf16.msra.mxu1 %v7997_v62  ;;  %5621 = vmatprep.subr.bf16.mxu0 %v8008_v63  ;;  %v8027_v32 = vld [vmem:[%s11223_s1 + $0x728] ss:$16 sps:$4 sm:$0xff]   ;;  %v8047_v58 = vld [vmem:[%s11223_s1 + $0x84c] ss:$16 sps:$4 sm:$0xff]  }
 0x1f9   :  { %5588 = vmatprep.subr.bf16.mxu1 %v8005_v60  ;;  %v8030_v40 = vld [vmem:[%s11223_s1 + $0x8a8] ss:$16 sps:$4 sm:$0xff]   ;;  %v8050_v61 = vld [vmem:[%s11223_s1 + $0xacc] ss:$16 sps:$4 sm:$0xff]  }
 0x1fa   :  { %v8033_v48 = vld [vmem:[%s11223_s1 + $0x708] ss:$16 sps:$4 sm:$0xff]   ;;  %v8053_v17 = vld [vmem:[%s11223_s1 + $0x82c] ss:$16 sps:$4 sm:$0xff]  }
 0x1fb   :  { %5622 = vmatpush2.bf16.msra.mxu0 %v8006_v3  ;;  %v8036_v13 = vld [vmem:[%s11223_s1 + $0x888] ss:$16 sps:$4 sm:$0xff]  }
 0x1fc   :  { %5589 = vmatpush2.bf16.msra.mxu1 %v8003_v2  ;;  %5623 = vmatprep.subr.bf16.mxu0 %v8014_v7  ;;  %v8039_v56 = vld [vmem:[%s11223_s1 + $0x868] ss:$16 sps:$4 sm:$0xff]   ;;  %v8059_v2 = vld [vmem:[%s11223_s1 + $0x80c] ss:$16 sps:$4 sm:$0xff]  }
 0x1fd   :  { %5590 = vmatprep.subr.bf16.mxu1 %v8011_v1  ;;  %v8042_v55 = vld [vmem:[%s11223_s1 + $0xae8] ss:$16 sps:$4 sm:$0xff]   ;;  %v8065_v7 = vld [vmem:[%s11223_s1 + $0x9ec] ss:$16 sps:$4 sm:$0xff]  }
 0x1fe   :  { %v8045_v57 = vld [vmem:[%s11223_s1 + $0x848] ss:$16 sps:$4 sm:$0xff]  }
 0x1ff   :  { %5624 = vmatpush2.bf16.msra.mxu0 %v8012_v10  ;;  %v8048_v62 = vld [vmem:[%s11223_s1 + $0xac8] ss:$16 sps:$4 sm:$0xff]  }
 0x200   :  { %5591 = vmatpush2.bf16.msra.mxu1 %v8009_v8  ;;  %5625 = vmatprep.subr.bf16.mxu0 %v8017_v11  ;;  %v8051_v60 = vld [vmem:[%s11223_s1 + $0x828] ss:$16 sps:$4 sm:$0xff]   ;;  %v8068_v8 = vld [vmem:[%s11223_s1 + $0xa6c] ss:$16 sps:$4 sm:$0xff]  }
 0x201   :  { %5642 = vmatprep.subr.bf16.mxu1 %v8020_v49  ;;  %v8054_v63 = vld [vmem:[%s11223_s1 + $0xaa8] ss:$16 sps:$4 sm:$0xff]   ;;  %v8071_v49 = vld [vmem:[%s11223_s1 + $0x9cc] ss:$16 sps:$4 sm:$0xff]  }
 0x202   :  { %v5307_v5 = vpop.f32.mrf.mxu0  ;;  %v8057_v3 = vld [vmem:[%s11223_s1 + $0x808] ss:$16 sps:$4 sm:$0xff]  }
 0x203   :  { %v5348_v20 = vpop.f32.mrf.mxu1  ;;  %5593 = vmatmul.mubr.bf16.vlgmr.msra.gmra.mxu1 %v8935_v26  ;;  %v5308_v23 = vadd.f32 %v5307_v5, %v10082_v45  ;;  %5626 = vmatpush2.bf16.msra.mxu0 %v8015_v16  ;;  %v8029_v26 = vld [vmem:[%s11223_s1 + $0x72c] ss:$16 sps:$4 sm:$0xff]   ;;  %v8060_v1 = vld [vmem:[%s11223_s1 + $0xa88] ss:$16 sps:$4 sm:$0xff]  }
 0x204   :  { %5643 = vmatpush1.bf16.msra.mxu1 %v8018_v19  ;;  %v5309_v28 = vpop.f32.mrf.mxu0  ;;  %5627 = vmatprep.subr.bf16.mxu0 %v8023_v18  ;;  %v8032_v45 = vld [vmem:[%s11223_s1 + $0x8ac] ss:$16 sps:$4 sm:$0xff]   ;;  %v8063_v10 = vld [vmem:[%s11223_s1 + $0x9e8] ss:$16 sps:$4 sm:$0xff]  }
 0x205   :  { %v5350_v29 = vpop.f32.mrf.mxu1  ;;  %5644 = vmatprep.subr.bf16.mxu1 %v8026_v4  ;;  %v10284_v30 = vadd.f32 %v5348_v20, %v5308_v23  ;;  %v5310_v34 = vadd.f32 %v5309_v28, %v10092_v53  ;;  %5674 = vmatprep.mubr.bf16.mxu1 %v8988_v41  ;;  %v8035_v41 = vld [vmem:[%s11223_s1 + $0x70c] ss:$16 sps:$4 sm:$0xff]   ;;  %v8066_v11 = vld [vmem:[%s11223_s1 + $0xa68] ss:$16 sps:$4 sm:$0xff]  }
 0x206   :  { %v5311_v36 = vpop.f32.mrf.mxu0  ;;  %v8038_v53 = vld [vmem:[%s11223_s1 + $0x88c] ss:$16 sps:$4 sm:$0xff]   ;;  %v8069_v19 = vld [vmem:[%s11223_s1 + $0x9c8] ss:$16 sps:$4 sm:$0xff]  }
 0x207   :  { %v5352_v37 = vpop.f32.mrf.mxu1  ;;  %v10288_v38 = vadd.f32 %v5350_v29, %v5310_v34  ;;  %5628 = vmatpush2.bf16.msra.mxu0 %v8021_v21  ;;  %v8074_v16 = vld [vmem:[%s11223_s1 + $0xa4c] ss:$16 sps:$4 sm:$0xff]   ;;  %v8072_v18 = vld [vmem:[%s11223_s1 + $0xa48] ss:$16 sps:$4 sm:$0xff]  }
 0x208   :  { %5645 = vmatpush1.bf16.msra.mxu1 %v8024_v0  ;;  %v5312_v44 = vpop.f32.mrf.mxu0  ;;  %5629 = vmatprep.subr.bf16.mxu0 %v8029_v26  ;;  %v8077_v4 = vld [vmem:[%s11223_s1 + $0x9ac] ss:$16 sps:$4 sm:$0xff]   ;;  %v8075_v20 = vld [vmem:[%s11223_s1 + $0x9a8] ss:$16 sps:$4 sm:$0xff]  }
 0x209   :  { %v5353_v47 = vpop.f32.mrf.mxu1  ;;  %5646 = vmatprep.subr.bf16.mxu1 %v8032_v45  ;;  %v8080_v5 = vld [vmem:[%s11223_s1 + $0xa2c] ss:$16 sps:$4 sm:$0xff]   ;;  %v8078_v23 = vld [vmem:[%s11223_s1 + $0xa28] ss:$16 sps:$4 sm:$0xff]  }
 0x20a   :  { %v8083_v21 = vld [vmem:[%s11223_s1 + $0x98c] ss:$16 sps:$4 sm:$0xff]   ;;  %v8081_v28 = vld [vmem:[%s11223_s1 + $0x988] ss:$16 sps:$4 sm:$0xff]  }
 0x20b   :  { %5630 = vmatpush2.bf16.msra.mxu0 %v8027_v32  ;;  %v8086_v0 = vld [vmem:[%s11223_s1 + $0xa0c] ss:$16 sps:$4 sm:$0xff]   ;;  %v8084_v29 = vld [vmem:[%s11223_s1 + $0xa08] ss:$16 sps:$4 sm:$0xff]  }
 0x20c   :  { %5647 = vmatpush1.bf16.msra.mxu1 %v8030_v40  ;;  %5631 = vmatprep.subr.bf16.mxu0 %v8035_v41  ;;  %v8089_v26 = vld [vmem:[%s11223_s1 + $0x96c] ss:$16 sps:$4 sm:$0xff]   ;;  %v8087_v34 = vld [vmem:[%s11223_s1 + $0x968] ss:$16 sps:$4 sm:$0xff]  }
 0x20d   :  { %5648 = vmatprep.subr.bf16.mxu1 %v8038_v53  ;;  %v8092_v45 = vld [vmem:[%s11223_s1 + $0xbec] ss:$16 sps:$4 sm:$0xff]   ;;  %v8090_v36 = vld [vmem:[%s11223_s1 + $0xbe8] ss:$16 sps:$4 sm:$0xff]  }
 0x20e   :  { %v8095_v37 = vld [vmem:[%s11223_s1 + $0x94c] ss:$16 sps:$4 sm:$0xff]   ;;  %v8093_v40 = vld [vmem:[%s11223_s1 + $0x948] ss:$16 sps:$4 sm:$0xff]  }
 0x20f   :  { %5632 = vmatpush2.bf16.msra.mxu0 %v8033_v48  ;;  %v8098_v32 = vld [vmem:[%s11223_s1 + $0xbcc] ss:$16 sps:$4 sm:$0xff]   ;;  %v8096_v44 = vld [vmem:[%s11223_s1 + $0xbc8] ss:$16 sps:$4 sm:$0xff]  }
 0x210   :  { %5649 = vmatpush1.bf16.msra.mxu1 %v8036_v13  ;;  %5683 = vmatprep.subr.bf16.mxu0 %v8044_v51  ;;  %v8101_v47 = vld [vmem:[%s11223_s1 + $0x92c] ss:$16 sps:$4 sm:$0xff]   ;;  %v8099_v53 = vld [vmem:[%s11223_s1 + $0x928] ss:$16 sps:$4 sm:$0xff]  }
 0x211   :  { %5650 = vmatprep.subr.bf16.mxu1 %v8041_v46  ;;  %v8104_v41 = vld [vmem:[%s11223_s1 + $0xbac] ss:$16 sps:$4 sm:$0xff]   ;;  %v8102_v48 = vld [vmem:[%s11223_s1 + $0xba8] ss:$16 sps:$4 sm:$0xff]  }
 0x212   :  { %5634 = vmatmul.mubr.bf16.vlgmr.msra.gmra.mxu0 %v8948_v6  ;;  %v8056_v6 = vld [vmem:[%s11223_s1 + $0xaac] ss:$16 sps:$4 sm:$0xff]   ;;  %v8105_v51 = vld [vmem:[%s11223_s1 + $0x908] ss:$16 sps:$4 sm:$0xff]  }
 0x213   :  { %5684 = vmatpush1.bf16.msra.mxu0 %v8042_v55  ;;  %5715 = vmatprep.mubr.bf16.mxu0 %v8993_v43  ;;  %v8062_v43 = vld [vmem:[%s11223_s1 + $0xa8c] ss:$16 sps:$4 sm:$0xff]  }
 0x214   :  { %5651 = vmatpush1.bf16.msra.mxu1 %v8039_v56  ;;  %5685 = vmatprep.subr.bf16.mxu0 %v8050_v61  ;;  %v8107_v13 = vld [vmem:[%s11223_s1 + $0x90c] ss:$16 sps:$4 sm:$0xff]   ;;  %v8108_v56 = vld [vmem:[%s11223_s1 + $0xb88] ss:$16 sps:$4 sm:$0xff]  }
 0x215   :  { %5652 = vmatprep.subr.bf16.mxu1 %v8047_v58  ;;  %v8110_v46 = vld [vmem:[%s11223_s1 + $0xb8c] ss:$16 sps:$4 sm:$0xff]   ;;  %v8111_v61 = vld [vmem:[%s11223_s1 + $0xb68] ss:$16 sps:$4 sm:$0xff]  }
 0x216   :  { %v8113_v55 = vld [vmem:[%s11223_s1 + $0xb6c] ss:$16 sps:$4 sm:$0xff]  }
 0x217   :  { %5686 = vmatpush1.bf16.msra.mxu0 %v8048_v62  ;;  %v8116_v58 = vld [vmem:[%s11223_s1 + $0xcec] ss:$16 sps:$4 sm:$0xff]  }
 0x218   :  { %5653 = vmatpush1.bf16.msra.mxu1 %v8045_v57  ;;  %5687 = vmatprep.subr.bf16.mxu0 %v8056_v6  ;;  %v8114_v57 = vld [vmem:[%s11223_s1 + $0xce8] ss:$16 sps:$4 sm:$0xff]   ;;  %v8119_v62 = vld [vmem:[%s11223_s1 + $0xb4c] ss:$16 sps:$4 sm:$0xff]  }
 0x219   :  { %5654 = vmatprep.subr.bf16.mxu1 %v8053_v17  ;;  %v8122_v17 = vld [vmem:[%s11223_s1 + $0xccc] ss:$16 sps:$4 sm:$0xff]  }
 0x21b   :  { %5688 = vmatpush1.bf16.msra.mxu0 %v8054_v63 }
 0x21c   :  { %5655 = vmatpush1.bf16.msra.mxu1 %v8051_v60  ;;  %5689 = vmatprep.subr.bf16.mxu0 %v8062_v43  ;;  %v8120_v43 = vld [vmem:[%s11223_s1 + $0xcc8] ss:$16 sps:$4 sm:$0xff]  }
 0x21d   :  { %5656 = vmatprep.subr.bf16.mxu1 %v8059_v2  ;;  %v8117_v2 = vld [vmem:[%s11223_s1 + $0xb48] ss:$16 sps:$4 sm:$0xff]  }
 0x21f   :  { %5690 = vmatpush1.bf16.msra.mxu0 %v8060_v1 }
 0x220   :  { %5657 = vmatpush1.bf16.msra.mxu1 %v8057_v3  ;;  %5691 = vmatprep.subr.bf16.mxu0 %v8068_v8 }
 0x221   :  { %5658 = vmatprep.subr.bf16.mxu1 %v8065_v7 }
 0x223   :  { %5692 = vmatpush1.bf16.msra.mxu0 %v8066_v11 }
 0x224   :  { %5659 = vmatpush2.bf16.msra.mxu1 %v8063_v10  ;;  %5693 = vmatprep.subr.bf16.mxu0 %v8074_v16  ;;  %v8123_v16 = vld [vmem:[%s11223_s1 + $0xb28] ss:$16 sps:$4 sm:$0xff]  }
 0x225   :  { %5660 = vmatprep.subr.bf16.mxu1 %v8071_v49 }
 0x227   :  { %5694 = vmatpush1.bf16.msra.mxu0 %v8072_v18 }
 0x228   :  { %5661 = vmatpush2.bf16.msra.mxu1 %v8069_v19  ;;  %5695 = vmatprep.subr.bf16.mxu0 %v8080_v5  ;;  %v8126_v19 = vld [vmem:[%s11223_s1 + $0xca8] ss:$16 sps:$4 sm:$0xff]  }
 0x229   :  { %5662 = vmatprep.subr.bf16.mxu1 %v8077_v4  ;;  %v8129_v5 = vld [vmem:[%s11223_s1 + $0xb08] ss:$16 sps:$4 sm:$0xff]  }
 0x22b   :  { %5696 = vmatpush1.bf16.msra.mxu0 %v8078_v23  ;;  %v8137_v23 = vld [vmem:[%s11223_s1 + $0xc6c] ss:$16 sps:$4 sm:$0xff]  }
 0x22c   :  { %5663 = vmatpush2.bf16.msra.mxu1 %v8075_v20  ;;  %5697 = vmatprep.subr.bf16.mxu0 %v8086_v0  ;;  %v8132_v20 = vld [vmem:[%s11223_s1 + $0xc88] ss:$16 sps:$4 sm:$0xff]  }
 0x22d   :  { %5664 = vmatprep.subr.bf16.mxu1 %v8083_v21  ;;  %v8140_v21 = vld [vmem:[%s11223_s1 + $0xeec] ss:$16 sps:$4 sm:$0xff]   ;;  %v8135_v0 = vld [vmem:[%s11223_s1 + $0xc68] ss:$16 sps:$4 sm:$0xff]  }
 0x22f   :  { %5698 = vmatpush1.bf16.msra.mxu0 %v8084_v29  ;;  %v8143_v29 = vld [vmem:[%s11223_s1 + $0xc4c] ss:$16 sps:$4 sm:$0xff]  }
 0x230   :  { %5665 = vmatpush2.bf16.msra.mxu1 %v8081_v28  ;;  %5699 = vmatprep.subr.bf16.mxu0 %v8092_v45  ;;  %v8138_v28 = vld [vmem:[%s11223_s1 + $0xee8] ss:$16 sps:$4 sm:$0xff]  }
 0x231   :  { %5666 = vmatprep.subr.bf16.mxu1 %v8089_v26  ;;  %v8146_v26 = vld [vmem:[%s11223_s1 + $0xecc] ss:$16 sps:$4 sm:$0xff]  }
 0x233   :  { %5700 = vmatpush2.bf16.msra.mxu0 %v8090_v36  ;;  %v8141_v36 = vld [vmem:[%s11223_s1 + $0xc48] ss:$16 sps:$4 sm:$0xff]  }
 0x234   :  { %5667 = vmatpush2.bf16.msra.mxu1 %v8087_v34  ;;  %5701 = vmatprep.subr.bf16.mxu0 %v8098_v32 }
 0x235   :  { %5668 = vmatprep.subr.bf16.mxu1 %v8095_v37  ;;  %v8144_v37 = vld [vmem:[%s11223_s1 + $0xec8] ss:$16 sps:$4 sm:$0xff]  }
 0x237   :  { %5702 = vmatpush2.bf16.msra.mxu0 %v8096_v44 }
 0x238   :  { %5669 = vmatpush2.bf16.msra.mxu1 %v8093_v40  ;;  %5703 = vmatprep.subr.bf16.mxu0 %v8104_v41  ;;  %v8149_v40 = vld [vmem:[%s11223_s1 + $0xc2c] ss:$16 sps:$4 sm:$0xff]   ;;  %v8147_v41 = vld [vmem:[%s11223_s1 + $0xc28] ss:$16 sps:$4 sm:$0xff]  }
 0x239   :  { %5670 = vmatprep.subr.bf16.mxu1 %v8101_v47 }
 0x23b   :  { %5704 = vmatpush2.bf16.msra.mxu0 %v8102_v48 }
 0x23c   :  { %5671 = vmatpush2.bf16.msra.mxu1 %v8099_v53  ;;  %5705 = vmatprep.subr.bf16.mxu0 %v8110_v46  ;;  %v8150_v53 = vld [vmem:[%s11223_s1 + $0xea8] ss:$16 sps:$4 sm:$0xff]  }
 0x23d   :  { %5672 = vmatprep.subr.bf16.mxu1 %v8107_v13  ;;  %v8155_v13 = vld [vmem:[%s11223_s1 + $0xc0c] ss:$16 sps:$4 sm:$0xff]   ;;  %v8153_v46 = vld [vmem:[%s11223_s1 + $0xc08] ss:$16 sps:$4 sm:$0xff]  }
 0x23f   :  { %5706 = vmatpush2.bf16.msra.mxu0 %v8108_v56  ;;  %v8161_v56 = vld [vmem:[%s11223_s1 + $0xdec] ss:$16 sps:$4 sm:$0xff]  }
 0x240   :  { %5673 = vmatpush2.bf16.msra.mxu1 %v8105_v51  ;;  %5707 = vmatprep.subr.bf16.mxu0 %v8113_v55  ;;  %v8156_v51 = vld [vmem:[%s11223_s1 + $0xe88] ss:$16 sps:$4 sm:$0xff]   ;;  %v8164_v55 = vld [vmem:[%s11223_s1 + $0xe6c] ss:$16 sps:$4 sm:$0xff]  }
 0x241   :  { %5724 = vmatprep.subr.bf16.mxu1 %v8116_v58  ;;  %v8159_v58 = vld [vmem:[%s11223_s1 + $0xde8] ss:$16 sps:$4 sm:$0xff]  }
 0x242   :  { %v5389_v6 = vpop.f32.mrf.mxu0 }
 0x243   :  { %v5430_v60 = vpop.f32.mrf.mxu1  ;;  %5675 = vmatmul.mubr.bf16.vlgmr.msra.gmra.mxu1 %v9164_v50  ;;  %v5390_v63 = vadd.f32 %v5389_v6, %v10284_v30  ;;  %5708 = vmatpush2.bf16.msra.mxu0 %v8111_v61  ;;  %v8125_v50 = vld [vmem:[%s11223_s1 + $0xb2c] ss:$16 sps:$4 sm:$0xff]   ;;  %v8162_v61 = vld [vmem:[%s11223_s1 + $0xe68] ss:$16 sps:$4 sm:$0xff]  }
 0x244   :  { %5725 = vmatpush1.bf16.msra.mxu1 %v8114_v57  ;;  %v5391_v3 = vpop.f32.mrf.mxu0  ;;  %5709 = vmatprep.subr.bf16.mxu0 %v8119_v62  ;;  %v8128_v30 = vld [vmem:[%s11223_s1 + $0xcac] ss:$16 sps:$4 sm:$0xff]   ;;  %v8168_v6 = vld [vmem:[%s11223_s1 + $0xe48] ss:$16 sps:$4 sm:$0xff]  }
 0x245   :  { %v5432_v1 = vpop.f32.mrf.mxu1  ;;  %5726 = vmatprep.subr.bf16.mxu1 %v8122_v17  ;;  %v5431_v7 = vadd.f32 %v5430_v60, %v5390_v63  ;;  %v5392_v8 = vadd.f32 %v5391_v3, %v10288_v38  ;;  %5756 = vmatprep.mubr.bf16.mxu1 %v9176_v54  ;;  %v8131_v54 = vld [vmem:[%s11223_s1 + $0xb0c] ss:$16 sps:$4 sm:$0xff]   ;;  %v8165_v17 = vld [vmem:[%s11223_s1 + $0xdc8] ss:$16 sps:$4 sm:$0xff]  }
 0x246   :  { %v5393_v10 = vpop.f32.mrf.mxu0  ;;  %v8134_v38 = vld [vmem:[%s11223_s1 + $0xc8c] ss:$16 sps:$4 sm:$0xff]  }
 0x247   :  { %v5434_v11 = vpop.f32.mrf.mxu1  ;;  %v5433_v49 = vadd.f32 %v5432_v1, %v5392_v8  ;;  %5710 = vmatpush2.bf16.msra.mxu0 %v8117_v2  ;;  %v8167_v57 = vld [vmem:[%s11223_s1 + $0xdcc] ss:$16 sps:$4 sm:$0xff]   ;;  %v8171_v2 = vld [vmem:[%s11223_s1 + $0xda8] ss:$16 sps:$4 sm:$0xff]  }
 0x248   :  { %5727 = vmatpush1.bf16.msra.mxu1 %v8120_v43  ;;  %v5394_v18 = vpop.f32.mrf.mxu0  ;;  %5711 = vmatprep.subr.bf16.mxu0 %v8125_v50  ;;  %v8170_v62 = vld [vmem:[%s11223_s1 + $0xe4c] ss:$16 sps:$4 sm:$0xff]   ;;  %v8174_v43 = vld [vmem:[%s11223_s1 + $0xe28] ss:$16 sps:$4 sm:$0xff]  }
 0x249   :  { %v5435_v4 = vpop.f32.mrf.mxu1  ;;  %5728 = vmatprep.subr.bf16.mxu1 %v8128_v30  ;;  %v8173_v60 = vld [vmem:[%s11223_s1 + $0xdac] ss:$16 sps:$4 sm:$0xff]   ;;  %v8177_v50 = vld [vmem:[%s11223_s1 + $0xd88] ss:$16 sps:$4 sm:$0xff]  }
 0x24a   :  { %v8176_v63 = vld [vmem:[%s11223_s1 + $0xe2c] ss:$16 sps:$4 sm:$0xff]   ;;  %v8180_v30 = vld [vmem:[%s11223_s1 + $0xe08] ss:$16 sps:$4 sm:$0xff]  }
 0x24b   :  { %5712 = vmatpush2.bf16.msra.mxu0 %v8123_v16  ;;  %v8179_v3 = vld [vmem:[%s11223_s1 + $0xd8c] ss:$16 sps:$4 sm:$0xff]   ;;  %v8183_v10 = vld [vmem:[%s11223_s1 + $0xd68] ss:$16 sps:$4 sm:$0xff]  }
 0x24c   :  { %5729 = vmatpush1.bf16.msra.mxu1 %v8126_v19  ;;  %5713 = vmatprep.subr.bf16.mxu0 %v8131_v54  ;;  %v8182_v1 = vld [vmem:[%s11223_s1 + $0xe0c] ss:$16 sps:$4 sm:$0xff]   ;;  %v8186_v11 = vld [vmem:[%s11223_s1 + $0xfe8] ss:$16 sps:$4 sm:$0xff]  }
 0x24d   :  { %5730 = vmatprep.subr.bf16.mxu1 %v8134_v38  ;;  %v8188_v8 = vld [vmem:[%s11223_s1 + $0xfec] ss:$16 sps:$4 sm:$0xff]   ;;  %v8189_v19 = vld [vmem:[%s11223_s1 + $0xd48] ss:$16 sps:$4 sm:$0xff]  }
 0x24e   :  { %v8194_v16 = vld [vmem:[%s11223_s1 + $0xfcc] ss:$16 sps:$4 sm:$0xff]   ;;  %v8192_v18 = vld [vmem:[%s11223_s1 + $0xfc8] ss:$16 sps:$4 sm:$0xff]  }
 0x24f   :  { %5714 = vmatpush2.bf16.msra.mxu0 %v8129_v5  ;;  %v8197_v4 = vld [vmem:[%s11223_s1 + $0xd2c] ss:$16 sps:$4 sm:$0xff]   ;;  %v8195_v38 = vld [vmem:[%s11223_s1 + $0xd28] ss:$16 sps:$4 sm:$0xff]  }
 0x250   :  { %5731 = vmatpush1.bf16.msra.mxu1 %v8132_v20  ;;  %5765 = vmatprep.subr.bf16.mxu0 %v8140_v21  ;;  %v8200_v54 = vld [vmem:[%s11223_s1 + $0xfac] ss:$16 sps:$4 sm:$0xff]   ;;  %v8198_v5 = vld [vmem:[%s11223_s1 + $0xfa8] ss:$16 sps:$4 sm:$0xff]  }
 0x251   :  { %5732 = vmatprep.subr.bf16.mxu1 %v8137_v23  ;;  %v8203_v20 = vld [vmem:[%s11223_s1 + $0xd0c] ss:$16 sps:$4 sm:$0xff]   ;;  %v8201_v21 = vld [vmem:[%s11223_s1 + $0xd08] ss:$16 sps:$4 sm:$0xff]  }
 0x252   :  { %v5471_v45 = vpop.f32.mrf.mxu0  ;;  %5716 = vmatmul.mubr.bf16.vlgmr.msra.gmra.mxu0 %v9180_v35  ;;  %v8152_v35 = vld [vmem:[%s11223_s1 + $0xeac] ss:$16 sps:$4 sm:$0xff]  }
 0x253   :  { %v10525_v34 = vadd.f32 %v5471_v45, %v5431_v7  ;;  %5766 = vmatpush1.bf16.msra.mxu0 %v8138_v28  ;;  %5797 = vmatprep.mubr.bf16.mxu0 %v9196_v59  ;;  %v8158_v59 = vld [vmem:[%s11223_s1 + $0xe8c] ss:$16 sps:$4 sm:$0xff]   ;;  %v8210_v45 = vld [vmem:[%s11223_s1 + $0x10e8] ss:$16 sps:$4 sm:$0xff]  }
 0x254   :  { %5733 = vmatpush1.bf16.msra.mxu1 %v8135_v0  ;;  %v5473_v32 = vpop.f32.mrf.mxu0  ;;  %5767 = vmatprep.subr.bf16.mxu0 %v8146_v26  ;;  %v8185_v7 = vld [vmem:[%s11223_s1 + $0xd6c] ss:$16 sps:$4 sm:$0xff]   ;;  %v8204_v0 = vld [vmem:[%s11223_s1 + $0xf88] ss:$16 sps:$4 sm:$0xff]  }
 0x255   :  { %5734 = vmatprep.subr.bf16.mxu1 %v8143_v29  ;;  %v10539_v44 = vadd.f32 %v5473_v32, %v5433_v49  ;;  %v8191_v49 = vld [vmem:[%s11223_s1 + $0xd4c] ss:$16 sps:$4 sm:$0xff]   ;;  %v8207_v26 = vld [vmem:[%s11223_s1 + $0xf68] ss:$16 sps:$4 sm:$0xff]  }
 0x256   :  { %v5475_v47 = vpop.f32.mrf.mxu0  ;;  %v8206_v23 = vld [vmem:[%s11223_s1 + $0xf8c] ss:$16 sps:$4 sm:$0xff]  }
 0x257   :  { %5768 = vmatpush1.bf16.msra.mxu0 %v8144_v37  ;;  %v8209_v28 = vld [vmem:[%s11223_s1 + $0xf6c] ss:$16 sps:$4 sm:$0xff]  }
 0x258   :  { %5735 = vmatpush1.bf16.msra.mxu1 %v8141_v36  ;;  %v5476_v48 = vpop.f32.mrf.mxu0  ;;  %5769 = vmatprep.subr.bf16.mxu0 %v8152_v35  ;;  %v8212_v29 = vld [vmem:[%s11223_s1 + $0x10ec] ss:$16 sps:$4 sm:$0xff]   ;;  %v8216_v35 = vld [vmem:[%s11223_s1 + $0x10c8] ss:$16 sps:$4 sm:$0xff]  }
 0x259   :  { %5736 = vmatprep.subr.bf16.mxu1 %v8149_v40  ;;  %v8215_v36 = vld [vmem:[%s11223_s1 + $0xf4c] ss:$16 sps:$4 sm:$0xff]   ;;  %v8213_v40 = vld [vmem:[%s11223_s1 + $0xf48] ss:$16 sps:$4 sm:$0xff]  }
 0x25a   :  { %v8218_v37 = vld [vmem:[%s11223_s1 + $0x10cc] ss:$16 sps:$4 sm:$0xff]   ;;  %v8219_v48 = vld [vmem:[%s11223_s1 + $0xf28] ss:$16 sps:$4 sm:$0xff]  }
 0x25b   :  { %5770 = vmatpush1.bf16.msra.mxu0 %v8150_v53 }
 0x25c   :  { %5737 = vmatpush1.bf16.msra.mxu1 %v8147_v41  ;;  %5771 = vmatprep.subr.bf16.mxu0 %v8158_v59  ;;  %v8221_v41 = vld [vmem:[%s11223_s1 + $0xf2c] ss:$16 sps:$4 sm:$0xff]  }
 0x25d   :  { %5738 = vmatprep.subr.bf16.mxu1 %v8155_v13  ;;  %v8222_v13 = vld [vmem:[%s11223_s1 + $0x10a8] ss:$16 sps:$4 sm:$0xff]  }
 0x25f   :  { %5772 = vmatpush1.bf16.msra.mxu0 %v8156_v51  ;;  %v822_v51 = vsub.s32 2, %v8628_v42 }
 0x260   :  { %5739 = vmatpush1.bf16.msra.mxu1 %v8153_v46  ;;  %5773 = vmatprep.subr.bf16.mxu0 %v8164_v55  ;;  %v8227_v46 = vld [vmem:[%s11223_s1 + $0xf0c] ss:$16 sps:$4 sm:$0xff]   ;;  %v8225_v55 = vld [vmem:[%s11223_s1 + $0xf08] ss:$16 sps:$4 sm:$0xff]  }
 0x261   :  { %5740 = vmatprep.subr.bf16.mxu1 %v8161_v56  ;;  %v826_v56 = vsub.s32 3, %v8628_v42  ;;  %v8236_v42 = vld [vmem:[%s11223_s1 + $0x12ec] ss:$16 sps:$4 sm:$0xff]  }
 0x263   :  { %5774 = vmatpush1.bf16.msra.mxu0 %v8162_v61  ;;  %v8233_v61 = vld [vmem:[%s11223_s1 + $0x106c] ss:$16 sps:$4 sm:$0xff]  }
 0x264   :  { %5741 = vmatpush2.bf16.msra.mxu1 %v8159_v58  ;;  %5775 = vmatprep.subr.bf16.mxu0 %v8170_v62  ;;  %v8228_v58 = vld [vmem:[%s11223_s1 + $0x1088] ss:$16 sps:$4 sm:$0xff]  }
 0x265   :  { %5742 = vmatprep.subr.bf16.mxu1 %v8167_v57  ;;  %v8455_v57 = vld [vmem:[%s11224_s2] sm:$0xf] }
 0x266   :  { %v823_v62 = vrot.slane %v8455_v57, %v822_v51  ;;  %v8288_v51 = vld [vmem:[%s11223_s1 + $0x13c8] ss:$16 sps:$4 sm:$0xff]  }
 0x267   :  { %5776 = vmatpush1.bf16.msra.mxu0 %v8168_v6  ;;  %v8231_v6 = vld [vmem:[%s11223_s1 + $0x1068] ss:$16 sps:$4 sm:$0xff]  }
 0x268   :  { %5743 = vmatpush2.bf16.msra.mxu1 %v8165_v17  ;;  %5777 = vmatprep.subr.bf16.mxu0 %v8176_v63  ;;  %v827_v17 = vrot.slane %v8455_v57, %v826_v56  ;;  %v8239_v63 = vld [vmem:[%s11223_s1 + $0x104c] ss:$16 sps:$4 sm:$0xff]  }
 0x269   :  { %5744 = vmatprep.subr.bf16.mxu1 %v8173_v60  ;;  %v8234_v60 = vld [vmem:[%s11223_s1 + $0x12e8] ss:$16 sps:$4 sm:$0xff]   ;;  %v8293_v56 = vld [vmem:[%s11223_s1 + $0x112c] ss:$16 sps:$4 sm:$0xff]  }
 0x26a   :  { %v8302_v57 = vld [vmem:[%s11223_s1 + $0x138c] ss:$16 sps:$4 sm:$0xff]  }
 0x26b   :  { %5778 = vmatpush1.bf16.msra.mxu0 %v8174_v43 }
 0x26c   :  { %5745 = vmatpush2.bf16.msra.mxu1 %v8171_v2  ;;  %5779 = vmatprep.subr.bf16.mxu0 %v8182_v1  ;;  %v8242_v2 = vld [vmem:[%s11223_s1 + $0x12cc] ss:$16 sps:$4 sm:$0xff]  }
 0x26d   :  { %5746 = vmatprep.subr.bf16.mxu1 %v8179_v3 }
 0x26f   :  { %5780 = vmatpush1.bf16.msra.mxu0 %v8180_v30  ;;  %v8237_v30 = vld [vmem:[%s11223_s1 + $0x1048] ss:$16 sps:$4 sm:$0xff]  }
 0x270   :  { %5747 = vmatpush2.bf16.msra.mxu1 %v8177_v50  ;;  %5781 = vmatprep.subr.bf16.mxu0 %v8188_v8 }
 0x271   :  { %5748 = vmatprep.subr.bf16.mxu1 %v8185_v7  ;;  %v8240_v7 = vld [vmem:[%s11223_s1 + $0x12c8] ss:$16 sps:$4 sm:$0xff]  }
 0x273   :  { %5782 = vmatpush2.bf16.msra.mxu0 %v8186_v11 }
 0x274   :  { %5749 = vmatpush2.bf16.msra.mxu1 %v8183_v10  ;;  %5783 = vmatprep.subr.bf16.mxu0 %v8194_v16  ;;  %v8248_v10 = vld [vmem:[%s11223_s1 + $0x12ac] ss:$16 sps:$4 sm:$0xff]   ;;  %v8243_v16 = vld [vmem:[%s11223_s1 + $0x1028] ss:$16 sps:$4 sm:$0xff]  }
 0x275   :  { %5750 = vmatprep.subr.bf16.mxu1 %v8191_v49 }
 0x277   :  { %5784 = vmatpush2.bf16.msra.mxu0 %v8192_v18 }
 0x278   :  { %5751 = vmatpush2.bf16.msra.mxu1 %v8189_v19  ;;  %5785 = vmatprep.subr.bf16.mxu0 %v8200_v54  ;;  %v8246_v19 = vld [vmem:[%s11223_s1 + $0x12a8] ss:$16 sps:$4 sm:$0xff]  }
 0x279   :  { %5752 = vmatprep.subr.bf16.mxu1 %v8197_v4  ;;  %v8251_v4 = vld [vmem:[%s11223_s1 + $0x100c] ss:$16 sps:$4 sm:$0xff]   ;;  %v8249_v54 = vld [vmem:[%s11223_s1 + $0x1008] ss:$16 sps:$4 sm:$0xff]  }
 0x27b   :  { %5786 = vmatpush2.bf16.msra.mxu0 %v8198_v5  ;;  %v8257_v5 = vld [vmem:[%s11223_s1 + $0x11ec] ss:$16 sps:$4 sm:$0xff]  }
 0x27c   :  { %5753 = vmatpush2.bf16.msra.mxu1 %v8195_v38  ;;  %5787 = vmatprep.subr.bf16.mxu0 %v8206_v23  ;;  %v8252_v38 = vld [vmem:[%s11223_s1 + $0x1288] ss:$16 sps:$4 sm:$0xff]  }
 0x27d   :  { %5754 = vmatprep.subr.bf16.mxu1 %v8203_v20  ;;  %v8260_v20 = vld [vmem:[%s11223_s1 + $0x126c] ss:$16 sps:$4 sm:$0xff]   ;;  %v8255_v23 = vld [vmem:[%s11223_s1 + $0x11e8] ss:$16 sps:$4 sm:$0xff]  }
 0x27f   :  { %5788 = vmatpush2.bf16.msra.mxu0 %v8204_v0  ;;  %v8263_v0 = vld [vmem:[%s11223_s1 + $0x11cc] ss:$16 sps:$4 sm:$0xff]  }
 0x280   :  { %5755 = vmatpush2.bf16.msra.mxu1 %v8201_v21  ;;  %5789 = vmatprep.subr.bf16.mxu0 %v8209_v28  ;;  %v8258_v21 = vld [vmem:[%s11223_s1 + $0x1268] ss:$16 sps:$4 sm:$0xff]   ;;  %v8266_v28 = vld [vmem:[%s11223_s1 + $0x124c] ss:$16 sps:$4 sm:$0xff]  }
 0x281   :  { %5806 = vmatprep.subr.bf16.mxu1 %v8212_v29  ;;  %v8261_v29 = vld [vmem:[%s11223_s1 + $0x11c8] ss:$16 sps:$4 sm:$0xff]  }
 0x283   :  { %v5512_v32 = vpop.f32.mrf.mxu1  ;;  %5757 = vmatmul.mubr.bf16.vlgmr.msra.gmra.mxu1 %v9392_v15  ;;  %5790 = vmatpush2.bf16.msra.mxu0 %v8207_v26  ;;  %v8224_v15 = vld [vmem:[%s11223_s1 + $0x10ac] ss:$16 sps:$4 sm:$0xff]   ;;  %v8264_v26 = vld [vmem:[%s11223_s1 + $0x1248] ss:$16 sps:$4 sm:$0xff]  }
 0x284   :  { %5807 = vmatpush1.bf16.msra.mxu1 %v8210_v45  ;;  %5791 = vmatprep.subr.bf16.mxu0 %v8215_v36  ;;  %v5513_v43 = vadd.f32 %v5512_v32, %v823_v62  ;;  %v8269_v45 = vld [vmem:[%s11223_s1 + $0x11ac] ss:$16 sps:$4 sm:$0xff]   ;;  %v8270_v32 = vld [vmem:[%s11223_s1 + $0x1228] ss:$16 sps:$4 sm:$0xff]  }
 0x285   :  { %v5514_v47 = vpop.f32.mrf.mxu1  ;;  %5808 = vmatprep.subr.bf16.mxu1 %v8218_v37  ;;  %5838 = vmatprep.mubr.bf16.mxu1 %v9403_v22  ;;  %v8230_v22 = vld [vmem:[%s11223_s1 + $0x108c] ss:$16 sps:$4 sm:$0xff]   ;;  %v8267_v37 = vld [vmem:[%s11223_s1 + $0x11a8] ss:$16 sps:$4 sm:$0xff]  }
 0x286   :  { %v5515_v1 = vadd.f32 %v5514_v47, %v827_v17  ;;  %v8272_v36 = vld [vmem:[%s11223_s1 + $0x122c] ss:$16 sps:$4 sm:$0xff]   ;;  %v8273_v47 = vld [vmem:[%s11223_s1 + $0x1188] ss:$16 sps:$4 sm:$0xff]  }
 0x287   :  { %v5516_v53 = vpop.f32.mrf.mxu1  ;;  %5792 = vmatpush2.bf16.msra.mxu0 %v8213_v40  ;;  %v8275_v40 = vld [vmem:[%s11223_s1 + $0x118c] ss:$16 sps:$4 sm:$0xff]   ;;  %v8297_v62 = vld [vmem:[%s11223_s1 + $0x1108] ss:$16 sps:$4 sm:$0xff]  }
 0x288   :  { %5809 = vmatpush1.bf16.msra.mxu1 %v8216_v35  ;;  %5793 = vmatprep.subr.bf16.mxu0 %v8221_v41  ;;  %v8278_v35 = vld [vmem:[%s11223_s1 + $0x120c] ss:$16 sps:$4 sm:$0xff]   ;;  %v8276_v41 = vld [vmem:[%s11223_s1 + $0x1208] ss:$16 sps:$4 sm:$0xff]  }
 0x289   :  { %v5517_v59 = vpop.f32.mrf.mxu1  ;;  %5810 = vmatprep.subr.bf16.mxu1 %v8224_v15  ;;  %v8281_v15 = vld [vmem:[%s11223_s1 + $0x116c] ss:$16 sps:$4 sm:$0xff]   ;;  %v8300_v17 = vld [vmem:[%s11223_s1 + $0x1388] ss:$16 sps:$4 sm:$0xff]  }
 0x28a   :  { %v8284_v53 = vld [vmem:[%s11223_s1 + $0x13ec] ss:$16 sps:$4 sm:$0xff]  }
 0x28b   :  { %5794 = vmatpush2.bf16.msra.mxu0 %v8219_v48  ;;  %v8279_v48 = vld [vmem:[%s11223_s1 + $0x1168] ss:$16 sps:$4 sm:$0xff]   ;;  %v8287_v59 = vld [vmem:[%s11223_s1 + $0x114c] ss:$16 sps:$4 sm:$0xff]  }
 0x28c   :  { %5811 = vmatpush1.bf16.msra.mxu1 %v8222_v13  ;;  %5795 = vmatprep.subr.bf16.mxu0 %v8227_v46  ;;  %v8282_v13 = vld [vmem:[%s11223_s1 + $0x13e8] ss:$16 sps:$4 sm:$0xff]   ;;  %v8290_v46 = vld [vmem:[%s11223_s1 + $0x13cc] ss:$16 sps:$4 sm:$0xff]  }
 0x28d   :  { %5812 = vmatprep.subr.bf16.mxu1 %v8230_v22  ;;  %v8285_v22 = vld [vmem:[%s11223_s1 + $0x1148] ss:$16 sps:$4 sm:$0xff]  }
 0x28f   :  { %5796 = vmatpush2.bf16.msra.mxu0 %v8225_v55  ;;  %v8296_v55 = vld [vmem:[%s11223_s1 + $0x13ac] ss:$16 sps:$4 sm:$0xff]  }
 0x290   :  { %5813 = vmatpush1.bf16.msra.mxu1 %v8228_v58  ;;  %5847 = vmatprep.subr.bf16.mxu0 %v8236_v42  ;;  %v8291_v58 = vld [vmem:[%s11223_s1 + $0x1128] ss:$16 sps:$4 sm:$0xff]   ;;  %v8299_v42 = vld [vmem:[%s11223_s1 + $0x110c] ss:$16 sps:$4 sm:$0xff]  }
 0x291   :  { %5814 = vmatprep.subr.bf16.mxu1 %v8233_v61  ;;  %v8294_v61 = vld [vmem:[%s11223_s1 + $0x13a8] ss:$16 sps:$4 sm:$0xff]  }
 0x292   :  { %v5553_v3 = vpop.f32.mrf.mxu0  ;;  %5798 = vmatmul.mubr.bf16.vlgmr.msra.gmra.mxu0 %v9407_v39  ;;  %v8245_v39 = vld [vmem:[%s11223_s1 + $0x102c] ss:$16 sps:$4 sm:$0xff]  }
 0x293   :  { %v10730_v50 = vadd.f32 %v5553_v3, %v5513_v43  ;;  %5848 = vmatpush1.bf16.msra.mxu0 %v8234_v60  ;;  %5879 = vmatprep.mubr.bf16.mxu0 %v9423_v31  ;;  %v8254_v31 = vld [vmem:[%s11223_s1 + $0x128c] ss:$16 sps:$4 sm:$0xff]  }
 0x294   :  { %5815 = vmatpush1.bf16.msra.mxu1 %v8231_v6  ;;  %v5555_v8 = vpop.f32.mrf.mxu0  ;;  %5849 = vmatprep.subr.bf16.mxu0 %v8242_v2  ;;  %v8305_v6 = vld [vmem:[%s11223_s1 + $0x136c] ss:$16 sps:$4 sm:$0xff]   ;;  %v8306_v2 = vld [vmem:[%s11223_s1 + $0x14e8] ss:$16 sps:$4 sm:$0xff]  }
 0x295   :  { %5816 = vmatprep.subr.bf16.mxu1 %v8239_v63  ;;  %v10744_v11 = vadd.f32 %v5555_v8, %v5515_v1  ;;  %v8308_v60 = vld [vmem:[%s11223_s1 + $0x14ec] ss:$16 sps:$4 sm:$0xff]   ;;  %v8303_v63 = vld [vmem:[%s11223_s1 + $0x1368] ss:$16 sps:$4 sm:$0xff]  }
 0x296   :  { %v5557_v49 = vpop.f32.mrf.mxu0  ;;  %v8311_v43 = vld [vmem:[%s11223_s1 + $0x134c] ss:$16 sps:$4 sm:$0xff]   ;;  %v8312_v8 = vld [vmem:[%s11223_s1 + $0x14c8] ss:$16 sps:$4 sm:$0xff]  }
 0x297   :  { %5850 = vmatpush1.bf16.msra.mxu0 %v8240_v7  ;;  %v8314_v3 = vld [vmem:[%s11223_s1 + $0x14cc] ss:$16 sps:$4 sm:$0xff]   ;;  %v8309_v7 = vld [vmem:[%s11223_s1 + $0x1348] ss:$16 sps:$4 sm:$0xff]  }
 0x298   :  { %5817 = vmatpush1.bf16.msra.mxu1 %v8237_v30  ;;  %v5558_v18 = vpop.f32.mrf.mxu0  ;;  %5851 = vmatprep.subr.bf16.mxu0 %v8248_v10  ;;  %v8317_v10 = vld [vmem:[%s11223_s1 + $0x132c] ss:$16 sps:$4 sm:$0xff]  }
 0x299   :  { %5818 = vmatprep.subr.bf16.mxu1 %v8245_v39 }
 0x29b   :  { %5852 = vmatpush1.bf16.msra.mxu0 %v8246_v19  ;;  %v8318_v19 = vld [vmem:[%s11223_s1 + $0x14a8] ss:$16 sps:$4 sm:$0xff]  }
 0x29c   :  { %5819 = vmatpush1.bf16.msra.mxu1 %v8243_v16  ;;  %5853 = vmatprep.subr.bf16.mxu0 %v8254_v31  ;;  %v8315_v16 = vld [vmem:[%s11223_s1 + $0x1328] ss:$16 sps:$4 sm:$0xff]  }
 0x29d   :  { %5820 = vmatprep.subr.bf16.mxu1 %v8251_v4  ;;  %v8321_v4 = vld [vmem:[%s11223_s1 + $0x1308] ss:$16 sps:$4 sm:$0xff]  }
 0x29e   :  { %v8324_v31 = vld [vmem:[%s11223_s1 + $0x1488] ss:$16 sps:$4 sm:$0xff]  }
 0x29f   :  { %5854 = vmatpush1.bf16.msra.mxu0 %v8252_v38  ;;  %v8332_v38 = vld [vmem:[%s11223_s1 + $0x16ec] ss:$16 sps:$4 sm:$0xff]  }
 0x2a0   :  { %5821 = vmatpush1.bf16.msra.mxu1 %v8249_v54  ;;  %5855 = vmatprep.subr.bf16.mxu0 %v8260_v20  ;;  %v8329_v54 = vld [vmem:[%s11223_s1 + $0x146c] ss:$16 sps:$4 sm:$0xff]   ;;  %v8330_v20 = vld [vmem:[%s11223_s1 + $0x16e8] ss:$16 sps:$4 sm:$0xff]  }
 0x2a1   :  { %5822 = vmatprep.subr.bf16.mxu1 %v8257_v5  ;;  %v8327_v5 = vld [vmem:[%s11223_s1 + $0x1468] ss:$16 sps:$4 sm:$0xff]  }
 0x2a3   :  { %5856 = vmatpush1.bf16.msra.mxu0 %v8258_v21  ;;  %v8338_v21 = vld [vmem:[%s11223_s1 + $0x16cc] ss:$16 sps:$4 sm:$0xff]  }
 0x2a4   :  { %5823 = vmatpush2.bf16.msra.mxu1 %v8255_v23  ;;  %5857 = vmatprep.subr.bf16.mxu0 %v8266_v28  ;;  %v8335_v23 = vld [vmem:[%s11223_s1 + $0x144c] ss:$16 sps:$4 sm:$0xff]  }
 0x2a5   :  { %5824 = vmatprep.subr.bf16.mxu1 %v8263_v0 }
 0x2a7   :  { %5858 = vmatpush1.bf16.msra.mxu0 %v8264_v26  ;;  %v8336_v26 = vld [vmem:[%s11223_s1 + $0x16c8] ss:$16 sps:$4 sm:$0xff]  }
 0x2a8   :  { %5825 = vmatpush2.bf16.msra.mxu1 %v8261_v29  ;;  %5859 = vmatprep.subr.bf16.mxu0 %v8272_v36  ;;  %v8333_v29 = vld [vmem:[%s11223_s1 + $0x1448] ss:$16 sps:$4 sm:$0xff]   ;;  %v8341_v36 = vld [vmem:[%s11223_s1 + $0x142c] ss:$16 sps:$4 sm:$0xff]  }
 0x2a9   :  { %5826 = vmatprep.subr.bf16.mxu1 %v8269_v45 }
 0x2ab   :  { %5860 = vmatpush1.bf16.msra.mxu0 %v8270_v32 }
 0x2ac   :  { %5827 = vmatpush2.bf16.msra.mxu1 %v8267_v37  ;;  %5861 = vmatprep.subr.bf16.mxu0 %v8278_v35  ;;  %v8342_v35 = vld [vmem:[%s11223_s1 + $0x16a8] ss:$16 sps:$4 sm:$0xff]  }
 0x2ad   :  { %5828 = vmatprep.subr.bf16.mxu1 %v8275_v40  ;;  %v8339_v40 = vld [vmem:[%s11223_s1 + $0x1428] ss:$16 sps:$4 sm:$0xff]  }
 0x2af   :  { %5862 = vmatpush1.bf16.msra.mxu0 %v8276_v41  ;;  %v8347_v41 = vld [vmem:[%s11223_s1 + $0x140c] ss:$16 sps:$4 sm:$0xff]  }
 0x2b0   :  { %5829 = vmatpush2.bf16.msra.mxu1 %v8273_v47  ;;  %5863 = vmatprep.subr.bf16.mxu0 %v8284_v53  ;;  %v8348_v53 = vld [vmem:[%s11223_s1 + $0x1688] ss:$16 sps:$4 sm:$0xff]  }
 0x2b1   :  { %5830 = vmatprep.subr.bf16.mxu1 %v8281_v15  ;;  %v8345_v15 = vld [vmem:[%s11223_s1 + $0x1408] ss:$16 sps:$4 sm:$0xff]  }
 0x2b3   :  { %5864 = vmatpush2.bf16.msra.mxu0 %v8282_v13  ;;  %v8356_v13 = vld [vmem:[%s11223_s1 + $0x166c] ss:$16 sps:$4 sm:$0xff]  }
 0x2b4   :  { %5831 = vmatpush2.bf16.msra.mxu1 %v8279_v48  ;;  %5865 = vmatprep.subr.bf16.mxu0 %v8290_v46  ;;  %v8353_v48 = vld [vmem:[%s11223_s1 + $0x15ec] ss:$16 sps:$4 sm:$0xff]   ;;  %v8354_v46 = vld [vmem:[%s11223_s1 + $0x1668] ss:$16 sps:$4 sm:$0xff]  }
 0x2b5   :  { %5832 = vmatprep.subr.bf16.mxu1 %v8287_v59  ;;  %v8351_v59 = vld [vmem:[%s11223_s1 + $0x15e8] ss:$16 sps:$4 sm:$0xff]  }
 0x2b7   :  { %5866 = vmatpush2.bf16.msra.mxu0 %v8288_v51  ;;  %v8362_v51 = vld [vmem:[%s11223_s1 + $0x164c] ss:$16 sps:$4 sm:$0xff]  }
 0x2b8   :  { %5833 = vmatpush2.bf16.msra.mxu1 %v8285_v22  ;;  %5867 = vmatprep.subr.bf16.mxu0 %v8296_v55  ;;  %v8359_v22 = vld [vmem:[%s11223_s1 + $0x15cc] ss:$16 sps:$4 sm:$0xff]   ;;  %v8360_v55 = vld [vmem:[%s11223_s1 + $0x1648] ss:$16 sps:$4 sm:$0xff]  }
 0x2b9   :  { %5834 = vmatprep.subr.bf16.mxu1 %v8293_v56  ;;  %v8357_v56 = vld [vmem:[%s11223_s1 + $0x15c8] ss:$16 sps:$4 sm:$0xff]  }
 0x2bb   :  { %5868 = vmatpush2.bf16.msra.mxu0 %v8294_v61  ;;  %v8368_v61 = vld [vmem:[%s11223_s1 + $0x162c] ss:$16 sps:$4 sm:$0xff]  }
 0x2bc   :  { %5835 = vmatpush2.bf16.msra.mxu1 %v8291_v58  ;;  %5869 = vmatprep.subr.bf16.mxu0 %v8302_v57  ;;  %v8365_v58 = vld [vmem:[%s11223_s1 + $0x15ac] ss:$16 sps:$4 sm:$0xff]   ;;  %v8366_v57 = vld [vmem:[%s11223_s1 + $0x1628] ss:$16 sps:$4 sm:$0xff]  }
 0x2bd   :  { %5836 = vmatprep.subr.bf16.mxu1 %v8299_v42  ;;  %v8363_v42 = vld [vmem:[%s11223_s1 + $0x15a8] ss:$16 sps:$4 sm:$0xff]  }
 0x2bf   :  { %5870 = vmatpush2.bf16.msra.mxu0 %v8300_v17  ;;  %v8374_v17 = vld [vmem:[%s11223_s1 + $0x160c] ss:$16 sps:$4 sm:$0xff]  }
 0x2c0   :  { %5837 = vmatpush2.bf16.msra.mxu1 %v8297_v62  ;;  %5871 = vmatprep.subr.bf16.mxu0 %v8305_v6  ;;  %v8371_v62 = vld [vmem:[%s11223_s1 + $0x158c] ss:$16 sps:$4 sm:$0xff]   ;;  %v8369_v6 = vld [vmem:[%s11223_s1 + $0x1588] ss:$16 sps:$4 sm:$0xff]  }
 0x2c1   :  { %5888 = vmatprep.subr.bf16.mxu1 %v8308_v60  ;;  %v8372_v60 = vld [vmem:[%s11223_s1 + $0x1608] ss:$16 sps:$4 sm:$0xff]  }
 0x2c3   :  { %v5594_v1 = vpop.f32.mrf.mxu1  ;;  %5839 = vmatmul.mubr.bf16.vlgmr.msra.gmra.mxu1 %v9610_v12  ;;  %5872 = vmatpush2.bf16.msra.mxu0 %v8303_v63  ;;  %v8320_v12 = vld [vmem:[%s11223_s1 + $0x14ac] ss:$16 sps:$4 sm:$0xff]  }
 0x2c4   :  { %v5595_v30 = vadd.f32 %v5594_v1, %v10730_v50  ;;  %5889 = vmatpush1.bf16.msra.mxu1 %v8306_v2  ;;  %5873 = vmatprep.subr.bf16.mxu0 %v8311_v43  ;;  %v8377_v63 = vld [vmem:[%s11223_s1 + $0x156c] ss:$16 sps:$4 sm:$0xff]   ;;  %v8375_v43 = vld [vmem:[%s11223_s1 + $0x1568] ss:$16 sps:$4 sm:$0xff]  }
 0x2c5   :  { %v5596_v39 = vpop.f32.mrf.mxu1  ;;  %5890 = vmatprep.subr.bf16.mxu1 %v8314_v3  ;;  %5920 = vmatprep.mubr.bf16.mxu1 %v9631_v24  ;;  %v8326_v24 = vld [vmem:[%s11223_s1 + $0x148c] ss:$16 sps:$4 sm:$0xff]   ;;  %v8378_v3 = vld [vmem:[%s11223_s1 + $0x17e8] ss:$16 sps:$4 sm:$0xff]  }
 0x2c6   :  { %v5597_v50 = vadd.f32 %v5596_v39, %v10744_v11  ;;  %v8323_v11 = vld [vmem:[%s11223_s1 + $0x130c] ss:$16 sps:$4 sm:$0xff]  }
 0x2c7   :  { %v5598_v49 = vpop.f32.mrf.mxu1  ;;  %5874 = vmatpush2.bf16.msra.mxu0 %v8309_v7  ;;  %v8380_v2 = vld [vmem:[%s11223_s1 + $0x17ec] ss:$16 sps:$4 sm:$0xff]   ;;  %v8381_v7 = vld [vmem:[%s11223_s1 + $0x1548] ss:$16 sps:$4 sm:$0xff]  }
 0x2c8   :  { %5891 = vmatpush1.bf16.msra.mxu1 %v8312_v8  ;;  %5875 = vmatprep.subr.bf16.mxu0 %v8317_v10  ;;  %v8383_v1 = vld [vmem:[%s11223_s1 + $0x154c] ss:$16 sps:$4 sm:$0xff]   ;;  %v8384_v8 = vld [vmem:[%s11223_s1 + $0x17c8] ss:$16 sps:$4 sm:$0xff]  }
 0x2c9   :  { %v5599_v18 = vpop.f32.mrf.mxu1  ;;  %5892 = vmatprep.subr.bf16.mxu1 %v8320_v12  ;;  %v8389_v39 = vld [vmem:[%s11223_s1 + $0x152c] ss:$16 sps:$4 sm:$0xff]   ;;  %v8387_v12 = vld [vmem:[%s11223_s1 + $0x1528] ss:$16 sps:$4 sm:$0xff]  }
 0x2ca   :  { %v8392_v10 = vld [vmem:[%s11223_s1 + $0x17ac] ss:$16 sps:$4 sm:$0xff]   ;;  %v8396_v18 = vld [vmem:[%s11223_s1 + $0x1788] ss:$16 sps:$4 sm:$0xff]  }
 0x2cb   :  { %5876 = vmatpush2.bf16.msra.mxu0 %v8315_v16  ;;  %v8395_v49 = vld [vmem:[%s11223_s1 + $0x150c] ss:$16 sps:$4 sm:$0xff]  }
 0x2cc   :  { %5893 = vmatpush1.bf16.msra.mxu1 %v8318_v19  ;;  %5877 = vmatprep.subr.bf16.mxu0 %v8323_v11  ;;  %v8398_v16 = vld [vmem:[%s11223_s1 + $0x178c] ss:$16 sps:$4 sm:$0xff]   ;;  %v8393_v19 = vld [vmem:[%s11223_s1 + $0x1508] ss:$16 sps:$4 sm:$0xff]  }
 0x2cd   :  { %5894 = vmatprep.subr.bf16.mxu1 %v8326_v24  ;;  %v8401_v11 = vld [vmem:[%s11223_s1 + $0x176c] ss:$16 sps:$4 sm:$0xff]  }
 0x2ce   :  { %v8404_v24 = vld [vmem:[%s11223_s1 + $0x186c] ss:$16 sps:$4 sm:$0xff]  }
 0x2cf   :  { %5878 = vmatpush2.bf16.msra.mxu0 %v8321_v4  ;;  %v8399_v4 = vld [vmem:[%s11223_s1 + $0x1768] ss:$16 sps:$4 sm:$0xff]  }
 0x2d0   :  { %5895 = vmatpush1.bf16.msra.mxu1 %v8324_v31  ;;  %5929 = vmatprep.subr.bf16.mxu0 %v8332_v38  ;;  %v8402_v31 = vld [vmem:[%s11223_s1 + $0x1868] ss:$16 sps:$4 sm:$0xff]   ;;  %v8410_v38 = vld [vmem:[%s11223_s1 + $0x184c] ss:$16 sps:$4 sm:$0xff]  }
 0x2d1   :  { %5896 = vmatprep.subr.bf16.mxu1 %v8329_v54  ;;  %v8407_v54 = vld [vmem:[%s11223_s1 + $0x174c] ss:$16 sps:$4 sm:$0xff]  }
 0x2d2   :  { %v5635_v0 = vpop.f32.mrf.mxu0  ;;  %5880 = vmatmul.mubr.bf16.vlgmr.msra.gmra.mxu0 %v9635_v25  ;;  %v8344_v25 = vld [vmem:[%s11223_s1 + $0x16ac] ss:$16 sps:$4 sm:$0xff]  }
 0x2d3   :  { %v10932_v28 = vadd.f32 %v5635_v0, %v5595_v30  ;;  %5930 = vmatpush1.bf16.msra.mxu0 %v8330_v20  ;;  %5961 = vmatprep.mubr.bf16.mxu0 %v9651_v33  ;;  %v8350_v33 = vld [vmem:[%s11223_s1 + $0x168c] ss:$16 sps:$4 sm:$0xff]  }
 0x2d4   :  { %5897 = vmatpush1.bf16.msra.mxu1 %v8327_v5  ;;  %v5637_v45 = vpop.f32.mrf.mxu0  ;;  %5931 = vmatprep.subr.bf16.mxu0 %v8338_v21  ;;  %v8386_v30 = vld [vmem:[%s11223_s1 + $0x17cc] ss:$16 sps:$4 sm:$0xff]   ;;  %v8408_v21 = vld [vmem:[%s11223_s1 + $0x1848] ss:$16 sps:$4 sm:$0xff]  }
 0x2d5   :  { %5898 = vmatprep.subr.bf16.mxu1 %v8335_v23  ;;  %v10946_v37 = vadd.f32 %v5637_v45, %v5597_v50  ;;  %v8390_v50 = vld [vmem:[%s11223_s1 + $0x17a8] ss:$16 sps:$4 sm:$0xff]  }
 0x2d6   :  { %v5639_v32 = vpop.f32.mrf.mxu0  ;;  %v8405_v23 = vld [vmem:[%s11223_s1 + $0x1748] ss:$16 sps:$4 sm:$0xff]  }
 0x2d7   :  { %5932 = vmatpush1.bf16.msra.mxu0 %v8336_v26  ;;  %v8411_v45 = vld [vmem:[%s11223_s1 + $0x1728] ss:$16 sps:$4 sm:$0xff]  }
 0x2d8   :  { %5899 = vmatpush1.bf16.msra.mxu1 %v8333_v29  ;;  %v5640_v47 = vpop.f32.mrf.mxu0  ;;  %5933 = vmatprep.subr.bf16.mxu0 %v8344_v25  ;;  %v8413_v29 = vld [vmem:[%s11223_s1 + $0x172c] ss:$16 sps:$4 sm:$0xff]   ;;  %v8417_v32 = vld [vmem:[%s11223_s1 + $0x1708] ss:$16 sps:$4 sm:$0xff]  }
 0x2d9   :  { %5900 = vmatprep.subr.bf16.mxu1 %v8341_v36  ;;  %v8414_v36 = vld [vmem:[%s11223_s1 + $0x1828] ss:$16 sps:$4 sm:$0xff]   ;;  %v6012_v47 = vmax.f32 %v10539_v44, 0.0  ;;  %v8426_v44 = vld [vmem:[%s11225_s3 + $0x30] sm:$0xff]  }
 0x2db   :  { %5934 = vmatpush1.bf16.msra.mxu0 %v8342_v35  ;;  %v8423_v35 = vld [vmem:[%s11225_s3 + $0x78] sm:$0xff]  }
 0x2dc   :  { %5901 = vmatpush1.bf16.msra.mxu1 %v8339_v40  ;;  %5935 = vmatprep.subr.bf16.mxu0 %v8350_v33  ;;  %v8420_v40 = vld [vmem:[%s11223_s1 + $0x1808] ss:$16 sps:$4 sm:$0xff]   ;;  %v8425_v33 = vld [vmem:[%s11225_s3 + $0x70] sm:$0xff]  }
 0x2dd   :  { %5902 = vmatprep.subr.bf16.mxu1 %v8347_v41  ;;  %v8424_v41 = vld [vmem:[%s11225_s3 + $0x38] sm:$0xff]  }
 0x2df   :  { %5936 = vmatpush1.bf16.msra.mxu0 %v8348_v53 }
 0x2e0   :  { %5903 = vmatpush1.bf16.msra.mxu1 %v8345_v15  ;;  %5937 = vmatprep.subr.bf16.mxu0 %v8356_v13  ;;  %v6016_v15 = vpack.c.bf16 %v6012_v47, %v6012_v47 }
 0x2e1   :  { %5904 = vmatprep.subr.bf16.mxu1 %v8353_v48 }
 0x2e3   :  { %5938 = vmatpush1.bf16.msra.mxu0 %v8354_v46 }
 0x2e4   :  { %5905 = vmatpush2.bf16.msra.mxu1 %v8351_v59  ;;  %5939 = vmatprep.subr.bf16.mxu0 %v8362_v51  ;;  %v8427_v59 = vld [vmem:[%s11225_s3 + $0x68] sm:$0xff]   ;;  %v8429_v51 = vld [vmem:[%s11225_s3 + $0x60] sm:$0xff]  }
 0x2e5   :  { %5906 = vmatprep.subr.bf16.mxu1 %v8359_v22 }
 0x2e7   :  { %5940 = vmatpush1.bf16.msra.mxu0 %v8360_v55  ;;  %v8440_v55 = vld [vmem:[%s11225_s3 + $0xb8] sm:$0xff]  }
 0x2e8   :  { %5907 = vmatpush2.bf16.msra.mxu1 %v8357_v56  ;;  %5941 = vmatprep.subr.bf16.mxu0 %v8368_v61  ;;  %v8439_v56 = vld [vmem:[%s11225_s3 + $0xf8] sm:$0xff]  }
 0x2e9   :  { %5908 = vmatprep.subr.bf16.mxu1 %v8365_v58  ;;  %v8430_v58 = vld [vmem:[%s11225_s3 + $0x20] sm:$0xff]   ;;  %v8431_v61 = vld [vmem:[%s11225_s3 + $0x58] sm:$0xff]  }
 0x2eb   :  { %5942 = vmatpush1.bf16.msra.mxu0 %v8366_v57  ;;  %v8433_v57 = vld [vmem:[%s11225_s3 + $0x50] sm:$0xff]  }
 0x2ec   :  { %5909 = vmatpush2.bf16.msra.mxu1 %v8363_v42  ;;  %5943 = vmatprep.subr.bf16.mxu0 %v8374_v17  ;;  %v8432_v42 = vld [vmem:[%s11225_s3 + $0x18] sm:$0xff]   ;;  %v8435_v17 = vld [vmem:[%s11225_s3 + $0x48] sm:$0xff]  }
 0x2ed   :  { %5910 = vmatprep.subr.bf16.mxu1 %v8371_v62  ;;  %v8434_v62 = vld [vmem:[%s11225_s3 + $0x10] sm:$0xff]  }
 0x2ef   :  { %5944 = vmatpush1.bf16.msra.mxu0 %v8372_v60  ;;  %v8437_v60 = vld [vmem:[%s11225_s3 + $0x40] sm:$0xff]  }
 0x2f0   :  { %5911 = vmatpush2.bf16.msra.mxu1 %v8369_v6  ;;  %5945 = vmatprep.subr.bf16.mxu0 %v8380_v2  ;;  %v8436_v6 = vld [vmem:[%s11225_s3 + $0x8] sm:$0xff]   ;;  %v6011_v2 = vmax.f32 %v10525_v34, 0.0 }
 0x2f1   :  { %5912 = vmatprep.subr.bf16.mxu1 %v8377_v63  ;;  %v8438_v63 = vld [vmem:[%s11225_s3] sm:$0xff]   ;;  %v8443_v34 = vld [vmem:[%s11225_s3 + $0xe8] sm:$0xff]  }
 0x2f3   :  { %5946 = vmatpush2.bf16.msra.mxu0 %v8378_v3  ;;  %v8441_v3 = vld [vmem:[%s11225_s3 + $0xf0] sm:$0xff]  }
 0x2f4   :  { %5913 = vmatpush2.bf16.msra.mxu1 %v8375_v43  ;;  %5947 = vmatprep.subr.bf16.mxu0 %v8386_v30  ;;  %v6015_v43 = vpack.c.bf16 %v6011_v2, %v6011_v2 }
 0x2f5   :  { %5914 = vmatprep.subr.bf16.mxu1 %v8383_v1  ;;  %v8442_v1 = vld [vmem:[%s11225_s3 + $0xb0] sm:$0xff]  }
 0x2f7   :  { %5948 = vmatpush2.bf16.msra.mxu0 %v8384_v8 }
 0x2f8   :  { %5915 = vmatpush2.bf16.msra.mxu1 %v8381_v7  ;;  %5949 = vmatprep.subr.bf16.mxu0 %v8392_v10  ;;  %v8444_v10 = vld [vmem:[%s11225_s3 + $0xa8] sm:$0xff]  }
 0x2f9   :  { %5916 = vmatprep.subr.bf16.mxu1 %v8389_v39 }
 0x2fb   :  { %5950 = vmatpush2.bf16.msra.mxu0 %v8390_v50 }
 0x2fc   :  { %5917 = vmatpush2.bf16.msra.mxu1 %v8387_v12  ;;  %5951 = vmatprep.subr.bf16.mxu0 %v8398_v16  ;;  %v8446_v16 = vld [vmem:[%s11225_s3 + $0xa0] sm:$0xff]  }
 0x2fd   :  { %5918 = vmatprep.subr.bf16.mxu1 %v8395_v49  ;;  %v8445_v49 = vld [vmem:[%s11225_s3 + $0xe0] sm:$0xff]  }
 0x2ff   :  { %5952 = vmatpush2.bf16.msra.mxu0 %v8396_v18  ;;  %v8448_v18 = vld [vmem:[%s11225_s3 + $0x98] sm:$0xff]  }
 0x300   :  { %5919 = vmatpush2.bf16.msra.mxu1 %v8393_v19  ;;  %5953 = vmatprep.subr.bf16.mxu0 %v8401_v11  ;;  %v8447_v19 = vld [vmem:[%s11225_s3 + $0xd8] sm:$0xff]   ;;  %v8449_v11 = vld [vmem:[%s11225_s3 + $0xd0] sm:$0xff]  }
 0x301   :  { %5978 = vmatprep.subr.bf16.mxu1 %v8404_v24  ;;  %v8450_v24 = vld [vmem:[%s11225_s3 + $0x90] sm:$0xff]  }
 0x303   :  { %v5676_v5 = vpop.f32.mrf.mxu1  ;;  %5921 = vmatmul.mubr.bf16.vlgmr.msra.gmra.mxu1 %v9827_v14  ;;  %5954 = vmatpush2.bf16.msra.mxu0 %v8399_v4  ;;  %v8416_v14 = vld [vmem:[%s11223_s1 + $0x182c] ss:$16 sps:$4 sm:$0xff]  }
 0x304   :  { %v5677_v20 = vadd.f32 %v5676_v5, %v10932_v28  ;;  %5979 = vmatpush1.bf16.msra.mxu1 %v8402_v31  ;;  %5955 = vmatprep.subr.bf16.mxu0 %v8407_v54 }
 0x305   :  { %v5678_v0 = vpop.f32.mrf.mxu1  ;;  %5980 = vmatprep.subr.bf16.mxu1 %v8410_v38  ;;  %6002 = vmatprep.mubr.bf16.mxu1 %v8479_v52  ;;  %v8422_v52 = vld [vmem:[%s11223_s1 + $0x180c] ss:$16 sps:$4 sm:$0xff]  }
 0x306   :  { %v5679_v28 = vadd.f32 %v5678_v0, %v10946_v37  ;;  %v8419_v37 = vld [vmem:[%s11223_s1 + $0x170c] ss:$16 sps:$4 sm:$0xff]   ;;  %v8453_v0 = vld [vmem:[%s11225_s3 + $0xc0] sm:$0xff]  }
 0x307   :  { %v5680_v26 = vpop.f32.mrf.mxu1  ;;  %5956 = vmatpush2.bf16.msra.mxu0 %v8405_v23  ;;  %v8451_v38 = vld [vmem:[%s11225_s3 + $0xc8] sm:$0xff]  }
 0x308   :  { %5981 = vmatpush1.bf16.msra.mxu1 %v8408_v21  ;;  %5957 = vmatprep.subr.bf16.mxu0 %v8413_v29  ;;  %v8454_v29 = vld [vmem:[%s11225_s3 + $0x80] sm:$0xff]  }
 0x309   :  { %v5681_v25 = vpop.f32.mrf.mxu1  ;;  %5982 = vmatprep.subr.bf16.mxu1 %v8416_v14 }
 0x30b   :  { %5958 = vmatpush2.bf16.msra.mxu0 %v8411_v45 }
 0x30c   :  { %5983 = vmatpush1.bf16.msra.mxu1 %v8414_v36  ;;  %5959 = vmatprep.subr.bf16.mxu0 %v8419_v37 }
 0x30d   :  { %5984 = vmatprep.subr.bf16.mxu1 %v8422_v52 }
 0x30f   :  { %5960 = vmatpush2.bf16.msra.mxu0 %v8417_v32 }
 0x310   :  { %5985 = vmatpush1.bf16.msra.mxu1 %v8420_v40  ;;  %7197 = vmatprep.subr.bf16.mxu0 %v8423_v35 }
 0x311   :  { %7219 = vmatprep.subr.bf16.mxu1 %v8439_v56 }
 0x312   :  { %v5717_v53 = vpop.f32.mrf.mxu0  ;;  %5962 = vmatmul.mubr.bf16.vlgmr.msra.gmra.mxu0 %v9849_v27  ;;  %v8428_v27 = vld [vmem:[%s11225_s3 + $0x28] sm:$0xff]  }
 0x313   :  { %7163 = vmatmul.mubr.msk.bf16.vlgmr.msra.gmra.mxu1 %vm4941_vm0, %v9913_v9  ;;  %v5718_v48 = vadd.f32 %v5717_v53, %v5677_v20  ;;  %7198 = vmatpush3.bf16.msra.mxu0 %v8424_v41  ;;  %v8452_v20 = vld [vmem:[%s11225_s3 + $0x88] sm:$0xff]  }
 0x314   :  { %6314 = vmatprep.mubr.bf16.mxu0 %v6016_v15  ;;  %v5719_v13 = vpop.f32.mrf.mxu0  ;;  %7199 = vmatprep.subr.bf16.mxu0 %v8425_v33 }
 0x315   :  { %v5720_v46 = vadd.f32 %v5719_v13, %v5679_v28  ;;  %7220 = vmatpush3.bf16.msra.mxu1 %v8440_v55 }
 0x316   :  { %v5721_v22 = vpop.f32.mrf.mxu0  ;;  %7221 = vmatprep.subr.bf16.mxu1 %v8441_v3 }
 0x317   :  { %7200 = vmatpush3.bf16.msra.mxu0 %v8426_v44 }
 0x318   :  { %v5722_v9 = vpop.f32.mrf.mxu0  ;;  %7201 = vmatprep.subr.bf16.mxu0 %v8427_v59 }
 0x319   :  { %7222 = vmatpush3.bf16.msra.mxu1 %v8442_v1  ;;  %v7164_v1 = vld [vmem:[%s11226_s4] ss:$0 sm:$0xff] }
 0x31a   :  { %7223 = vmatprep.subr.bf16.mxu1 %v8443_v34 }
 0x31b   :  { %7202 = vmatpush3.bf16.msra.mxu0 %v8428_v27 }
 0x31c   :  { %7203 = vmatprep.subr.bf16.mxu0 %v8429_v51 }
 0x31d   :  { %7224 = vmatpush3.bf16.msra.mxu1 %v8444_v10 }
 0x31e   :  { %7225 = vmatprep.subr.bf16.mxu1 %v8445_v49 }
 0x31f   :  { %7204 = vmatpush3.bf16.msra.mxu0 %v8430_v58 }
 0x320   :  { %7205 = vmatprep.subr.bf16.mxu0 %v8431_v61 }
 0x321   :  { %7226 = vmatpush3.bf16.msra.mxu1 %v8446_v16 }
 0x322   :  { %7227 = vmatprep.subr.bf16.mxu1 %v8447_v19 }
 0x323   :  { %7206 = vmatpush3.bf16.msra.mxu0 %v8432_v42 }
 0x324   :  { %7207 = vmatprep.subr.bf16.mxu0 %v8433_v57 }
 0x325   :  { %7228 = vmatpush3.bf16.msra.mxu1 %v8448_v18 }
 0x326   :  { %7229 = vmatprep.subr.bf16.mxu1 %v8449_v11 }
 0x327   :  { %7208 = vmatpush3.bf16.msra.mxu0 %v8434_v62 }
 0x328   :  { %7209 = vmatprep.subr.bf16.mxu0 %v8435_v17 }
 0x329   :  { %7230 = vmatpush3.bf16.msra.mxu1 %v8450_v24 }
 0x32a   :  { %7231 = vmatprep.subr.bf16.mxu1 %v8451_v38 }
 0x32b   :  { %7210 = vmatpush3.bf16.msra.mxu0 %v8436_v6 }
 0x32c   :  { %7211 = vmatprep.subr.bf16.mxu0 %v8437_v60 }
 0x32d   :  { %7232 = vmatpush3.bf16.msra.mxu1 %v8452_v20 }
 0x32e   :  { %7233 = vmatprep.subr.bf16.mxu1 %v8453_v0 }
 0x32f   :  { %7212 = vmatpush3.bf16.msra.mxu0 %v8438_v63 }
 0x331   :  { %7234 = vmatpush3.bf16.msra.mxu1 %v8454_v29 }
 0x332   :  { %6315 = vmatmul.mubr.bf16.vlgmr.msra.gmra.mxu0 %v6015_v43 }
 0x343   :  { %v5758_v30 = vpop.f32.mrf.mxu1 }
 0x344   :  { %v5759_v7 = vadd.f32 %v5758_v30, %v5718_v48 }
 0x345   :  { %v5760_v8 = vpop.f32.mrf.mxu1 }
 0x346   :  { %v5761_v39 = vadd.f32 %v5760_v8, %v5720_v46 }
 0x347   :  { %v5762_v12 = vpop.f32.mrf.mxu1 }
 0x349   :  { %v5763_v50 = vpop.f32.mrf.mxu1 }
 0x352   :  { %v5799_v4 = vpop.f32.mrf.mxu0 }
 0x353   :  { %v5800_v31 = vadd.f32 %v5799_v4, %v5759_v7 }
 0x354   :  { %v5801_v54 = vpop.f32.mrf.mxu0 }
 0x355   :  { %v5802_v5 = vadd.f32 %v5801_v54, %v5761_v39 }
 0x356   :  { %v5803_v23 = vpop.f32.mrf.mxu0 }
 0x358   :  { %v5804_v21 = vpop.f32.mrf.mxu0 }
 0x383   :  { %v5840_v14 = vpop.f32.mrf.mxu1 }
 0x384   :  { %v5841_v28 = vadd.f32 %v5840_v14, %v5800_v31 }
 0x385   :  { %v5842_v26 = vpop.f32.mrf.mxu1 }
 0x386   :  { %v5843_v45 = vadd.f32 %v5842_v26, %v5802_v5 }
 0x387   :  { %v5844_v36 = vpop.f32.mrf.mxu1 }
 0x389   :  { %v5845_v25 = vpop.f32.mrf.mxu1 }
 0x392   :  { %v5881_v37 = vpop.f32.mrf.mxu0 }
 0x393   :  { %v5882_v15 = vadd.f32 %v5881_v37, %v5841_v28 }
 0x394   :  { %v5883_v52 = vpop.f32.mrf.mxu0 }
 0x395   :  { %v5884_v53 = vadd.f32 %v5883_v52, %v5843_v45 }
 0x396   :  { %v5885_v32 = vpop.f32.mrf.mxu0 }
 0x398   :  { %v5886_v40 = vpop.f32.mrf.mxu0 }
 0x3c3   :  { %v5922_v35 = vpop.f32.mrf.mxu1 }
 0x3c4   :  { %v5923_v48 = vadd.f32 %v5922_v35, %v5882_v15 }
 0x3c5   :  { %v5924_v47 = vpop.f32.mrf.mxu1 }
 0x3c6   :  { %v5925_v59 = vadd.f32 %v5924_v47, %v5884_v53 }
 0x3c7   :  { %v5926_v41 = vpop.f32.mrf.mxu1 }
 0x3c9   :  { %v5927_v33 = vpop.f32.mrf.mxu1 }
 0x3d2   :  { %v5963_v44 = vpop.f32.mrf.mxu0 }
 0x3d3   :  { %v6004_v13 = vpop.f32.mrf.mxu1  ;;  %v5964_v46 = vadd.f32 %v5963_v44, %v5923_v48 }
 0x3d4   :  { %v5965_v22 = vpop.f32.mrf.mxu0 }
 0x3d5   :  { %v6006_v27 = vpop.f32.mrf.mxu1  ;;  %v6005_v9 = vadd.f32 %v6004_v13, %v5964_v46  ;;  %v5966_v51 = vadd.f32 %v5965_v22, %v5925_v59 }
 0x3d6   :  { %v5967_v56 = vpop.f32.mrf.mxu0 }
 0x3d7   :  { %v6008_v55 = vpop.f32.mrf.mxu1  ;;  %v6007_v58 = vadd.f32 %v6006_v27, %v5966_v51  ;;  %v6013_v61 = vmax.f32 %v6005_v9, 0.0 }
 0x3d8   :  { %v5968_v42 = vpop.f32.mrf.mxu0 }
 0x3d9   :  { %v6009_v57 = vpop.f32.mrf.mxu1  ;;  %v6014_v62 = vmax.f32 %v6007_v58, 0.0  ;;  %v6017_v6 = vpack.c.bf16 %v6013_v61, %v6013_v61 }
 0x3db   :  { %v6018_v17 = vpack.c.bf16 %v6014_v62, %v6014_v62 }
 0x3dd   :  { %6354 = vmatprep.mubr.bf16.mxu1 %v6018_v17 }
 0x3de   :  { %6355 = vmatmul.mubr.bf16.vlgmr.msra.gmra.mxu1 %v6017_v6 }
 0x3f2   :  { %v7213_v60 = vpop.f32.mrf.mxu0 }
 0x3f4   :  { %v7214_v63 = vpop.f32.mrf.mxu0 }
 0x3f5   :  { %v7215_v2 = vadd.f32 %v7214_v63, %v7213_v60 }
 0x3f6   :  { %v7216_v43 = vpop.f32.mrf.mxu0 }
 0x3f7   :  { %v6317_v8 = vadd.f32 %v7215_v2, %v7164_v1 }
 0x3f8   :  { %v7217_v3 = vpop.f32.mrf.mxu0 }
 0x49e   :  { %v7235_v30 = vpop.f32.mrf.mxu1 }
 0x4a0   :  { %v7236_v7 = vpop.f32.mrf.mxu1 }
 0x4a1   :  { %v7237_v34 = vadd.f32 %v7236_v7, %v7235_v30 }
 0x4a2   :  { %v7238_v39 = vpop.f32.mrf.mxu1 }
 0x4a3   :  { %v6357_v10 = vadd.f32 %v7237_v34, %v6317_v8 }
 0x4a4   :  { %v7239_v12 = vpop.f32.mrf.mxu1 }
 0x4a5   :  { %6362 = vst [vmem:[#allocation2] sm:$0x3] %v6357_v10 }
 0x4a6   :  { %8467 = shalt.err (!%p8464_p4)
}
 0x4a7   :  { %6372 = dma.vmem_to_hbm [thread:$0]  %s6370_s17, 32, %s11227_s5, [#allocation3]  }
 0x4a8   :  { %8476 = dma.done.wait [#allocation3], 32  }
 0x4a9   :  { %8477 = vsyncadd [#allocation3], 4294967264 }
 0x4aa   :  { %6376 = vsyncpa [#allocation3], 1 }

</bundles_post_ra>
